<compile_context>
chip_gen: v6e
topology: v6e:2x2x1
jax: 0.10.0
libtpu: 0.0.40
codegen_flags: <defaults>
</compile_context>

<pallas_src>
import functools

import jax
import jax.numpy as jnp
from jax import lax
from jax.experimental import pallas as pl
from jax.experimental.pallas import tpu as pltpu


def _shift_read(x, off):
    """result[..., i] = x[..., i + off]; out-of-range positions read as 0."""
    n = x.shape[-1]
    if off == 0:
        return x
    if abs(off) >= n:
        return jnp.zeros_like(x)
    if off > 0:
        fill = jnp.zeros(x.shape[:-1] + (off,), x.dtype)
        return jnp.concatenate([x[..., off:], fill], axis=-1)
    fill = jnp.zeros(x.shape[:-1] + (-off,), x.dtype)
    return jnp.concatenate([fill, x[..., :off]], axis=-1)


def _saliency_kernel(g_ref, valid_ref, invden_ref, out_ref, *, C, WPP, cs, K,
                     similarity_fn_name, wta_surround, normalize_patches):
    """g_ref:      (bb*C, N)  zero-padded image, spatial flattened onto lanes
       valid_ref:  (1, N)     1.0 on real pixels, 0.0 on padding
       invden_ref: (1, N)     1 / (#valid neighbours)   (geometry only)
       out_ref:    (bb, N)    saliency on the same flattened grid."""
    hc, hK = cs // 2, K // 2
    P = cs * cs

    g = g_ref[...].astype(jnp.float32)    # [bb*C, N]
    valid = valid_ref[...]                # [1, N]
    invden = invden_ref[...]              # [1, N]
    N = g.shape[-1]
    bb = out_ref.shape[0]

    # ---- in-kernel im2col: P lane-shifted views of the padded image --------
    patch_offs = [(ci - hc) * WPP + (cj - hc)
                  for ci in range(cs) for cj in range(cs)]
    gs = [_shift_read(g, d) for d in patch_offs]

    if normalize_patches:
        # F.layer_norm over the patch dim (per channel/pixel), eps=1e-5,
        # then the module's "+1.0; +=1.0" (=> +2.0).  rsqrt runs on the EUP.
        inv_p = 1.0 / P
        s1 = gs[0]
        s2 = gs[0] * gs[0]
        for gv in gs[1:]:
            s1 = s1 + gv
            s2 = s2 + gv * gv
        mean = s1 * inv_p
        var = s2 * inv_p - mean * mean
        rstd = lax.rsqrt(var + 1e-5)
        feats = [(gv - mean) * rstd + 2.0 for gv in gs]
    else:
        feats = gs

    # Squared norm of the C*P-dim feature vector at every grid location.
    nrm2 = feats[0] * feats[0]
    for f in feats[1:]:
        nrm2 = nrm2 + f * f

    def batch_rows(x, b):                 # sum channel rows of batch b -> [1, N]
        return jnp.sum(x[b * C:(b + 1) * C, :], axis=0, keepdims=True)

    cn2 = [batch_rows(nrm2, b) for b in range(bb)]      # per-batch [1, N]

    use_cos = similarity_fn_name == 'cos'
    if similarity_fn_name not in ('cos', 'mse'):
        raise NotImplementedError(similarity_fn_name)

    if wta_surround:
        agg = [jnp.full((1, N), jnp.inf, jnp.float32) for _ in range(bb)]
    else:
        agg = [jnp.zeros((1, N), jnp.float32) for _ in range(bb)]

    for dy in range(K):
        for dx in range(K):
            if dy == hK and dx == hK:                   # skip the center
                continue
            o = (dy - hK) * WPP + (dx - hK)
            m = _shift_read(valid, o)                   # [1, N]
            # Fused: shifted neighbour features are consumed immediately,
            # nothing full-size stays live past this multiply-accumulate.
            prod = feats[0] * _shift_read(feats[0], o)
            for f in feats[1:]:
                prod = prod + f * _shift_read(f, o)
            for b in range(bb):
                dot = batch_rows(prod, b)               # [1, N]
                nn2 = _shift_read(cn2[b], o)            # [1, N]
                if use_cos:
                    # dot / max(|c||n|, 1e-8) == dot * rsqrt(max(cn2*nn2, 1e-16))
                    cosv = dot * lax.rsqrt(jnp.maximum(cn2[b] * nn2, 1e-16))
                    if wta_surround:
                        dist = 0.5 - 0.5 * cosv
                        agg[b] = jnp.minimum(
                            agg[b], jnp.where(m > 0, dist, jnp.inf))
                    else:
                        agg[b] = agg[b] + cosv * m
                else:  # mse
                    dist = cn2[b] + nn2 - 2.0 * dot
                    if wta_surround:
                        agg[b] = jnp.minimum(
                            agg[b], jnp.where(m > 0, dist, jnp.inf))
                    else:
                        agg[b] = agg[b] + dist * m

    for b in range(bb):
        if wta_surround:
            res = agg[b]
        elif use_cos:
            # mean_o [1 - (1+cos_o)/2] == 0.5 - 0.5 * (sum_o cos_o*m_o) / den
            res = 0.5 - 0.5 * (agg[b] * invden)
        else:
            res = agg[b] * invden
        out_ref[pl.ds(b, 1), :] = res.astype(out_ref.dtype)


def _pick_batch_block(B, C, nflat, budget_bytes=2 << 20):
    """Whole batch per grid step if it fits comfortably; otherwise the largest
    divisor of B that keeps blocks sublane-aligned and under budget."""
    if B * C * nflat * 4 <= budget_bytes:
        return B
    for bb in range(B - 1, 0, -1):
        if B % bb:
            continue
        if (bb * C) % 8 or bb % 8:
            continue
        if bb * C * nflat * 4 <= budget_bytes:
            return bb
    return B


@functools.partial(jax.jit, static_argnames=(
    "center_size", "neighbourhood_size", "similarity_fn_name", "wta_surround",
    "normalize_patches"))
def error_neurons_saliency(image, *, center_size=3, neighbourhood_size=3,
                           similarity_fn_name='cos', wta_surround=False,
                           normalize_patches=True):
    """image: [B, C, H, W] float32 -> saliency map [B, H, W] float32."""
    image = image.astype(jnp.float32)
    B, C, H, W = image.shape
    cs, K = center_size, neighbourhood_size
    hc, hK = cs // 2, K // 2
    pad = hc + hK
    HPP, WPP = H + 2 * pad, W + 2 * pad
    nbase = HPP * WPP
    nflat = ((nbase + 127) // 128) * 128      # lane-dense (multiple of 128)

    # --- glue: zero-pad once, flatten spatial onto lanes, fold B,C onto rows.
    imgpp = jnp.pad(image, ((0, 0), (0, 0), (pad, pad), (pad, pad)))
    g = imgpp.reshape(B * C, nbase)
    g = jnp.pad(g, ((0, 0), (0, nflat - nbase)))
    # TODO(synk): store g as bf16 (cast in-kernel) to halve HBM traffic once
    #             the accuracy budget allows it.

    # --- geometry-only maps: valid-pixel mask and 1/(#valid neighbours) -----
    valid2d = jnp.pad(jnp.ones((H, W), jnp.float32), ((pad, pad), (pad, pad)))
    vk = jnp.pad(valid2d, ((hK, hK), (hK, hK)))
    den2d = jnp.zeros((HPP, WPP), jnp.float32)
    for dy in range(K):
        for dx in range(K):
            if dy == hK and dx == hK:
                continue
            den2d = den2d + vk[dy:dy + HPP, dx:dx + WPP]
    invden2d = jnp.where(den2d > 0, 1.0 / jnp.maximum(den2d, 1.0), 0.0)
    valid = jnp.pad(valid2d.reshape(1, nbase), ((0, 0), (0, nflat - nbase)))
    invden = jnp.pad(invden2d.reshape(1, nbase), ((0, 0), (0, nflat - nbase)))

    bb = _pick_batch_block(B, C, nflat)
    grid_b = B // bb
    block_bytes = bb * C * nflat * 4
    vmem_limit = int(min(max(40 * block_bytes, 16 << 20), 48 << 20))

    kernel = functools.partial(
        _saliency_kernel, C=C, WPP=WPP, cs=cs, K=K,
        similarity_fn_name=similarity_fn_name, wta_surround=wta_surround,
        normalize_patches=normalize_patches)

    out_flat = pl.pallas_call(
        kernel,
        out_shape=jax.ShapeDtypeStruct((B, nflat), jnp.float32),
        grid_spec=pltpu.PrefetchScalarGridSpec(
            num_scalar_prefetch=0,
            grid=(grid_b,),
            in_specs=[
                pl.BlockSpec((bb * C, nflat), lambda i: (i, 0)),
                pl.BlockSpec((1, nflat), lambda i: (0, 0)),
                pl.BlockSpec((1, nflat), lambda i: (0, 0)),
            ],
            out_specs=pl.BlockSpec((bb, nflat), lambda i: (i, 0)),
        ),
        compiler_params=pltpu.CompilerParams(
            dimension_semantics=("parallel",),
            vmem_limit_bytes=vmem_limit),
    )(g, valid, invden)

    # un-flatten: keep only the real pixels.
    out = out_flat[:, :nbase].reshape(B, HPP, WPP)[:, pad:pad + H, pad:pad + W]
    return out


# --- pure-JAX reference (follows the PyTorch gather-based code path) --------
def _reference(image, center_size, neighbourhood_size,
               similarity_fn_name='cos', normalize_patches=True):
    B, C, H, W = image.shape
    cs, K = center_size, neighbourhood_size
    hc, hK = cs // 2, K // 2

    imgp = jnp.pad(image, ((0, 0), (0, 0), (hc, hc), (hc, hc)))
    cols = jnp.stack(
        [imgp[:, :, i:i + H, j:j + W].reshape(B, C, H * W)
         for i in range(cs) for j in range(cs)], axis=2)        # [B, C, P, HW]
    bu = cols.transpose(0, 3, 1, 2).reshape(B, H * W, C * cs * cs)
    if normalize_patches:
        bp = bu.reshape(B, H * W, C, cs * cs)
        mean = bp.mean(-1, keepdims=True)
        var = jnp.square(bp - mean).mean(-1, keepdims=True)
        bu = ((bp - mean) / jnp.sqrt(var + 1e-5)).reshape(
            B, H * W, C * cs * cs) + 2.0

    idx_map = jnp.pad(jnp.arange(H * W).reshape(H, W),
                      ((hK, hK), (hK, hK)), constant_values=H * W)
    nbr = jnp.stack(
        [idx_map[ky:ky + H, kx:kx + W].reshape(H * W)
         for ky in range(K) for kx in range(K)
         if not (ky == hK and kx == hK)], axis=-1)              # [HW, K*K-1]

    bu_ext = jnp.concatenate(
        [bu, jnp.zeros((B, 1, C * cs * cs), jnp.float32)], axis=1)
    gathered = bu_ext[:, nbr]                                   # [B, HW, S, D]
    center = bu[:, :, None, :]

    if similarity_fn_name == 'cos':
        dot = jnp.sum(center * gathered, axis=-1)
        nc = jnp.sqrt(jnp.sum(center * center, axis=-1))
        ng = jnp.sqrt(jnp.sum(gathered * gathered, axis=-1))
        cos = dot / jnp.maximum(nc * ng, 1e-8)
        dist = 1.0 - 0.5 * (1.0 + cos)
    else:
        dist = jnp.sum(jnp.square(center - gathered), axis=-1)

    mask = jnp.where(nbr[None] == H * W, 0.0, 1.0)
    out = (dist * mask).sum(-1) / mask.sum(-1)
    return out.reshape(B, H, W)


if __name__ == "__main__":
    key = jax.random.PRNGKey(0)
    # small NCHW image consistent with the module's expected input
    image = jax.random.uniform(key, (2, 4, 16, 16), dtype=jnp.float32)

    out = error_neurons_saliency(
        image, center_size=3, neighbourhood_size=3,
        similarity_fn_name='cos', wta_surround=False, normalize_patches=True)
    out = jax.block_until_ready(out)
    assert out.shape == (2, 16, 16), out.shape

    ref = _reference(image, 3, 3, 'cos', True)
    max_err = float(jnp.max(jnp.abs(out - ref)))
    assert max_err < 1e-3, f"mismatch vs reference: {max_err}"

    print("KERNEL_OK")
</pallas_src>

<mosaic_0001>
module attributes {stable_mosaic.version = 11 : i64} {
  func.func @_saliency_kernel(%arg0: i32, %arg1: memref<8x512xf32, #tpu.memory_space<vmem>>, %arg2: memref<1x512xf32, #tpu.memory_space<vmem>>, %arg3: memref<1x512xf32, #tpu.memory_space<vmem>>, %arg4: memref<2x512xf32, #tpu.memory_space<vmem>>) attributes {dimension_semantics = [#tpu.dimension_semantics<parallel>], iteration_bounds = array<i64: 1>, scalar_prefetch = 0 : i64, scratch_operands = 0 : i64, tpu.core_type = #tpu.core_type<tc>, window_params = [{transform_indices = @transform_0, window_bounds = array<i64: 8, 512>}, {pipeline_mode = #tpu.pipeline_mode<synchronous>, transform_indices = @transform_1, window_bounds = array<i64: 1, 512>}, {pipeline_mode = #tpu.pipeline_mode<synchronous>, transform_indices = @transform_2, window_bounds = array<i64: 1, 512>}, {transform_indices = @transform_3, window_bounds = array<i64: 2, 512>}]} {
    %c0 = arith.constant 0 : index
    %c0_0 = arith.constant 0 : index
    %0 = vector.load %arg1[%c0, %c0_0] : memref<8x512xf32, #tpu.memory_space<vmem>>, vector<8x512xf32>
    %c0_1 = arith.constant 0 : index
    %c0_2 = arith.constant 0 : index
    %1 = vector.load %arg2[%c0_1, %c0_2] : memref<1x512xf32, #tpu.memory_space<vmem>>, vector<1x512xf32>
    %c0_3 = arith.constant 0 : index
    %c0_4 = arith.constant 0 : index
    %2 = vector.load %arg3[%c0_3, %c0_4] : memref<1x512xf32, #tpu.memory_space<vmem>>, vector<1x512xf32>
    %cst = arith.constant 0.000000e+00 : f32
    %3 = vector.broadcast %cst : f32 to vector<8x21xf32>
    %4 = vector.extract_strided_slice %0 {offsets = [0, 0], sizes = [8, 491], strides = [1, 1]} : vector<8x512xf32> to vector<8x491xf32>
    %5 = tpu.concatenate %3, %4 in 1 : vector<8x21xf32>, vector<8x491xf32> -> vector<8x512xf32>
    %cst_5 = arith.constant 0.000000e+00 : f32
    %6 = vector.broadcast %cst_5 : f32 to vector<8x20xf32>
    %7 = vector.extract_strided_slice %0 {offsets = [0, 0], sizes = [8, 492], strides = [1, 1]} : vector<8x512xf32> to vector<8x492xf32>
    %8 = tpu.concatenate %6, %7 in 1 : vector<8x20xf32>, vector<8x492xf32> -> vector<8x512xf32>
    %cst_6 = arith.constant 0.000000e+00 : f32
    %9 = vector.broadcast %cst_6 : f32 to vector<8x19xf32>
    %10 = vector.extract_strided_slice %0 {offsets = [0, 0], sizes = [8, 493], strides = [1, 1]} : vector<8x512xf32> to vector<8x493xf32>
    %11 = tpu.concatenate %9, %10 in 1 : vector<8x19xf32>, vector<8x493xf32> -> vector<8x512xf32>
    %cst_7 = arith.constant 0.000000e+00 : f32
    %12 = vector.broadcast %cst_7 : f32 to vector<8x1xf32>
    %13 = vector.extract_strided_slice %0 {offsets = [0, 0], sizes = [8, 511], strides = [1, 1]} : vector<8x512xf32> to vector<8x511xf32>
    %14 = tpu.concatenate %12, %13 in 1 : vector<8x1xf32>, vector<8x511xf32> -> vector<8x512xf32>
    %cst_8 = arith.constant 0.000000e+00 : f32
    %15 = vector.broadcast %cst_8 : f32 to vector<8x1xf32>
    %16 = vector.extract_strided_slice %0 {offsets = [0, 1], sizes = [8, 511], strides = [1, 1]} : vector<8x512xf32> to vector<8x511xf32>
    %17 = tpu.concatenate %16, %15 in 1 : vector<8x511xf32>, vector<8x1xf32> -> vector<8x512xf32>
    %cst_9 = arith.constant 0.000000e+00 : f32
    %18 = vector.broadcast %cst_9 : f32 to vector<8x19xf32>
    %19 = vector.extract_strided_slice %0 {offsets = [0, 19], sizes = [8, 493], strides = [1, 1]} : vector<8x512xf32> to vector<8x493xf32>
    %20 = tpu.concatenate %19, %18 in 1 : vector<8x493xf32>, vector<8x19xf32> -> vector<8x512xf32>
    %cst_10 = arith.constant 0.000000e+00 : f32
    %21 = vector.broadcast %cst_10 : f32 to vector<8x20xf32>
    %22 = vector.extract_strided_slice %0 {offsets = [0, 20], sizes = [8, 492], strides = [1, 1]} : vector<8x512xf32> to vector<8x492xf32>
    %23 = tpu.concatenate %22, %21 in 1 : vector<8x492xf32>, vector<8x20xf32> -> vector<8x512xf32>
    %cst_11 = arith.constant 0.000000e+00 : f32
    %24 = vector.broadcast %cst_11 : f32 to vector<8x21xf32>
    %25 = vector.extract_strided_slice %0 {offsets = [0, 21], sizes = [8, 491], strides = [1, 1]} : vector<8x512xf32> to vector<8x491xf32>
    %26 = tpu.concatenate %25, %24 in 1 : vector<8x491xf32>, vector<8x21xf32> -> vector<8x512xf32>
    %27 = arith.mulf %5, %5 : vector<8x512xf32>
    %28 = arith.addf %5, %8 : vector<8x512xf32>
    %29 = arith.mulf %8, %8 : vector<8x512xf32>
    %30 = arith.addf %27, %29 : vector<8x512xf32>
    %31 = arith.addf %28, %11 : vector<8x512xf32>
    %32 = arith.mulf %11, %11 : vector<8x512xf32>
    %33 = arith.addf %30, %32 : vector<8x512xf32>
    %34 = arith.addf %31, %14 : vector<8x512xf32>
    %35 = arith.mulf %14, %14 : vector<8x512xf32>
    %36 = arith.addf %33, %35 : vector<8x512xf32>
    %37 = arith.addf %34, %0 : vector<8x512xf32>
    %38 = arith.mulf %0, %0 : vector<8x512xf32>
    %39 = arith.addf %36, %38 : vector<8x512xf32>
    %40 = arith.addf %37, %17 : vector<8x512xf32>
    %41 = arith.mulf %17, %17 : vector<8x512xf32>
    %42 = arith.addf %39, %41 : vector<8x512xf32>
    %43 = arith.addf %40, %20 : vector<8x512xf32>
    %44 = arith.mulf %20, %20 : vector<8x512xf32>
    %45 = arith.addf %42, %44 : vector<8x512xf32>
    %46 = arith.addf %43, %23 : vector<8x512xf32>
    %47 = arith.mulf %23, %23 : vector<8x512xf32>
    %48 = arith.addf %45, %47 : vector<8x512xf32>
    %49 = arith.addf %46, %26 : vector<8x512xf32>
    %50 = arith.mulf %26, %26 : vector<8x512xf32>
    %51 = arith.addf %48, %50 : vector<8x512xf32>
    %cst_12 = arith.constant 0.111111112 : f32
    %52 = vector.broadcast %cst_12 : f32 to vector<8x512xf32>
    %53 = arith.mulf %49, %52 : vector<8x512xf32>
    %cst_13 = arith.constant 0.111111112 : f32
    %54 = vector.broadcast %cst_13 : f32 to vector<8x512xf32>
    %55 = arith.mulf %51, %54 : vector<8x512xf32>
    %56 = arith.mulf %53, %53 : vector<8x512xf32>
    %57 = arith.subf %55, %56 : vector<8x512xf32>
    %cst_14 = arith.constant 9.99999974E-6 : f32
    %58 = vector.broadcast %cst_14 : f32 to vector<8x512xf32>
    %59 = arith.addf %57, %58 : vector<8x512xf32>
    %60 = math.rsqrt %59 : vector<8x512xf32>
    %61 = arith.subf %5, %53 : vector<8x512xf32>
    %62 = arith.mulf %61, %60 : vector<8x512xf32>
    %cst_15 = arith.constant 2.000000e+00 : f32
    %63 = vector.broadcast %cst_15 : f32 to vector<8x512xf32>
    %64 = arith.addf %62, %63 : vector<8x512xf32>
    %65 = arith.subf %8, %53 : vector<8x512xf32>
    %66 = arith.mulf %65, %60 : vector<8x512xf32>
    %cst_16 = arith.constant 2.000000e+00 : f32
    %67 = vector.broadcast %cst_16 : f32 to vector<8x512xf32>
    %68 = arith.addf %66, %67 : vector<8x512xf32>
    %69 = arith.subf %11, %53 : vector<8x512xf32>
    %70 = arith.mulf %69, %60 : vector<8x512xf32>
    %cst_17 = arith.constant 2.000000e+00 : f32
    %71 = vector.broadcast %cst_17 : f32 to vector<8x512xf32>
    %72 = arith.addf %70, %71 : vector<8x512xf32>
    %73 = arith.subf %14, %53 : vector<8x512xf32>
    %74 = arith.mulf %73, %60 : vector<8x512xf32>
    %cst_18 = arith.constant 2.000000e+00 : f32
    %75 = vector.broadcast %cst_18 : f32 to vector<8x512xf32>
    %76 = arith.addf %74, %75 : vector<8x512xf32>
    %77 = arith.subf %0, %53 : vector<8x512xf32>
    %78 = arith.mulf %77, %60 : vector<8x512xf32>
    %cst_19 = arith.constant 2.000000e+00 : f32
    %79 = vector.broadcast %cst_19 : f32 to vector<8x512xf32>
    %80 = arith.addf %78, %79 : vector<8x512xf32>
    %81 = arith.subf %17, %53 : vector<8x512xf32>
    %82 = arith.mulf %81, %60 : vector<8x512xf32>
    %cst_20 = arith.constant 2.000000e+00 : f32
    %83 = vector.broadcast %cst_20 : f32 to vector<8x512xf32>
    %84 = arith.addf %82, %83 : vector<8x512xf32>
    %85 = arith.subf %20, %53 : vector<8x512xf32>
    %86 = arith.mulf %85, %60 : vector<8x512xf32>
    %cst_21 = arith.constant 2.000000e+00 : f32
    %87 = vector.broadcast %cst_21 : f32 to vector<8x512xf32>
    %88 = arith.addf %86, %87 : vector<8x512xf32>
    %89 = arith.subf %23, %53 : vector<8x512xf32>
    %90 = arith.mulf %89, %60 : vector<8x512xf32>
    %cst_22 = arith.constant 2.000000e+00 : f32
    %91 = vector.broadcast %cst_22 : f32 to vector<8x512xf32>
    %92 = arith.addf %90, %91 : vector<8x512xf32>
    %93 = arith.subf %26, %53 : vector<8x512xf32>
    %94 = arith.mulf %93, %60 : vector<8x512xf32>
    %cst_23 = arith.constant 2.000000e+00 : f32
    %95 = vector.broadcast %cst_23 : f32 to vector<8x512xf32>
    %96 = arith.addf %94, %95 : vector<8x512xf32>
    %97 = arith.mulf %64, %64 : vector<8x512xf32>
    %98 = arith.mulf %68, %68 : vector<8x512xf32>
    %99 = arith.addf %97, %98 : vector<8x512xf32>
    %100 = arith.mulf %72, %72 : vector<8x512xf32>
    %101 = arith.addf %99, %100 : vector<8x512xf32>
    %102 = arith.mulf %76, %76 : vector<8x512xf32>
    %103 = arith.addf %101, %102 : vector<8x512xf32>
    %104 = arith.mulf %80, %80 : vector<8x512xf32>
    %105 = arith.addf %103, %104 : vector<8x512xf32>
    %106 = arith.mulf %84, %84 : vector<8x512xf32>
    %107 = arith.addf %105, %106 : vector<8x512xf32>
    %108 = arith.mulf %88, %88 : vector<8x512xf32>
    %109 = arith.addf %107, %108 : vector<8x512xf32>
    %110 = arith.mulf %92, %92 : vector<8x512xf32>
    %111 = arith.addf %109, %110 : vector<8x512xf32>
    %112 = arith.mulf %96, %96 : vector<8x512xf32>
    %113 = arith.addf %111, %112 : vector<8x512xf32>
    %114 = vector.extract_strided_slice %113 {offsets = [0, 0], sizes = [4, 512], strides = [1, 1]} : vector<8x512xf32> to vector<4x512xf32>
    %cst_24 = arith.constant dense<0.000000e+00> : vector<512xf32>
    %115 = vector.multi_reduction <add>, %114, %cst_24 [0] : vector<4x512xf32> to vector<512xf32>
    %116 = vector.shape_cast %115 : vector<512xf32> to vector<1x512xf32>
    %117 = vector.extract_strided_slice %113 {offsets = [4, 0], sizes = [4, 512], strides = [1, 1]} : vector<8x512xf32> to vector<4x512xf32>
    %cst_25 = arith.constant dense<0.000000e+00> : vector<512xf32>
    %118 = vector.multi_reduction <add>, %117, %cst_25 [0] : vector<4x512xf32> to vector<512xf32>
    %119 = vector.shape_cast %118 : vector<512xf32> to vector<1x512xf32>
    %cst_26 = arith.constant 0.000000e+00 : f32
    %120 = vector.broadcast %cst_26 : f32 to vector<1x512xf32>
    %cst_27 = arith.constant 0.000000e+00 : f32
    %121 = vector.broadcast %cst_27 : f32 to vector<1x512xf32>
    %cst_28 = arith.constant 0.000000e+00 : f32
    %122 = vector.broadcast %cst_28 : f32 to vector<1x21xf32>
    %123 = vector.extract_strided_slice %1 {offsets = [0, 0], sizes = [1, 491], strides = [1, 1]} : vector<1x512xf32> to vector<1x491xf32>
    %124 = tpu.concatenate %122, %123 in 1 : vector<1x21xf32>, vector<1x491xf32> -> vector<1x512xf32>
    %cst_29 = arith.constant 0.000000e+00 : f32
    %125 = vector.broadcast %cst_29 : f32 to vector<8x21xf32>
    %126 = vector.extract_strided_slice %64 {offsets = [0, 0], sizes = [8, 491], strides = [1, 1]} : vector<8x512xf32> to vector<8x491xf32>
    %127 = tpu.concatenate %125, %126 in 1 : vector<8x21xf32>, vector<8x491xf32> -> vector<8x512xf32>
    %128 = arith.mulf %64, %127 : vector<8x512xf32>
    %cst_30 = arith.constant 0.000000e+00 : f32
    %129 = vector.broadcast %cst_30 : f32 to vector<8x21xf32>
    %130 = vector.extract_strided_slice %68 {offsets = [0, 0], sizes = [8, 491], strides = [1, 1]} : vector<8x512xf32> to vector<8x491xf32>
    %131 = tpu.concatenate %129, %130 in 1 : vector<8x21xf32>, vector<8x491xf32> -> vector<8x512xf32>
    %132 = arith.mulf %68, %131 : vector<8x512xf32>
    %133 = arith.addf %128, %132 : vector<8x512xf32>
    %cst_31 = arith.constant 0.000000e+00 : f32
    %134 = vector.broadcast %cst_31 : f32 to vector<8x21xf32>
    %135 = vector.extract_strided_slice %72 {offsets = [0, 0], sizes = [8, 491], strides = [1, 1]} : vector<8x512xf32> to vector<8x491xf32>
    %136 = tpu.concatenate %134, %135 in 1 : vector<8x21xf32>, vector<8x491xf32> -> vector<8x512xf32>
    %137 = arith.mulf %72, %136 : vector<8x512xf32>
    %138 = arith.addf %133, %137 : vector<8x512xf32>
    %cst_32 = arith.constant 0.000000e+00 : f32
    %139 = vector.broadcast %cst_32 : f32 to vector<8x21xf32>
    %140 = vector.extract_strided_slice %76 {offsets = [0, 0], sizes = [8, 491], strides = [1, 1]} : vector<8x512xf32> to vector<8x491xf32>
    %141 = tpu.concatenate %139, %140 in 1 : vector<8x21xf32>, vector<8x491xf32> -> vector<8x512xf32>
    %142 = arith.mulf %76, %141 : vector<8x512xf32>
    %143 = arith.addf %138, %142 : vector<8x512xf32>
    %cst_33 = arith.constant 0.000000e+00 : f32
    %144 = vector.broadcast %cst_33 : f32 to vector<8x21xf32>
    %145 = vector.extract_strided_slice %80 {offsets = [0, 0], sizes = [8, 491], strides = [1, 1]} : vector<8x512xf32> to vector<8x491xf32>
    %146 = tpu.concatenate %144, %145 in 1 : vector<8x21xf32>, vector<8x491xf32> -> vector<8x512xf32>
    %147 = arith.mulf %80, %146 : vector<8x512xf32>
    %148 = arith.addf %143, %147 : vector<8x512xf32>
    %cst_34 = arith.constant 0.000000e+00 : f32
    %149 = vector.broadcast %cst_34 : f32 to vector<8x21xf32>
    %150 = vector.extract_strided_slice %84 {offsets = [0, 0], sizes = [8, 491], strides = [1, 1]} : vector<8x512xf32> to vector<8x491xf32>
    %151 = tpu.concatenate %149, %150 in 1 : vector<8x21xf32>, vector<8x491xf32> -> vector<8x512xf32>
    %152 = arith.mulf %84, %151 : vector<8x512xf32>
    %153 = arith.addf %148, %152 : vector<8x512xf32>
    %cst_35 = arith.constant 0.000000e+00 : f32
    %154 = vector.broadcast %cst_35 : f32 to vector<8x21xf32>
    %155 = vector.extract_strided_slice %88 {offsets = [0, 0], sizes = [8, 491], strides = [1, 1]} : vector<8x512xf32> to vector<8x491xf32>
    %156 = tpu.concatenate %154, %155 in 1 : vector<8x21xf32>, vector<8x491xf32> -> vector<8x512xf32>
    %157 = arith.mulf %88, %156 : vector<8x512xf32>
    %158 = arith.addf %153, %157 : vector<8x512xf32>
    %cst_36 = arith.constant 0.000000e+00 : f32
    %159 = vector.broadcast %cst_36 : f32 to vector<8x21xf32>
    %160 = vector.extract_strided_slice %92 {offsets = [0, 0], sizes = [8, 491], strides = [1, 1]} : vector<8x512xf32> to vector<8x491xf32>
    %161 = tpu.concatenate %159, %160 in 1 : vector<8x21xf32>, vector<8x491xf32> -> vector<8x512xf32>
    %162 = arith.mulf %92, %161 : vector<8x512xf32>
    %163 = arith.addf %158, %162 : vector<8x512xf32>
    %cst_37 = arith.constant 0.000000e+00 : f32
    %164 = vector.broadcast %cst_37 : f32 to vector<8x21xf32>
    %165 = vector.extract_strided_slice %96 {offsets = [0, 0], sizes = [8, 491], strides = [1, 1]} : vector<8x512xf32> to vector<8x491xf32>
    %166 = tpu.concatenate %164, %165 in 1 : vector<8x21xf32>, vector<8x491xf32> -> vector<8x512xf32>
    %167 = arith.mulf %96, %166 : vector<8x512xf32>
    %168 = arith.addf %163, %167 : vector<8x512xf32>
    %169 = vector.extract_strided_slice %168 {offsets = [0, 0], sizes = [4, 512], strides = [1, 1]} : vector<8x512xf32> to vector<4x512xf32>
    %cst_38 = arith.constant dense<0.000000e+00> : vector<512xf32>
    %170 = vector.multi_reduction <add>, %169, %cst_38 [0] : vector<4x512xf32> to vector<512xf32>
    %171 = vector.shape_cast %170 : vector<512xf32> to vector<1x512xf32>
    %cst_39 = arith.constant 0.000000e+00 : f32
    %172 = vector.broadcast %cst_39 : f32 to vector<1x21xf32>
    %173 = vector.extract_strided_slice %116 {offsets = [0, 0], sizes = [1, 491], strides = [1, 1]} : vector<1x512xf32> to vector<1x491xf32>
    %174 = tpu.concatenate %172, %173 in 1 : vector<1x21xf32>, vector<1x491xf32> -> vector<1x512xf32>
    %175 = arith.mulf %116, %174 : vector<1x512xf32>
    %cst_40 = arith.constant 1.000000e-16 : f32
    %176 = vector.broadcast %cst_40 : f32 to vector<1x512xf32>
    %177 = arith.maximumf %175, %176 : vector<1x512xf32>
    %178 = math.rsqrt %177 : vector<1x512xf32>
    %179 = arith.mulf %171, %178 : vector<1x512xf32>
    %180 = arith.mulf %179, %124 : vector<1x512xf32>
    %181 = arith.addf %120, %180 : vector<1x512xf32>
    %182 = vector.extract_strided_slice %168 {offsets = [4, 0], sizes = [4, 512], strides = [1, 1]} : vector<8x512xf32> to vector<4x512xf32>
    %cst_41 = arith.constant dense<0.000000e+00> : vector<512xf32>
    %183 = vector.multi_reduction <add>, %182, %cst_41 [0] : vector<4x512xf32> to vector<512xf32>
    %184 = vector.shape_cast %183 : vector<512xf32> to vector<1x512xf32>
    %cst_42 = arith.constant 0.000000e+00 : f32
    %185 = vector.broadcast %cst_42 : f32 to vector<1x21xf32>
    %186 = vector.extract_strided_slice %119 {offsets = [0, 0], sizes = [1, 491], strides = [1, 1]} : vector<1x512xf32> to vector<1x491xf32>
    %187 = tpu.concatenate %185, %186 in 1 : vector<1x21xf32>, vector<1x491xf32> -> vector<1x512xf32>
    %188 = arith.mulf %119, %187 : vector<1x512xf32>
    %cst_43 = arith.constant 1.000000e-16 : f32
    %189 = vector.broadcast %cst_43 : f32 to vector<1x512xf32>
    %190 = arith.maximumf %188, %189 : vector<1x512xf32>
    %191 = math.rsqrt %190 : vector<1x512xf32>
    %192 = arith.mulf %184, %191 : vector<1x512xf32>
    %193 = arith.mulf %192, %124 : vector<1x512xf32>
    %194 = arith.addf %121, %193 : vector<1x512xf32>
    %cst_44 = arith.constant 0.000000e+00 : f32
    %195 = vector.broadcast %cst_44 : f32 to vector<1x20xf32>
    %196 = vector.extract_strided_slice %1 {offsets = [0, 0], sizes = [1, 492], strides = [1, 1]} : vector<1x512xf32> to vector<1x492xf32>
    %197 = tpu.concatenate %195, %196 in 1 : vector<1x20xf32>, vector<1x492xf32> -> vector<1x512xf32>
    %cst_45 = arith.constant 0.000000e+00 : f32
    %198 = vector.broadcast %cst_45 : f32 to vector<8x20xf32>
    %199 = vector.extract_strided_slice %64 {offsets = [0, 0], sizes = [8, 492], strides = [1, 1]} : vector<8x512xf32> to vector<8x492xf32>
    %200 = tpu.concatenate %198, %199 in 1 : vector<8x20xf32>, vector<8x492xf32> -> vector<8x512xf32>
    %201 = arith.mulf %64, %200 : vector<8x512xf32>
    %cst_46 = arith.constant 0.000000e+00 : f32
    %202 = vector.broadcast %cst_46 : f32 to vector<8x20xf32>
    %203 = vector.extract_strided_slice %68 {offsets = [0, 0], sizes = [8, 492], strides = [1, 1]} : vector<8x512xf32> to vector<8x492xf32>
    %204 = tpu.concatenate %202, %203 in 1 : vector<8x20xf32>, vector<8x492xf32> -> vector<8x512xf32>
    %205 = arith.mulf %68, %204 : vector<8x512xf32>
    %206 = arith.addf %201, %205 : vector<8x512xf32>
    %cst_47 = arith.constant 0.000000e+00 : f32
    %207 = vector.broadcast %cst_47 : f32 to vector<8x20xf32>
    %208 = vector.extract_strided_slice %72 {offsets = [0, 0], sizes = [8, 492], strides = [1, 1]} : vector<8x512xf32> to vector<8x492xf32>
    %209 = tpu.concatenate %207, %208 in 1 : vector<8x20xf32>, vector<8x492xf32> -> vector<8x512xf32>
    %210 = arith.mulf %72, %209 : vector<8x512xf32>
    %211 = arith.addf %206, %210 : vector<8x512xf32>
    %cst_48 = arith.constant 0.000000e+00 : f32
    %212 = vector.broadcast %cst_48 : f32 to vector<8x20xf32>
    %213 = vector.extract_strided_slice %76 {offsets = [0, 0], sizes = [8, 492], strides = [1, 1]} : vector<8x512xf32> to vector<8x492xf32>
    %214 = tpu.concatenate %212, %213 in 1 : vector<8x20xf32>, vector<8x492xf32> -> vector<8x512xf32>
    %215 = arith.mulf %76, %214 : vector<8x512xf32>
    %216 = arith.addf %211, %215 : vector<8x512xf32>
    %cst_49 = arith.constant 0.000000e+00 : f32
    %217 = vector.broadcast %cst_49 : f32 to vector<8x20xf32>
    %218 = vector.extract_strided_slice %80 {offsets = [0, 0], sizes = [8, 492], strides = [1, 1]} : vector<8x512xf32> to vector<8x492xf32>
    %219 = tpu.concatenate %217, %218 in 1 : vector<8x20xf32>, vector<8x492xf32> -> vector<8x512xf32>
    %220 = arith.mulf %80, %219 : vector<8x512xf32>
    %221 = arith.addf %216, %220 : vector<8x512xf32>
    %cst_50 = arith.constant 0.000000e+00 : f32
    %222 = vector.broadcast %cst_50 : f32 to vector<8x20xf32>
    %223 = vector.extract_strided_slice %84 {offsets = [0, 0], sizes = [8, 492], strides = [1, 1]} : vector<8x512xf32> to vector<8x492xf32>
    %224 = tpu.concatenate %222, %223 in 1 : vector<8x20xf32>, vector<8x492xf32> -> vector<8x512xf32>
    %225 = arith.mulf %84, %224 : vector<8x512xf32>
    %226 = arith.addf %221, %225 : vector<8x512xf32>
    %cst_51 = arith.constant 0.000000e+00 : f32
    %227 = vector.broadcast %cst_51 : f32 to vector<8x20xf32>
    %228 = vector.extract_strided_slice %88 {offsets = [0, 0], sizes = [8, 492], strides = [1, 1]} : vector<8x512xf32> to vector<8x492xf32>
    %229 = tpu.concatenate %227, %228 in 1 : vector<8x20xf32>, vector<8x492xf32> -> vector<8x512xf32>
    %230 = arith.mulf %88, %229 : vector<8x512xf32>
    %231 = arith.addf %226, %230 : vector<8x512xf32>
    %cst_52 = arith.constant 0.000000e+00 : f32
    %232 = vector.broadcast %cst_52 : f32 to vector<8x20xf32>
    %233 = vector.extract_strided_slice %92 {offsets = [0, 0], sizes = [8, 492], strides = [1, 1]} : vector<8x512xf32> to vector<8x492xf32>
    %234 = tpu.concatenate %232, %233 in 1 : vector<8x20xf32>, vector<8x492xf32> -> vector<8x512xf32>
    %235 = arith.mulf %92, %234 : vector<8x512xf32>
    %236 = arith.addf %231, %235 : vector<8x512xf32>
    %cst_53 = arith.constant 0.000000e+00 : f32
    %237 = vector.broadcast %cst_53 : f32 to vector<8x20xf32>
    %238 = vector.extract_strided_slice %96 {offsets = [0, 0], sizes = [8, 492], strides = [1, 1]} : vector<8x512xf32> to vector<8x492xf32>
    %239 = tpu.concatenate %237, %238 in 1 : vector<8x20xf32>, vector<8x492xf32> -> vector<8x512xf32>
    %240 = arith.mulf %96, %239 : vector<8x512xf32>
    %241 = arith.addf %236, %240 : vector<8x512xf32>
    %242 = vector.extract_strided_slice %241 {offsets = [0, 0], sizes = [4, 512], strides = [1, 1]} : vector<8x512xf32> to vector<4x512xf32>
    %cst_54 = arith.constant dense<0.000000e+00> : vector<512xf32>
    %243 = vector.multi_reduction <add>, %242, %cst_54 [0] : vector<4x512xf32> to vector<512xf32>
    %244 = vector.shape_cast %243 : vector<512xf32> to vector<1x512xf32>
    %cst_55 = arith.constant 0.000000e+00 : f32
    %245 = vector.broadcast %cst_55 : f32 to vector<1x20xf32>
    %246 = vector.extract_strided_slice %116 {offsets = [0, 0], sizes = [1, 492], strides = [1, 1]} : vector<1x512xf32> to vector<1x492xf32>
    %247 = tpu.concatenate %245, %246 in 1 : vector<1x20xf32>, vector<1x492xf32> -> vector<1x512xf32>
    %248 = arith.mulf %116, %247 : vector<1x512xf32>
    %cst_56 = arith.constant 1.000000e-16 : f32
    %249 = vector.broadcast %cst_56 : f32 to vector<1x512xf32>
    %250 = arith.maximumf %248, %249 : vector<1x512xf32>
    %251 = math.rsqrt %250 : vector<1x512xf32>
    %252 = arith.mulf %244, %251 : vector<1x512xf32>
    %253 = arith.mulf %252, %197 : vector<1x512xf32>
    %254 = arith.addf %181, %253 : vector<1x512xf32>
    %255 = vector.extract_strided_slice %241 {offsets = [4, 0], sizes = [4, 512], strides = [1, 1]} : vector<8x512xf32> to vector<4x512xf32>
    %cst_57 = arith.constant dense<0.000000e+00> : vector<512xf32>
    %256 = vector.multi_reduction <add>, %255, %cst_57 [0] : vector<4x512xf32> to vector<512xf32>
    %257 = vector.shape_cast %256 : vector<512xf32> to vector<1x512xf32>
    %cst_58 = arith.constant 0.000000e+00 : f32
    %258 = vector.broadcast %cst_58 : f32 to vector<1x20xf32>
    %259 = vector.extract_strided_slice %119 {offsets = [0, 0], sizes = [1, 492], strides = [1, 1]} : vector<1x512xf32> to vector<1x492xf32>
    %260 = tpu.concatenate %258, %259 in 1 : vector<1x20xf32>, vector<1x492xf32> -> vector<1x512xf32>
    %261 = arith.mulf %119, %260 : vector<1x512xf32>
    %cst_59 = arith.constant 1.000000e-16 : f32
    %262 = vector.broadcast %cst_59 : f32 to vector<1x512xf32>
    %263 = arith.maximumf %261, %262 : vector<1x512xf32>
    %264 = math.rsqrt %263 : vector<1x512xf32>
    %265 = arith.mulf %257, %264 : vector<1x512xf32>
    %266 = arith.mulf %265, %197 : vector<1x512xf32>
    %267 = arith.addf %194, %266 : vector<1x512xf32>
    %cst_60 = arith.constant 0.000000e+00 : f32
    %268 = vector.broadcast %cst_60 : f32 to vector<1x19xf32>
    %269 = vector.extract_strided_slice %1 {offsets = [0, 0], sizes = [1, 493], strides = [1, 1]} : vector<1x512xf32> to vector<1x493xf32>
    %270 = tpu.concatenate %268, %269 in 1 : vector<1x19xf32>, vector<1x493xf32> -> vector<1x512xf32>
    %cst_61 = arith.constant 0.000000e+00 : f32
    %271 = vector.broadcast %cst_61 : f32 to vector<8x19xf32>
    %272 = vector.extract_strided_slice %64 {offsets = [0, 0], sizes = [8, 493], strides = [1, 1]} : vector<8x512xf32> to vector<8x493xf32>
    %273 = tpu.concatenate %271, %272 in 1 : vector<8x19xf32>, vector<8x493xf32> -> vector<8x512xf32>
    %274 = arith.mulf %64, %273 : vector<8x512xf32>
    %cst_62 = arith.constant 0.000000e+00 : f32
    %275 = vector.broadcast %cst_62 : f32 to vector<8x19xf32>
    %276 = vector.extract_strided_slice %68 {offsets = [0, 0], sizes = [8, 493], strides = [1, 1]} : vector<8x512xf32> to vector<8x493xf32>
    %277 = tpu.concatenate %275, %276 in 1 : vector<8x19xf32>, vector<8x493xf32> -> vector<8x512xf32>
    %278 = arith.mulf %68, %277 : vector<8x512xf32>
    %279 = arith.addf %274, %278 : vector<8x512xf32>
    %cst_63 = arith.constant 0.000000e+00 : f32
    %280 = vector.broadcast %cst_63 : f32 to vector<8x19xf32>
    %281 = vector.extract_strided_slice %72 {offsets = [0, 0], sizes = [8, 493], strides = [1, 1]} : vector<8x512xf32> to vector<8x493xf32>
    %282 = tpu.concatenate %280, %281 in 1 : vector<8x19xf32>, vector<8x493xf32> -> vector<8x512xf32>
    %283 = arith.mulf %72, %282 : vector<8x512xf32>
    %284 = arith.addf %279, %283 : vector<8x512xf32>
    %cst_64 = arith.constant 0.000000e+00 : f32
    %285 = vector.broadcast %cst_64 : f32 to vector<8x19xf32>
    %286 = vector.extract_strided_slice %76 {offsets = [0, 0], sizes = [8, 493], strides = [1, 1]} : vector<8x512xf32> to vector<8x493xf32>
    %287 = tpu.concatenate %285, %286 in 1 : vector<8x19xf32>, vector<8x493xf32> -> vector<8x512xf32>
    %288 = arith.mulf %76, %287 : vector<8x512xf32>
    %289 = arith.addf %284, %288 : vector<8x512xf32>
    %cst_65 = arith.constant 0.000000e+00 : f32
    %290 = vector.broadcast %cst_65 : f32 to vector<8x19xf32>
    %291 = vector.extract_strided_slice %80 {offsets = [0, 0], sizes = [8, 493], strides = [1, 1]} : vector<8x512xf32> to vector<8x493xf32>
    %292 = tpu.concatenate %290, %291 in 1 : vector<8x19xf32>, vector<8x493xf32> -> vector<8x512xf32>
    %293 = arith.mulf %80, %292 : vector<8x512xf32>
    %294 = arith.addf %289, %293 : vector<8x512xf32>
    %cst_66 = arith.constant 0.000000e+00 : f32
    %295 = vector.broadcast %cst_66 : f32 to vector<8x19xf32>
    %296 = vector.extract_strided_slice %84 {offsets = [0, 0], sizes = [8, 493], strides = [1, 1]} : vector<8x512xf32> to vector<8x493xf32>
    %297 = tpu.concatenate %295, %296 in 1 : vector<8x19xf32>, vector<8x493xf32> -> vector<8x512xf32>
    %298 = arith.mulf %84, %297 : vector<8x512xf32>
    %299 = arith.addf %294, %298 : vector<8x512xf32>
    %cst_67 = arith.constant 0.000000e+00 : f32
    %300 = vector.broadcast %cst_67 : f32 to vector<8x19xf32>
    %301 = vector.extract_strided_slice %88 {offsets = [0, 0], sizes = [8, 493], strides = [1, 1]} : vector<8x512xf32> to vector<8x493xf32>
    %302 = tpu.concatenate %300, %301 in 1 : vector<8x19xf32>, vector<8x493xf32> -> vector<8x512xf32>
    %303 = arith.mulf %88, %302 : vector<8x512xf32>
    %304 = arith.addf %299, %303 : vector<8x512xf32>
    %cst_68 = arith.constant 0.000000e+00 : f32
    %305 = vector.broadcast %cst_68 : f32 to vector<8x19xf32>
    %306 = vector.extract_strided_slice %92 {offsets = [0, 0], sizes = [8, 493], strides = [1, 1]} : vector<8x512xf32> to vector<8x493xf32>
    %307 = tpu.concatenate %305, %306 in 1 : vector<8x19xf32>, vector<8x493xf32> -> vector<8x512xf32>
    %308 = arith.mulf %92, %307 : vector<8x512xf32>
    %309 = arith.addf %304, %308 : vector<8x512xf32>
    %cst_69 = arith.constant 0.000000e+00 : f32
    %310 = vector.broadcast %cst_69 : f32 to vector<8x19xf32>
    %311 = vector.extract_strided_slice %96 {offsets = [0, 0], sizes = [8, 493], strides = [1, 1]} : vector<8x512xf32> to vector<8x493xf32>
    %312 = tpu.concatenate %310, %311 in 1 : vector<8x19xf32>, vector<8x493xf32> -> vector<8x512xf32>
    %313 = arith.mulf %96, %312 : vector<8x512xf32>
    %314 = arith.addf %309, %313 : vector<8x512xf32>
    %315 = vector.extract_strided_slice %314 {offsets = [0, 0], sizes = [4, 512], strides = [1, 1]} : vector<8x512xf32> to vector<4x512xf32>
    %cst_70 = arith.constant dense<0.000000e+00> : vector<512xf32>
    %316 = vector.multi_reduction <add>, %315, %cst_70 [0] : vector<4x512xf32> to vector<512xf32>
    %317 = vector.shape_cast %316 : vector<512xf32> to vector<1x512xf32>
    %cst_71 = arith.constant 0.000000e+00 : f32
    %318 = vector.broadcast %cst_71 : f32 to vector<1x19xf32>
    %319 = vector.extract_strided_slice %116 {offsets = [0, 0], sizes = [1, 493], strides = [1, 1]} : vector<1x512xf32> to vector<1x493xf32>
    %320 = tpu.concatenate %318, %319 in 1 : vector<1x19xf32>, vector<1x493xf32> -> vector<1x512xf32>
    %321 = arith.mulf %116, %320 : vector<1x512xf32>
    %cst_72 = arith.constant 1.000000e-16 : f32
    %322 = vector.broadcast %cst_72 : f32 to vector<1x512xf32>
    %323 = arith.maximumf %321, %322 : vector<1x512xf32>
    %324 = math.rsqrt %323 : vector<1x512xf32>
    %325 = arith.mulf %317, %324 : vector<1x512xf32>
    %326 = arith.mulf %325, %270 : vector<1x512xf32>
    %327 = arith.addf %254, %326 : vector<1x512xf32>
    %328 = vector.extract_strided_slice %314 {offsets = [4, 0], sizes = [4, 512], strides = [1, 1]} : vector<8x512xf32> to vector<4x512xf32>
    %cst_73 = arith.constant dense<0.000000e+00> : vector<512xf32>
    %329 = vector.multi_reduction <add>, %328, %cst_73 [0] : vector<4x512xf32> to vector<512xf32>
    %330 = vector.shape_cast %329 : vector<512xf32> to vector<1x512xf32>
    %cst_74 = arith.constant 0.000000e+00 : f32
    %331 = vector.broadcast %cst_74 : f32 to vector<1x19xf32>
    %332 = vector.extract_strided_slice %119 {offsets = [0, 0], sizes = [1, 493], strides = [1, 1]} : vector<1x512xf32> to vector<1x493xf32>
    %333 = tpu.concatenate %331, %332 in 1 : vector<1x19xf32>, vector<1x493xf32> -> vector<1x512xf32>
    %334 = arith.mulf %119, %333 : vector<1x512xf32>
    %cst_75 = arith.constant 1.000000e-16 : f32
    %335 = vector.broadcast %cst_75 : f32 to vector<1x512xf32>
    %336 = arith.maximumf %334, %335 : vector<1x512xf32>
    %337 = math.rsqrt %336 : vector<1x512xf32>
    %338 = arith.mulf %330, %337 : vector<1x512xf32>
    %339 = arith.mulf %338, %270 : vector<1x512xf32>
    %340 = arith.addf %267, %339 : vector<1x512xf32>
    %cst_76 = arith.constant 0.000000e+00 : f32
    %341 = vector.broadcast %cst_76 : f32 to vector<1x1xf32>
    %342 = vector.extract_strided_slice %1 {offsets = [0, 0], sizes = [1, 511], strides = [1, 1]} : vector<1x512xf32> to vector<1x511xf32>
    %343 = tpu.concatenate %341, %342 in 1 : vector<1x1xf32>, vector<1x511xf32> -> vector<1x512xf32>
    %cst_77 = arith.constant 0.000000e+00 : f32
    %344 = vector.broadcast %cst_77 : f32 to vector<8x1xf32>
    %345 = vector.extract_strided_slice %64 {offsets = [0, 0], sizes = [8, 511], strides = [1, 1]} : vector<8x512xf32> to vector<8x511xf32>
    %346 = tpu.concatenate %344, %345 in 1 : vector<8x1xf32>, vector<8x511xf32> -> vector<8x512xf32>
    %347 = arith.mulf %64, %346 : vector<8x512xf32>
    %cst_78 = arith.constant 0.000000e+00 : f32
    %348 = vector.broadcast %cst_78 : f32 to vector<8x1xf32>
    %349 = vector.extract_strided_slice %68 {offsets = [0, 0], sizes = [8, 511], strides = [1, 1]} : vector<8x512xf32> to vector<8x511xf32>
    %350 = tpu.concatenate %348, %349 in 1 : vector<8x1xf32>, vector<8x511xf32> -> vector<8x512xf32>
    %351 = arith.mulf %68, %350 : vector<8x512xf32>
    %352 = arith.addf %347, %351 : vector<8x512xf32>
    %cst_79 = arith.constant 0.000000e+00 : f32
    %353 = vector.broadcast %cst_79 : f32 to vector<8x1xf32>
    %354 = vector.extract_strided_slice %72 {offsets = [0, 0], sizes = [8, 511], strides = [1, 1]} : vector<8x512xf32> to vector<8x511xf32>
    %355 = tpu.concatenate %353, %354 in 1 : vector<8x1xf32>, vector<8x511xf32> -> vector<8x512xf32>
    %356 = arith.mulf %72, %355 : vector<8x512xf32>
    %357 = arith.addf %352, %356 : vector<8x512xf32>
    %cst_80 = arith.constant 0.000000e+00 : f32
    %358 = vector.broadcast %cst_80 : f32 to vector<8x1xf32>
    %359 = vector.extract_strided_slice %76 {offsets = [0, 0], sizes = [8, 511], strides = [1, 1]} : vector<8x512xf32> to vector<8x511xf32>
    %360 = tpu.concatenate %358, %359 in 1 : vector<8x1xf32>, vector<8x511xf32> -> vector<8x512xf32>
    %361 = arith.mulf %76, %360 : vector<8x512xf32>
    %362 = arith.addf %357, %361 : vector<8x512xf32>
    %cst_81 = arith.constant 0.000000e+00 : f32
    %363 = vector.broadcast %cst_81 : f32 to vector<8x1xf32>
    %364 = vector.extract_strided_slice %80 {offsets = [0, 0], sizes = [8, 511], strides = [1, 1]} : vector<8x512xf32> to vector<8x511xf32>
    %365 = tpu.concatenate %363, %364 in 1 : vector<8x1xf32>, vector<8x511xf32> -> vector<8x512xf32>
    %366 = arith.mulf %80, %365 : vector<8x512xf32>
    %367 = arith.addf %362, %366 : vector<8x512xf32>
    %cst_82 = arith.constant 0.000000e+00 : f32
    %368 = vector.broadcast %cst_82 : f32 to vector<8x1xf32>
    %369 = vector.extract_strided_slice %84 {offsets = [0, 0], sizes = [8, 511], strides = [1, 1]} : vector<8x512xf32> to vector<8x511xf32>
    %370 = tpu.concatenate %368, %369 in 1 : vector<8x1xf32>, vector<8x511xf32> -> vector<8x512xf32>
    %371 = arith.mulf %84, %370 : vector<8x512xf32>
    %372 = arith.addf %367, %371 : vector<8x512xf32>
    %cst_83 = arith.constant 0.000000e+00 : f32
    %373 = vector.broadcast %cst_83 : f32 to vector<8x1xf32>
    %374 = vector.extract_strided_slice %88 {offsets = [0, 0], sizes = [8, 511], strides = [1, 1]} : vector<8x512xf32> to vector<8x511xf32>
    %375 = tpu.concatenate %373, %374 in 1 : vector<8x1xf32>, vector<8x511xf32> -> vector<8x512xf32>
    %376 = arith.mulf %88, %375 : vector<8x512xf32>
    %377 = arith.addf %372, %376 : vector<8x512xf32>
    %cst_84 = arith.constant 0.000000e+00 : f32
    %378 = vector.broadcast %cst_84 : f32 to vector<8x1xf32>
    %379 = vector.extract_strided_slice %92 {offsets = [0, 0], sizes = [8, 511], strides = [1, 1]} : vector<8x512xf32> to vector<8x511xf32>
    %380 = tpu.concatenate %378, %379 in 1 : vector<8x1xf32>, vector<8x511xf32> -> vector<8x512xf32>
    %381 = arith.mulf %92, %380 : vector<8x512xf32>
    %382 = arith.addf %377, %381 : vector<8x512xf32>
    %cst_85 = arith.constant 0.000000e+00 : f32
    %383 = vector.broadcast %cst_85 : f32 to vector<8x1xf32>
    %384 = vector.extract_strided_slice %96 {offsets = [0, 0], sizes = [8, 511], strides = [1, 1]} : vector<8x512xf32> to vector<8x511xf32>
    %385 = tpu.concatenate %383, %384 in 1 : vector<8x1xf32>, vector<8x511xf32> -> vector<8x512xf32>
    %386 = arith.mulf %96, %385 : vector<8x512xf32>
    %387 = arith.addf %382, %386 : vector<8x512xf32>
    %388 = vector.extract_strided_slice %387 {offsets = [0, 0], sizes = [4, 512], strides = [1, 1]} : vector<8x512xf32> to vector<4x512xf32>
    %cst_86 = arith.constant dense<0.000000e+00> : vector<512xf32>
    %389 = vector.multi_reduction <add>, %388, %cst_86 [0] : vector<4x512xf32> to vector<512xf32>
    %390 = vector.shape_cast %389 : vector<512xf32> to vector<1x512xf32>
    %cst_87 = arith.constant 0.000000e+00 : f32
    %391 = vector.broadcast %cst_87 : f32 to vector<1x1xf32>
    %392 = vector.extract_strided_slice %116 {offsets = [0, 0], sizes = [1, 511], strides = [1, 1]} : vector<1x512xf32> to vector<1x511xf32>
    %393 = tpu.concatenate %391, %392 in 1 : vector<1x1xf32>, vector<1x511xf32> -> vector<1x512xf32>
    %394 = arith.mulf %116, %393 : vector<1x512xf32>
    %cst_88 = arith.constant 1.000000e-16 : f32
    %395 = vector.broadcast %cst_88 : f32 to vector<1x512xf32>
    %396 = arith.maximumf %394, %395 : vector<1x512xf32>
    %397 = math.rsqrt %396 : vector<1x512xf32>
    %398 = arith.mulf %390, %397 : vector<1x512xf32>
    %399 = arith.mulf %398, %343 : vector<1x512xf32>
    %400 = arith.addf %327, %399 : vector<1x512xf32>
    %401 = vector.extract_strided_slice %387 {offsets = [4, 0], sizes = [4, 512], strides = [1, 1]} : vector<8x512xf32> to vector<4x512xf32>
    %cst_89 = arith.constant dense<0.000000e+00> : vector<512xf32>
    %402 = vector.multi_reduction <add>, %401, %cst_89 [0] : vector<4x512xf32> to vector<512xf32>
    %403 = vector.shape_cast %402 : vector<512xf32> to vector<1x512xf32>
    %cst_90 = arith.constant 0.000000e+00 : f32
    %404 = vector.broadcast %cst_90 : f32 to vector<1x1xf32>
    %405 = vector.extract_strided_slice %119 {offsets = [0, 0], sizes = [1, 511], strides = [1, 1]} : vector<1x512xf32> to vector<1x511xf32>
    %406 = tpu.concatenate %404, %405 in 1 : vector<1x1xf32>, vector<1x511xf32> -> vector<1x512xf32>
    %407 = arith.mulf %119, %406 : vector<1x512xf32>
    %cst_91 = arith.constant 1.000000e-16 : f32
    %408 = vector.broadcast %cst_91 : f32 to vector<1x512xf32>
    %409 = arith.maximumf %407, %408 : vector<1x512xf32>
    %410 = math.rsqrt %409 : vector<1x512xf32>
    %411 = arith.mulf %403, %410 : vector<1x512xf32>
    %412 = arith.mulf %411, %343 : vector<1x512xf32>
    %413 = arith.addf %340, %412 : vector<1x512xf32>
    %cst_92 = arith.constant 0.000000e+00 : f32
    %414 = vector.broadcast %cst_92 : f32 to vector<1x1xf32>
    %415 = vector.extract_strided_slice %1 {offsets = [0, 1], sizes = [1, 511], strides = [1, 1]} : vector<1x512xf32> to vector<1x511xf32>
    %416 = tpu.concatenate %415, %414 in 1 : vector<1x511xf32>, vector<1x1xf32> -> vector<1x512xf32>
    %cst_93 = arith.constant 0.000000e+00 : f32
    %417 = vector.broadcast %cst_93 : f32 to vector<8x1xf32>
    %418 = vector.extract_strided_slice %64 {offsets = [0, 1], sizes = [8, 511], strides = [1, 1]} : vector<8x512xf32> to vector<8x511xf32>
    %419 = tpu.concatenate %418, %417 in 1 : vector<8x511xf32>, vector<8x1xf32> -> vector<8x512xf32>
    %420 = arith.mulf %64, %419 : vector<8x512xf32>
    %cst_94 = arith.constant 0.000000e+00 : f32
    %421 = vector.broadcast %cst_94 : f32 to vector<8x1xf32>
    %422 = vector.extract_strided_slice %68 {offsets = [0, 1], sizes = [8, 511], strides = [1, 1]} : vector<8x512xf32> to vector<8x511xf32>
    %423 = tpu.concatenate %422, %421 in 1 : vector<8x511xf32>, vector<8x1xf32> -> vector<8x512xf32>
    %424 = arith.mulf %68, %423 : vector<8x512xf32>
    %425 = arith.addf %420, %424 : vector<8x512xf32>
    %cst_95 = arith.constant 0.000000e+00 : f32
    %426 = vector.broadcast %cst_95 : f32 to vector<8x1xf32>
    %427 = vector.extract_strided_slice %72 {offsets = [0, 1], sizes = [8, 511], strides = [1, 1]} : vector<8x512xf32> to vector<8x511xf32>
    %428 = tpu.concatenate %427, %426 in 1 : vector<8x511xf32>, vector<8x1xf32> -> vector<8x512xf32>
    %429 = arith.mulf %72, %428 : vector<8x512xf32>
    %430 = arith.addf %425, %429 : vector<8x512xf32>
    %cst_96 = arith.constant 0.000000e+00 : f32
    %431 = vector.broadcast %cst_96 : f32 to vector<8x1xf32>
    %432 = vector.extract_strided_slice %76 {offsets = [0, 1], sizes = [8, 511], strides = [1, 1]} : vector<8x512xf32> to vector<8x511xf32>
    %433 = tpu.concatenate %432, %431 in 1 : vector<8x511xf32>, vector<8x1xf32> -> vector<8x512xf32>
    %434 = arith.mulf %76, %433 : vector<8x512xf32>
    %435 = arith.addf %430, %434 : vector<8x512xf32>
    %cst_97 = arith.constant 0.000000e+00 : f32
    %436 = vector.broadcast %cst_97 : f32 to vector<8x1xf32>
    %437 = vector.extract_strided_slice %80 {offsets = [0, 1], sizes = [8, 511], strides = [1, 1]} : vector<8x512xf32> to vector<8x511xf32>
    %438 = tpu.concatenate %437, %436 in 1 : vector<8x511xf32>, vector<8x1xf32> -> vector<8x512xf32>
    %439 = arith.mulf %80, %438 : vector<8x512xf32>
    %440 = arith.addf %435, %439 : vector<8x512xf32>
    %cst_98 = arith.constant 0.000000e+00 : f32
    %441 = vector.broadcast %cst_98 : f32 to vector<8x1xf32>
    %442 = vector.extract_strided_slice %84 {offsets = [0, 1], sizes = [8, 511], strides = [1, 1]} : vector<8x512xf32> to vector<8x511xf32>
    %443 = tpu.concatenate %442, %441 in 1 : vector<8x511xf32>, vector<8x1xf32> -> vector<8x512xf32>
    %444 = arith.mulf %84, %443 : vector<8x512xf32>
    %445 = arith.addf %440, %444 : vector<8x512xf32>
    %cst_99 = arith.constant 0.000000e+00 : f32
    %446 = vector.broadcast %cst_99 : f32 to vector<8x1xf32>
    %447 = vector.extract_strided_slice %88 {offsets = [0, 1], sizes = [8, 511], strides = [1, 1]} : vector<8x512xf32> to vector<8x511xf32>
    %448 = tpu.concatenate %447, %446 in 1 : vector<8x511xf32>, vector<8x1xf32> -> vector<8x512xf32>
    %449 = arith.mulf %88, %448 : vector<8x512xf32>
    %450 = arith.addf %445, %449 : vector<8x512xf32>
    %cst_100 = arith.constant 0.000000e+00 : f32
    %451 = vector.broadcast %cst_100 : f32 to vector<8x1xf32>
    %452 = vector.extract_strided_slice %92 {offsets = [0, 1], sizes = [8, 511], strides = [1, 1]} : vector<8x512xf32> to vector<8x511xf32>
    %453 = tpu.concatenate %452, %451 in 1 : vector<8x511xf32>, vector<8x1xf32> -> vector<8x512xf32>
    %454 = arith.mulf %92, %453 : vector<8x512xf32>
    %455 = arith.addf %450, %454 : vector<8x512xf32>
    %cst_101 = arith.constant 0.000000e+00 : f32
    %456 = vector.broadcast %cst_101 : f32 to vector<8x1xf32>
    %457 = vector.extract_strided_slice %96 {offsets = [0, 1], sizes = [8, 511], strides = [1, 1]} : vector<8x512xf32> to vector<8x511xf32>
    %458 = tpu.concatenate %457, %456 in 1 : vector<8x511xf32>, vector<8x1xf32> -> vector<8x512xf32>
    %459 = arith.mulf %96, %458 : vector<8x512xf32>
    %460 = arith.addf %455, %459 : vector<8x512xf32>
    %461 = vector.extract_strided_slice %460 {offsets = [0, 0], sizes = [4, 512], strides = [1, 1]} : vector<8x512xf32> to vector<4x512xf32>
    %cst_102 = arith.constant dense<0.000000e+00> : vector<512xf32>
    %462 = vector.multi_reduction <add>, %461, %cst_102 [0] : vector<4x512xf32> to vector<512xf32>
    %463 = vector.shape_cast %462 : vector<512xf32> to vector<1x512xf32>
    %cst_103 = arith.constant 0.000000e+00 : f32
    %464 = vector.broadcast %cst_103 : f32 to vector<1x1xf32>
    %465 = vector.extract_strided_slice %116 {offsets = [0, 1], sizes = [1, 511], strides = [1, 1]} : vector<1x512xf32> to vector<1x511xf32>
    %466 = tpu.concatenate %465, %464 in 1 : vector<1x511xf32>, vector<1x1xf32> -> vector<1x512xf32>
    %467 = arith.mulf %116, %466 : vector<1x512xf32>
    %cst_104 = arith.constant 1.000000e-16 : f32
    %468 = vector.broadcast %cst_104 : f32 to vector<1x512xf32>
    %469 = arith.maximumf %467, %468 : vector<1x512xf32>
    %470 = math.rsqrt %469 : vector<1x512xf32>
    %471 = arith.mulf %463, %470 : vector<1x512xf32>
    %472 = arith.mulf %471, %416 : vector<1x512xf32>
    %473 = arith.addf %400, %472 : vector<1x512xf32>
    %474 = vector.extract_strided_slice %460 {offsets = [4, 0], sizes = [4, 512], strides = [1, 1]} : vector<8x512xf32> to vector<4x512xf32>
    %cst_105 = arith.constant dense<0.000000e+00> : vector<512xf32>
    %475 = vector.multi_reduction <add>, %474, %cst_105 [0] : vector<4x512xf32> to vector<512xf32>
    %476 = vector.shape_cast %475 : vector<512xf32> to vector<1x512xf32>
    %cst_106 = arith.constant 0.000000e+00 : f32
    %477 = vector.broadcast %cst_106 : f32 to vector<1x1xf32>
    %478 = vector.extract_strided_slice %119 {offsets = [0, 1], sizes = [1, 511], strides = [1, 1]} : vector<1x512xf32> to vector<1x511xf32>
    %479 = tpu.concatenate %478, %477 in 1 : vector<1x511xf32>, vector<1x1xf32> -> vector<1x512xf32>
    %480 = arith.mulf %119, %479 : vector<1x512xf32>
    %cst_107 = arith.constant 1.000000e-16 : f32
    %481 = vector.broadcast %cst_107 : f32 to vector<1x512xf32>
    %482 = arith.maximumf %480, %481 : vector<1x512xf32>
    %483 = math.rsqrt %482 : vector<1x512xf32>
    %484 = arith.mulf %476, %483 : vector<1x512xf32>
    %485 = arith.mulf %484, %416 : vector<1x512xf32>
    %486 = arith.addf %413, %485 : vector<1x512xf32>
    %cst_108 = arith.constant 0.000000e+00 : f32
    %487 = vector.broadcast %cst_108 : f32 to vector<1x19xf32>
    %488 = vector.extract_strided_slice %1 {offsets = [0, 19], sizes = [1, 493], strides = [1, 1]} : vector<1x512xf32> to vector<1x493xf32>
    %489 = tpu.concatenate %488, %487 in 1 : vector<1x493xf32>, vector<1x19xf32> -> vector<1x512xf32>
    %cst_109 = arith.constant 0.000000e+00 : f32
    %490 = vector.broadcast %cst_109 : f32 to vector<8x19xf32>
    %491 = vector.extract_strided_slice %64 {offsets = [0, 19], sizes = [8, 493], strides = [1, 1]} : vector<8x512xf32> to vector<8x493xf32>
    %492 = tpu.concatenate %491, %490 in 1 : vector<8x493xf32>, vector<8x19xf32> -> vector<8x512xf32>
    %493 = arith.mulf %64, %492 : vector<8x512xf32>
    %cst_110 = arith.constant 0.000000e+00 : f32
    %494 = vector.broadcast %cst_110 : f32 to vector<8x19xf32>
    %495 = vector.extract_strided_slice %68 {offsets = [0, 19], sizes = [8, 493], strides = [1, 1]} : vector<8x512xf32> to vector<8x493xf32>
    %496 = tpu.concatenate %495, %494 in 1 : vector<8x493xf32>, vector<8x19xf32> -> vector<8x512xf32>
    %497 = arith.mulf %68, %496 : vector<8x512xf32>
    %498 = arith.addf %493, %497 : vector<8x512xf32>
    %cst_111 = arith.constant 0.000000e+00 : f32
    %499 = vector.broadcast %cst_111 : f32 to vector<8x19xf32>
    %500 = vector.extract_strided_slice %72 {offsets = [0, 19], sizes = [8, 493], strides = [1, 1]} : vector<8x512xf32> to vector<8x493xf32>
    %501 = tpu.concatenate %500, %499 in 1 : vector<8x493xf32>, vector<8x19xf32> -> vector<8x512xf32>
    %502 = arith.mulf %72, %501 : vector<8x512xf32>
    %503 = arith.addf %498, %502 : vector<8x512xf32>
    %cst_112 = arith.constant 0.000000e+00 : f32
    %504 = vector.broadcast %cst_112 : f32 to vector<8x19xf32>
    %505 = vector.extract_strided_slice %76 {offsets = [0, 19], sizes = [8, 493], strides = [1, 1]} : vector<8x512xf32> to vector<8x493xf32>
    %506 = tpu.concatenate %505, %504 in 1 : vector<8x493xf32>, vector<8x19xf32> -> vector<8x512xf32>
    %507 = arith.mulf %76, %506 : vector<8x512xf32>
    %508 = arith.addf %503, %507 : vector<8x512xf32>
    %cst_113 = arith.constant 0.000000e+00 : f32
    %509 = vector.broadcast %cst_113 : f32 to vector<8x19xf32>
    %510 = vector.extract_strided_slice %80 {offsets = [0, 19], sizes = [8, 493], strides = [1, 1]} : vector<8x512xf32> to vector<8x493xf32>
    %511 = tpu.concatenate %510, %509 in 1 : vector<8x493xf32>, vector<8x19xf32> -> vector<8x512xf32>
    %512 = arith.mulf %80, %511 : vector<8x512xf32>
    %513 = arith.addf %508, %512 : vector<8x512xf32>
    %cst_114 = arith.constant 0.000000e+00 : f32
    %514 = vector.broadcast %cst_114 : f32 to vector<8x19xf32>
    %515 = vector.extract_strided_slice %84 {offsets = [0, 19], sizes = [8, 493], strides = [1, 1]} : vector<8x512xf32> to vector<8x493xf32>
    %516 = tpu.concatenate %515, %514 in 1 : vector<8x493xf32>, vector<8x19xf32> -> vector<8x512xf32>
    %517 = arith.mulf %84, %516 : vector<8x512xf32>
    %518 = arith.addf %513, %517 : vector<8x512xf32>
    %cst_115 = arith.constant 0.000000e+00 : f32
    %519 = vector.broadcast %cst_115 : f32 to vector<8x19xf32>
    %520 = vector.extract_strided_slice %88 {offsets = [0, 19], sizes = [8, 493], strides = [1, 1]} : vector<8x512xf32> to vector<8x493xf32>
    %521 = tpu.concatenate %520, %519 in 1 : vector<8x493xf32>, vector<8x19xf32> -> vector<8x512xf32>
    %522 = arith.mulf %88, %521 : vector<8x512xf32>
    %523 = arith.addf %518, %522 : vector<8x512xf32>
    %cst_116 = arith.constant 0.000000e+00 : f32
    %524 = vector.broadcast %cst_116 : f32 to vector<8x19xf32>
    %525 = vector.extract_strided_slice %92 {offsets = [0, 19], sizes = [8, 493], strides = [1, 1]} : vector<8x512xf32> to vector<8x493xf32>
    %526 = tpu.concatenate %525, %524 in 1 : vector<8x493xf32>, vector<8x19xf32> -> vector<8x512xf32>
    %527 = arith.mulf %92, %526 : vector<8x512xf32>
    %528 = arith.addf %523, %527 : vector<8x512xf32>
    %cst_117 = arith.constant 0.000000e+00 : f32
    %529 = vector.broadcast %cst_117 : f32 to vector<8x19xf32>
    %530 = vector.extract_strided_slice %96 {offsets = [0, 19], sizes = [8, 493], strides = [1, 1]} : vector<8x512xf32> to vector<8x493xf32>
    %531 = tpu.concatenate %530, %529 in 1 : vector<8x493xf32>, vector<8x19xf32> -> vector<8x512xf32>
    %532 = arith.mulf %96, %531 : vector<8x512xf32>
    %533 = arith.addf %528, %532 : vector<8x512xf32>
    %534 = vector.extract_strided_slice %533 {offsets = [0, 0], sizes = [4, 512], strides = [1, 1]} : vector<8x512xf32> to vector<4x512xf32>
    %cst_118 = arith.constant dense<0.000000e+00> : vector<512xf32>
    %535 = vector.multi_reduction <add>, %534, %cst_118 [0] : vector<4x512xf32> to vector<512xf32>
    %536 = vector.shape_cast %535 : vector<512xf32> to vector<1x512xf32>
    %cst_119 = arith.constant 0.000000e+00 : f32
    %537 = vector.broadcast %cst_119 : f32 to vector<1x19xf32>
    %538 = vector.extract_strided_slice %116 {offsets = [0, 19], sizes = [1, 493], strides = [1, 1]} : vector<1x512xf32> to vector<1x493xf32>
    %539 = tpu.concatenate %538, %537 in 1 : vector<1x493xf32>, vector<1x19xf32> -> vector<1x512xf32>
    %540 = arith.mulf %116, %539 : vector<1x512xf32>
    %cst_120 = arith.constant 1.000000e-16 : f32
    %541 = vector.broadcast %cst_120 : f32 to vector<1x512xf32>
    %542 = arith.maximumf %540, %541 : vector<1x512xf32>
    %543 = math.rsqrt %542 : vector<1x512xf32>
    %544 = arith.mulf %536, %543 : vector<1x512xf32>
    %545 = arith.mulf %544, %489 : vector<1x512xf32>
    %546 = arith.addf %473, %545 : vector<1x512xf32>
    %547 = vector.extract_strided_slice %533 {offsets = [4, 0], sizes = [4, 512], strides = [1, 1]} : vector<8x512xf32> to vector<4x512xf32>
    %cst_121 = arith.constant dense<0.000000e+00> : vector<512xf32>
    %548 = vector.multi_reduction <add>, %547, %cst_121 [0] : vector<4x512xf32> to vector<512xf32>
    %549 = vector.shape_cast %548 : vector<512xf32> to vector<1x512xf32>
    %cst_122 = arith.constant 0.000000e+00 : f32
    %550 = vector.broadcast %cst_122 : f32 to vector<1x19xf32>
    %551 = vector.extract_strided_slice %119 {offsets = [0, 19], sizes = [1, 493], strides = [1, 1]} : vector<1x512xf32> to vector<1x493xf32>
    %552 = tpu.concatenate %551, %550 in 1 : vector<1x493xf32>, vector<1x19xf32> -> vector<1x512xf32>
    %553 = arith.mulf %119, %552 : vector<1x512xf32>
    %cst_123 = arith.constant 1.000000e-16 : f32
    %554 = vector.broadcast %cst_123 : f32 to vector<1x512xf32>
    %555 = arith.maximumf %553, %554 : vector<1x512xf32>
    %556 = math.rsqrt %555 : vector<1x512xf32>
    %557 = arith.mulf %549, %556 : vector<1x512xf32>
    %558 = arith.mulf %557, %489 : vector<1x512xf32>
    %559 = arith.addf %486, %558 : vector<1x512xf32>
    %cst_124 = arith.constant 0.000000e+00 : f32
    %560 = vector.broadcast %cst_124 : f32 to vector<1x20xf32>
    %561 = vector.extract_strided_slice %1 {offsets = [0, 20], sizes = [1, 492], strides = [1, 1]} : vector<1x512xf32> to vector<1x492xf32>
    %562 = tpu.concatenate %561, %560 in 1 : vector<1x492xf32>, vector<1x20xf32> -> vector<1x512xf32>
    %cst_125 = arith.constant 0.000000e+00 : f32
    %563 = vector.broadcast %cst_125 : f32 to vector<8x20xf32>
    %564 = vector.extract_strided_slice %64 {offsets = [0, 20], sizes = [8, 492], strides = [1, 1]} : vector<8x512xf32> to vector<8x492xf32>
    %565 = tpu.concatenate %564, %563 in 1 : vector<8x492xf32>, vector<8x20xf32> -> vector<8x512xf32>
    %566 = arith.mulf %64, %565 : vector<8x512xf32>
    %cst_126 = arith.constant 0.000000e+00 : f32
    %567 = vector.broadcast %cst_126 : f32 to vector<8x20xf32>
    %568 = vector.extract_strided_slice %68 {offsets = [0, 20], sizes = [8, 492], strides = [1, 1]} : vector<8x512xf32> to vector<8x492xf32>
    %569 = tpu.concatenate %568, %567 in 1 : vector<8x492xf32>, vector<8x20xf32> -> vector<8x512xf32>
    %570 = arith.mulf %68, %569 : vector<8x512xf32>
    %571 = arith.addf %566, %570 : vector<8x512xf32>
    %cst_127 = arith.constant 0.000000e+00 : f32
    %572 = vector.broadcast %cst_127 : f32 to vector<8x20xf32>
    %573 = vector.extract_strided_slice %72 {offsets = [0, 20], sizes = [8, 492], strides = [1, 1]} : vector<8x512xf32> to vector<8x492xf32>
    %574 = tpu.concatenate %573, %572 in 1 : vector<8x492xf32>, vector<8x20xf32> -> vector<8x512xf32>
    %575 = arith.mulf %72, %574 : vector<8x512xf32>
    %576 = arith.addf %571, %575 : vector<8x512xf32>
    %cst_128 = arith.constant 0.000000e+00 : f32
    %577 = vector.broadcast %cst_128 : f32 to vector<8x20xf32>
    %578 = vector.extract_strided_slice %76 {offsets = [0, 20], sizes = [8, 492], strides = [1, 1]} : vector<8x512xf32> to vector<8x492xf32>
    %579 = tpu.concatenate %578, %577 in 1 : vector<8x492xf32>, vector<8x20xf32> -> vector<8x512xf32>
    %580 = arith.mulf %76, %579 : vector<8x512xf32>
    %581 = arith.addf %576, %580 : vector<8x512xf32>
    %cst_129 = arith.constant 0.000000e+00 : f32
    %582 = vector.broadcast %cst_129 : f32 to vector<8x20xf32>
    %583 = vector.extract_strided_slice %80 {offsets = [0, 20], sizes = [8, 492], strides = [1, 1]} : vector<8x512xf32> to vector<8x492xf32>
    %584 = tpu.concatenate %583, %582 in 1 : vector<8x492xf32>, vector<8x20xf32> -> vector<8x512xf32>
    %585 = arith.mulf %80, %584 : vector<8x512xf32>
    %586 = arith.addf %581, %585 : vector<8x512xf32>
    %cst_130 = arith.constant 0.000000e+00 : f32
    %587 = vector.broadcast %cst_130 : f32 to vector<8x20xf32>
    %588 = vector.extract_strided_slice %84 {offsets = [0, 20], sizes = [8, 492], strides = [1, 1]} : vector<8x512xf32> to vector<8x492xf32>
    %589 = tpu.concatenate %588, %587 in 1 : vector<8x492xf32>, vector<8x20xf32> -> vector<8x512xf32>
    %590 = arith.mulf %84, %589 : vector<8x512xf32>
    %591 = arith.addf %586, %590 : vector<8x512xf32>
    %cst_131 = arith.constant 0.000000e+00 : f32
    %592 = vector.broadcast %cst_131 : f32 to vector<8x20xf32>
    %593 = vector.extract_strided_slice %88 {offsets = [0, 20], sizes = [8, 492], strides = [1, 1]} : vector<8x512xf32> to vector<8x492xf32>
    %594 = tpu.concatenate %593, %592 in 1 : vector<8x492xf32>, vector<8x20xf32> -> vector<8x512xf32>
    %595 = arith.mulf %88, %594 : vector<8x512xf32>
    %596 = arith.addf %591, %595 : vector<8x512xf32>
    %cst_132 = arith.constant 0.000000e+00 : f32
    %597 = vector.broadcast %cst_132 : f32 to vector<8x20xf32>
    %598 = vector.extract_strided_slice %92 {offsets = [0, 20], sizes = [8, 492], strides = [1, 1]} : vector<8x512xf32> to vector<8x492xf32>
    %599 = tpu.concatenate %598, %597 in 1 : vector<8x492xf32>, vector<8x20xf32> -> vector<8x512xf32>
    %600 = arith.mulf %92, %599 : vector<8x512xf32>
    %601 = arith.addf %596, %600 : vector<8x512xf32>
    %cst_133 = arith.constant 0.000000e+00 : f32
    %602 = vector.broadcast %cst_133 : f32 to vector<8x20xf32>
    %603 = vector.extract_strided_slice %96 {offsets = [0, 20], sizes = [8, 492], strides = [1, 1]} : vector<8x512xf32> to vector<8x492xf32>
    %604 = tpu.concatenate %603, %602 in 1 : vector<8x492xf32>, vector<8x20xf32> -> vector<8x512xf32>
    %605 = arith.mulf %96, %604 : vector<8x512xf32>
    %606 = arith.addf %601, %605 : vector<8x512xf32>
    %607 = vector.extract_strided_slice %606 {offsets = [0, 0], sizes = [4, 512], strides = [1, 1]} : vector<8x512xf32> to vector<4x512xf32>
    %cst_134 = arith.constant dense<0.000000e+00> : vector<512xf32>
    %608 = vector.multi_reduction <add>, %607, %cst_134 [0] : vector<4x512xf32> to vector<512xf32>
    %609 = vector.shape_cast %608 : vector<512xf32> to vector<1x512xf32>
    %cst_135 = arith.constant 0.000000e+00 : f32
    %610 = vector.broadcast %cst_135 : f32 to vector<1x20xf32>
    %611 = vector.extract_strided_slice %116 {offsets = [0, 20], sizes = [1, 492], strides = [1, 1]} : vector<1x512xf32> to vector<1x492xf32>
    %612 = tpu.concatenate %611, %610 in 1 : vector<1x492xf32>, vector<1x20xf32> -> vector<1x512xf32>
    %613 = arith.mulf %116, %612 : vector<1x512xf32>
    %cst_136 = arith.constant 1.000000e-16 : f32
    %614 = vector.broadcast %cst_136 : f32 to vector<1x512xf32>
    %615 = arith.maximumf %613, %614 : vector<1x512xf32>
    %616 = math.rsqrt %615 : vector<1x512xf32>
    %617 = arith.mulf %609, %616 : vector<1x512xf32>
    %618 = arith.mulf %617, %562 : vector<1x512xf32>
    %619 = arith.addf %546, %618 : vector<1x512xf32>
    %620 = vector.extract_strided_slice %606 {offsets = [4, 0], sizes = [4, 512], strides = [1, 1]} : vector<8x512xf32> to vector<4x512xf32>
    %cst_137 = arith.constant dense<0.000000e+00> : vector<512xf32>
    %621 = vector.multi_reduction <add>, %620, %cst_137 [0] : vector<4x512xf32> to vector<512xf32>
    %622 = vector.shape_cast %621 : vector<512xf32> to vector<1x512xf32>
    %cst_138 = arith.constant 0.000000e+00 : f32
    %623 = vector.broadcast %cst_138 : f32 to vector<1x20xf32>
    %624 = vector.extract_strided_slice %119 {offsets = [0, 20], sizes = [1, 492], strides = [1, 1]} : vector<1x512xf32> to vector<1x492xf32>
    %625 = tpu.concatenate %624, %623 in 1 : vector<1x492xf32>, vector<1x20xf32> -> vector<1x512xf32>
    %626 = arith.mulf %119, %625 : vector<1x512xf32>
    %cst_139 = arith.constant 1.000000e-16 : f32
    %627 = vector.broadcast %cst_139 : f32 to vector<1x512xf32>
    %628 = arith.maximumf %626, %627 : vector<1x512xf32>
    %629 = math.rsqrt %628 : vector<1x512xf32>
    %630 = arith.mulf %622, %629 : vector<1x512xf32>
    %631 = arith.mulf %630, %562 : vector<1x512xf32>
    %632 = arith.addf %559, %631 : vector<1x512xf32>
    %cst_140 = arith.constant 0.000000e+00 : f32
    %633 = vector.broadcast %cst_140 : f32 to vector<1x21xf32>
    %634 = vector.extract_strided_slice %1 {offsets = [0, 21], sizes = [1, 491], strides = [1, 1]} : vector<1x512xf32> to vector<1x491xf32>
    %635 = tpu.concatenate %634, %633 in 1 : vector<1x491xf32>, vector<1x21xf32> -> vector<1x512xf32>
    %cst_141 = arith.constant 0.000000e+00 : f32
    %636 = vector.broadcast %cst_141 : f32 to vector<8x21xf32>
    %637 = vector.extract_strided_slice %64 {offsets = [0, 21], sizes = [8, 491], strides = [1, 1]} : vector<8x512xf32> to vector<8x491xf32>
    %638 = tpu.concatenate %637, %636 in 1 : vector<8x491xf32>, vector<8x21xf32> -> vector<8x512xf32>
    %639 = arith.mulf %64, %638 : vector<8x512xf32>
    %cst_142 = arith.constant 0.000000e+00 : f32
    %640 = vector.broadcast %cst_142 : f32 to vector<8x21xf32>
    %641 = vector.extract_strided_slice %68 {offsets = [0, 21], sizes = [8, 491], strides = [1, 1]} : vector<8x512xf32> to vector<8x491xf32>
    %642 = tpu.concatenate %641, %640 in 1 : vector<8x491xf32>, vector<8x21xf32> -> vector<8x512xf32>
    %643 = arith.mulf %68, %642 : vector<8x512xf32>
    %644 = arith.addf %639, %643 : vector<8x512xf32>
    %cst_143 = arith.constant 0.000000e+00 : f32
    %645 = vector.broadcast %cst_143 : f32 to vector<8x21xf32>
    %646 = vector.extract_strided_slice %72 {offsets = [0, 21], sizes = [8, 491], strides = [1, 1]} : vector<8x512xf32> to vector<8x491xf32>
    %647 = tpu.concatenate %646, %645 in 1 : vector<8x491xf32>, vector<8x21xf32> -> vector<8x512xf32>
    %648 = arith.mulf %72, %647 : vector<8x512xf32>
    %649 = arith.addf %644, %648 : vector<8x512xf32>
    %cst_144 = arith.constant 0.000000e+00 : f32
    %650 = vector.broadcast %cst_144 : f32 to vector<8x21xf32>
    %651 = vector.extract_strided_slice %76 {offsets = [0, 21], sizes = [8, 491], strides = [1, 1]} : vector<8x512xf32> to vector<8x491xf32>
    %652 = tpu.concatenate %651, %650 in 1 : vector<8x491xf32>, vector<8x21xf32> -> vector<8x512xf32>
    %653 = arith.mulf %76, %652 : vector<8x512xf32>
    %654 = arith.addf %649, %653 : vector<8x512xf32>
    %cst_145 = arith.constant 0.000000e+00 : f32
    %655 = vector.broadcast %cst_145 : f32 to vector<8x21xf32>
    %656 = vector.extract_strided_slice %80 {offsets = [0, 21], sizes = [8, 491], strides = [1, 1]} : vector<8x512xf32> to vector<8x491xf32>
    %657 = tpu.concatenate %656, %655 in 1 : vector<8x491xf32>, vector<8x21xf32> -> vector<8x512xf32>
    %658 = arith.mulf %80, %657 : vector<8x512xf32>
    %659 = arith.addf %654, %658 : vector<8x512xf32>
    %cst_146 = arith.constant 0.000000e+00 : f32
    %660 = vector.broadcast %cst_146 : f32 to vector<8x21xf32>
    %661 = vector.extract_strided_slice %84 {offsets = [0, 21], sizes = [8, 491], strides = [1, 1]} : vector<8x512xf32> to vector<8x491xf32>
    %662 = tpu.concatenate %661, %660 in 1 : vector<8x491xf32>, vector<8x21xf32> -> vector<8x512xf32>
    %663 = arith.mulf %84, %662 : vector<8x512xf32>
    %664 = arith.addf %659, %663 : vector<8x512xf32>
    %cst_147 = arith.constant 0.000000e+00 : f32
    %665 = vector.broadcast %cst_147 : f32 to vector<8x21xf32>
    %666 = vector.extract_strided_slice %88 {offsets = [0, 21], sizes = [8, 491], strides = [1, 1]} : vector<8x512xf32> to vector<8x491xf32>
    %667 = tpu.concatenate %666, %665 in 1 : vector<8x491xf32>, vector<8x21xf32> -> vector<8x512xf32>
    %668 = arith.mulf %88, %667 : vector<8x512xf32>
    %669 = arith.addf %664, %668 : vector<8x512xf32>
    %cst_148 = arith.constant 0.000000e+00 : f32
    %670 = vector.broadcast %cst_148 : f32 to vector<8x21xf32>
    %671 = vector.extract_strided_slice %92 {offsets = [0, 21], sizes = [8, 491], strides = [1, 1]} : vector<8x512xf32> to vector<8x491xf32>
    %672 = tpu.concatenate %671, %670 in 1 : vector<8x491xf32>, vector<8x21xf32> -> vector<8x512xf32>
    %673 = arith.mulf %92, %672 : vector<8x512xf32>
    %674 = arith.addf %669, %673 : vector<8x512xf32>
    %cst_149 = arith.constant 0.000000e+00 : f32
    %675 = vector.broadcast %cst_149 : f32 to vector<8x21xf32>
    %676 = vector.extract_strided_slice %96 {offsets = [0, 21], sizes = [8, 491], strides = [1, 1]} : vector<8x512xf32> to vector<8x491xf32>
    %677 = tpu.concatenate %676, %675 in 1 : vector<8x491xf32>, vector<8x21xf32> -> vector<8x512xf32>
    %678 = arith.mulf %96, %677 : vector<8x512xf32>
    %679 = arith.addf %674, %678 : vector<8x512xf32>
    %680 = vector.extract_strided_slice %679 {offsets = [0, 0], sizes = [4, 512], strides = [1, 1]} : vector<8x512xf32> to vector<4x512xf32>
    %cst_150 = arith.constant dense<0.000000e+00> : vector<512xf32>
    %681 = vector.multi_reduction <add>, %680, %cst_150 [0] : vector<4x512xf32> to vector<512xf32>
    %682 = vector.shape_cast %681 : vector<512xf32> to vector<1x512xf32>
    %cst_151 = arith.constant 0.000000e+00 : f32
    %683 = vector.broadcast %cst_151 : f32 to vector<1x21xf32>
    %684 = vector.extract_strided_slice %116 {offsets = [0, 21], sizes = [1, 491], strides = [1, 1]} : vector<1x512xf32> to vector<1x491xf32>
    %685 = tpu.concatenate %684, %683 in 1 : vector<1x491xf32>, vector<1x21xf32> -> vector<1x512xf32>
    %686 = arith.mulf %116, %685 : vector<1x512xf32>
    %cst_152 = arith.constant 1.000000e-16 : f32
    %687 = vector.broadcast %cst_152 : f32 to vector<1x512xf32>
    %688 = arith.maximumf %686, %687 : vector<1x512xf32>
    %689 = math.rsqrt %688 : vector<1x512xf32>
    %690 = arith.mulf %682, %689 : vector<1x512xf32>
    %691 = arith.mulf %690, %635 : vector<1x512xf32>
    %692 = arith.addf %619, %691 : vector<1x512xf32>
    %693 = vector.extract_strided_slice %679 {offsets = [4, 0], sizes = [4, 512], strides = [1, 1]} : vector<8x512xf32> to vector<4x512xf32>
    %cst_153 = arith.constant dense<0.000000e+00> : vector<512xf32>
    %694 = vector.multi_reduction <add>, %693, %cst_153 [0] : vector<4x512xf32> to vector<512xf32>
    %695 = vector.shape_cast %694 : vector<512xf32> to vector<1x512xf32>
    %cst_154 = arith.constant 0.000000e+00 : f32
    %696 = vector.broadcast %cst_154 : f32 to vector<1x21xf32>
    %697 = vector.extract_strided_slice %119 {offsets = [0, 21], sizes = [1, 491], strides = [1, 1]} : vector<1x512xf32> to vector<1x491xf32>
    %698 = tpu.concatenate %697, %696 in 1 : vector<1x491xf32>, vector<1x21xf32> -> vector<1x512xf32>
    %699 = arith.mulf %119, %698 : vector<1x512xf32>
    %cst_155 = arith.constant 1.000000e-16 : f32
    %700 = vector.broadcast %cst_155 : f32 to vector<1x512xf32>
    %701 = arith.maximumf %699, %700 : vector<1x512xf32>
    %702 = math.rsqrt %701 : vector<1x512xf32>
    %703 = arith.mulf %695, %702 : vector<1x512xf32>
    %704 = arith.mulf %703, %635 : vector<1x512xf32>
    %705 = arith.addf %632, %704 : vector<1x512xf32>
    %706 = arith.mulf %692, %2 : vector<1x512xf32>
    %cst_156 = arith.constant 5.000000e-01 : f32
    %707 = vector.broadcast %cst_156 : f32 to vector<1x512xf32>
    %708 = arith.mulf %707, %706 : vector<1x512xf32>
    %cst_157 = arith.constant 5.000000e-01 : f32
    %709 = vector.broadcast %cst_157 : f32 to vector<1x512xf32>
    %710 = arith.subf %709, %708 : vector<1x512xf32>
    %c0_158 = arith.constant 0 : index
    %c0_159 = arith.constant 0 : index
    %711 = vector.load %arg4[%c0_158, %c0_159] : memref<2x512xf32, #tpu.memory_space<vmem>>, vector<1x512xf32>
    tpu.vector_store %arg4[%c0_158, %c0_159], %710 {strides = array<i32>} : memref<2x512xf32, #tpu.memory_space<vmem>>, vector<1x512xf32>,
    %712 = arith.mulf %705, %2 : vector<1x512xf32>
    %cst_160 = arith.constant 5.000000e-01 : f32
    %713 = vector.broadcast %cst_160 : f32 to vector<1x512xf32>
    %714 = arith.mulf %713, %712 : vector<1x512xf32>
    %cst_161 = arith.constant 5.000000e-01 : f32
    %715 = vector.broadcast %cst_161 : f32 to vector<1x512xf32>
    %716 = arith.subf %715, %714 : vector<1x512xf32>
    %c1 = arith.constant 1 : index
    %c0_162 = arith.constant 0 : index
    %717 = vector.load %arg4[%c1, %c0_162] : memref<2x512xf32, #tpu.memory_space<vmem>>, vector<1x512xf32>
    tpu.vector_store %arg4[%c1, %c0_162], %716 {strides = array<i32>} : memref<2x512xf32, #tpu.memory_space<vmem>>, vector<1x512xf32>,
    return
  }
  func.func @transform_0(%arg0: i32) -> (i32, i32) {
    %c0_i32 = arith.constant 0 : i32
    %c0_i32_0 = arith.constant 0 : i32
    return %arg0, %c0_i32 : i32, i32
  }
  func.func @transform_1(%arg0: i32) -> (i32, i32) {
    %c0_i32 = arith.constant 0 : i32
    %c0_i32_0 = arith.constant 0 : i32
    %c0_i32_1 = arith.constant 0 : i32
    return %c0_i32, %c0_i32_0 : i32, i32
  }
  func.func @transform_2(%arg0: i32) -> (i32, i32) {
    %c0_i32 = arith.constant 0 : i32
    %c0_i32_0 = arith.constant 0 : i32
    %c0_i32_1 = arith.constant 0 : i32
    return %c0_i32, %c0_i32_0 : i32, i32
  }
  func.func @transform_3(%arg0: i32) -> (i32, i32) {
    %c0_i32 = arith.constant 0 : i32
    %c0_i32_0 = arith.constant 0 : i32
    return %arg0, %c0_i32 : i32, i32
  }
}

</mosaic_0001>

<bundles_post_ra>
// kernel: error_neurons_saliency.1
= control target key start
LH: loop header
LB: loop body
LE: loop exit
PB: predicated region body
PF: predicated region fallthrough
CT: control target
= control target key end

     0   :  { %s3858_s16 = smov 21   ;;  %s3859_s21 = smov 20   ;;  %v8034_v4 = vlaneseq  ;;  %vm49_vm0 = vcmask 162816   ;;  %vm32_vm1 = vcmask 171008   ;;  %vm66_vm2 = vcmask 154624   ;;  %s8030_s0 = inlined_call_operand.vmem [shape: f32[8,512], index: 0, kind: input, shape index: {}]   ;;  %s8031_s1 = inlined_call_operand.vmem [shape: f32[1,512], index: 1, kind: input, shape index: {}]   ;;  %s8032_s2 = inlined_call_operand.vmem [shape: f32[1,512], index: 2, kind: input, shape index: {}]   ;;  %s8033_s3 = inlined_call_operand.vmem [shape: f32[2,512], index: 3, kind: output, shape index: {}]  }
   0x1   :  { %v3890_v0 = vld [vmem:[%s8030_s0 + $0x10] sm:$0xff]  ;;  %v3895_v1 = vld [vmem:[%s8030_s0] sm:$0xff]  ;;  %v3904_v2 = vld [vmem:[%s8030_s0 + $0x18] sm:$0xff]  ;;  %s3861_s22 = smov 1   ;;  %s3862_s23 = smov 127   ;;  %vm83_vm3 = vcmask 7168  }
   0x2   :  { %28 = vrot.lane.b32.xlu1 %v3890_v0, %s3858_s16  ;;  %24 = vrot.lane.b32.xlu0 %v3895_v1, %s3858_s16  ;;  %v3909_v3 = vld [vmem:[%s8030_s0 + $0x8] sm:$0xff]  ;;  %s3860_s0 = smov 19   ;;  %s3863_s24 = smov 109   ;;  %v3972_v5 = vshrl.u32 %v8034_v4, 7  ;;  %v18_v7 = vld [vmem:[%s8031_s1] sm:$0xf]  ;;  %v4029_v37 = vmul.f32 %v3895_v1, %v3895_v1  ;;  %v4046_v43 = vmul.f32 %v3904_v2, %v3904_v2 }
   0x3   :  { %s3864_s25 = smov 108   ;;  %s3865_s26 = smov 107   ;;  %vm100_vm4 = vcmask 1039360   ;;  %v4050_v44 = vmul.f32 %v3909_v3, %v3909_v3  ;;  %vm117_vm5 = vcmask 891904   ;;  %vm134_vm6 = vcmask 883712  }
   0x4   :  { %8473 = vst [vmem:[#allocation2_spill] sm:$0xff] %v3972_v5  ;;  %v8038_v6 = vsub.s32 0, %v3972_v5  ;;  %v8037_v9 = vsub.s32 1, %v3972_v5  ;;  %v8036_v10 = vsub.s32 2, %v3972_v5  ;;  %v8035_v13 = vsub.s32 3, %v3972_v5 }
   0x5   :  { %vm151_vm7 = vcmask 875520   ;;  %vm460_vm8 = vcmask 1043456  }
   0x6   :  { %30 = vrot.lane.b32.xlu1 %v3904_v2, %s3858_s16  ;;  %26 = vrot.lane.b32.xlu0 %v3909_v3, %s3858_s16  ;;  %v3980_v8 = vrot.slane %v18_v7, %v8038_v6  ;;  %v3988_v11 = vrot.slane %v18_v7, %v8037_v9  ;;  %v3992_v12 = vrot.slane %v18_v7, %v8036_v10 }
   0x7   :  { %v4001_v14 = vrot.slane %v18_v7, %v8035_v13 }
   0x8   :  { %8474 = vst [vmem:[#allocation3_spill] sm:$0xff] %v3980_v8  ;;  %8475 = vst [vmem:[#allocation4_spill] sm:$0xff] %v3988_v11 }
   0x9   :  { %8476 = vst [vmem:[#allocation5_spill] sm:$0xff] %v3992_v12  ;;  %8477 = vst [vmem:[#allocation6_spill] sm:$0xff] %v4001_v14 }
   0xa   :  { %43 = vrot.lane.b32.xlu1 %v3909_v3, %s3859_s21  ;;  %41 = vrot.lane.b32.xlu0 %v3895_v1, %s3859_s21 }
   0xe   :  { %47 = vrot.lane.b32.xlu1 %v3904_v2, %s3859_s21  ;;  %45 = vrot.lane.b32.xlu0 %v3890_v0, %s3859_s21 }
  0x12   :  { %60 = vrot.lane.b32.xlu1 %v3909_v3, %s3860_s0  ;;  %58 = vrot.lane.b32.xlu0 %v3895_v1, %s3860_s0 }
  0x16   :  { %64 = vrot.lane.b32.xlu1 %v3904_v2, %s3860_s0  ;;  %62 = vrot.lane.b32.xlu0 %v3890_v0, %s3860_s0 }
  0x1a   :  { %77 = vrot.lane.b32.xlu1 %v3909_v3, %s3861_s22  ;;  %75 = vrot.lane.b32.xlu0 %v3895_v1, %s3861_s22 }
  0x1e   :  { %81 = vrot.lane.b32.xlu1 %v3904_v2, %s3861_s22  ;;  %79 = vrot.lane.b32.xlu0 %v3890_v0, %s3861_s22 }
  0x22   :  { %94 = vrot.lane.b32.xlu1 %v3909_v3, %s3862_s23  ;;  %92 = vrot.lane.b32.xlu0 %v3895_v1, %s3862_s23 }
  0x26   :  { %98 = vrot.lane.b32.xlu1 %v3904_v2, %s3862_s23  ;;  %96 = vrot.lane.b32.xlu0 %v3890_v0, %s3862_s23 }
  0x2a   :  { %111 = vrot.lane.b32.xlu1 %v3909_v3, %s3863_s24  ;;  %109 = vrot.lane.b32.xlu0 %v3895_v1, %s3863_s24 }
  0x2e   :  { %115 = vrot.lane.b32.xlu1 %v3904_v2, %s3863_s24  ;;  %113 = vrot.lane.b32.xlu0 %v3890_v0, %s3863_s24 }
  0x32   :  { %128 = vrot.lane.b32.xlu1 %v3909_v3, %s3864_s25  ;;  %126 = vrot.lane.b32.xlu0 %v3895_v1, %s3864_s25 }
  0x36   :  { %132 = vrot.lane.b32.xlu1 %v3904_v2, %s3864_s25  ;;  %130 = vrot.lane.b32.xlu0 %v3890_v0, %s3864_s25 }
  0x3a   :  { %145 = vrot.lane.b32.xlu1 %v3909_v3, %s3865_s26  ;;  %143 = vrot.lane.b32.xlu0 %v3895_v1, %s3865_s26 }
  0x3e   :  { %149 = vrot.lane.b32.xlu1 %v3904_v2, %s3865_s26  ;;  %147 = vrot.lane.b32.xlu0 %v3890_v0, %s3865_s26 }
  0x42   :  { %546 = vrot.lane.b32.xlu0 %v3980_v8, %s3858_s16  ;;  %548 = vrot.lane.b32.xlu1 %v3988_v11, %s3858_s16 }
  0x46   :  { %550 = vrot.lane.b32.xlu0 %v3992_v12, %s3858_s16  ;;  %552 = vrot.lane.b32.xlu1 %v4001_v14, %s3858_s16 }
  0x4a   :  { %966 = vrot.lane.b32.xlu0 %v3980_v8, %s3859_s21  ;;  %968 = vrot.lane.b32.xlu1 %v3988_v11, %s3859_s21 }
  0x4e   :  { %970 = vrot.lane.b32.xlu0 %v3992_v12, %s3859_s21  ;;  %972 = vrot.lane.b32.xlu1 %v4001_v14, %s3859_s21 }
  0x74   :  { %v29_v15 = vpop.permute.xlu1 %28  ;;  %v25_v16 = vpop.permute.xlu0 %24 }
  0x75   :  { %v4017_v32 = vsel %vm32_vm1, 0.0, %v25_v16 }
  0x76   :  { %v160_v42 = vmul.f32 %v4017_v32, %v4017_v32 }
  0x78   :  { %v31_v17 = vpop.permute.xlu1 %30  ;;  %v27_v18 = vpop.permute.xlu0 %26 }
  0x79   :  { %v4020_v33 = vsel %vm32_vm1, %v29_v15, %v31_v17  ;;  %v4032_v38 = vsel %vm32_vm1, %v25_v16, %v27_v18  ;;  %v4035_v39 = vsel %vm32_vm1, %v27_v18, %v29_v15 }
  0x7a   :  { %v163_v45 = vmul.f32 %v4020_v33, %v4020_v33  ;;  %v161_v49 = vmul.f32 %v4032_v38, %v4032_v38  ;;  %v162_v50 = vmul.f32 %v4035_v39, %v4035_v39 }
  0x7c   :  { %v44_v19 = vpop.permute.xlu1 %43  ;;  %v42_v20 = vpop.permute.xlu0 %41 }
  0x7d   :  { %v4014_v31 = vsel %vm49_vm0, 0.0, %v42_v20  ;;  %v4023_v34 = vsel %vm49_vm0, %v42_v20, %v44_v19 }
  0x7e   :  { %v168_v40 = vmul.f32 %v4014_v31, %v4014_v31  ;;  %v169_v46 = vmul.f32 %v4023_v34, %v4023_v34  ;;  %v164_v55 = vadd.f32 %v4014_v31, %v4017_v32  ;;  %v165_v56 = vadd.f32 %v4023_v34, %v4032_v38 }
  0x80   :  { %v48_v21 = vpop.permute.xlu1 %47  ;;  %v46_v22 = vpop.permute.xlu0 %45  ;;  %v172_v57 = vadd.f32 %v168_v40, %v160_v42  ;;  %v173_v63 = vadd.f32 %v169_v46, %v161_v49 }
  0x81   :  { %v4040_v41 = vsel %vm49_vm0, %v44_v19, %v46_v22  ;;  %v4057_v47 = vsel %vm49_vm0, %v46_v22, %v48_v21 }
  0x82   :  { %v170_v51 = vmul.f32 %v4040_v41, %v4040_v41  ;;  %v171_v59 = vmul.f32 %v4057_v47, %v4057_v47  ;;  %v166_v7 = vadd.f32 %v4040_v41, %v4035_v39  ;;  %v167_v17 = vadd.f32 %v4057_v47, %v4020_v33 }
  0x84   :  { %v61_v23 = vpop.permute.xlu1 %60  ;;  %v59_v24 = vpop.permute.xlu0 %58  ;;  %v174_v18 = vadd.f32 %v170_v51, %v162_v50 }
  0x85   :  { %v4060_v48 = vsel %vm66_vm2, 0.0, %v59_v24  ;;  %v4069_v52 = vsel %vm66_vm2, %v59_v24, %v61_v23 }
  0x86   :  { %v180_v60 = vmul.f32 %v4060_v48, %v4060_v48  ;;  %v181_v15 = vmul.f32 %v4069_v52, %v4069_v52  ;;  %v176_v24 = vadd.f32 %v164_v55, %v4060_v48  ;;  %v177_v40 = vadd.f32 %v165_v56, %v4069_v52 }
  0x88   :  { %v65_v25 = vpop.permute.xlu1 %64  ;;  %v63_v26 = vpop.permute.xlu0 %62  ;;  %v184_v42 = vadd.f32 %v180_v60, %v172_v57  ;;  %v185_v46 = vadd.f32 %v181_v15, %v173_v63 }
  0x89   :  { %v4080_v58 = vsel %vm66_vm2, %v63_v26, %v65_v25  ;;  %v4097_v16 = vsel %vm66_vm2, %v61_v23, %v63_v26 }
  0x8a   :  { %v183_v19 = vmul.f32 %v4080_v58, %v4080_v58  ;;  %v179_v49 = vadd.f32 %v167_v17, %v4080_v58  ;;  %v178_v55 = vadd.f32 %v166_v7, %v4097_v16  ;;  %v206_v7 = vmul.f32 %v3890_v0, %v3890_v0 }
  0x8c   :  { %v78_v27 = vpop.permute.xlu1 %77  ;;  %v76_v28 = vpop.permute.xlu0 %75 }
  0x8d   :  { %v4087_v61 = vsel %vm83_vm3, %v76_v28, %v78_v27  ;;  %v4090_v62 = vsel %vm83_vm3, 0.0, %v76_v28  ;;  %v175_v28 = vadd.f32 %v171_v59, %v163_v45 }
  0x8e   :  { %v192_v25 = vmul.f32 %v4090_v62, %v4090_v62  ;;  %v193_v23 = vmul.f32 %v4087_v61, %v4087_v61  ;;  %v188_v50 = vadd.f32 %v176_v24, %v4090_v62 }
  0x8f   :  { %v187_v4 = vadd.f32 %v183_v19, %v175_v28 }
  0x90   :  { %v82_v29 = vpop.permute.xlu1 %81  ;;  %v80_v30 = vpop.permute.xlu0 %79  ;;  %v196_v57 = vadd.f32 %v192_v25, %v184_v42  ;;  %v197_v59 = vadd.f32 %v193_v23, %v185_v46  ;;  %v200_v24 = vadd.f32 %v188_v50, %v3895_v1 }
  0x91   :  { %v4104_v20 = vsel %vm83_vm3, %v80_v30, %v82_v29  ;;  %v4112_v26 = vsel %vm83_vm3, %v78_v27, %v80_v30  ;;  %v182_v29 = vmul.f32 %v4097_v16, %v4097_v16  ;;  %v189_v27 = vadd.f32 %v177_v40, %v4087_v61 }
  0x92   :  { %v195_v51 = vmul.f32 %v4104_v20, %v4104_v20  ;;  %v194_v30 = vmul.f32 %v4112_v26, %v4112_v26  ;;  %v191_v60 = vadd.f32 %v179_v49, %v4104_v20  ;;  %v190_v17 = vadd.f32 %v178_v55, %v4112_v26 }
  0x93   :  { %v186_v15 = vadd.f32 %v182_v29, %v174_v18  ;;  %v208_v42 = vadd.f32 %v4029_v37, %v196_v57  ;;  %v201_v46 = vadd.f32 %v189_v27, %v3909_v3  ;;  %v209_v49 = vadd.f32 %v4050_v44, %v197_v59 }
  0x94   :  { %v4025_v35 = vpop.permute.xlu1 %94  ;;  %v93_v36 = vpop.permute.xlu0 %92  ;;  %v199_v19 = vadd.f32 %v195_v51, %v187_v4  ;;  %v203_v29 = vadd.f32 %v191_v60, %v3904_v2 }
  0x95   :  { %v4128_v63 = vsel %vm100_vm4, %v93_v36, %v4025_v35  ;;  %v198_v23 = vadd.f32 %v194_v30, %v186_v15 }
  0x96   :  { %v216_v36 = vmul.f32 %v4128_v63, %v4128_v63  ;;  %v212_v50 = vadd.f32 %v200_v24, %v4128_v63  ;;  %v211_v37 = vadd.f32 %v4046_v43, %v199_v19 }
  0x97   :  { %v210_v57 = vadd.f32 %v206_v7, %v198_v23 }
  0x98   :  { %v4071_v53 = vpop.permute.xlu1 %98  ;;  %v4073_v54 = vpop.permute.xlu0 %96  ;;  %v220_v30 = vadd.f32 %v216_v36, %v208_v42 }
  0x99   :  { %v4136_v25 = vsel %vm100_vm4, %v4071_v53, 0.0  ;;  %v4143_v18 = vsel %vm100_vm4, %v4025_v35, %v4073_v54  ;;  %v202_v35 = vadd.f32 %v190_v17, %v3890_v0 }
  0x9a   :  { %v219_v51 = vmul.f32 %v4136_v25, %v4136_v25  ;;  %v217_v55 = vmul.f32 %v4143_v18, %v4143_v18  ;;  %v215_v43 = vadd.f32 %v203_v29, %v4136_v25  ;;  %v213_v15 = vadd.f32 %v201_v46, %v4143_v18 }
  0x9c   :  { %v112_v21 = vpop.permute.xlu1 %111  ;;  %v110_v22 = vpop.permute.xlu0 %109  ;;  %v223_v24 = vadd.f32 %v219_v51, %v211_v37  ;;  %v221_v36 = vadd.f32 %v217_v55, %v209_v49 }
  0x9d   :  { %v4146_v28 = vsel %vm117_vm5, %v110_v22, %v112_v21  ;;  %v4159_v22 = vsel %vm100_vm4, %v4073_v54, %v4071_v53 }
  0x9e   :  { %v228_v44 = vmul.f32 %v4146_v28, %v4146_v28  ;;  %v218_v17 = vmul.f32 %v4159_v22, %v4159_v22  ;;  %v214_v7 = vadd.f32 %v202_v35, %v4159_v22  ;;  %v224_v23 = vadd.f32 %v212_v50, %v4146_v28 }
  0xa0   :  { %v116_v45 = vpop.permute.xlu1 %115  ;;  %v114_v56 = vpop.permute.xlu0 %113  ;;  %v222_v35 = vadd.f32 %v218_v17, %v210_v57 }
  0xa1   :  { %v4170_v59 = vsel %vm117_vm5, %v116_v45, 0.0  ;;  %v4173_v60 = vsel %vm117_vm5, %v112_v21, %v114_v56  ;;  %v4180_v19 = vsel %vm117_vm5, %v114_v56, %v116_v45 }
  0xa2   :  { %v231_v42 = vmul.f32 %v4170_v59, %v4170_v59  ;;  %v229_v29 = vmul.f32 %v4173_v60, %v4173_v60  ;;  %v230_v45 = vmul.f32 %v4180_v19, %v4180_v19  ;;  %v227_v37 = vadd.f32 %v215_v43, %v4170_v59 }
  0xa3   :  { %v225_v55 = vadd.f32 %v213_v15, %v4173_v60  ;;  %v226_v9 = vadd.f32 %v214_v7, %v4180_v19 }
  0xa4   :  { %v129_v4 = vpop.permute.xlu1 %128  ;;  %v127_v40 = vpop.permute.xlu0 %126  ;;  %v235_v10 = vadd.f32 %v231_v42, %v223_v24  ;;  %v233_v15 = vadd.f32 %v229_v29, %v221_v36  ;;  %v234_v17 = vadd.f32 %v230_v45, %v222_v35 }
  0xa5   :  { %v4167_v27 = vsel %vm134_vm6, %v127_v40, %v129_v4  ;;  %v232_v40 = vadd.f32 %v228_v44, %v220_v30 }
  0xa6   :  { %v240_v21 = vmul.f32 %v4167_v27, %v4167_v27  ;;  %v236_v56 = vadd.f32 %v224_v23, %v4167_v27 }
  0xa8   :  { %v133_v53 = vpop.permute.xlu1 %132  ;;  %v131_v54 = vpop.permute.xlu0 %130  ;;  %v244_v30 = vadd.f32 %v240_v21, %v232_v40 }
  0xa9   :  { %v4194_v46 = vsel %vm134_vm6, %v133_v53, 0.0  ;;  %v4197_v50 = vsel %vm134_vm6, %v129_v4, %v131_v54  ;;  %v4205_v13 = vsel %vm134_vm6, %v131_v54, %v133_v53 }
  0xaa   :  { %v243_v57 = vmul.f32 %v4194_v46, %v4194_v46  ;;  %v241_v43 = vmul.f32 %v4197_v50, %v4197_v50  ;;  %v242_v24 = vmul.f32 %v4205_v13, %v4205_v13 }
  0xac   :  { %v146_v51 = vpop.permute.xlu1 %145  ;;  %v144_v49 = vpop.permute.xlu0 %143  ;;  %v247_v35 = vadd.f32 %v243_v57, %v235_v10 }
  0xad   :  { %v4202_v44 = vsel %vm151_vm7, %v144_v49, %v146_v51  ;;  %v237_v49 = vadd.f32 %v225_v55, %v4197_v50  ;;  %v245_v55 = vadd.f32 %v241_v43, %v233_v15  ;;  %v246_v43 = vadd.f32 %v242_v24, %v234_v17 }
  0xae   :  { %v248_v23 = vadd.f32 %v236_v56, %v4202_v44  ;;  %v252_v4 = vmul.f32 %v4202_v44, %v4202_v44  ;;  %v239_v56 = vadd.f32 %v227_v37, %v4194_v46  ;;  %v238_v37 = vadd.f32 %v226_v9, %v4205_v13 }
  0xb0   :  { %v256_v21 = vadd.f32 %v252_v4, %v244_v30  ;;  %v4215_v40 = vmul.f32 0.11111111, %v248_v23  ;;  %v150_v53 = vpop.permute.xlu1 %149  ;;  %v148_v54 = vpop.permute.xlu0 %147 }
  0xb1   :  { %v4222_v7 = vsel %vm151_vm7, %v150_v53, 0.0  ;;  %v4227_v29 = vsel %vm151_vm7, %v146_v51, %v148_v54  ;;  %v4230_v45 = vsel %vm151_vm7, %v148_v54, %v150_v53 }
  0xb2   :  { %v264_v42 = vmul.f32 0.11111111, %v256_v21  ;;  %v268_v36 = vmul.f32 %v4215_v40, %v4215_v40  ;;  %v344_v30 = vsub.f32 %v4128_v63, %v4215_v40  ;;  %v356_v4 = vsub.f32 %v4146_v28, %v4215_v40 }
  0xb3   :  { %v368_v21 = vsub.f32 %v4167_v27, %v4215_v40  ;;  %v380_v51 = vsub.f32 %v4202_v44, %v4215_v40  ;;  %v251_v53 = vadd.f32 %v239_v56, %v4222_v7  ;;  %v255_v10 = vmul.f32 %v4222_v7, %v4222_v7 }
  0xb4   :  { %v272_v23 = vsub.f32 %v264_v42, %v268_v36  ;;  %v249_v9 = vadd.f32 %v237_v49, %v4227_v29  ;;  %v250_v57 = vadd.f32 %v238_v37, %v4230_v45  ;;  %v253_v28 = vmul.f32 %v4227_v29, %v4227_v29 }
  0xb5   :  { %v254_v27 = vmul.f32 %v4230_v45, %v4230_v45  ;;  %v259_v54 = vadd.f32 %v255_v10, %v247_v35  ;;  %v4250_v42 = vmul.f32 0.11111111, %v251_v53 }
  0xb6   :  { %v276_v15 = vadd.f32 1e-05, %v272_v23  ;;  %v4252_v44 = vmul.f32 0.11111111, %v249_v9  ;;  %v257_v56 = vadd.f32 %v253_v28, %v245_v55  ;;  %v4254_v6 = vmul.f32 0.11111111, %v250_v57 }
  0xb7   :  { %v258_v36 = vadd.f32 %v254_v27, %v246_v43  ;;  %v267_v49 = vmul.f32 0.11111111, %v259_v54  ;;  %v271_v17 = vmul.f32 %v4250_v42, %v4250_v42  ;;  %v359_v37 = vsub.f32 %v4170_v59, %v4250_v42 }
  0xb8   :  { %3722 = vrsqrt.f32 %v276_v15  ;;  %v371_v35 = vsub.f32 %v4194_v46, %v4250_v42  ;;  %v383_v23 = vsub.f32 %v4222_v7, %v4250_v42  ;;  %v265_v53 = vmul.f32 0.11111111, %v257_v56 }
  0xb9   :  { %v275_v24 = vsub.f32 %v267_v49, %v271_v17  ;;  %v266_v10 = vmul.f32 0.11111111, %v258_v36  ;;  %v269_v55 = vmul.f32 %v4252_v44, %v4252_v44  ;;  %v270_v9 = vmul.f32 %v4254_v6, %v4254_v6 }
  0xba   :  { %v357_v46 = vsub.f32 %v4173_v60, %v4252_v44  ;;  %v358_v7 = vsub.f32 %v4180_v19, %v4254_v6  ;;  %v369_v54 = vsub.f32 %v4197_v50, %v4252_v44  ;;  %v370_v56 = vsub.f32 %v4205_v13, %v4254_v6 }
  0xbb   :  { %v279_v57 = vadd.f32 1e-05, %v275_v24  ;;  %v273_v43 = vsub.f32 %v265_v53, %v269_v55  ;;  %v274_v15 = vsub.f32 %v266_v10, %v270_v9  ;;  %v381_v36 = vsub.f32 %v4227_v29, %v4252_v44 }
  0xbc   :  { %v382_v49 = vsub.f32 %v4230_v45, %v4254_v6  ;;  %v284_v17 = vsub.f32 %v4017_v32, %v4215_v40 }
  0xbd   :  { %3724 = vrsqrt.f32 %v279_v57  ;;  %v277_v28 = vadd.f32 1e-05, %v273_v43  ;;  %v278_v27 = vadd.f32 1e-05, %v274_v15  ;;  %v287_v57 = vsub.f32 %v4020_v33, %v4250_v42 }
  0xbe   :  { %v298_v33 = vsub.f32 %v4040_v41, %v4254_v6 }
  0xbf   :  { %3726 = vrsqrt.f32 %v277_v28 }
  0xc0   :  { %3728 = vrsqrt.f32 %v278_v27 }
  0xc5   :  { %v4282_v24 = vpop.eup %3722 }
  0xc6   :  { %v288_v53 = vmul.f32 %v4282_v24, %v284_v17  ;;  %v4286_v10 = vmul.f32 %v4282_v24, %v356_v4  ;;  %v4289_v50 = vmul.f32 %v4282_v24, %v368_v21  ;;  %v4294_v29 = vmul.f32 %v4282_v24, %v380_v51 }
  0xc7   :  { %v285_v4 = vsub.f32 %v4032_v38, %v4252_v44  ;;  %v286_v21 = vsub.f32 %v4035_v39, %v4254_v6  ;;  %v296_v51 = vsub.f32 %v4014_v31, %v4215_v40  ;;  %v297_v31 = vsub.f32 %v4023_v34, %v4252_v44 }
  0xc8   :  { %v4291_v13 = vadd.f32 2.0, %v288_v53  ;;  %v308_v34 = vsub.f32 %v4060_v48, %v4215_v40 }
  0xc9   :  { %v300_v38 = vmul.f32 %v4282_v24, %v296_v51  ;;  %v299_v51 = vsub.f32 %v4057_v47, %v4250_v42  ;;  %v309_v47 = vsub.f32 %v4069_v52, %v4252_v44  ;;  %v320_v52 = vsub.f32 %v4090_v62, %v4215_v40 }
  0xca   :  { %8478 = vst [vmem:[#allocation7_spill] sm:$0xff] %v4291_v13  ;;  %566 = vrot.lane.b32.xlu0 %v4291_v13, %s3858_s16  ;;  %v4298_v45 = vpop.eup %3724  ;;  %v312_v48 = vmul.f32 %v4282_v24, %v308_v34  ;;  %v321_v62 = vsub.f32 %v4087_v61, %v4252_v44  ;;  %v332_v61 = vsub.f32 %v3895_v1, %v4215_v40 }
  0xcb   :  { %v4301_v32 = vmul.f32 %v4298_v45, %v371_v35  ;;  %v4316_v43 = vmul.f32 %v4298_v45, %v383_v23  ;;  %v291_v28 = vmul.f32 %v4298_v45, %v287_v57  ;;  %v4334_v23 = vadd.f32 2.0, %v300_v38 }
  0xcc   :  { %v4303_v55 = vpop.eup %3726  ;;  %v333_v1 = vsub.f32 %v3909_v3, %v4252_v44  ;;  %v335_v3 = vsub.f32 %v3904_v2, %v4250_v42  ;;  %v345_v2 = vsub.f32 %v4143_v18, %v4252_v44  ;;  %v392_v63 = vmul.f32 %v4291_v13, %v4291_v13 }
  0xcd   :  { %v4309_v9 = vpop.eup %3728  ;;  %v289_v35 = vmul.f32 %v4303_v55, %v285_v4  ;;  %8481 = vst [vmem:[#allocation10_spill] sm:$0xff] %v4334_v23  ;;  %v4336_v17 = vadd.f32 2.0, %v291_v28  ;;  %v301_v53 = vmul.f32 %v4303_v55, %v297_v31  ;;  %v4351_v57 = vmul.f32 %v4303_v55, %v381_v36 }
  0xce   :  { %v290_v15 = vmul.f32 %v4309_v9, %v286_v21  ;;  %v302_v4 = vmul.f32 %v4309_v9, %v298_v33  ;;  %v4341_v21 = vmul.f32 %v4303_v55, %v369_v54  ;;  %v4346_v41 = vmul.f32 %v4309_v9, %v370_v56 }
  0xcf   :  { %v4322_v39 = vadd.f32 2.0, %v289_v35  ;;  %8482 = vst [vmem:[#allocation11_spill] sm:$0xff] %v4336_v17  ;;  %v4354_v35 = vmul.f32 %v4309_v9, %v382_v49  ;;  %v303_v54 = vmul.f32 %v4298_v45, %v299_v51  ;;  %v4362_v56 = vadd.f32 2.0, %v301_v53 }
  0xd0   :  { %v4324_v27 = vadd.f32 2.0, %v290_v15  ;;  %v4364_v15 = vadd.f32 2.0, %v302_v4  ;;  %v310_v36 = vsub.f32 %v4097_v16, %v4254_v6  ;;  %v4374_v49 = vadd.f32 2.0, %v312_v48 }
  0xd1   :  { %8479 = vst [vmem:[#allocation8_spill] sm:$0xff] %v4322_v39  ;;  %568 = vrot.lane.b32.xlu1 %v4322_v39, %s3858_s16  ;;  %8483 = vst [vmem:[#allocation12_spill] sm:$0xff] %v4362_v56  ;;  %v4376_v38 = vadd.f32 2.0, %v303_v54  ;;  %v313_v28 = vmul.f32 %v4303_v55, %v309_v47  ;;  %v311_v16 = vsub.f32 %v4080_v58, %v4250_v42 }
  0xd2   :  { %8480 = vst [vmem:[#allocation9_spill] sm:$0xff] %v4324_v27  ;;  %570 = vrot.lane.b32.xlu0 %v4324_v27, %s3858_s16  ;;  %8484 = vst [vmem:[#allocation13_spill] sm:$0xff] %v4364_v15  ;;  %v314_v31 = vmul.f32 %v4309_v9, %v310_v36  ;;  %v324_v33 = vmul.f32 %v4282_v24, %v320_v52  ;;  %v322_v58 = vsub.f32 %v4112_v26, %v4254_v6 }
  0xd3   :  { %8485 = vst [vmem:[#allocation14_spill] sm:$0xff] %v4374_v49  ;;  %8486 = vst [vmem:[#allocation15_spill] sm:$0xff] %v4376_v38  ;;  %v315_v53 = vmul.f32 %v4298_v45, %v311_v16  ;;  %v4390_v4 = vadd.f32 2.0, %v313_v28  ;;  %v325_v54 = vmul.f32 %v4303_v55, %v321_v62  ;;  %v323_v26 = vsub.f32 %v4104_v20, %v4250_v42 }
  0xd4   :  { %v4392_v34 = vadd.f32 2.0, %v314_v31  ;;  %v4402_v51 = vadd.f32 2.0, %v324_v33  ;;  %v326_v47 = vmul.f32 %v4309_v9, %v322_v58  ;;  %v336_v36 = vmul.f32 %v4282_v24, %v332_v61 }
  0xd5   :  { %572 = vrot.lane.b32.xlu1 %v4336_v17, %s3858_s16  ;;  %8487 = vst [vmem:[#allocation16_spill] sm:$0xff] %v4390_v4  ;;  %v4404_v48 = vadd.f32 2.0, %v315_v53  ;;  %v327_v28 = vmul.f32 %v4298_v45, %v323_v26  ;;  %v4418_v31 = vadd.f32 2.0, %v325_v54  ;;  %v334_v20 = vsub.f32 %v3890_v0, %v4254_v6 }
  0xd6   :  { %590 = vrot.lane.b32.xlu0 %v4334_v23, %s3858_s16  ;;  %8488 = vst [vmem:[#allocation17_spill] sm:$0xff] %v4392_v34  ;;  %8489 = vst [vmem:[#allocation18_spill] sm:$0xff] %v4402_v51  ;;  %v4420_v52 = vadd.f32 2.0, %v326_v47  ;;  %v4430_v16 = vadd.f32 2.0, %v336_v36  ;;  %v337_v53 = vmul.f32 %v4303_v55, %v333_v1  ;;  %v348_v0 = vmul.f32 %v4282_v24, %v344_v30 }
  0xd7   :  { %8490 = vst [vmem:[#allocation19_spill] sm:$0xff] %v4404_v48  ;;  %8491 = vst [vmem:[#allocation20_spill] sm:$0xff] %v4418_v31  ;;  %v4432_v33 = vadd.f32 2.0, %v327_v28  ;;  %v338_v62 = vmul.f32 %v4309_v9, %v334_v20  ;;  %v339_v58 = vmul.f32 %v4298_v45, %v335_v3  ;;  %v346_v61 = vsub.f32 %v4159_v22, %v4254_v6 }
  0xd8   :  { %8492 = vst [vmem:[#allocation21_spill] sm:$0xff] %v4420_v52  ;;  %8493 = vst [vmem:[#allocation22_spill] sm:$0xff] %v4430_v16  ;;  %v4447_v54 = vadd.f32 2.0, %v337_v53  ;;  %v396_v40 = vmul.f32 %v4334_v23, %v4334_v23  ;;  %v4463_v30 = vadd.f32 2.0, %v348_v0  ;;  %v349_v18 = vmul.f32 %v4303_v55, %v345_v2 }
  0xd9   :  { %592 = vrot.lane.b32.xlu1 %v4362_v56, %s3858_s16  ;;  %8494 = vst [vmem:[#allocation23_spill] sm:$0xff] %v4432_v33  ;;  %v4449_v47 = vadd.f32 2.0, %v338_v62  ;;  %v4465_v24 = vadd.f32 2.0, %v339_v58  ;;  %v350_v22 = vmul.f32 %v4309_v9, %v346_v61  ;;  %v347_v26 = vsub.f32 %v4136_v25, %v4250_v42 }
  0xda   :  { %594 = vrot.lane.b32.xlu0 %v4364_v15, %s3858_s16  ;;  %8495 = vst [vmem:[#allocation24_spill] sm:$0xff] %v4447_v54  ;;  %8497 = vst [vmem:[#allocation26_spill] sm:$0xff] %v4463_v30  ;;  %v400_v28 = vadd.f32 %v396_v40, %v392_v63  ;;  %v4476_v1 = vadd.f32 2.0, %v349_v18  ;;  %v393_v53 = vmul.f32 %v4322_v39, %v4322_v39  ;;  %v4495_v58 = vadd.f32 2.0, %v4286_v10 }
  0xdb   :  { %8496 = vst [vmem:[#allocation25_spill] sm:$0xff] %v4449_v47  ;;  %8498 = vst [vmem:[#allocation27_spill] sm:$0xff] %v4465_v24  ;;  %v351_v36 = vmul.f32 %v4298_v45, %v347_v26  ;;  %v4478_v20 = vadd.f32 2.0, %v350_v22  ;;  %v397_v62 = vmul.f32 %v4362_v56, %v4362_v56  ;;  %v394_v25 = vmul.f32 %v4324_v27, %v4324_v27 }
  0xdc   :  { %8499 = vst [vmem:[#allocation28_spill] sm:$0xff] %v4476_v1  ;;  %v398_v3 = vmul.f32 %v4364_v15, %v4364_v15  ;;  %v404_v0 = vmul.f32 %v4374_v49, %v4374_v49  ;;  %8501 = vst [vmem:[#allocation30_spill] sm:$0xff] %v4495_v58  ;;  %v361_v61 = vmul.f32 %v4303_v55, %v357_v46 }
  0xdd   :  { %596 = vrot.lane.b32.xlu1 %v4376_v38, %s3858_s16  ;;  %8500 = vst [vmem:[#allocation29_spill] sm:$0xff] %v4478_v20  ;;  %v4497_v2 = vadd.f32 2.0, %v351_v36  ;;  %v362_v63 = vmul.f32 %v4309_v9, %v358_v7  ;;  %v401_v18 = vadd.f32 %v397_v62, %v393_v53  ;;  %v395_v26 = vmul.f32 %v4336_v17, %v4336_v17 }
  0xde   :  { %618 = vrot.lane.b32.xlu0 %v4374_v49, %s3858_s16  ;;  %v408_v40 = vadd.f32 %v404_v0, %v400_v28  ;;  %v402_v22 = vadd.f32 %v398_v3, %v394_v25  ;;  %v399_v10 = vmul.f32 %v4376_v38, %v4376_v38  ;;  %v412_v6 = vmul.f32 %v4402_v51, %v4402_v51 }
  0xdf   :  { %8502 = vst [vmem:[#allocation31_spill] sm:$0xff] %v4497_v2  ;;  %v405_v60 = vmul.f32 %v4390_v4, %v4390_v4  ;;  %v363_v19 = vmul.f32 %v4298_v45, %v359_v37  ;;  %v406_v44 = vmul.f32 %v4392_v34, %v4392_v34  ;;  %v4525_v46 = vadd.f32 2.0, %v361_v61 }
  0xe0   :  { %v4527_v7 = vadd.f32 2.0, %v362_v63  ;;  %v416_v55 = vadd.f32 %v412_v6, %v408_v40  ;;  %v403_v28 = vadd.f32 %v399_v10, %v395_v26  ;;  %v420_v59 = vmul.f32 %v4430_v16, %v4430_v16 }
  0xe1   :  { %620 = vrot.lane.b32.xlu1 %v4390_v4, %s3858_s16  ;;  %8503 = vst [vmem:[#allocation32_spill] sm:$0xff] %v4525_v46  ;;  %v409_v9 = vadd.f32 %v405_v60, %v401_v18  ;;  %v410_v36 = vadd.f32 %v406_v44, %v402_v22  ;;  %v413_v42 = vmul.f32 %v4418_v31, %v4418_v31  ;;  %v4542_v53 = vadd.f32 2.0, %v4289_v50 }
  0xe2   :  { %622 = vrot.lane.b32.xlu0 %v4392_v34, %s3858_s16  ;;  %8504 = vst [vmem:[#allocation33_spill] sm:$0xff] %v4527_v7  ;;  %v414_v37 = vmul.f32 %v4420_v52, %v4420_v52  ;;  %v407_v45 = vmul.f32 %v4404_v48, %v4404_v48  ;;  %v4544_v62 = vadd.f32 2.0, %v363_v19  ;;  %v424_v25 = vadd.f32 %v420_v59, %v416_v55 }
  0xe3   :  { %8505 = vst [vmem:[#allocation34_spill] sm:$0xff] %v4542_v53  ;;  %v417_v3 = vadd.f32 %v413_v42, %v409_v9  ;;  %v428_v63 = vmul.f32 %v4463_v30, %v4463_v30  ;;  %v421_v40 = vmul.f32 %v4447_v54, %v4447_v54  ;;  %v422_v50 = vmul.f32 %v4449_v47, %v4449_v47 }
  0xe4   :  { %8506 = vst [vmem:[#allocation35_spill] sm:$0xff] %v4544_v62  ;;  %v418_v0 = vadd.f32 %v414_v37, %v410_v36  ;;  %v411_v61 = vadd.f32 %v407_v45, %v403_v28  ;;  %v415_v18 = vmul.f32 %v4432_v33, %v4432_v33  ;;  %v4559_v22 = vadd.f32 2.0, %v4341_v21 }
  0xe5   :  { %624 = vrot.lane.b32.xlu1 %v4404_v48, %s3858_s16  ;;  %v4562_v26 = vadd.f32 2.0, %v4346_v41  ;;  %v432_v10 = vadd.f32 %v428_v63, %v424_v25  ;;  %v425_v6 = vadd.f32 %v421_v40, %v417_v3  ;;  %v436_v44 = vmul.f32 %v4495_v58, %v4495_v58 }
  0xe6   :  { %646 = vrot.lane.b32.xlu0 %v4402_v51, %s3858_s16  ;;  %8507 = vst [vmem:[#allocation36_spill] sm:$0xff] %v4559_v22  ;;  %v426_v60 = vadd.f32 %v422_v50, %v418_v0  ;;  %v419_v19 = vadd.f32 %v415_v18, %v411_v61  ;;  %v429_v21 = vmul.f32 %v4476_v1, %v4476_v1  ;;  %v4577_v9 = vadd.f32 2.0, %v4294_v29 }
  0xe7   :  { %8508 = vst [vmem:[#allocation37_spill] sm:$0xff] %v4562_v26  ;;  %v430_v41 = vmul.f32 %v4478_v20, %v4478_v20  ;;  %v423_v55 = vmul.f32 %v4465_v24, %v4465_v24  ;;  %v4580_v36 = vadd.f32 2.0, %v4301_v32  ;;  %v440_v28 = vadd.f32 %v436_v44, %v432_v10 }
  0xe8   :  { %8509 = vst [vmem:[#allocation38_spill] sm:$0xff] %v4577_v9  ;;  %v433_v59 = vadd.f32 %v429_v21, %v425_v6  ;;  %v444_v45 = vmul.f32 %v4542_v53, %v4542_v53  ;;  %v437_v29 = vmul.f32 %v4525_v46, %v4525_v46  ;;  %v438_v32 = vmul.f32 %v4527_v7, %v4527_v7 }
  0xe9   :  { %648 = vrot.lane.b32.xlu1 %v4418_v31, %s3858_s16  ;;  %8510 = vst [vmem:[#allocation39_spill] sm:$0xff] %v4580_v36  ;;  %v434_v42 = vadd.f32 %v430_v41, %v426_v60  ;;  %v427_v37 = vadd.f32 %v423_v55, %v419_v19  ;;  %v431_v25 = vmul.f32 %v4497_v2, %v4497_v2  ;;  %v4595_v3 = vadd.f32 2.0, %v4351_v57 }
  0xea   :  { %650 = vrot.lane.b32.xlu0 %v4420_v52, %s3858_s16  ;;  %v4598_v0 = vadd.f32 2.0, %v4354_v35  ;;  %v448_v61 = vadd.f32 %v444_v45, %v440_v28  ;;  %v441_v63 = vadd.f32 %v437_v29, %v433_v59  ;;  %v452_v18 = vmul.f32 %v4577_v9, %v4577_v9 }
  0xeb   :  { %8511 = vst [vmem:[#allocation40_spill] sm:$0xff] %v4595_v3  ;;  %v442_v40 = vadd.f32 %v438_v32, %v434_v42  ;;  %v435_v50 = vadd.f32 %v431_v25, %v427_v37  ;;  %v445_v57 = vmul.f32 %v4559_v22, %v4559_v22  ;;  %v446_v35 = vmul.f32 %v4562_v26, %v4562_v26 }
  0xec   :  { %8512 = vst [vmem:[#allocation41_spill] sm:$0xff] %v4598_v0  ;;  %v439_v10 = vmul.f32 %v4544_v62, %v4544_v62  ;;  %v4613_v6 = vadd.f32 2.0, %v4316_v43  ;;  %v456_v60 = vadd.f32 %v452_v18, %v448_v61  ;;  %v453_v41 = vmul.f32 %v4595_v3, %v4595_v3 }
  0xed   :  { %652 = vrot.lane.b32.xlu1 %v4432_v33, %s3858_s16  ;;  %v449_v19 = vadd.f32 %v445_v57, %v441_v63  ;;  %v450_v44 = vadd.f32 %v446_v35, %v442_v40  ;;  %v454_v55 = vmul.f32 %v4598_v0, %v4598_v0  ;;  %v447_v43 = vmul.f32 %v4580_v36, %v4580_v36 }
  0xee   :  { %674 = vrot.lane.b32.xlu0 %v4430_v16, %s3858_s16  ;;  %8513 = vst [vmem:[#allocation42_spill] sm:$0xff] %v4613_v6  ;;  %v443_v21 = vadd.f32 %v439_v10, %v435_v50  ;;  %v461_v28 = vsel %vm460_vm8, %v456_v60, 0.0  ;;  %v455_v29 = vmul.f32 %v4613_v6, %v4613_v6  ;;  %v493_v25 = vrot.slane %v456_v60, 4 }
  0xef   :  { %v457_v59 = vadd.f32 %v453_v41, %v449_v19  ;;  %v458_v42 = vadd.f32 %v454_v55, %v450_v44  ;;  %v462_v45 = vrot.slane %v461_v28, 4 }
  0xf0   :  { %v451_v37 = vadd.f32 %v447_v43, %v443_v21  ;;  %v501_v57 = vsel %vm460_vm8, %v493_v25, 0.0 }
  0xf1   :  { %676 = vrot.lane.b32.xlu1 %v4447_v54, %s3858_s16  ;;  %v468_v32 = vsel %vm460_vm8, %v457_v59, 0.0  ;;  %v475_v61 = vsel %vm460_vm8, %v458_v42, 0.0  ;;  %v463_v40 = vadd.f32 %v462_v45, %v461_v28  ;;  %v494_v35 = vrot.slane %v457_v59, 4  ;;  %v4650_v59 = vpop.permute.xlu0 %546 }
  0xf2   :  { %678 = vrot.lane.b32.xlu0 %v4449_v47, %s3858_s16  ;;  %v459_v63 = vadd.f32 %v455_v29, %v451_v37  ;;  %v469_v50 = vrot.slane %v468_v32, 4  ;;  %v476_v18 = vrot.slane %v475_v61, 4  ;;  %v495_v19 = vrot.slane %v458_v42, 4  ;;  %8514 = vst [vmem:[#allocation43_spill] sm:$0xff] %v4650_v59  ;;  %v4657_v59 = vpop.permute.xlu1 %548 }
  0xf3   :  { %v464_v60 = vrot.slane %v463_v40, 2  ;;  %v502_v21 = vrot.slane %v501_v57, 4  ;;  %v508_v43 = vsel %vm460_vm8, %v494_v35, 0.0  ;;  %8515 = vst [vmem:[#allocation44_spill] sm:$0xff] %v4657_v59 }
  0xf4   :  { %v482_v10 = vsel %vm460_vm8, %v459_v63, 0.0  ;;  %v470_v44 = vadd.f32 %v469_v50, %v468_v32  ;;  %v477_v41 = vadd.f32 %v476_v18, %v475_v61  ;;  %v515_v28 = vsel %vm460_vm8, %v495_v19, 0.0 }
  0xf5   :  { %680 = vrot.lane.b32.xlu1 %v4465_v24, %s3858_s16  ;;  %v483_v55 = vrot.slane %v482_v10, 4  ;;  %v496_v37 = vrot.slane %v459_v63, 4  ;;  %v465_v42 = vadd.f32 %v464_v60, %v463_v40  ;;  %v503_v29 = vadd.f32 %v502_v21, %v501_v57  ;;  %v4659_v40 = vpop.permute.xlu0 %550 }
  0xf6   :  { %702 = vrot.lane.b32.xlu0 %v4463_v30, %s3858_s16  ;;  %v471_v45 = vrot.slane %v470_v44, 2  ;;  %v509_v32 = vrot.slane %v508_v43, 4  ;;  %v478_v25 = vrot.slane %v477_v41, 2  ;;  %v516_v50 = vrot.slane %v515_v28, 4  ;;  %8516 = vst [vmem:[#allocation45_spill] sm:$0xff] %v4659_v40 }
  0xf7   :  { %v484_v61 = vadd.f32 %v483_v55, %v482_v10  ;;  %v522_v18 = vsel %vm460_vm8, %v496_v37, 0.0  ;;  %v466_v63 = vrot.slane %v465_v42, 1  ;;  %v504_v19 = vrot.slane %v503_v29, 2 }
  0xf8   :  { %v472_v35 = vadd.f32 %v471_v45, %v470_v44  ;;  %v510_v5 = vadd.f32 %v509_v32, %v508_v43  ;;  %v479_v57 = vadd.f32 %v478_v25, %v477_v41  ;;  %v517_v10 = vadd.f32 %v516_v50, %v515_v28  ;;  %v4671_v41 = vpop.permute.xlu1 %552 }
  0xf9   :  { %704 = vrot.lane.b32.xlu1 %v4476_v1, %s3858_s16  ;;  %v485_v60 = vrot.slane %v484_v61, 2  ;;  %v523_v21 = vrot.slane %v522_v18, 4  ;;  %v4665_v55 = vadd.f32 %v466_v63, %v465_v42  ;;  %v505_v44 = vadd.f32 %v504_v19, %v503_v29  ;;  %8518 = vst [vmem:[#allocation47_spill] sm:$0xff] %v4671_v41  ;;  %v4673_v28 = vpop.permute.xlu0 %966 }
  0xfa   :  { %706 = vrot.lane.b32.xlu0 %v4478_v20, %s3858_s16  ;;  %v473_v37 = vrot.slane %v472_v35, 1  ;;  %v511_v45 = vrot.slane %v510_v5, 2  ;;  %v480_v43 = vrot.slane %v479_v57, 1  ;;  %v518_v59 = vrot.slane %v517_v10, 2  ;;  %8519 = vst [vmem:[#allocation48_spill] sm:$0xff] %v4673_v28 }
  0xfb   :  { %8517 = vst [vmem:[#allocation46_spill] sm:$0xff] %v4665_v55  ;;  %v486_v32 = vadd.f32 %v485_v60, %v484_v61  ;;  %v506_v42 = vrot.slane %v505_v44, 1 }
  0xfc   :  { %v4675_v25 = vadd.f32 %v473_v37, %v472_v35  ;;  %v512_v50 = vadd.f32 %v511_v45, %v510_v5  ;;  %v4677_v29 = vadd.f32 %v480_v43, %v479_v57  ;;  %v519_v61 = vadd.f32 %v518_v59, %v517_v10 }
  0xfd   :  { %708 = vrot.lane.b32.xlu1 %v4497_v2, %s3858_s16  ;;  %v487_v63 = vrot.slane %v486_v32, 1  ;;  %v4689_v35 = vpop.permute.xlu0 %970 }
  0xfe   :  { %730 = vrot.lane.b32.xlu0 %v4495_v58, %s3858_s16  ;;  %8520 = vst [vmem:[#allocation49_spill] sm:$0xff] %v4675_v25  ;;  %8521 = vst [vmem:[#allocation50_spill] sm:$0xff] %v4677_v29  ;;  %v513_v5 = vrot.slane %v512_v50, 1  ;;  %v520_v57 = vrot.slane %v519_v61, 1 }
  0xff   :  { %v4685_v60 = vadd.f32 %v487_v63, %v486_v32  ;;  %8525 = vst [vmem:[#allocation54_spill] sm:$0xff] %v4689_v35 }
 0x100   :  { %v4695_v59 = vadd.f32 %v513_v5, %v512_v50  ;;  %v4697_v10 = vadd.f32 %v520_v57, %v519_v61 }
 0x101   :  { %732 = vrot.lane.b32.xlu1 %v4525_v46, %s3858_s16  ;;  %8523 = vst [vmem:[#allocation52_spill] sm:$0xff] %v4685_v60 }
 0x102   :  { %734 = vrot.lane.b32.xlu0 %v4527_v7, %s3858_s16  ;;  %8526 = vst [vmem:[#allocation55_spill] sm:$0xff] %v4695_v59  ;;  %8527 = vst [vmem:[#allocation56_spill] sm:$0xff] %v4697_v10 }
 0x105   :  { %736 = vrot.lane.b32.xlu1 %v4544_v62, %s3858_s16 }
 0x106   :  { %758 = vrot.lane.b32.xlu0 %v4542_v53, %s3858_s16 }
 0x109   :  { %760 = vrot.lane.b32.xlu1 %v4559_v22, %s3858_s16 }
 0x10a   :  { %762 = vrot.lane.b32.xlu0 %v4562_v26, %s3858_s16 }
 0x10d   :  { %764 = vrot.lane.b32.xlu1 %v4580_v36, %s3858_s16 }
 0x10e   :  { %786 = vrot.lane.b32.xlu0 %v4577_v9, %s3858_s16 }
 0x111   :  { %788 = vrot.lane.b32.xlu1 %v4595_v3, %s3858_s16 }
 0x112   :  { %790 = vrot.lane.b32.xlu0 %v4598_v0, %s3858_s16 }
 0x115   :  { %792 = vrot.lane.b32.xlu1 %v4613_v6, %s3858_s16 }
 0x116   :  { %982 = vrot.lane.b32.xlu0 %v4291_v13, %s3859_s21 }
 0x119   :  { %984 = vrot.lane.b32.xlu1 %v4322_v39, %s3859_s21 }
 0x11a   :  { %986 = vrot.lane.b32.xlu0 %v4324_v27, %s3859_s21 }
 0x11d   :  { %988 = vrot.lane.b32.xlu1 %v4336_v17, %s3859_s21 }
 0x11e   :  { %1002 = vrot.lane.b32.xlu0 %v4334_v23, %s3859_s21 }
 0x121   :  { %1004 = vrot.lane.b32.xlu1 %v4362_v56, %s3859_s21 }
 0x122   :  { %1006 = vrot.lane.b32.xlu0 %v4364_v15, %s3859_s21 }
 0x125   :  { %1008 = vrot.lane.b32.xlu1 %v4376_v38, %s3859_s21 }
 0x126   :  { %1026 = vrot.lane.b32.xlu0 %v4374_v49, %s3859_s21 }
 0x129   :  { %1028 = vrot.lane.b32.xlu1 %v4390_v4, %s3859_s21 }
 0x12a   :  { %1030 = vrot.lane.b32.xlu0 %v4392_v34, %s3859_s21  ;;  %v524_v34 = vadd.f32 %v523_v21, %v522_v18  ;;  %v4683_v18 = vadd.f32 %v506_v42, %v505_v44  ;;  %v4687_v21 = vpop.permute.xlu1 %968 }
 0x12b   :  { %8524 = vst [vmem:[#allocation53_spill] sm:$0xff] %v4687_v21 }
 0x12c   :  { %v525_v19 = vrot.slane %v524_v34, 2  ;;  %8522 = vst [vmem:[#allocation51_spill] sm:$0xff] %v4683_v18 }
 0x12d   :  { %1032 = vrot.lane.b32.xlu1 %v4404_v48, %s3859_s21 }
 0x12e   :  { %1050 = vrot.lane.b32.xlu0 %v4402_v51, %s3859_s21  ;;  %v526_v37 = vadd.f32 %v525_v19, %v524_v34  ;;  %v4703_v45 = vpop.permute.xlu1 %972 }
 0x12f   :  { %8528 = vst [vmem:[#allocation57_spill] sm:$0xff] %v4703_v45 }
 0x130   :  { %v527_v44 = vrot.slane %v526_v37, 1 }
 0x131   :  { %1052 = vrot.lane.b32.xlu1 %v4418_v31, %s3859_s21 }
 0x132   :  { %842 = vrot.lane.b32.xlu0 %v4665_v55, %s3858_s16  ;;  %v4707_v43 = vadd.f32 %v527_v44, %v526_v37 }
 0x134   :  { %8529 = vst [vmem:[#allocation58_spill] sm:$0xff] %v4707_v43 }
 0x135   :  { %844 = vrot.lane.b32.xlu1 %v4675_v25, %s3858_s16 }
 0x136   :  { %846 = vrot.lane.b32.xlu0 %v4677_v29, %s3858_s16 }
 0x139   :  { %848 = vrot.lane.b32.xlu1 %v4685_v60, %s3858_s16 }
 0x13a   :  { %926 = vrot.lane.b32.xlu0 %v4683_v18, %s3858_s16 }
 0x13c   :  { %v4705_v34 = vpop.permute.xlu0 %566 }
 0x13d   :  { %928 = vrot.lane.b32.xlu1 %v4695_v59, %s3858_s16 }
 0x13e   :  { %930 = vrot.lane.b32.xlu0 %v4697_v10, %s3858_s16 }
 0x141   :  { %932 = vrot.lane.b32.xlu1 %v4707_v43, %s3858_s16 }
 0x142   :  { %1054 = vrot.lane.b32.xlu0 %v4420_v52, %s3859_s21 }
 0x143   :  { %v4713_v32 = vpop.permute.xlu1 %568 }
 0x144   :  { %v4715_v42 = vpop.permute.xlu0 %570 }
 0x145   :  { %1056 = vrot.lane.b32.xlu1 %v4432_v33, %s3859_s21 }
 0x146   :  { %1074 = vrot.lane.b32.xlu0 %v4430_v16, %s3859_s21 }
 0x147   :  { %v4721_v50 = vpop.permute.xlu1 %572 }
 0x148   :  { %v4723_v63 = vpop.permute.xlu0 %590 }
 0x149   :  { %1076 = vrot.lane.b32.xlu1 %v4447_v54, %s3859_s21 }
 0x14a   :  { %1078 = vrot.lane.b32.xlu0 %v4449_v47, %s3859_s21 }
 0x14b   :  { %v4729_v61 = vpop.permute.xlu1 %592 }
 0x14c   :  { %v4731_v19 = vpop.permute.xlu0 %594 }
 0x14d   :  { %1080 = vrot.lane.b32.xlu1 %v4465_v24, %s3859_s21 }
 0x14e   :  { %1098 = vrot.lane.b32.xlu0 %v4463_v30, %s3859_s21 }
 0x14f   :  { %v4737_v5 = vpop.permute.xlu1 %596 }
 0x150   :  { %v4739_v57 = vpop.permute.xlu0 %618 }
 0x151   :  { %1100 = vrot.lane.b32.xlu1 %v4476_v1, %s3859_s21 }
 0x152   :  { %1102 = vrot.lane.b32.xlu0 %v4478_v20, %s3859_s21 }
 0x153   :  { %v4745_v37 = vpop.permute.xlu1 %620 }
 0x154   :  { %8530 = vst [vmem:[#allocation59_spill] sm:$0xff] %v4745_v37  ;;  %v4747_v44 = vpop.permute.xlu0 %622 }
 0x155   :  { %8531 = vst [vmem:[#allocation60_spill] sm:$0xff] %v4747_v44  ;;  %1104 = vrot.lane.b32.xlu1 %v4497_v2, %s3859_s21 }
 0x156   :  { %1122 = vrot.lane.b32.xlu0 %v4495_v58, %s3859_s21 }
 0x157   :  { %v4753_v45 = vpop.permute.xlu1 %624 }
 0x158   :  { %8532 = vst [vmem:[#allocation61_spill] sm:$0xff] %v4753_v45  ;;  %v4755_v35 = vpop.permute.xlu0 %646 }
 0x159   :  { %1124 = vrot.lane.b32.xlu1 %v4525_v46, %s3859_s21 }
 0x15a   :  { %1126 = vrot.lane.b32.xlu0 %v4527_v7, %s3859_s21 }
 0x15b   :  { %v4761_v28 = vpop.permute.xlu1 %648 }
 0x15c   :  { %8533 = vst [vmem:[#allocation62_spill] sm:$0xff] %v4761_v28  ;;  %v4763_v21 = vpop.permute.xlu0 %650 }
 0x15d   :  { %8534 = vst [vmem:[#allocation63_spill] sm:$0xff] %v4763_v21  ;;  %1128 = vrot.lane.b32.xlu1 %v4544_v62, %s3859_s21 }
 0x15e   :  { %1146 = vrot.lane.b32.xlu0 %v4542_v53, %s3859_s21 }
 0x15f   :  { %v4769_v41 = vpop.permute.xlu1 %652 }
 0x160   :  { %8535 = vst [vmem:[#allocation64_spill] sm:$0xff] %v4769_v41  ;;  %v4771_v40 = vpop.permute.xlu0 %674 }
 0x161   :  { %1148 = vrot.lane.b32.xlu1 %v4559_v22, %s3859_s21 }
 0x162   :  { %1150 = vrot.lane.b32.xlu0 %v4562_v26, %s3859_s21 }
 0x163   :  { %v4777_v45 = vpop.permute.xlu1 %676 }
 0x164   :  { %8536 = vst [vmem:[#allocation65_spill] sm:$0xff] %v4777_v45  ;;  %v4779_v28 = vpop.permute.xlu0 %678 }
 0x165   :  { %8537 = vst [vmem:[#allocation66_spill] sm:$0xff] %v4779_v28  ;;  %1152 = vrot.lane.b32.xlu1 %v4580_v36, %s3859_s21 }
 0x166   :  { %1170 = vrot.lane.b32.xlu0 %v4577_v9, %s3859_s21 }
 0x167   :  { %v4785_v21 = vpop.permute.xlu1 %680 }
 0x168   :  { %8538 = vst [vmem:[#allocation67_spill] sm:$0xff] %v4785_v21  ;;  %v4787_v41 = vpop.permute.xlu0 %702 }
 0x169   :  { %8539 = vst [vmem:[#allocation68_spill] sm:$0xff] %v4787_v41  ;;  %1172 = vrot.lane.b32.xlu1 %v4595_v3, %s3859_s21 }
 0x16a   :  { %1174 = vrot.lane.b32.xlu0 %v4598_v0, %s3859_s21 }
 0x16b   :  { %v4793_v44 = vpop.permute.xlu1 %704 }
 0x16c   :  { %8540 = vst [vmem:[#allocation69_spill] sm:$0xff] %v4793_v44  ;;  %v4795_v45 = vpop.permute.xlu0 %706 }
 0x16d   :  { %8541 = vst [vmem:[#allocation70_spill] sm:$0xff] %v4795_v45  ;;  %1176 = vrot.lane.b32.xlu1 %v4613_v6, %s3859_s21 }
 0x16e   :  { %1222 = vrot.lane.b32.xlu0 %v4665_v55, %s3859_s21 }
 0x16f   :  { %v4801_v28 = vpop.permute.xlu1 %708 }
 0x170   :  { %8542 = vst [vmem:[#allocation71_spill] sm:$0xff] %v4801_v28  ;;  %v4803_v21 = vpop.permute.xlu0 %730 }
 0x171   :  { %8543 = vst [vmem:[#allocation72_spill] sm:$0xff] %v4803_v21  ;;  %1224 = vrot.lane.b32.xlu1 %v4675_v25, %s3859_s21 }
 0x172   :  { %1226 = vrot.lane.b32.xlu0 %v4677_v29, %s3859_s21 }
 0x173   :  { %v4809_v41 = vpop.permute.xlu1 %732 }
 0x174   :  { %8544 = vst [vmem:[#allocation73_spill] sm:$0xff] %v4809_v41  ;;  %v4811_v44 = vpop.permute.xlu0 %734 }
 0x175   :  { %8545 = vst [vmem:[#allocation74_spill] sm:$0xff] %v4811_v44  ;;  %1228 = vrot.lane.b32.xlu1 %v4685_v60, %s3859_s21 }
 0x176   :  { %1302 = vrot.lane.b32.xlu0 %v4683_v18, %s3859_s21 }
 0x177   :  { %v4817_v45 = vpop.permute.xlu1 %736 }
 0x178   :  { %8546 = vst [vmem:[#allocation75_spill] sm:$0xff] %v4817_v45  ;;  %v4819_v28 = vpop.permute.xlu0 %758 }
 0x179   :  { %8547 = vst [vmem:[#allocation76_spill] sm:$0xff] %v4819_v28  ;;  %1304 = vrot.lane.b32.xlu1 %v4695_v59, %s3859_s21 }
 0x17a   :  { %1306 = vrot.lane.b32.xlu0 %v4697_v10, %s3859_s21 }
 0x17b   :  { %v4825_v21 = vpop.permute.xlu1 %760 }
 0x17c   :  { %8548 = vst [vmem:[#allocation77_spill] sm:$0xff] %v4825_v21  ;;  %v4827_v41 = vpop.permute.xlu0 %762 }
 0x17d   :  { %8549 = vst [vmem:[#allocation78_spill] sm:$0xff] %v4827_v41  ;;  %1308 = vrot.lane.b32.xlu1 %v4707_v43, %s3859_s21 }
 0x17e   :  { %1342 = vrot.lane.b32.xlu0 %v3980_v8, %s3860_s0 }
 0x17f   :  { %v4833_v44 = vpop.permute.xlu1 %764 }
 0x180   :  { %8550 = vst [vmem:[#allocation79_spill] sm:$0xff] %v4833_v44  ;;  %v4835_v45 = vpop.permute.xlu0 %786 }
 0x181   :  { %8551 = vst [vmem:[#allocation80_spill] sm:$0xff] %v4835_v45  ;;  %1344 = vrot.lane.b32.xlu1 %v3988_v11, %s3860_s0 }
 0x182   :  { %1346 = vrot.lane.b32.xlu0 %v3992_v12, %s3860_s0 }
 0x183   :  { %v4841_v28 = vpop.permute.xlu1 %788 }
 0x184   :  { %8552 = vst [vmem:[#allocation81_spill] sm:$0xff] %v4841_v28  ;;  %v4843_v21 = vpop.permute.xlu0 %790 }
 0x185   :  { %8553 = vst [vmem:[#allocation82_spill] sm:$0xff] %v4843_v21  ;;  %1348 = vrot.lane.b32.xlu1 %v4001_v14, %s3860_s0 }
 0x186   :  { %1358 = vrot.lane.b32.xlu0 %v4291_v13, %s3860_s0 }
 0x187   :  { %v4849_v41 = vpop.permute.xlu1 %792 }
 0x188   :  { %8554 = vst [vmem:[#allocation83_spill] sm:$0xff] %v4849_v41  ;;  %v4851_v44 = vpop.permute.xlu0 %982 }
 0x189   :  { %8555 = vst [vmem:[#allocation84_spill] sm:$0xff] %v4851_v44  ;;  %1360 = vrot.lane.b32.xlu1 %v4322_v39, %s3860_s0 }
 0x18a   :  { %1362 = vrot.lane.b32.xlu0 %v4324_v27, %s3860_s0 }
 0x18b   :  { %v4857_v45 = vpop.permute.xlu1 %984 }
 0x18c   :  { %8556 = vst [vmem:[#allocation85_spill] sm:$0xff] %v4857_v45  ;;  %v4859_v28 = vpop.permute.xlu0 %986 }
 0x18d   :  { %8557 = vst [vmem:[#allocation86_spill] sm:$0xff] %v4859_v28  ;;  %1364 = vrot.lane.b32.xlu1 %v4336_v17, %s3860_s0 }
 0x18e   :  { %1378 = vrot.lane.b32.xlu0 %v4334_v23, %s3860_s0 }
 0x18f   :  { %v4865_v21 = vpop.permute.xlu1 %988 }
 0x190   :  { %8558 = vst [vmem:[#allocation87_spill] sm:$0xff] %v4865_v21  ;;  %v4867_v41 = vpop.permute.xlu0 %1002 }
 0x191   :  { %8559 = vst [vmem:[#allocation88_spill] sm:$0xff] %v4867_v41  ;;  %1380 = vrot.lane.b32.xlu1 %v4362_v56, %s3860_s0  ;;  %v8564_v41 = vld [vmem:[#allocation17_spill] sm:$0xff] }
 0x192   :  { %1382 = vrot.lane.b32.xlu0 %v4364_v15, %s3860_s0 }
 0x193   :  { %v4873_v44 = vpop.permute.xlu1 %1004 }
 0x194   :  { %8560 = vst [vmem:[#allocation89_spill] sm:$0xff] %v4873_v44  ;;  %v4875_v45 = vpop.permute.xlu0 %1006 }
 0x195   :  { %8561 = vst [vmem:[#allocation90_spill] sm:$0xff] %v4875_v45  ;;  %1384 = vrot.lane.b32.xlu1 %v4376_v38, %s3860_s0 }
 0x196   :  { %1402 = vrot.lane.b32.xlu0 %v4374_v49, %s3860_s0 }
 0x197   :  { %v4881_v28 = vpop.permute.xlu1 %1008 }
 0x198   :  { %8562 = vst [vmem:[#allocation91_spill] sm:$0xff] %v4881_v28  ;;  %v4883_v21 = vpop.permute.xlu0 %1026 }
 0x199   :  { %8563 = vst [vmem:[#allocation92_spill] sm:$0xff] %v4883_v21  ;;  %1404 = vrot.lane.b32.xlu1 %v4390_v4, %s3860_s0 }
 0x19a   :  { %1406 = vrot.lane.b32.xlu0 %v8564_v41, %s3860_s0 }
 0x19b   :  { %v4889_v37 = vpop.permute.xlu1 %1028 }
 0x19c   :  { %8565 = vst [vmem:[#allocation93_spill] sm:$0xff] %v4889_v37  ;;  %v4891_v44 = vpop.permute.xlu0 %1030 }
 0x19d   :  { %8566 = vst [vmem:[#allocation94_spill] sm:$0xff] %v4891_v44  ;;  %1408 = vrot.lane.b32.xlu1 %v4404_v48, %s3860_s0 }
 0x19e   :  { %1426 = vrot.lane.b32.xlu0 %v4402_v51, %s3860_s0 }
 0x19f   :  { %v4897_v45 = vpop.permute.xlu1 %1032 }
 0x1a0   :  { %8567 = vst [vmem:[#allocation95_spill] sm:$0xff] %v4897_v45  ;;  %v4899_v28 = vpop.permute.xlu0 %1050 }
 0x1a1   :  { %8568 = vst [vmem:[#allocation96_spill] sm:$0xff] %v4899_v28  ;;  %1428 = vrot.lane.b32.xlu1 %v4418_v31, %s3860_s0 }
 0x1a2   :  { %1430 = vrot.lane.b32.xlu0 %v4420_v52, %s3860_s0 }
 0x1a3   :  { %v4905_v21 = vpop.permute.xlu1 %1052 }
 0x1a4   :  { %8569 = vst [vmem:[#allocation97_spill] sm:$0xff] %v4905_v21  ;;  %v4907_v37 = vpop.permute.xlu0 %842 }
 0x1a5   :  { %8570 = vst [vmem:[#allocation98_spill] sm:$0xff] %v4907_v37  ;;  %1432 = vrot.lane.b32.xlu1 %v4432_v33, %s3860_s0 }
 0x1a6   :  { %1450 = vrot.lane.b32.xlu0 %v4430_v16, %s3860_s0 }
 0x1a7   :  { %v4913_v44 = vpop.permute.xlu1 %844 }
 0x1a8   :  { %8571 = vst [vmem:[#allocation99_spill] sm:$0xff] %v4913_v44  ;;  %v4915_v45 = vpop.permute.xlu0 %846 }
 0x1a9   :  { %8572 = vst [vmem:[#allocation100_spill] sm:$0xff] %v4915_v45  ;;  %1452 = vrot.lane.b32.xlu1 %v4447_v54, %s3860_s0 }
 0x1aa   :  { %1454 = vrot.lane.b32.xlu0 %v4449_v47, %s3860_s0 }
 0x1ab   :  { %v4921_v28 = vpop.permute.xlu1 %848 }
 0x1ac   :  { %8573 = vst [vmem:[#allocation101_spill] sm:$0xff] %v4921_v28  ;;  %v4923_v21 = vpop.permute.xlu0 %926 }
 0x1ad   :  { %8574 = vst [vmem:[#allocation102_spill] sm:$0xff] %v4923_v21  ;;  %1456 = vrot.lane.b32.xlu1 %v4465_v24, %s3860_s0 }
 0x1ae   :  { %1474 = vrot.lane.b32.xlu0 %v4463_v30, %s3860_s0 }
 0x1af   :  { %v4929_v37 = vpop.permute.xlu1 %928 }
 0x1b0   :  { %8575 = vst [vmem:[#allocation103_spill] sm:$0xff] %v4929_v37  ;;  %v4931_v44 = vpop.permute.xlu0 %930 }
 0x1b1   :  { %8576 = vst [vmem:[#allocation104_spill] sm:$0xff] %v4931_v44  ;;  %1476 = vrot.lane.b32.xlu1 %v4476_v1, %s3860_s0 }
 0x1b2   :  { %1478 = vrot.lane.b32.xlu0 %v4478_v20, %s3860_s0 }
 0x1b3   :  { %v4937_v45 = vpop.permute.xlu1 %932 }
 0x1b4   :  { %8577 = vst [vmem:[#allocation105_spill] sm:$0xff] %v4937_v45  ;;  %v4939_v28 = vpop.permute.xlu0 %1054 }
 0x1b5   :  { %8578 = vst [vmem:[#allocation106_spill] sm:$0xff] %v4939_v28  ;;  %1480 = vrot.lane.b32.xlu1 %v4497_v2, %s3860_s0 }
 0x1b6   :  { %1498 = vrot.lane.b32.xlu0 %v4495_v58, %s3860_s0 }
 0x1b7   :  { %v4945_v21 = vpop.permute.xlu1 %1056 }
 0x1b8   :  { %8579 = vst [vmem:[#allocation107_spill] sm:$0xff] %v4945_v21  ;;  %v4947_v37 = vpop.permute.xlu0 %1074 }
 0x1b9   :  { %8580 = vst [vmem:[#allocation108_spill] sm:$0xff] %v4947_v37  ;;  %1500 = vrot.lane.b32.xlu1 %v4525_v46, %s3860_s0 }
 0x1ba   :  { %1502 = vrot.lane.b32.xlu0 %v4527_v7, %s3860_s0 }
 0x1bb   :  { %v4953_v44 = vpop.permute.xlu1 %1076 }
 0x1bc   :  { %8581 = vst [vmem:[#allocation109_spill] sm:$0xff] %v4953_v44  ;;  %v4955_v45 = vpop.permute.xlu0 %1078 }
 0x1bd   :  { %8582 = vst [vmem:[#allocation110_spill] sm:$0xff] %v4955_v45  ;;  %1504 = vrot.lane.b32.xlu1 %v4544_v62, %s3860_s0 }
 0x1be   :  { %1522 = vrot.lane.b32.xlu0 %v4542_v53, %s3860_s0 }
 0x1bf   :  { %v4961_v28 = vpop.permute.xlu1 %1080 }
 0x1c0   :  { %8583 = vst [vmem:[#allocation111_spill] sm:$0xff] %v4961_v28  ;;  %v4963_v21 = vpop.permute.xlu0 %1098 }
 0x1c1   :  { %8584 = vst [vmem:[#allocation112_spill] sm:$0xff] %v4963_v21  ;;  %1524 = vrot.lane.b32.xlu1 %v4559_v22, %s3860_s0 }
 0x1c2   :  { %1526 = vrot.lane.b32.xlu0 %v4562_v26, %s3860_s0 }
 0x1c3   :  { %v4969_v37 = vpop.permute.xlu1 %1100 }
 0x1c4   :  { %8585 = vst [vmem:[#allocation113_spill] sm:$0xff] %v4969_v37  ;;  %v4971_v44 = vpop.permute.xlu0 %1102 }
 0x1c5   :  { %8586 = vst [vmem:[#allocation114_spill] sm:$0xff] %v4971_v44  ;;  %1528 = vrot.lane.b32.xlu1 %v4580_v36, %s3860_s0 }
 0x1c6   :  { %1546 = vrot.lane.b32.xlu0 %v4577_v9, %s3860_s0 }
 0x1c7   :  { %v4977_v45 = vpop.permute.xlu1 %1104 }
 0x1c8   :  { %8587 = vst [vmem:[#allocation115_spill] sm:$0xff] %v4977_v45  ;;  %v4979_v28 = vpop.permute.xlu0 %1122 }
 0x1c9   :  { %8588 = vst [vmem:[#allocation116_spill] sm:$0xff] %v4979_v28  ;;  %1548 = vrot.lane.b32.xlu1 %v4595_v3, %s3860_s0 }
 0x1ca   :  { %1550 = vrot.lane.b32.xlu0 %v4598_v0, %s3860_s0 }
 0x1cb   :  { %v4985_v21 = vpop.permute.xlu1 %1124 }
 0x1cc   :  { %8589 = vst [vmem:[#allocation117_spill] sm:$0xff] %v4985_v21  ;;  %v4987_v37 = vpop.permute.xlu0 %1126 }
 0x1cd   :  { %8590 = vst [vmem:[#allocation118_spill] sm:$0xff] %v4987_v37  ;;  %1552 = vrot.lane.b32.xlu1 %v4613_v6, %s3860_s0 }
 0x1ce   :  { %1598 = vrot.lane.b32.xlu0 %v4665_v55, %s3860_s0 }
 0x1cf   :  { %v4993_v44 = vpop.permute.xlu1 %1128 }
 0x1d0   :  { %8591 = vst [vmem:[#allocation119_spill] sm:$0xff] %v4993_v44  ;;  %v4995_v45 = vpop.permute.xlu0 %1146 }
 0x1d1   :  { %8592 = vst [vmem:[#allocation120_spill] sm:$0xff] %v4995_v45  ;;  %1600 = vrot.lane.b32.xlu1 %v4675_v25, %s3860_s0 }
 0x1d2   :  { %1602 = vrot.lane.b32.xlu0 %v4677_v29, %s3860_s0 }
 0x1d3   :  { %v5001_v28 = vpop.permute.xlu1 %1148 }
 0x1d4   :  { %8593 = vst [vmem:[#allocation121_spill] sm:$0xff] %v5001_v28  ;;  %v5003_v21 = vpop.permute.xlu0 %1150 }
 0x1d5   :  { %8594 = vst [vmem:[#allocation122_spill] sm:$0xff] %v5003_v21  ;;  %1604 = vrot.lane.b32.xlu1 %v4685_v60, %s3860_s0 }
 0x1d6   :  { %1678 = vrot.lane.b32.xlu0 %v4683_v18, %s3860_s0 }
 0x1d7   :  { %v5009_v37 = vpop.permute.xlu1 %1152 }
 0x1d8   :  { %8595 = vst [vmem:[#allocation123_spill] sm:$0xff] %v5009_v37  ;;  %v5011_v44 = vpop.permute.xlu0 %1170 }
 0x1d9   :  { %8596 = vst [vmem:[#allocation124_spill] sm:$0xff] %v5011_v44  ;;  %1680 = vrot.lane.b32.xlu1 %v4695_v59, %s3860_s0 }
 0x1da   :  { %1682 = vrot.lane.b32.xlu0 %v4697_v10, %s3860_s0 }
 0x1db   :  { %v5017_v45 = vpop.permute.xlu1 %1172 }
 0x1dc   :  { %8597 = vst [vmem:[#allocation125_spill] sm:$0xff] %v5017_v45  ;;  %v5019_v28 = vpop.permute.xlu0 %1174 }
 0x1dd   :  { %8598 = vst [vmem:[#allocation126_spill] sm:$0xff] %v5019_v28  ;;  %1684 = vrot.lane.b32.xlu1 %v4707_v43, %s3860_s0 }
 0x1de   :  { %1718 = vrot.lane.b32.xlu0 %v3980_v8, %s3861_s22 }
 0x1df   :  { %v5025_v21 = vpop.permute.xlu1 %1176 }
 0x1e0   :  { %8599 = vst [vmem:[#allocation127_spill] sm:$0xff] %v5025_v21  ;;  %v5027_v37 = vpop.permute.xlu0 %1222 }
 0x1e1   :  { %8600 = vst [vmem:[#allocation128_spill] sm:$0xff] %v5027_v37  ;;  %1720 = vrot.lane.b32.xlu1 %v3988_v11, %s3861_s22 }
 0x1e2   :  { %1722 = vrot.lane.b32.xlu0 %v3992_v12, %s3861_s22 }
 0x1e3   :  { %v5033_v44 = vpop.permute.xlu1 %1224 }
 0x1e4   :  { %8601 = vst [vmem:[#allocation129_spill] sm:$0xff] %v5033_v44  ;;  %v5035_v45 = vpop.permute.xlu0 %1226 }
 0x1e5   :  { %8602 = vst [vmem:[#allocation130_spill] sm:$0xff] %v5035_v45  ;;  %1724 = vrot.lane.b32.xlu1 %v4001_v14, %s3861_s22 }
 0x1e6   :  { %1734 = vrot.lane.b32.xlu0 %v4291_v13, %s3861_s22 }
 0x1e7   :  { %v5041_v28 = vpop.permute.xlu1 %1228 }
 0x1e8   :  { %8603 = vst [vmem:[#allocation131_spill] sm:$0xff] %v5041_v28  ;;  %v5043_v21 = vpop.permute.xlu0 %1302 }
 0x1e9   :  { %8604 = vst [vmem:[#allocation132_spill] sm:$0xff] %v5043_v21  ;;  %1736 = vrot.lane.b32.xlu1 %v4322_v39, %s3861_s22 }
 0x1ea   :  { %1738 = vrot.lane.b32.xlu0 %v4324_v27, %s3861_s22 }
 0x1eb   :  { %v5049_v37 = vpop.permute.xlu1 %1304 }
 0x1ec   :  { %8605 = vst [vmem:[#allocation133_spill] sm:$0xff] %v5049_v37  ;;  %v5051_v44 = vpop.permute.xlu0 %1306 }
 0x1ed   :  { %8606 = vst [vmem:[#allocation134_spill] sm:$0xff] %v5051_v44  ;;  %1740 = vrot.lane.b32.xlu1 %v4336_v17, %s3861_s22 }
 0x1ee   :  { %1754 = vrot.lane.b32.xlu0 %v4334_v23, %s3861_s22 }
 0x1ef   :  { %v5057_v45 = vpop.permute.xlu1 %1308 }
 0x1f0   :  { %8607 = vst [vmem:[#allocation135_spill] sm:$0xff] %v5057_v45  ;;  %v5059_v28 = vpop.permute.xlu0 %1342 }
 0x1f1   :  { %8608 = vst [vmem:[#allocation136_spill] sm:$0xff] %v5059_v28  ;;  %1756 = vrot.lane.b32.xlu1 %v4362_v56, %s3861_s22 }
 0x1f2   :  { %1758 = vrot.lane.b32.xlu0 %v4364_v15, %s3861_s22 }
 0x1f3   :  { %v5065_v21 = vpop.permute.xlu1 %1344 }
 0x1f4   :  { %8609 = vst [vmem:[#allocation137_spill] sm:$0xff] %v5065_v21  ;;  %v5067_v37 = vpop.permute.xlu0 %1346 }
 0x1f5   :  { %8610 = vst [vmem:[#allocation138_spill] sm:$0xff] %v5067_v37  ;;  %1760 = vrot.lane.b32.xlu1 %v4376_v38, %s3861_s22 }
 0x1f6   :  { %1778 = vrot.lane.b32.xlu0 %v4374_v49, %s3861_s22 }
 0x1f7   :  { %v5073_v44 = vpop.permute.xlu1 %1348 }
 0x1f8   :  { %8611 = vst [vmem:[#allocation139_spill] sm:$0xff] %v5073_v44  ;;  %v5075_v45 = vpop.permute.xlu0 %1358 }
 0x1f9   :  { %8612 = vst [vmem:[#allocation140_spill] sm:$0xff] %v5075_v45  ;;  %1780 = vrot.lane.b32.xlu1 %v4390_v4, %s3861_s22 }
 0x1fa   :  { %1782 = vrot.lane.b32.xlu0 %v8564_v41, %s3861_s22 }
 0x1fb   :  { %v5081_v28 = vpop.permute.xlu1 %1360 }
 0x1fc   :  { %8613 = vst [vmem:[#allocation141_spill] sm:$0xff] %v5081_v28  ;;  %v5083_v21 = vpop.permute.xlu0 %1362 }
 0x1fd   :  { %8614 = vst [vmem:[#allocation142_spill] sm:$0xff] %v5083_v21  ;;  %1784 = vrot.lane.b32.xlu1 %v4404_v48, %s3861_s22 }
 0x1fe   :  { %1802 = vrot.lane.b32.xlu0 %v4402_v51, %s3861_s22 }
 0x1ff   :  { %v5089_v37 = vpop.permute.xlu1 %1364 }
 0x200   :  { %8615 = vst [vmem:[#allocation143_spill] sm:$0xff] %v5089_v37  ;;  %v5091_v44 = vpop.permute.xlu0 %1378 }
 0x201   :  { %8616 = vst [vmem:[#allocation144_spill] sm:$0xff] %v5091_v44  ;;  %1804 = vrot.lane.b32.xlu1 %v4418_v31, %s3861_s22 }
 0x202   :  { %1806 = vrot.lane.b32.xlu0 %v4420_v52, %s3861_s22 }
 0x203   :  { %v5097_v45 = vpop.permute.xlu1 %1380 }
 0x204   :  { %8617 = vst [vmem:[#allocation145_spill] sm:$0xff] %v5097_v45  ;;  %v5099_v28 = vpop.permute.xlu0 %1382 }
 0x205   :  { %8618 = vst [vmem:[#allocation146_spill] sm:$0xff] %v5099_v28  ;;  %1808 = vrot.lane.b32.xlu1 %v4432_v33, %s3861_s22 }
 0x206   :  { %1826 = vrot.lane.b32.xlu0 %v4430_v16, %s3861_s22 }
 0x207   :  { %v5105_v21 = vpop.permute.xlu1 %1384 }
 0x208   :  { %8619 = vst [vmem:[#allocation147_spill] sm:$0xff] %v5105_v21  ;;  %v5107_v37 = vpop.permute.xlu0 %1402 }
 0x209   :  { %8620 = vst [vmem:[#allocation148_spill] sm:$0xff] %v5107_v37  ;;  %1828 = vrot.lane.b32.xlu1 %v4447_v54, %s3861_s22 }
 0x20a   :  { %1830 = vrot.lane.b32.xlu0 %v4449_v47, %s3861_s22 }
 0x20b   :  { %v5113_v44 = vpop.permute.xlu1 %1404 }
 0x20c   :  { %8621 = vst [vmem:[#allocation149_spill] sm:$0xff] %v5113_v44  ;;  %v5115_v45 = vpop.permute.xlu0 %1406 }
 0x20d   :  { %8622 = vst [vmem:[#allocation150_spill] sm:$0xff] %v5115_v45  ;;  %1832 = vrot.lane.b32.xlu1 %v4465_v24, %s3861_s22 }
 0x20e   :  { %1850 = vrot.lane.b32.xlu0 %v4463_v30, %s3861_s22 }
 0x20f   :  { %v5121_v28 = vpop.permute.xlu1 %1408 }
 0x210   :  { %8623 = vst [vmem:[#allocation151_spill] sm:$0xff] %v5121_v28  ;;  %v5123_v21 = vpop.permute.xlu0 %1426 }
 0x211   :  { %8624 = vst [vmem:[#allocation152_spill] sm:$0xff] %v5123_v21  ;;  %1852 = vrot.lane.b32.xlu1 %v4476_v1, %s3861_s22 }
 0x212   :  { %1854 = vrot.lane.b32.xlu0 %v4478_v20, %s3861_s22 }
 0x213   :  { %v5129_v37 = vpop.permute.xlu1 %1428 }
 0x214   :  { %8625 = vst [vmem:[#allocation153_spill] sm:$0xff] %v5129_v37  ;;  %v5131_v44 = vpop.permute.xlu0 %1430 }
 0x215   :  { %8626 = vst [vmem:[#allocation154_spill] sm:$0xff] %v5131_v44  ;;  %1856 = vrot.lane.b32.xlu1 %v4497_v2, %s3861_s22 }
 0x216   :  { %1874 = vrot.lane.b32.xlu0 %v4495_v58, %s3861_s22 }
 0x217   :  { %v5137_v45 = vpop.permute.xlu1 %1432 }
 0x218   :  { %8627 = vst [vmem:[#allocation155_spill] sm:$0xff] %v5137_v45  ;;  %v5139_v28 = vpop.permute.xlu0 %1450 }
 0x219   :  { %8628 = vst [vmem:[#allocation156_spill] sm:$0xff] %v5139_v28  ;;  %1876 = vrot.lane.b32.xlu1 %v4525_v46, %s3861_s22 }
 0x21a   :  { %1878 = vrot.lane.b32.xlu0 %v4527_v7, %s3861_s22 }
 0x21b   :  { %v5145_v21 = vpop.permute.xlu1 %1452 }
 0x21c   :  { %8629 = vst [vmem:[#allocation157_spill] sm:$0xff] %v5145_v21  ;;  %v5147_v37 = vpop.permute.xlu0 %1454 }
 0x21d   :  { %8630 = vst [vmem:[#allocation158_spill] sm:$0xff] %v5147_v37  ;;  %1880 = vrot.lane.b32.xlu1 %v4544_v62, %s3861_s22 }
 0x21e   :  { %1898 = vrot.lane.b32.xlu0 %v4542_v53, %s3861_s22 }
 0x21f   :  { %v5153_v44 = vpop.permute.xlu1 %1456 }
 0x220   :  { %8631 = vst [vmem:[#allocation159_spill] sm:$0xff] %v5153_v44  ;;  %v5155_v45 = vpop.permute.xlu0 %1474 }
 0x221   :  { %8632 = vst [vmem:[#allocation160_spill] sm:$0xff] %v5155_v45  ;;  %1900 = vrot.lane.b32.xlu1 %v4559_v22, %s3861_s22 }
 0x222   :  { %1902 = vrot.lane.b32.xlu0 %v4562_v26, %s3861_s22 }
 0x223   :  { %v5161_v28 = vpop.permute.xlu1 %1476 }
 0x224   :  { %8633 = vst [vmem:[#allocation161_spill] sm:$0xff] %v5161_v28  ;;  %v5163_v21 = vpop.permute.xlu0 %1478 }
 0x225   :  { %8634 = vst [vmem:[#allocation162_spill] sm:$0xff] %v5163_v21  ;;  %1904 = vrot.lane.b32.xlu1 %v4580_v36, %s3861_s22 }
 0x226   :  { %1922 = vrot.lane.b32.xlu0 %v4577_v9, %s3861_s22 }
 0x227   :  { %v5169_v37 = vpop.permute.xlu1 %1480 }
 0x228   :  { %8635 = vst [vmem:[#allocation163_spill] sm:$0xff] %v5169_v37  ;;  %v5171_v44 = vpop.permute.xlu0 %1498 }
 0x229   :  { %8636 = vst [vmem:[#allocation164_spill] sm:$0xff] %v5171_v44  ;;  %1924 = vrot.lane.b32.xlu1 %v4595_v3, %s3861_s22 }
 0x22a   :  { %1926 = vrot.lane.b32.xlu0 %v4598_v0, %s3861_s22 }
 0x22b   :  { %v5177_v45 = vpop.permute.xlu1 %1500 }
 0x22c   :  { %8637 = vst [vmem:[#allocation165_spill] sm:$0xff] %v5177_v45  ;;  %v5179_v28 = vpop.permute.xlu0 %1502 }
 0x22d   :  { %8638 = vst [vmem:[#allocation166_spill] sm:$0xff] %v5179_v28  ;;  %1928 = vrot.lane.b32.xlu1 %v4613_v6, %s3861_s22 }
 0x22e   :  { %1974 = vrot.lane.b32.xlu0 %v4665_v55, %s3861_s22 }
 0x22f   :  { %v5185_v21 = vpop.permute.xlu1 %1504 }
 0x230   :  { %8639 = vst [vmem:[#allocation167_spill] sm:$0xff] %v5185_v21  ;;  %v5187_v37 = vpop.permute.xlu0 %1522 }
 0x231   :  { %8640 = vst [vmem:[#allocation168_spill] sm:$0xff] %v5187_v37  ;;  %1976 = vrot.lane.b32.xlu1 %v4675_v25, %s3861_s22 }
 0x232   :  { %1978 = vrot.lane.b32.xlu0 %v4677_v29, %s3861_s22 }
 0x233   :  { %v5193_v44 = vpop.permute.xlu1 %1524 }
 0x234   :  { %8641 = vst [vmem:[#allocation169_spill] sm:$0xff] %v5193_v44  ;;  %v5195_v45 = vpop.permute.xlu0 %1526 }
 0x235   :  { %8642 = vst [vmem:[#allocation170_spill] sm:$0xff] %v5195_v45  ;;  %1980 = vrot.lane.b32.xlu1 %v4685_v60, %s3861_s22 }
 0x236   :  { %2054 = vrot.lane.b32.xlu0 %v4683_v18, %s3861_s22 }
 0x237   :  { %v5201_v28 = vpop.permute.xlu1 %1528 }
 0x238   :  { %8643 = vst [vmem:[#allocation171_spill] sm:$0xff] %v5201_v28  ;;  %v5203_v21 = vpop.permute.xlu0 %1546 }
 0x239   :  { %8644 = vst [vmem:[#allocation172_spill] sm:$0xff] %v5203_v21  ;;  %2056 = vrot.lane.b32.xlu1 %v4695_v59, %s3861_s22 }
 0x23a   :  { %2058 = vrot.lane.b32.xlu0 %v4697_v10, %s3861_s22  ;;  %v8682_v10 = vld [vmem:[#allocation61_spill] sm:$0xff] }
 0x23b   :  { %v5209_v37 = vpop.permute.xlu1 %1548 }
 0x23c   :  { %8645 = vst [vmem:[#allocation173_spill] sm:$0xff] %v5209_v37  ;;  %v5211_v44 = vpop.permute.xlu0 %1550 }
 0x23d   :  { %8646 = vst [vmem:[#allocation174_spill] sm:$0xff] %v5211_v44  ;;  %2060 = vrot.lane.b32.xlu1 %v4707_v43, %s3861_s22 }
 0x23e   :  { %2094 = vrot.lane.b32.xlu0 %v3980_v8, %s3862_s23  ;;  %v575_v8 = vsel %vm32_vm1, %v4713_v32, %v4715_v42 }
 0x23f   :  { %v5217_v45 = vpop.permute.xlu1 %1552 }
 0x240   :  { %8647 = vst [vmem:[#allocation175_spill] sm:$0xff] %v5217_v45  ;;  %v5219_v28 = vpop.permute.xlu0 %1598 }
 0x241   :  { %8648 = vst [vmem:[#allocation176_spill] sm:$0xff] %v5219_v28  ;;  %2096 = vrot.lane.b32.xlu1 %v3988_v11, %s3862_s23 }
 0x242   :  { %2098 = vrot.lane.b32.xlu0 %v3992_v12, %s3862_s23 }
 0x243   :  { %v5225_v21 = vpop.permute.xlu1 %1600 }
 0x244   :  { %8649 = vst [vmem:[#allocation177_spill] sm:$0xff] %v5225_v21  ;;  %v5227_v37 = vpop.permute.xlu0 %1602 }
 0x245   :  { %8650 = vst [vmem:[#allocation178_spill] sm:$0xff] %v5227_v37  ;;  %2100 = vrot.lane.b32.xlu1 %v4001_v14, %s3862_s23  ;;  %v581_v14 = vsel %vm32_vm1, 0.0, %v4705_v34 }
 0x246   :  { %2110 = vrot.lane.b32.xlu0 %v4291_v13, %s3862_s23  ;;  %v582_v12 = vmul.f32 %v581_v14, %v4291_v13  ;;  %v599_v14 = vsel %vm32_vm1, %v4729_v61, %v4731_v19 }
 0x247   :  { %v5233_v44 = vpop.permute.xlu1 %1604 }
 0x248   :  { %8651 = vst [vmem:[#allocation179_spill] sm:$0xff] %v5233_v44  ;;  %v5235_v45 = vpop.permute.xlu0 %1678 }
 0x249   :  { %8652 = vst [vmem:[#allocation180_spill] sm:$0xff] %v5235_v45  ;;  %2112 = vrot.lane.b32.xlu1 %v4322_v39, %s3862_s23 }
 0x24a   :  { %2114 = vrot.lane.b32.xlu0 %v4324_v27, %s3862_s23 }
 0x24b   :  { %v5241_v28 = vpop.permute.xlu1 %1680 }
 0x24c   :  { %8653 = vst [vmem:[#allocation181_spill] sm:$0xff] %v5241_v28  ;;  %v5243_v21 = vpop.permute.xlu0 %1682 }
 0x24d   :  { %8654 = vst [vmem:[#allocation182_spill] sm:$0xff] %v5243_v21  ;;  %2116 = vrot.lane.b32.xlu1 %v4336_v17, %s3862_s23 }
 0x24e   :  { %2130 = vrot.lane.b32.xlu0 %v4334_v23, %s3862_s23 }
 0x24f   :  { %v5249_v37 = vpop.permute.xlu1 %1684 }
 0x250   :  { %8655 = vst [vmem:[#allocation183_spill] sm:$0xff] %v5249_v37  ;;  %v5251_v44 = vpop.permute.xlu0 %1718 }
 0x251   :  { %8656 = vst [vmem:[#allocation184_spill] sm:$0xff] %v5251_v44  ;;  %2132 = vrot.lane.b32.xlu1 %v4362_v56, %s3862_s23 }
 0x252   :  { %2134 = vrot.lane.b32.xlu0 %v4364_v15, %s3862_s23 }
 0x253   :  { %v5257_v45 = vpop.permute.xlu1 %1720 }
 0x254   :  { %8657 = vst [vmem:[#allocation185_spill] sm:$0xff] %v5257_v45  ;;  %v5259_v28 = vpop.permute.xlu0 %1722 }
 0x255   :  { %8658 = vst [vmem:[#allocation186_spill] sm:$0xff] %v5259_v28  ;;  %2136 = vrot.lane.b32.xlu1 %v4376_v38, %s3862_s23 }
 0x256   :  { %2154 = vrot.lane.b32.xlu0 %v4374_v49, %s3862_s23 }
 0x257   :  { %v5265_v21 = vpop.permute.xlu1 %1724 }
 0x258   :  { %8659 = vst [vmem:[#allocation187_spill] sm:$0xff] %v5265_v21  ;;  %v5267_v37 = vpop.permute.xlu0 %1734 }
 0x259   :  { %8660 = vst [vmem:[#allocation188_spill] sm:$0xff] %v5267_v37  ;;  %2156 = vrot.lane.b32.xlu1 %v4390_v4, %s3862_s23 }
 0x25a   :  { %2158 = vrot.lane.b32.xlu0 %v8564_v41, %s3862_s23 }
 0x25b   :  { %v5273_v44 = vpop.permute.xlu1 %1736 }
 0x25c   :  { %8661 = vst [vmem:[#allocation189_spill] sm:$0xff] %v5273_v44  ;;  %v5275_v45 = vpop.permute.xlu0 %1738 }
 0x25d   :  { %8662 = vst [vmem:[#allocation190_spill] sm:$0xff] %v5275_v45  ;;  %2160 = vrot.lane.b32.xlu1 %v4404_v48, %s3862_s23 }
 0x25e   :  { %2178 = vrot.lane.b32.xlu0 %v4402_v51, %s3862_s23 }
 0x25f   :  { %v5281_v28 = vpop.permute.xlu1 %1740 }
 0x260   :  { %8663 = vst [vmem:[#allocation191_spill] sm:$0xff] %v5281_v28  ;;  %v5283_v21 = vpop.permute.xlu0 %1754 }
 0x261   :  { %8664 = vst [vmem:[#allocation192_spill] sm:$0xff] %v5283_v21  ;;  %2180 = vrot.lane.b32.xlu1 %v4418_v31, %s3862_s23 }
 0x262   :  { %2182 = vrot.lane.b32.xlu0 %v4420_v52, %s3862_s23 }
 0x263   :  { %v5289_v37 = vpop.permute.xlu1 %1756 }
 0x264   :  { %8665 = vst [vmem:[#allocation193_spill] sm:$0xff] %v5289_v37  ;;  %v5291_v44 = vpop.permute.xlu0 %1758 }
 0x265   :  { %8666 = vst [vmem:[#allocation194_spill] sm:$0xff] %v5291_v44  ;;  %2184 = vrot.lane.b32.xlu1 %v4432_v33, %s3862_s23 }
 0x266   :  { %2202 = vrot.lane.b32.xlu0 %v4430_v16, %s3862_s23 }
 0x267   :  { %v5297_v45 = vpop.permute.xlu1 %1760 }
 0x268   :  { %8667 = vst [vmem:[#allocation195_spill] sm:$0xff] %v5297_v45  ;;  %v5299_v28 = vpop.permute.xlu0 %1778 }
 0x269   :  { %8668 = vst [vmem:[#allocation196_spill] sm:$0xff] %v5299_v28  ;;  %2204 = vrot.lane.b32.xlu1 %v4447_v54, %s3862_s23 }
 0x26a   :  { %2206 = vrot.lane.b32.xlu0 %v4449_v47, %s3862_s23 }
 0x26b   :  { %v5305_v21 = vpop.permute.xlu1 %1780 }
 0x26c   :  { %8669 = vst [vmem:[#allocation197_spill] sm:$0xff] %v5305_v21  ;;  %v5307_v37 = vpop.permute.xlu0 %1782  ;;  %v605_v21 = vsel %vm32_vm1, 0.0, %v4723_v63 }
 0x26d   :  { %8670 = vst [vmem:[#allocation198_spill] sm:$0xff] %v5307_v37  ;;  %2208 = vrot.lane.b32.xlu1 %v4465_v24, %s3862_s23 }
 0x26e   :  { %2226 = vrot.lane.b32.xlu0 %v4463_v30, %s3862_s23 }
 0x26f   :  { %v5313_v44 = vpop.permute.xlu1 %1784 }
 0x270   :  { %8671 = vst [vmem:[#allocation199_spill] sm:$0xff] %v5313_v44  ;;  %v5315_v45 = vpop.permute.xlu0 %1802  ;;  %v606_v44 = vmul.f32 %v605_v21, %v4334_v23  ;;  %v574_v23 = vsel %vm32_vm1, %v4705_v34, %v4713_v32  ;;  %v8677_v32 = vld [vmem:[#allocation59_spill] sm:$0xff] }
 0x271   :  { %8672 = vst [vmem:[#allocation200_spill] sm:$0xff] %v5315_v45  ;;  %2228 = vrot.lane.b32.xlu1 %v4476_v1, %s3862_s23  ;;  %v633_v45 = vsel %vm32_vm1, 0.0, %v4739_v57 }
 0x272   :  { %2230 = vrot.lane.b32.xlu0 %v4478_v20, %s3862_s23  ;;  %v610_v13 = vadd.f32 %v606_v44, %v582_v12  ;;  %v608_v44 = vmul.f32 %v599_v14, %v4364_v15 }
 0x273   :  { %v5323_v37 = vpop.permute.xlu1 %1804 }
 0x274   :  { %8673 = vst [vmem:[#allocation201_spill] sm:$0xff] %v5323_v37  ;;  %v5325_v28 = vpop.permute.xlu0 %1806  ;;  %v661_v37 = vsel %vm32_vm1, 0.0, %v4755_v35 }
 0x275   :  { %8674 = vst [vmem:[#allocation202_spill] sm:$0xff] %v5325_v28  ;;  %2232 = vrot.lane.b32.xlu1 %v4497_v2, %s3862_s23  ;;  %v598_v28 = vsel %vm32_vm1, %v4723_v63, %v4729_v61  ;;  %v634_v63 = vmul.f32 %v633_v45, %v4374_v49  ;;  %v600_v45 = vsel %vm32_vm1, %v4731_v19, %v4737_v5  ;;  %v8678_v49 = vld [vmem:[#allocation68_spill] sm:$0xff] }
 0x276   :  { %2250 = vrot.lane.b32.xlu0 %v4495_v58, %s3862_s23  ;;  %v607_v34 = vmul.f32 %v598_v28, %v4362_v56  ;;  %v662_v12 = vmul.f32 %v661_v37, %v4402_v51  ;;  %v584_v61 = vmul.f32 %v575_v8, %v4324_v27  ;;  %v717_v43 = vsel %vm32_vm1, 0.0, %v8678_v49  ;;  %v8681_v5 = vld [vmem:[#allocation60_spill] sm:$0xff] }
 0x277   :  { %v5342_v11 = vpop.permute.xlu1 %1808  ;;  %v638_v19 = vadd.f32 %v634_v63, %v610_v13  ;;  %v609_v14 = vmul.f32 %v600_v45, %v4376_v38 }
 0x278   :  { %8675 = vst [vmem:[#allocation203_spill] sm:$0xff] %v5342_v11  ;;  %v5344_v21 = vpop.permute.xlu0 %1826  ;;  %v576_v11 = vsel %vm32_vm1, %v4715_v42, %v4721_v50  ;;  %v626_v42 = vsel %vm32_vm1, %v4739_v57, %v8677_v32  ;;  %v583_v50 = vmul.f32 %v574_v23, %v4322_v39  ;;  %v627_v57 = vsel %vm32_vm1, %v8677_v32, %v8681_v5 }
 0x279   :  { %8676 = vst [vmem:[#allocation204_spill] sm:$0xff] %v5344_v21  ;;  %v689_v21 = vsel %vm32_vm1, 0.0, %v4771_v40  ;;  %2252 = vrot.lane.b32.xlu1 %v4525_v46, %s3862_s23  ;;  %v628_v23 = vsel %vm32_vm1, %v8681_v5, %v8682_v10  ;;  %v585_v37 = vmul.f32 %v576_v11, %v4336_v17  ;;  %v635_v51 = vmul.f32 %v626_v42, %v4390_v4  ;;  %v8684_v10 = vld [vmem:[#allocation62_spill] sm:$0xff]  ;;  %v8685_v42 = vld [vmem:[#allocation63_spill] sm:$0xff] }
 0x27a   :  { %2254 = vrot.lane.b32.xlu0 %v4527_v7, %s3862_s23  ;;  %v690_v8 = vmul.f32 %v689_v21, %v4430_v16  ;;  %v611_v13 = vadd.f32 %v607_v34, %v583_v50  ;;  %v666_v63 = vadd.f32 %v662_v12, %v638_v19  ;;  %v654_v21 = vsel %vm32_vm1, %v4755_v35, %v8684_v10  ;;  %v8686_v16 = vld [vmem:[#allocation76_spill] sm:$0xff]  ;;  %v8689_v35 = vld [vmem:[#allocation65_spill] sm:$0xff] }
 0x27b   :  { %v5378_v28 = vpop.permute.xlu1 %1828  ;;  %v718_v11 = vmul.f32 %v717_v43, %v4463_v30  ;;  %v636_v45 = vmul.f32 %v627_v57, %v8564_v41  ;;  %v637_v32 = vmul.f32 %v628_v23, %v4404_v48  ;;  %v655_v5 = vsel %vm32_vm1, %v8684_v10, %v8685_v42  ;;  %v8690_v10 = vld [vmem:[#allocation80_spill] sm:$0xff] }
 0x27c   :  { %8679 = vst [vmem:[#allocation59_spill] sm:$0xff] %v5378_v28  ;;  %v5380_v56 = vpop.permute.xlu0 %1830  ;;  %v8683_v28 = vld [vmem:[#allocation72_spill] sm:$0xff]  ;;  %v773_v4 = vsel %vm32_vm1, 0.0, %v8686_v16  ;;  %v612_v12 = vadd.f32 %v608_v44, %v584_v61  ;;  %v694_v50 = vadd.f32 %v690_v8, %v666_v63  ;;  %v682_v43 = vsel %vm32_vm1, %v4771_v40, %v8689_v35  ;;  %v8691_v44 = vld [vmem:[#allocation66_spill] sm:$0xff] }
 0x27d   :  { %8680 = vst [vmem:[#allocation68_spill] sm:$0xff] %v5380_v56  ;;  %v745_v56 = vsel %vm32_vm1, 0.0, %v8683_v28  ;;  %2256 = vrot.lane.b32.xlu1 %v4544_v62, %s3862_s23  ;;  %v613_v57 = vadd.f32 %v609_v14, %v585_v37  ;;  %v639_v23 = vadd.f32 %v635_v51, %v611_v13  ;;  %v663_v30 = vmul.f32 %v654_v21, %v4418_v31  ;;  %v8692_v13 = vld [vmem:[#allocation69_spill] sm:$0xff] }
 0x27e   :  { %2274 = vrot.lane.b32.xlu0 %v4542_v53, %s3862_s23  ;;  %v746_v19 = vmul.f32 %v745_v56, %v4495_v58  ;;  %v801_v48 = vsel %vm32_vm1, 0.0, %v8690_v10  ;;  %v664_v61 = vmul.f32 %v655_v5, %v4420_v52  ;;  %v683_v40 = vsel %vm32_vm1, %v8689_v35, %v8691_v44  ;;  %v8695_v5 = vld [vmem:[#allocation64_spill] sm:$0xff]  ;;  %v8696_v35 = vld [vmem:[#allocation70_spill] sm:$0xff] }
 0x27f   :  { %v5409_v38 = vpop.permute.xlu1 %1832  ;;  %v722_v56 = vadd.f32 %v718_v11, %v694_v50  ;;  %v774_v51 = vmul.f32 %v773_v4, %v4542_v53  ;;  %v640_v8 = vadd.f32 %v636_v45, %v612_v12  ;;  %v641_v37 = vadd.f32 %v637_v32, %v613_v57  ;;  %v8697_v50 = vld [vmem:[#allocation73_spill] sm:$0xff]  ;;  %v8698_v57 = vld [vmem:[#allocation74_spill] sm:$0xff] }
 0x280   :  { %8687 = vst [vmem:[#allocation60_spill] sm:$0xff] %v5409_v38  ;;  %v5411_v34 = vpop.permute.xlu0 %1850  ;;  %v691_v14 = vmul.f32 %v682_v43, %v4447_v54  ;;  %v710_v63 = vsel %vm32_vm1, %v8678_v49, %v8692_v13  ;;  %v711_v4 = vsel %vm32_vm1, %v8692_v13, %v8696_v35  ;;  %v802_v45 = vmul.f32 %v801_v48, %v4577_v9 }
 0x281   :  { %8688 = vst [vmem:[#allocation61_spill] sm:$0xff] %v5411_v34  ;;  %2276 = vrot.lane.b32.xlu1 %v4559_v22, %s3862_s23  ;;  %v656_v34 = vsel %vm32_vm1, %v8685_v42, %v8695_v5  ;;  %v750_v11 = vadd.f32 %v746_v19, %v722_v56  ;;  %v667_v32 = vadd.f32 %v663_v30, %v639_v23 }
 0x282   :  { %2278 = vrot.lane.b32.xlu0 %v4562_v26, %s3862_s23  ;;  %v692_v12 = vmul.f32 %v683_v40, %v4449_v47  ;;  %v738_v49 = vsel %vm32_vm1, %v8683_v28, %v8697_v50  ;;  %v668_v42 = vadd.f32 %v664_v61, %v640_v8  ;;  %v719_v43 = vmul.f32 %v710_v63, %v4476_v1  ;;  %v8699_v40 = vld [vmem:[#allocation67_spill] sm:$0xff]  ;;  %v8702_v8 = vld [vmem:[#allocation77_spill] sm:$0xff] }
 0x283   :  { %v5433_v21 = vpop.permute.xlu1 %1852  ;;  %v739_v48 = vsel %vm32_vm1, %v8697_v50, %v8698_v57  ;;  %v778_v30 = vadd.f32 %v774_v51, %v750_v11  ;;  %v665_v19 = vmul.f32 %v656_v34, %v4432_v33  ;;  %v695_v23 = vadd.f32 %v691_v14, %v667_v32  ;;  %v8703_v51 = vld [vmem:[#allocation78_spill] sm:$0xff]  ;;  %v8704_v32 = vld [vmem:[#allocation71_spill] sm:$0xff] }
 0x284   :  { %8693 = vst [vmem:[#allocation72_spill] sm:$0xff] %v5433_v21  ;;  %v5435_v38 = vpop.permute.xlu0 %1854  ;;  %v684_v28 = vsel %vm32_vm1, %v8691_v44, %v8699_v40  ;;  %v720_v56 = vmul.f32 %v711_v4, %v4478_v20  ;;  %v747_v61 = vmul.f32 %v738_v49, %v4525_v46  ;;  %v766_v63 = vsel %vm32_vm1, %v8686_v16, %v8702_v8  ;;  %v8705_v49 = vld [vmem:[#allocation81_spill] sm:$0xff] }
 0x285   :  { %8694 = vst [vmem:[#allocation62_spill] sm:$0xff] %v5435_v38  ;;  %2280 = vrot.lane.b32.xlu1 %v4580_v36, %s3862_s23  ;;  %v767_v34 = vsel %vm32_vm1, %v8702_v8, %v8703_v51  ;;  %v806_v14 = vadd.f32 %v802_v45, %v778_v30  ;;  %v696_v11 = vadd.f32 %v692_v12, %v668_v42  ;;  %v8706_v12 = vld [vmem:[#allocation82_spill] sm:$0xff] }
 0x286   :  { %2298 = vrot.lane.b32.xlu0 %v4577_v9, %s3862_s23  ;;  %v712_v44 = vsel %vm32_vm1, %v8696_v35, %v8704_v32  ;;  %v748_v4 = vmul.f32 %v739_v48, %v4527_v7  ;;  %v693_v16 = vmul.f32 %v684_v28, %v4465_v24  ;;  %v723_v50 = vadd.f32 %v719_v43, %v695_v23  ;;  %v8709_v28 = vld [vmem:[#allocation75_spill] sm:$0xff] }
 0x287   :  { %v5461_v13 = vpop.permute.xlu1 %1856  ;;  %v794_v45 = vsel %vm32_vm1, %v8690_v10, %v8705_v49  ;;  %v795_v42 = vsel %vm32_vm1, %v8705_v49, %v8706_v12  ;;  %v669_v35 = vadd.f32 %v665_v19, %v641_v37  ;;  %v724_v30 = vadd.f32 %v720_v56, %v696_v11 }
 0x288   :  { %8700 = vst [vmem:[#allocation63_spill] sm:$0xff] %v5461_v13  ;;  %v5463_v5 = vpop.permute.xlu0 %1874  ;;  %v775_v48 = vmul.f32 %v766_v63, %v4559_v22  ;;  %v776_v40 = vmul.f32 %v767_v34, %v4562_v26  ;;  %v721_v43 = vmul.f32 %v712_v44, %v4497_v2  ;;  %v751_v23 = vadd.f32 %v747_v61, %v723_v50  ;;  %v8710_v61 = vld [vmem:[#allocation79_spill] sm:$0xff] }
 0x289   :  { %8701 = vst [vmem:[#allocation76_spill] sm:$0xff] %v5463_v5  ;;  %2300 = vrot.lane.b32.xlu1 %v4595_v3, %s3862_s23  ;;  %v740_v10 = vsel %vm32_vm1, %v8698_v57, %v8709_v28  ;;  %v810_v13 = vsel %vm460_vm8, %v806_v14, 0.0  ;;  %v752_v49 = vadd.f32 %v748_v4, %v724_v30  ;;  %v886_v37 = vrot.slane %v806_v14, 4 }
 0x28a   :  { %2302 = vrot.lane.b32.xlu0 %v4598_v0, %s3862_s23  ;;  %v803_v19 = vmul.f32 %v794_v45, %v4595_v3  ;;  %v804_v56 = vmul.f32 %v795_v42, %v4598_v0  ;;  %v697_v63 = vadd.f32 %v693_v16, %v669_v35  ;;  %v768_v34 = vsel %vm32_vm1, %v8703_v51, %v8710_v61  ;;  %v8713_v42 = vld [vmem:[#allocation83_spill] sm:$0xff]  ;;  %v8776_v0 = vld [vmem:[#allocation102_spill] sm:$0xff] }
 0x28b   :  { %v5489_v8 = vpop.permute.xlu1 %1876  ;;  %v749_v57 = vmul.f32 %v740_v10, %v4544_v62  ;;  %v779_v11 = vadd.f32 %v775_v48, %v751_v23  ;;  %v780_v44 = vadd.f32 %v776_v40, %v752_v49  ;;  %v811_v14 = vrot.slane %v810_v13, 4 }
 0x28c   :  { %8707 = vst [vmem:[#allocation65_spill] sm:$0xff] %v5489_v8  ;;  %v5491_v32 = vpop.permute.xlu0 %1878  ;;  %v725_v45 = vadd.f32 %v721_v43, %v697_v63  ;;  %v796_v30 = vsel %vm32_vm1, %v8706_v12, %v8713_v42  ;;  %v777_v16 = vmul.f32 %v768_v34, %v4580_v36  ;;  %v894_v35 = vsel %vm460_vm8, %v886_v37, 0.0 }
 0x28d   :  { %8708 = vst [vmem:[#allocation80_spill] sm:$0xff] %v5491_v32  ;;  %2304 = vrot.lane.b32.xlu1 %v4613_v6, %s3862_s23  ;;  %v807_v28 = vadd.f32 %v803_v19, %v779_v11  ;;  %v808_v51 = vadd.f32 %v804_v56, %v780_v44  ;;  %v812_v40 = vadd.f32 %v811_v14, %v810_v13  ;;  %v895_v12 = vrot.slane %v894_v35, 4 }
 0x28e   :  { %2350 = vrot.lane.b32.xlu0 %v4665_v55, %s3862_s23  ;;  %v753_v48 = vadd.f32 %v749_v57, %v725_v45  ;;  %v805_v43 = vmul.f32 %v796_v30, %v4613_v6  ;;  %v8718_v45 = vld [vmem:[#allocation56_spill] sm:$0xff] }
 0x28f   :  { %v5508_v4 = vpop.permute.xlu1 %1880  ;;  %v817_v37 = vsel %vm460_vm8, %v807_v28, 0.0  ;;  %v824_v19 = vsel %vm460_vm8, %v808_v51, 0.0  ;;  %v887_v56 = vrot.slane %v807_v28, 4  ;;  %v813_v13 = vrot.slane %v812_v40, 2 }
 0x290   :  { %8711 = vst [vmem:[#allocation66_spill] sm:$0xff] %v5508_v4  ;;  %v5510_v50 = vpop.permute.xlu0 %1898  ;;  %v781_v49 = vadd.f32 %v777_v16, %v753_v48  ;;  %v888_v63 = vrot.slane %v808_v51, 4  ;;  %v896_v11 = vadd.f32 %v895_v12, %v894_v35  ;;  %v818_v44 = vrot.slane %v817_v37, 4 }
 0x291   :  { %8712 = vst [vmem:[#allocation69_spill] sm:$0xff] %v5510_v50  ;;  %2352 = vrot.lane.b32.xlu1 %v4675_v25, %s3862_s23  ;;  %v825_v14 = vrot.slane %v824_v19, 4  ;;  %v901_v42 = vsel %vm460_vm8, %v887_v56, 0.0  ;;  %v814_v30 = vadd.f32 %v813_v13, %v812_v40  ;;  %v8725_v40 = vld [vmem:[#allocation3_spill] sm:$0xff]  ;;  %v8726_v56 = vld [vmem:[#allocation45_spill] sm:$0xff] }
 0x292   :  { %2354 = vrot.lane.b32.xlu0 %v4677_v29, %s3862_s23  ;;  %v809_v61 = vadd.f32 %v805_v43, %v781_v49  ;;  %v908_v16 = vsel %vm460_vm8, %v888_v63, 0.0  ;;  %v897_v43 = vrot.slane %v896_v11, 2  ;;  %v819_v35 = vadd.f32 %v818_v44, %v817_v37  ;;  %v8721_v49 = vld [vmem:[#allocation44_spill] sm:$0xff]  ;;  %v8728_v63 = vld [vmem:[#allocation47_spill] sm:$0xff] }
 0x293   :  { %v5522_v23 = vpop.permute.xlu1 %1900  ;;  %v826_v12 = vadd.f32 %v825_v14, %v824_v19  ;;  %v5558_v13 = vsel %vm32_vm1, %v8721_v49, %v8726_v56  ;;  %v5563_v37 = vsel %vm32_vm1, %v8726_v56, %v8728_v63  ;;  %v909_v19 = vrot.slane %v908_v16, 4  ;;  %v8730_v14 = vld [vmem:[#allocation53_spill] sm:$0xff] }
 0x294   :  { %8714 = vst [vmem:[#allocation64_spill] sm:$0xff] %v5522_v23  ;;  %v5524_v10 = vpop.permute.xlu0 %1902  ;;  %v889_v28 = vrot.slane %v809_v61, 4  ;;  %v8724_v23 = vld [vmem:[#allocation58_spill] sm:$0xff]  ;;  %8727 = vst [vmem:[#allocation71_spill] sm:$0xff] %v5558_v13  ;;  %v831_v44 = vsel %vm460_vm8, %v809_v61, 0.0  ;;  %v815_v32 = vrot.slane %v814_v30, 1  ;;  %v5578_v56 = vadd.f32 %v897_v43, %v896_v11 }
 0x295   :  { %8715 = vst [vmem:[#allocation70_spill] sm:$0xff] %v5524_v10  ;;  %2356 = vrot.lane.b32.xlu1 %v4685_v60, %s3862_s23  ;;  %v902_v10 = vrot.slane %v901_v42, 4  ;;  %8729 = vst [vmem:[#allocation81_spill] sm:$0xff] %v5563_v37  ;;  %v820_v63 = vrot.slane %v819_v35, 2  ;;  %v827_v50 = vrot.slane %v826_v12, 2  ;;  %v8737_v61 = vld [vmem:[#allocation88_spill] sm:$0xff]  ;;  %v5598_v37 = vadd.f32 %v909_v19, %v908_v16 }
 0x296   :  { %2430 = vrot.lane.b32.xlu0 %v4683_v18, %s3862_s23  ;;  %v915_v8 = vsel %vm460_vm8, %v889_v28, 0.0  ;;  %8736 = vst [vmem:[#allocation83_spill] sm:$0xff] %v5578_v56  ;;  %v1017_v5 = vsel %vm49_vm0, 0.0, %v8737_v61  ;;  %v8740_v28 = vld [vmem:[#allocation57_spill] sm:$0xff]  ;;  %v8743_v11 = vld [vmem:[#allocation4_spill] sm:$0xff]  ;;  %v8769_v56 = vld [vmem:[#allocation95_spill] sm:$0xff] }
 0x297   :  { %v5532_v34 = vpop.permute.xlu1 %1904  ;;  %v8744_v43 = vld [vmem:[#allocation5_spill] sm:$0xff]  ;;  %v916_v13 = vrot.slane %v915_v8, 4  ;;  %v5618_v6 = vadd.f32 %v820_v63, %v819_v35  ;;  %v8760_v63 = vld [vmem:[#allocation12_spill] sm:$0xff] }
 0x298   :  { %8716 = vst [vmem:[#allocation73_spill] sm:$0xff] %v5532_v34  ;;  %v5534_v57 = vpop.permute.xlu0 %1922  ;;  %v8722_v34 = vld [vmem:[#allocation43_spill] sm:$0xff] }
 0x299   :  { %8717 = vst [vmem:[#allocation74_spill] sm:$0xff] %v5534_v57  ;;  %2432 = vrot.lane.b32.xlu1 %v4695_v59, %s3862_s23  ;;  %v5549_v4 = vsel %vm32_vm1, %v8722_v34, %v8721_v49  ;;  %v8733_v57 = vld [vmem:[#allocation84_spill] sm:$0xff] }
 0x29a   :  { %2434 = vrot.lane.b32.xlu0 %v8718_v45, %s3862_s23  ;;  %8723 = vst [vmem:[#allocation78_spill] sm:$0xff] %v5549_v4  ;;  %v997_v49 = vsel %vm49_vm0, 0.0, %v8733_v57  ;;  %v8745_v4 = vld [vmem:[#allocation7_spill] sm:$0xff] }
 0x29b   :  { %v5542_v51 = vpop.permute.xlu1 %1924 }
 0x29c   :  { %8719 = vst [vmem:[#allocation67_spill] sm:$0xff] %v5542_v51  ;;  %v5544_v48 = vpop.permute.xlu0 %1926 }
 0x29d   :  { %8720 = vst [vmem:[#allocation77_spill] sm:$0xff] %v5544_v48  ;;  %2436 = vrot.lane.b32.xlu1 %v8724_v23, %s3862_s23  ;;  %v8731_v48 = vld [vmem:[#allocation48_spill] sm:$0xff] }
 0x29e   :  { %2470 = vrot.lane.b32.xlu0 %v8725_v40, %s3863_s24  ;;  %v5569_v51 = vsel %vm49_vm0, %v8731_v48, %v8730_v14  ;;  %v8738_v40 = vld [vmem:[#allocation54_spill] sm:$0xff] }
 0x29f   :  { %8732 = vst [vmem:[#allocation82_spill] sm:$0xff] %v5569_v51  ;;  %v5574_v38 = vpop.permute.xlu1 %1928  ;;  %v5585_v51 = vsel %vm49_vm0, %v8730_v14, %v8738_v40  ;;  %v5590_v48 = vsel %vm49_vm0, %v8738_v40, %v8740_v28  ;;  %v998_v14 = vmul.f32 %v997_v49, %v8745_v4  ;;  %v5604_v40 = vadd.f32 %v815_v32, %v814_v30  ;;  %v8749_v28 = vld [vmem:[#allocation87_spill] sm:$0xff]  ;;  %v8757_v49 = vld [vmem:[#allocation6_spill] sm:$0xff] }
 0x2a0   :  { %8734 = vst [vmem:[#allocation75_spill] sm:$0xff] %v5574_v38  ;;  %v5576_v21 = vpop.permute.xlu0 %1974  ;;  %8739 = vst [vmem:[#allocation44_spill] sm:$0xff] %v5585_v51  ;;  %v5592_v38 = vadd.f32 %v902_v10, %v901_v42  ;;  %v8746_v51 = vld [vmem:[#allocation85_spill] sm:$0xff]  ;;  %v8748_v10 = vld [vmem:[#allocation86_spill] sm:$0xff]  ;;  %v5620_v32 = vadd.f32 %v827_v50, %v826_v12  ;;  %v5636_v50 = vadd.f32 %v916_v13, %v915_v8 }
 0x2a1   :  { %8735 = vst [vmem:[#allocation79_spill] sm:$0xff] %v5576_v21  ;;  %8741 = vst [vmem:[#allocation45_spill] sm:$0xff] %v5590_v48  ;;  %v832_v21 = vrot.slane %v831_v44, 4  ;;  %2472 = vrot.lane.b32.xlu1 %v8743_v11, %s3863_s24  ;;  %v990_v34 = vsel %vm49_vm0, %v8733_v57, %v8746_v51  ;;  %v991_v42 = vsel %vm49_vm0, %v8746_v51, %v8748_v10  ;;  %v8755_v57 = vld [vmem:[#allocation89_spill] sm:$0xff] }
 0x2a2   :  { %8742 = vst [vmem:[#allocation47_spill] sm:$0xff] %v5592_v38  ;;  %2474 = vrot.lane.b32.xlu0 %v8744_v43, %s3863_s24  ;;  %8747 = vst [vmem:[#allocation53_spill] sm:$0xff] %v5604_v40  ;;  %v992_v48 = vsel %vm49_vm0, %v8748_v10, %v8749_v28  ;;  %v8750_v43 = vld [vmem:[#allocation10_spill] sm:$0xff]  ;;  %v1010_v30 = vsel %vm49_vm0, %v8737_v61, %v8755_v57  ;;  %v1000_v35 = vmul.f32 %v991_v42, %v4324_v27 }
 0x2a3   :  { %v1018_v16 = vmul.f32 %v1017_v5, %v8750_v43  ;;  %v5613_v19 = vpop.permute.xlu1 %1976  ;;  %8753 = vst [vmem:[#allocation54_spill] sm:$0xff] %v5618_v6  ;;  %8754 = vst [vmem:[#allocation57_spill] sm:$0xff] %v5620_v32  ;;  %v5626_v40 = vadd.f32 %v832_v21, %v831_v44  ;;  %v999_v5 = vmul.f32 %v990_v34, %v4322_v39  ;;  %v8756_v10 = vld [vmem:[#allocation90_spill] sm:$0xff]  ;;  %v8759_v21 = vld [vmem:[#allocation91_spill] sm:$0xff] }
 0x2a4   :  { %8751 = vst [vmem:[#allocation84_spill] sm:$0xff] %v5613_v19  ;;  %v5615_v11 = vpop.permute.xlu0 %1978  ;;  %v1011_v28 = vsel %vm49_vm0, %v8755_v57, %v8756_v10  ;;  %8758 = vst [vmem:[#allocation85_spill] sm:$0xff] %v5636_v50  ;;  %v1001_v12 = vmul.f32 %v992_v48, %v4336_v17  ;;  %v1012_v34 = vsel %vm49_vm0, %v8756_v10, %v8759_v21  ;;  %v8761_v57 = vld [vmem:[#allocation92_spill] sm:$0xff]  ;;  %v8765_v48 = vld [vmem:[#allocation93_spill] sm:$0xff] }
 0x2a5   :  { %8752 = vst [vmem:[#allocation88_spill] sm:$0xff] %v5615_v11  ;;  %2476 = vrot.lane.b32.xlu1 %v8757_v49, %s3863_s24  ;;  %v1022_v44 = vadd.f32 %v1018_v16, %v998_v14  ;;  %v1019_v61 = vmul.f32 %v1010_v30, %v8760_v63  ;;  %v1041_v51 = vsel %vm49_vm0, 0.0, %v8761_v57  ;;  %v8762_v11 = vld [vmem:[#allocation98_spill] sm:$0xff]  ;;  %v1020_v13 = vmul.f32 %v1011_v28, %v4364_v15  ;;  %v8767_v16 = vld [vmem:[#allocation99_spill] sm:$0xff]  ;;  %v8771_v32 = vld [vmem:[#allocation100_spill] sm:$0xff] }
 0x2a6   :  { %2486 = vrot.lane.b32.xlu0 %v8745_v4, %s3863_s24  ;;  %v857_v19 = vsel %vm32_vm1, 0.0, %v8762_v11  ;;  %v1034_v42 = vsel %vm49_vm0, %v8761_v57, %v8765_v48  ;;  %v8766_v10 = vld [vmem:[#allocation94_spill] sm:$0xff]  ;;  %v850_v30 = vsel %vm32_vm1, %v8762_v11, %v8767_v16  ;;  %v8768_v21 = vld [vmem:[#allocation15_spill] sm:$0xff]  ;;  %v851_v57 = vsel %vm32_vm1, %v8767_v16, %v8771_v32  ;;  %v8775_v6 = vld [vmem:[#allocation16_spill] sm:$0xff] }
 0x2a7   :  { %v5648_v49 = vpop.permute.xlu1 %1980  ;;  %v1035_v14 = vsel %vm49_vm0, %v8765_v48, %v8766_v10  ;;  %v1021_v4 = vmul.f32 %v1012_v34, %v8768_v21  ;;  %v8772_v11 = vld [vmem:[#allocation14_spill] sm:$0xff]  ;;  %v8773_v34 = vld [vmem:[#allocation97_spill] sm:$0xff]  ;;  %v1043_v16 = vmul.f32 %v1034_v42, %v8775_v6  ;;  %v8779_v50 = vld [vmem:[#allocation19_spill] sm:$0xff] }
 0x2a8   :  { %8763 = vst [vmem:[#allocation86_spill] sm:$0xff] %v5648_v49  ;;  %v5650_v8 = vpop.permute.xlu0 %2054  ;;  %v8770_v49 = vld [vmem:[#allocation96_spill] sm:$0xff]  ;;  %v1042_v48 = vmul.f32 %v1041_v51, %v8772_v11  ;;  %v1044_v62 = vmul.f32 %v1035_v14, %v8564_v41 }
 0x2a9   :  { %8764 = vst [vmem:[#allocation87_spill] sm:$0xff] %v5650_v8  ;;  %v1036_v8 = vsel %vm49_vm0, %v8766_v10, %v8769_v56  ;;  %v1065_v28 = vsel %vm49_vm0, 0.0, %v8770_v49  ;;  %2488 = vrot.lane.b32.xlu1 %v4322_v39, %s3863_s24  ;;  %v1058_v38 = vsel %vm49_vm0, %v8770_v49, %v8773_v34  ;;  %v858_v56 = vmul.f32 %v857_v19, %v4665_v55  ;;  %v8774_v10 = vld [vmem:[#allocation101_spill] sm:$0xff]  ;;  %v8780_v55 = vld [vmem:[#allocation18_spill] sm:$0xff] }
 0x2aa   :  { %2490 = vrot.lane.b32.xlu0 %v4324_v27, %s3863_s24  ;;  %v852_v36 = vsel %vm32_vm1, %v8771_v32, %v8774_v10  ;;  %v859_v39 = vmul.f32 %v850_v30, %v4675_v25  ;;  %v941_v27 = vsel %vm32_vm1, 0.0, %v8776_v0  ;;  %v1023_v49 = vadd.f32 %v1019_v61, %v999_v5 }
 0x2ab   :  { %v5688_v51 = vpop.permute.xlu1 %2056  ;;  %v1045_v19 = vmul.f32 %v1036_v8, %v8779_v50  ;;  %v1066_v3 = vmul.f32 %v1065_v28, %v8780_v55  ;;  %v860_v32 = vmul.f32 %v851_v57, %v4677_v29  ;;  %v1024_v10 = vadd.f32 %v1020_v13, %v1000_v35  ;;  %v8798_v57 = vld [vmem:[#allocation113_spill] sm:$0xff] }
 0x2ac   :  { %8777 = vst [vmem:[#allocation89_spill] sm:$0xff] %v5688_v51  ;;  %v5690_v2 = vpop.permute.xlu0 %2058  ;;  %v1067_v14 = vmul.f32 %v1058_v38, %v4418_v31  ;;  %v861_v30 = vmul.f32 %v852_v36, %v4685_v60  ;;  %v1025_v5 = vadd.f32 %v1021_v4, %v1001_v12  ;;  %v1046_v61 = vadd.f32 %v1042_v48, %v1022_v44  ;;  %v8783_v60 = vld [vmem:[#allocation108_spill] sm:$0xff]  ;;  %v8784_v48 = vld [vmem:[#allocation103_spill] sm:$0xff] }
 0x2ad   :  { %8778 = vst [vmem:[#allocation90_spill] sm:$0xff] %v5690_v2  ;;  %2492 = vrot.lane.b32.xlu1 %v4336_v17, %s3863_s24  ;;  %v862_v8 = vmax.f32 %v858_v56, 1e-16  ;;  %v942_v28 = vmul.f32 %v941_v27, %v4683_v18  ;;  %v1047_v2 = vadd.f32 %v1043_v16, %v1023_v49  ;;  %v1048_v42 = vadd.f32 %v1044_v62, %v1024_v10  ;;  %v8785_v56 = vld [vmem:[#allocation106_spill] sm:$0xff]  ;;  %v8787_v16 = vld [vmem:[#allocation112_spill] sm:$0xff]  ;;  %v8790_v10 = vld [vmem:[#allocation109_spill] sm:$0xff] }
 0x2ae   :  { %2506 = vrot.lane.b32.xlu0 %v8750_v43, %s3863_s24  ;;  %v863_v35 = vmax.f32 %v859_v39, 1e-16  ;;  %v5708_v36 = vadd.f32 %v1045_v19, %v1025_v5  ;;  %v1070_v51 = vadd.f32 %v1066_v3, %v1046_v61  ;;  %v864_v17 = vmax.f32 %v860_v32, 1e-16  ;;  %v8786_v3 = vld [vmem:[#allocation104_spill] sm:$0xff]  ;;  %v8789_v19 = vld [vmem:[#allocation22_spill] sm:$0xff] }
 0x2af   :  { %v5704_v13 = vpop.permute.xlu1 %2060  ;;  %v1089_v4 = vsel %vm49_vm0, 0.0, %v8783_v60  ;;  %v1071_v12 = vadd.f32 %v1067_v14, %v1047_v2  ;;  %v865_v44 = vmax.f32 %v861_v30, 1e-16  ;;  %v934_v27 = vsel %vm32_vm1, %v8776_v0, %v8784_v48  ;;  %v8788_v0 = vld [vmem:[#allocation105_spill] sm:$0xff] }
 0x2b0   :  { %8781 = vst [vmem:[#allocation91_spill] sm:$0xff] %v5704_v13  ;;  %v5706_v38 = vpop.permute.xlu0 %2094  ;;  %v1059_v39 = vsel %vm49_vm0, %v8773_v34, %v8785_v56  ;;  %3730 = vrsqrt.f32 %v862_v8  ;;  %v946_v62 = vmax.f32 %v942_v28, 1e-16  ;;  %v935_v2 = vsel %vm32_vm1, %v8784_v48, %v8786_v3  ;;  %v8793_v28 = vld [vmem:[#allocation116_spill] sm:$0xff]  ;;  %v8794_v48 = vld [vmem:[#allocation110_spill] sm:$0xff] }
 0x2b1   :  { %8782 = vst [vmem:[#allocation92_spill] sm:$0xff] %v5706_v38  ;;  %2508 = vrot.lane.b32.xlu1 %v8760_v63, %s3863_s24  ;;  %v1113_v49 = vsel %vm49_vm0, 0.0, %v8787_v16  ;;  %3732 = vrsqrt.f32 %v863_v35  ;;  %v936_v34 = vsel %vm32_vm1, %v8786_v3, %v8788_v0  ;;  %v1090_v32 = vmul.f32 %v1089_v4, %v8789_v19  ;;  %v8795_v3 = vld [vmem:[#allocation26_spill] sm:$0xff] }
 0x2b2   :  { %2510 = vrot.lane.b32.xlu0 %v4364_v15, %s3863_s24  ;;  %v1082_v14 = vsel %vm49_vm0, %v8783_v60, %v8790_v10  ;;  %3734 = vrsqrt.f32 %v864_v17  ;;  %v5739_v61 = vmul.f32 %v934_v27, %v4695_v59  ;;  %v1068_v8 = vmul.f32 %v1059_v39, %v4420_v52  ;;  %v8796_v27 = vld [vmem:[#allocation120_spill] sm:$0xff]  ;;  %v8801_v13 = vld [vmem:[#allocation114_spill] sm:$0xff] }
 0x2b3   :  { %v5734_v30 = vpop.permute.xlu1 %2096  ;;  %v1137_v35 = vsel %vm49_vm0, 0.0, %v8793_v28  ;;  %3736 = vrsqrt.f32 %v865_v44  ;;  %v5745_v4 = vmul.f32 %v935_v2, %v8718_v45  ;;  %v1083_v60 = vsel %vm49_vm0, %v8790_v10, %v8794_v48  ;;  %v8797_v2 = vld [vmem:[#allocation107_spill] sm:$0xff]  ;;  %v8802_v15 = vld [vmem:[#allocation124_spill] sm:$0xff] }
 0x2b4   :  { %8791 = vst [vmem:[#allocation98_spill] sm:$0xff] %v5734_v30  ;;  %v5736_v5 = vpop.permute.xlu0 %2098  ;;  %v1114_v0 = vmul.f32 %v1113_v49, %v8795_v3  ;;  %3738 = vrsqrt.f32 %v946_v62  ;;  %v5756_v17 = vmul.f32 %v936_v34, %v8724_v23  ;;  %v1091_v44 = vmul.f32 %v1082_v14, %v4447_v54 }
 0x2b5   :  { %8792 = vst [vmem:[#allocation93_spill] sm:$0xff] %v5736_v5  ;;  %2512 = vrot.lane.b32.xlu1 %v8768_v21, %s3863_s24  ;;  %v1161_v39 = vsel %vm49_vm0, 0.0, %v8796_v27  ;;  %v1060_v10 = vsel %vm49_vm0, %v8785_v56, %v8797_v2  ;;  %v1094_v49 = vadd.f32 %v1090_v32, %v1070_v51  ;;  %v1106_v5 = vsel %vm49_vm0, %v8787_v16, %v8798_v57  ;;  %v8803_v16 = vld [vmem:[#allocation117_spill] sm:$0xff] }
 0x2b6   :  { %2530 = vrot.lane.b32.xlu0 %v8772_v11, %s3863_s24  ;;  %v1138_v38 = vmul.f32 %v1137_v35, %v4495_v58  ;;  %v1072_v30 = vadd.f32 %v1068_v8, %v1048_v42  ;;  %v1092_v14 = vmul.f32 %v1083_v60, %v4449_v47  ;;  %v1107_v21 = vsel %vm49_vm0, %v8798_v57, %v8801_v13  ;;  %v8804_v60 = vld [vmem:[#allocation118_spill] sm:$0xff] }
 0x2b7   :  { %v5768_v62 = vpop.permute.xlu1 %2100  ;;  %v1185_v51 = vsel %vm49_vm0, 0.0, %v8802_v15  ;;  %v947_v56 = vmax.f32 %v5739_v61, 1e-16  ;;  %v1118_v32 = vadd.f32 %v1114_v0, %v1094_v49  ;;  %v1130_v35 = vsel %vm49_vm0, %v8793_v28, %v8803_v16  ;;  %v8805_v49 = vld [vmem:[#allocation121_spill] sm:$0xff] }
 0x2b8   :  { %8799 = vst [vmem:[#allocation94_spill] sm:$0xff] %v5768_v62  ;;  %v5770_v34 = vpop.permute.xlu0 %2110  ;;  %v1162_v2 = vmul.f32 %v1161_v39, %v4542_v53  ;;  %v1069_v42 = vmul.f32 %v1060_v10, %v4432_v33  ;;  %v1095_v57 = vadd.f32 %v1091_v44, %v1071_v12  ;;  %v1115_v8 = vmul.f32 %v1106_v5, %v4476_v1  ;;  %v8808_v44 = vld [vmem:[#allocation111_spill] sm:$0xff] }
 0x2b9   :  { %8800 = vst [vmem:[#allocation99_spill] sm:$0xff] %v5770_v34  ;;  %2532 = vrot.lane.b32.xlu1 %v8775_v6, %s3863_s24  ;;  %v1131_v61 = vsel %vm49_vm0, %v8803_v16, %v8804_v60  ;;  %v1116_v0 = vmul.f32 %v1107_v21, %v4478_v20  ;;  %v1142_v28 = vadd.f32 %v1138_v38, %v1118_v32  ;;  %v8809_v16 = vld [vmem:[#allocation122_spill] sm:$0xff]  ;;  %v948_v38 = vmax.f32 %v5745_v4, 1e-16  ;;  %v8810_v32 = vld [vmem:[#allocation125_spill] sm:$0xff] }
 0x2ba   :  { %2534 = vrot.lane.b32.xlu0 %v8564_v41, %s3863_s24  ;;  %v1154_v39 = vsel %vm49_vm0, %v8796_v27, %v8805_v49  ;;  %v1186_v62 = vmul.f32 %v1185_v51, %v4577_v9  ;;  %v1096_v12 = vadd.f32 %v1092_v14, %v1072_v30  ;;  %v1084_v5 = vsel %vm49_vm0, %v8794_v48, %v8808_v44  ;;  %v8811_v48 = vld [vmem:[#allocation115_spill] sm:$0xff] }
 0x2bb   :  { %v5797_v34 = vpop.permute.xlu1 %2112  ;;  %v1139_v10 = vmul.f32 %v1130_v35, %v4525_v46  ;;  %v1155_v21 = vsel %vm49_vm0, %v8805_v49, %v8809_v16  ;;  %v1140_v27 = vmul.f32 %v1131_v61, %v4527_v7  ;;  %v1166_v51 = vadd.f32 %v1162_v2, %v1142_v28  ;;  %v8812_v35 = vld [vmem:[#allocation126_spill] sm:$0xff] }
 0x2bc   :  { %8806 = vst [vmem:[#allocation95_spill] sm:$0xff] %v5797_v34  ;;  %v5799_v41 = vpop.permute.xlu0 %2114  ;;  %v1119_v30 = vadd.f32 %v1115_v8, %v1095_v57  ;;  %v1108_v14 = vsel %vm49_vm0, %v8801_v13, %v8811_v48  ;;  %v1163_v4 = vmul.f32 %v1154_v39, %v4559_v22  ;;  %v1179_v2 = vsel %vm49_vm0, %v8810_v32, %v8812_v35  ;;  %v8815_v48 = vld [vmem:[#allocation119_spill] sm:$0xff] }
 0x2bd   :  { %8807 = vst [vmem:[#allocation96_spill] sm:$0xff] %v5799_v41  ;;  %v1178_v41 = vsel %vm49_vm0, %v8802_v15, %v8810_v32  ;;  %2536 = vrot.lane.b32.xlu1 %v8779_v50, %s3863_s24  ;;  %v5824_v61 = vpop.eup %3730  ;;  %v1093_v15 = vmul.f32 %v1084_v5, %v4465_v24  ;;  %v1120_v28 = vadd.f32 %v1116_v0, %v1096_v12  ;;  %v8816_v50 = vld [vmem:[#allocation40_spill] sm:$0xff]  ;;  %v8817_v0 = vld [vmem:[#allocation85_spill] sm:$0xff]  ;;  %3740 = vrsqrt.f32 %v947_v56 }
 0x2be   :  { %2554 = vrot.lane.b32.xlu0 %v8780_v55, %s3863_s24  ;;  %v1164_v49 = vmul.f32 %v1155_v21, %v4562_v26  ;;  %v1190_v44 = vadd.f32 %v1186_v62, %v1166_v51  ;;  %v5832_v8 = vpop.eup %3732  ;;  %v1073_v13 = vadd.f32 %v1069_v42, %v5708_v36  ;;  %v1143_v39 = vadd.f32 %v1139_v10, %v1119_v30  ;;  %v8818_v62 = vld [vmem:[#allocation31_spill] sm:$0xff] }
 0x2bf   :  { %v5828_v34 = vpop.permute.xlu1 %2116  ;;  %v1132_v32 = vsel %vm49_vm0, %v8804_v60, %v8815_v48  ;;  %v1187_v6 = vmul.f32 %v1178_v41, %v8816_v50  ;;  %v5839_v5 = vpop.eup %3734  ;;  %v918_v12 = vrot.slane %v8817_v0, 2  ;;  %v1117_v21 = vmul.f32 %v1108_v14, %v8818_v62  ;;  %v8821_v10 = vld [vmem:[#allocation123_spill] sm:$0xff] }
 0x2c0   :  { %8813 = vst [vmem:[#allocation100_spill] sm:$0xff] %v5828_v34  ;;  %v5830_v57 = vpop.permute.xlu0 %2130  ;;  %v1144_v51 = vadd.f32 %v1140_v27, %v1120_v28  ;;  %v8819_v34 = vld [vmem:[#allocation41_spill] sm:$0xff]  ;;  %v5848_v36 = vpop.eup %3736  ;;  %v8820_v41 = vrot.slane %v5626_v40, 2  ;;  %v1167_v60 = vadd.f32 %v1163_v4, %v1143_v39  ;;  %v1156_v27 = vsel %vm49_vm0, %v8809_v16, %v8821_v10  ;;  %v8825_v4 = vld [vmem:[#allocation127_spill] sm:$0xff]  ;;  %v8826_v16 = vld [vmem:[#allocation54_spill] sm:$0xff] }
 0x2c1   :  { %8814 = vst [vmem:[#allocation97_spill] sm:$0xff] %v5830_v57  ;;  %v1188_v57 = vmul.f32 %v1179_v2, %v8819_v34  ;;  %2556 = vrot.lane.b32.xlu1 %v4418_v31, %s3863_s24  ;;  %v5856_v30 = vpop.eup %3738  ;;  %v1097_v14 = vadd.f32 %v1093_v15, %v1073_v13  ;;  %v8822_v2 = vld [vmem:[#allocation35_spill] sm:$0xff]  ;;  %v1266_v31 = vrot.slane %v1190_v44, 4  ;;  %3742 = vrsqrt.f32 %v948_v38 }
 0x2c2   :  { %2558 = vrot.lane.b32.xlu0 %v4420_v52, %s3863_s24  ;;  %v835_v42 = vadd.f32 %v8820_v41, %v5626_v40  ;;  %v1141_v28 = vmul.f32 %v1132_v32, %v8822_v2  ;;  %v1168_v48 = vadd.f32 %v1164_v49, %v1144_v51  ;;  %v949_v40 = vmax.f32 %v5756_v17, 1e-16  ;;  %v8827_v15 = vld [vmem:[#allocation39_spill] sm:$0xff]  ;;  %v8830_v49 = vld [vmem:[#allocation57_spill] sm:$0xff] }
 0x2c3   :  { %v5859_v52 = vpop.permute.xlu1 %2132  ;;  %v1191_v56 = vadd.f32 %v1187_v6, %v1167_v60  ;;  %v1180_v39 = vsel %vm49_vm0, %v8812_v35, %v8825_v4  ;;  %v822_v41 = vrot.slane %v8826_v16, 1  ;;  %v1121_v10 = vadd.f32 %v1117_v21, %v1097_v14  ;;  %v8828_v38 = vld [vmem:[#allocation47_spill] sm:$0xff] }
 0x2c4   :  { %8823 = vst [vmem:[#allocation101_spill] sm:$0xff] %v5859_v52  ;;  %v5861_v34 = vpop.permute.xlu0 %2134  ;;  %v1165_v13 = vmul.f32 %v1156_v27, %v8827_v15  ;;  %v1192_v32 = vadd.f32 %v1188_v57, %v1168_v48  ;;  %v8829_v17 = vrot.slane %v8828_v38, 2  ;;  %v829_v51 = vrot.slane %v8830_v49, 1  ;;  %v8832_v48 = vld [vmem:[#allocation42_spill] sm:$0xff] }
 0x2c5   :  { %8824 = vst [vmem:[#allocation102_spill] sm:$0xff] %v5861_v34  ;;  %2560 = vrot.lane.b32.xlu1 %v4432_v33, %s3863_s24  ;;  %v8831_v35 = vrot.slane %v5598_v37, 2  ;;  %v1194_v21 = vsel %vm460_vm8, %v1190_v44, 0.0  ;;  %v919_v57 = vadd.f32 %v918_v12, %v8817_v0  ;;  %v1145_v27 = vadd.f32 %v1141_v28, %v1121_v10 }
 0x2c6   :  { %2578 = vrot.lane.b32.xlu0 %v8789_v19, %s3863_s24  ;;  %v905_v6 = vadd.f32 %v8829_v17, %v8828_v38  ;;  %v1274_v14 = vsel %vm460_vm8, %v1266_v31, 0.0  ;;  %v1189_v4 = vmul.f32 %v1180_v39, %v8832_v48  ;;  %v836_v38 = vrot.slane %v835_v42, 1  ;;  %v8835_v19 = vld [vmem:[#allocation83_spill] sm:$0xff] }
 0x2c7   :  { %v912_v60 = vadd.f32 %v8831_v35, %v5598_v37  ;;  %v5884_v34 = vpop.permute.xlu1 %2136  ;;  %3744 = vrsqrt.f32 %v949_v40  ;;  %v1201_v17 = vsel %vm460_vm8, %v1191_v56, 0.0  ;;  %v1267_v33 = vrot.slane %v1191_v56, 4 }
 0x2c8   :  { %8833 = vst [vmem:[#allocation108_spill] sm:$0xff] %v5884_v34  ;;  %v5886_v52 = vpop.permute.xlu0 %2154  ;;  %v8836_v37 = vrot.slane %v8835_v19, 1  ;;  %v1169_v35 = vadd.f32 %v1165_v13, %v1145_v27  ;;  %v1195_v0 = vrot.slane %v1194_v21, 4  ;;  %v1208_v12 = vsel %vm460_vm8, %v1192_v32, 0.0 }
 0x2c9   :  { %8834 = vst [vmem:[#allocation103_spill] sm:$0xff] %v5886_v52  ;;  %2580 = vrot.lane.b32.xlu1 %v4447_v54, %s3863_s24  ;;  %v823_v31 = vadd.f32 %v822_v41, %v8826_v16  ;;  %v906_v28 = vrot.slane %v905_v6, 1  ;;  %v1275_v40 = vrot.slane %v1274_v14, 4  ;;  %v1268_v39 = vrot.slane %v1192_v32, 4  ;;  %v8840_v41 = vld [vmem:[#allocation53_spill] sm:$0xff] }
 0x2ca   :  { %v900_v44 = vadd.f32 %v8836_v37, %v8835_v19  ;;  %2582 = vrot.lane.b32.xlu0 %v4449_v47, %s3863_s24  ;;  %v830_v56 = vadd.f32 %v829_v51, %v8830_v49  ;;  %v913_v10 = vrot.slane %v912_v60, 1  ;;  %v1202_v34 = vrot.slane %v1201_v17, 4  ;;  %v8839_v47 = vld [vmem:[#allocation43_spill] sm:$0xff] }
 0x2cb   :  { %v1193_v19 = vadd.f32 %v1189_v4, %v1169_v35  ;;  %v5899_v13 = vpop.permute.xlu1 %2156  ;;  %v837_v37 = vadd.f32 %v836_v38, %v835_v42  ;;  %v920_v52 = vrot.slane %v919_v57, 1  ;;  %v1281_v54 = vsel %vm460_vm8, %v1267_v33, 0.0 }
 0x2cc   :  { %8837 = vst [vmem:[#allocation106_spill] sm:$0xff] %v5899_v13  ;;  %v5901_v27 = vpop.permute.xlu0 %2158  ;;  %v1209_v48 = vrot.slane %v1208_v12, 4  ;;  %v561_v16 = vsel %vm32_vm1, 0.0, %v8839_v47  ;;  %v870_v32 = vmul.f32 %v5824_v61, %v8840_v41  ;;  %v871_v49 = vmul.f32 %v5832_v8, %v823_v31  ;;  %v3741_v47 = vpop.eup %3740 }
 0x2cd   :  { %8838 = vst [vmem:[#allocation104_spill] sm:$0xff] %v5901_v27  ;;  %v1196_v51 = vadd.f32 %v1195_v0, %v1194_v21  ;;  %2584 = vrot.lane.b32.xlu1 %v4465_v24, %s3863_s24  ;;  %v872_v42 = vmul.f32 %v5839_v5, %v830_v56  ;;  %v873_v33 = vmul.f32 %v5848_v36, %v837_v37  ;;  %v1288_v38 = vsel %vm460_vm8, %v1268_v39, 0.0 }
 0x2ce   :  { %2602 = vrot.lane.b32.xlu0 %v8795_v3, %s3863_s24  ;;  %v1276_v4 = vadd.f32 %v1275_v40, %v1274_v14  ;;  %v907_v35 = vadd.f32 %v906_v28, %v905_v6  ;;  %v1203_v27 = vadd.f32 %v1202_v34, %v1201_v17  ;;  %v1282_v61 = vrot.slane %v1281_v54, 4  ;;  %v3743_v5 = vpop.eup %3742  ;;  %v8844_v6 = vld [vmem:[#allocation78_spill] sm:$0xff] }
 0x2cf   :  { %v1269_v41 = vrot.slane %v1193_v19, 4  ;;  %v5916_v8 = vpop.permute.xlu1 %2160  ;;  %v914_v0 = vadd.f32 %v913_v10, %v912_v60  ;;  %v921_v31 = vadd.f32 %v920_v52, %v919_v57  ;;  %v954_v13 = vmul.f32 %v5856_v30, %v900_v44  ;;  %v8846_v60 = vld [vmem:[#allocation128_spill] sm:$0xff]  ;;  %v8847_v30 = vld [vmem:[#allocation71_spill] sm:$0xff] }
 0x2d0   :  { %8841 = vst [vmem:[#allocation112_spill] sm:$0xff] %v5916_v8  ;;  %v5918_v21 = vpop.permute.xlu0 %2178  ;;  %v1210_v24 = vadd.f32 %v1209_v48, %v1208_v12  ;;  %v1197_v56 = vrot.slane %v1196_v51, 2  ;;  %v1289_v36 = vrot.slane %v1288_v38, 4  ;;  %v5925_v34 = vmul.f32 %v870_v32, %v561_v16  ;;  %v8849_v48 = vld [vmem:[#allocation81_spill] sm:$0xff] }
 0x2d1   :  { %8842 = vst [vmem:[#allocation105_spill] sm:$0xff] %v5918_v21  ;;  %2604 = vrot.lane.b32.xlu1 %v4476_v1, %s3863_s24  ;;  %v5928_v14 = vmul.f32 %v871_v49, %v8844_v6  ;;  %v1277_v17 = vrot.slane %v1276_v4, 2  ;;  %v1237_v52 = vsel %vm49_vm0, 0.0, %v8846_v60  ;;  %v5933_v57 = vmul.f32 %v872_v42, %v8847_v30 }
 0x2d2   :  { %2606 = vrot.lane.b32.xlu0 %v4478_v20, %s3863_s24  ;;  %8843 = vst [vmem:[#allocation109_spill] sm:$0xff] %v5925_v34  ;;  %v5936_v44 = vmul.f32 %v873_v33, %v8849_v48  ;;  %v1204_v12 = vrot.slane %v1203_v27, 2  ;;  %v1283_v28 = vadd.f32 %v1282_v61, %v1281_v54  ;;  %v1215_v40 = vsel %vm460_vm8, %v1193_v19, 0.0  ;;  %v8854_v33 = vld [vmem:[#allocation129_spill] sm:$0xff] }
 0x2d3   :  { %8845 = vst [vmem:[#allocation116_spill] sm:$0xff] %v5928_v14  ;;  %8848 = vst [vmem:[#allocation110_spill] sm:$0xff] %v5933_v57  ;;  %v1295_v39 = vsel %vm460_vm8, %v1269_v41, 0.0  ;;  %v5940_v10 = vpop.permute.xlu1 %2180  ;;  %v955_v32 = vmul.f32 %v3741_v47, %v907_v35  ;;  %v956_v49 = vmul.f32 %v3743_v5, %v914_v0  ;;  %v1211_v8 = vrot.slane %v1210_v24, 2  ;;  %v8855_v47 = vld [vmem:[#allocation46_spill] sm:$0xff]  ;;  %v8857_v0 = vld [vmem:[#allocation131_spill] sm:$0xff] }
 0x2d4   :  { %8850 = vst [vmem:[#allocation120_spill] sm:$0xff] %v5936_v44  ;;  %8851 = vst [vmem:[#allocation107_spill] sm:$0xff] %v5940_v10  ;;  %v5942_v37 = vpop.permute.xlu0 %2182  ;;  %v5944_v21 = vmul.f32 %v954_v13, %v561_v16  ;;  %v3745_v42 = vpop.eup %3744  ;;  %v1198_v57 = vadd.f32 %v1197_v56, %v1196_v51  ;;  %v1290_v14 = vadd.f32 %v1289_v36, %v1288_v38  ;;  %v1216_v19 = vrot.slane %v1215_v40, 4  ;;  %v8856_v41 = vld [vmem:[#allocation130_spill] sm:$0xff] }
 0x2d5   :  { %8852 = vst [vmem:[#allocation113_spill] sm:$0xff] %v5942_v37  ;;  %v1230_v54 = vsel %vm49_vm0, %v8846_v60, %v8854_v33  ;;  %2608 = vrot.lane.b32.xlu1 %v8818_v62, %s3863_s24  ;;  %v1296_v61 = vrot.slane %v1295_v39, 4  ;;  %v1238_v35 = vmul.f32 %v1237_v52, %v8855_v47  ;;  %v1231_v13 = vsel %vm49_vm0, %v8854_v33, %v8856_v41 }
 0x2d6   :  { %8853 = vst [vmem:[#allocation114_spill] sm:$0xff] %v5944_v21  ;;  %2626 = vrot.lane.b32.xlu0 %v4495_v58, %s3863_s24  ;;  %v1278_v16 = vadd.f32 %v1277_v17, %v1276_v4  ;;  %v1205_v51 = vadd.f32 %v1204_v12, %v1203_v27  ;;  %v1284_v38 = vrot.slane %v1283_v28, 2  ;;  %v1232_v5 = vsel %vm49_vm0, %v8856_v41, %v8857_v0  ;;  %v8861_v4 = vld [vmem:[#allocation132_spill] sm:$0xff] }
 0x2d7   :  { %v5960_v56 = vpop.permute.xlu1 %2184  ;;  %v957_v60 = vmul.f32 %v3745_v42, %v921_v31  ;;  %v1212_v37 = vadd.f32 %v1211_v8, %v1210_v24  ;;  %v1239_v10 = vmul.f32 %v1230_v54, %v4675_v25  ;;  %v5966_v52 = vmul.f32 %v955_v32, %v8844_v6  ;;  %v8862_v8 = vld [vmem:[#allocation52_spill] sm:$0xff] }
 0x2d8   :  { %8858 = vst [vmem:[#allocation124_spill] sm:$0xff] %v5960_v56  ;;  %v5962_v36 = vpop.permute.xlu0 %2202  ;;  %v1199_v44 = vrot.slane %v1198_v57, 1  ;;  %v1291_v33 = vrot.slane %v1290_v14, 2  ;;  %v1240_v27 = vmul.f32 %v1231_v13, %v4677_v29  ;;  %v1317_v17 = vsel %vm49_vm0, 0.0, %v8861_v4 }
 0x2d9   :  { %8859 = vst [vmem:[#allocation117_spill] sm:$0xff] %v5962_v36  ;;  %8860 = vst [vmem:[#allocation118_spill] sm:$0xff] %v5966_v52  ;;  %2628 = vrot.lane.b32.xlu1 %v4525_v46, %s3863_s24  ;;  %v1217_v31 = vadd.f32 %v1216_v19, %v1215_v40  ;;  %v1297_v24 = vadd.f32 %v1296_v61, %v1295_v39  ;;  %v1241_v12 = vmul.f32 %v1232_v5, %v8862_v8  ;;  %v8866_v40 = vld [vmem:[#allocation133_spill] sm:$0xff] }
 0x2da   :  { %2630 = vrot.lane.b32.xlu0 %v4527_v7, %s3863_s24  ;;  %v5977_v6 = vmul.f32 %v956_v49, %v8847_v30  ;;  %v1279_v32 = vrot.slane %v1278_v16, 1  ;;  %v1206_v42 = vrot.slane %v1205_v51, 1  ;;  %v5979_v54 = vadd.f32 %v1284_v38, %v1283_v28  ;;  %v8868_v38 = vld [vmem:[#allocation134_spill] sm:$0xff] }
 0x2db   :  { %v1242_v41 = vmax.f32 %v1238_v35, 1e-16  ;;  %v5981_v13 = vpop.permute.xlu1 %2204  ;;  %v1213_v56 = vrot.slane %v1212_v37, 1  ;;  %v1243_v36 = vmax.f32 %v1239_v10, 1e-16  ;;  %v1318_v52 = vmul.f32 %v1317_v17, %v4683_v18 }
 0x2dc   :  { %8863 = vst [vmem:[#allocation121_spill] sm:$0xff] %v5977_v6  ;;  %8864 = vst [vmem:[#allocation111_spill] sm:$0xff] %v5981_v13  ;;  %v5983_v0 = vpop.permute.xlu0 %2206  ;;  %v1310_v39 = vsel %vm49_vm0, %v8861_v4, %v8866_v40  ;;  %v5989_v19 = vadd.f32 %v1199_v44, %v1198_v57  ;;  %v5991_v30 = vadd.f32 %v1291_v33, %v1290_v14  ;;  %v1244_v49 = vmax.f32 %v1240_v27, 1e-16  ;;  %v8888_v13 = vld [vmem:[#allocation149_spill] sm:$0xff] }
 0x2dd   :  { %8865 = vst [vmem:[#allocation122_spill] sm:$0xff] %v5983_v0  ;;  %2632 = vrot.lane.b32.xlu1 %v8822_v2, %s3863_s24  ;;  %v5998_v28 = vmul.f32 %v957_v60, %v8849_v48  ;;  %v1218_v10 = vrot.slane %v1217_v31, 2  ;;  %v1298_v61 = vrot.slane %v1297_v24, 2  ;;  %v1245_v35 = vmax.f32 %v1241_v12, 1e-16  ;;  %v8882_v48 = vld [vmem:[#allocation146_spill] sm:$0xff] }
 0x2de   :  { %2650 = vrot.lane.b32.xlu0 %v4542_v53, %s3863_s24  ;;  %v1311_v57 = vsel %vm49_vm0, %v8866_v40, %v8868_v38  ;;  %v6003_v44 = vadd.f32 %v1279_v32, %v1278_v16  ;;  %v6005_v14 = vadd.f32 %v1206_v42, %v1205_v51  ;;  %3746 = vrsqrt.f32 %v1242_v41  ;;  %v8872_v51 = vld [vmem:[#allocation144_spill] sm:$0xff]  ;;  %v8874_v42 = vld [vmem:[#allocation135_spill] sm:$0xff]  ;;  %v8875_v40 = vld [vmem:[#allocation145_spill] sm:$0xff] }
 0x2df   :  { %8867 = vst [vmem:[#allocation125_spill] sm:$0xff] %v5998_v28  ;;  %v1319_v5 = vmul.f32 %v1310_v39, %v4695_v59  ;;  %v6008_v33 = vpop.permute.xlu1 %2208  ;;  %v6013_v60 = vadd.f32 %v1213_v56, %v1212_v37  ;;  %3748 = vrsqrt.f32 %v1243_v36  ;;  %v1322_v4 = vmax.f32 %v1318_v52, 1e-16  ;;  %v8873_v56 = vld [vmem:[#allocation140_spill] sm:$0xff]  ;;  %v8883_v0 = vld [vmem:[#allocation147_spill] sm:$0xff] }
 0x2e0   :  { %8869 = vst [vmem:[#allocation115_spill] sm:$0xff] %v6003_v44  ;;  %8870 = vst [vmem:[#allocation126_spill] sm:$0xff] %v6008_v33  ;;  %v6010_v27 = vpop.permute.xlu0 %2226  ;;  %3750 = vrsqrt.f32 %v1244_v49  ;;  %v1320_v16 = vmul.f32 %v1311_v57, %v8718_v45  ;;  %v1393_v12 = vsel %vm66_vm2, 0.0, %v8872_v51  ;;  %v6023_v32 = vadd.f32 %v1218_v10, %v1217_v31  ;;  %v8876_v49 = vld [vmem:[#allocation148_spill] sm:$0xff]  ;;  %v8879_v10 = vld [vmem:[#allocation141_spill] sm:$0xff] }
 0x2e1   :  { %8871 = vst [vmem:[#allocation119_spill] sm:$0xff] %v6010_v27  ;;  %2652 = vrot.lane.b32.xlu1 %v4559_v22, %s3863_s24  ;;  %v6025_v37 = vadd.f32 %v1298_v61, %v1297_v24  ;;  %3752 = vrsqrt.f32 %v1245_v35  ;;  %v1373_v36 = vsel %vm66_vm2, 0.0, %v8873_v56  ;;  %v1323_v52 = vmax.f32 %v1319_v5, 1e-16  ;;  %v8880_v35 = vld [vmem:[#allocation142_spill] sm:$0xff]  ;;  %v8887_v27 = vld [vmem:[#allocation9_spill] sm:$0xff] }
 0x2e2   :  { %2654 = vrot.lane.b32.xlu0 %v4562_v26, %s3863_s24  ;;  %v1312_v41 = vsel %vm49_vm0, %v8868_v38, %v8874_v42  ;;  %v1386_v39 = vsel %vm66_vm2, %v8872_v51, %v8875_v40  ;;  %v1417_v57 = vsel %vm66_vm2, 0.0, %v8876_v49  ;;  %3754 = vrsqrt.f32 %v1322_v4  ;;  %v8881_v51 = vld [vmem:[#allocation7_spill] sm:$0xff] }
 0x2e3   :  { %v6037_v31 = vpop.permute.xlu1 %2228  ;;  %v1366_v61 = vsel %vm66_vm2, %v8873_v56, %v8879_v10  ;;  %v1367_v38 = vsel %vm66_vm2, %v8879_v10, %v8880_v35  ;;  %v1394_v5 = vmul.f32 %v1393_v12, %v8750_v43  ;;  %v1324_v42 = vmax.f32 %v1320_v16, 1e-16  ;;  %v8884_v56 = vld [vmem:[#allocation143_spill] sm:$0xff]  ;;  %v8885_v10 = vld [vmem:[#allocation152_spill] sm:$0xff] }
 0x2e4   :  { %8877 = vst [vmem:[#allocation85_spill] sm:$0xff] %v6037_v31  ;;  %v6039_v24 = vpop.permute.xlu0 %2230  ;;  %v1374_v17 = vmul.f32 %v1373_v36, %v8881_v51  ;;  %v1387_v33 = vsel %vm66_vm2, %v8875_v40, %v8882_v48  ;;  %v1388_v4 = vsel %vm66_vm2, %v8882_v48, %v8883_v0  ;;  %v1368_v16 = vsel %vm66_vm2, %v8880_v35, %v8884_v56  ;;  %v8886_v0 = vld [vmem:[#allocation8_spill] sm:$0xff] }
 0x2e5   :  { %8878 = vst [vmem:[#allocation123_spill] sm:$0xff] %v6039_v24  ;;  %2656 = vrot.lane.b32.xlu1 %v8827_v15, %s3863_s24  ;;  %v1395_v12 = vmul.f32 %v1386_v39, %v8760_v63  ;;  %v1418_v36 = vmul.f32 %v1417_v57, %v8772_v11  ;;  %v1441_v40 = vsel %vm66_vm2, 0.0, %v8885_v10  ;;  %v6067_v24 = vmul.f32 %v1312_v41, %v8724_v23  ;;  %v8891_v57 = vld [vmem:[#allocation13_spill] sm:$0xff]  ;;  %v8892_v11 = vld [vmem:[#allocation15_spill] sm:$0xff]  ;;  %v8893_v43 = vld [vmem:[#allocation156_spill] sm:$0xff] }
 0x2e6   :  { %2674 = vrot.lane.b32.xlu0 %v4577_v9, %s3863_s24  ;;  %v1375_v48 = vmul.f32 %v1366_v61, %v8886_v0  ;;  %v1376_v31 = vmul.f32 %v1367_v38, %v8887_v27  ;;  %v1410_v28 = vsel %vm66_vm2, %v8876_v49, %v8888_v13  ;;  %v1398_v39 = vadd.f32 %v1394_v5, %v1374_v17  ;;  %v8894_v61 = vld [vmem:[#allocation11_spill] sm:$0xff]  ;;  %v8895_v38 = vld [vmem:[#allocation150_spill] sm:$0xff]  ;;  %v8896_v17 = vld [vmem:[#allocation41_spill] sm:$0xff] }
 0x2e7   :  { %v6074_v6 = vpop.permute.xlu1 %2232  ;;  %v1396_v56 = vmul.f32 %v1387_v33, %v8891_v57  ;;  %v1397_v63 = vmul.f32 %v1388_v4, %v8892_v11  ;;  %v1465_v41 = vsel %vm66_vm2, 0.0, %v8893_v43  ;;  %3756 = vrsqrt.f32 %v1323_v52  ;;  %v8897_v4 = vld [vmem:[#allocation16_spill] sm:$0xff]  ;;  %v8905_v0 = vld [vmem:[#allocation17_spill] sm:$0xff] }
 0x2e8   :  { %8889 = vst [vmem:[#allocation127_spill] sm:$0xff] %v6074_v6  ;;  %v6076_v35 = vpop.permute.xlu0 %2250  ;;  %v1377_v21 = vmul.f32 %v1368_v16, %v8894_v61  ;;  %v1411_v27 = vsel %vm66_vm2, %v8888_v13, %v8895_v38  ;;  %v1442_v49 = vmul.f32 %v1441_v40, %v8780_v55  ;;  %v1399_v33 = vadd.f32 %v1395_v12, %v1375_v48  ;;  %v8899_v16 = vld [vmem:[#allocation151_spill] sm:$0xff]  ;;  %v8900_v13 = vld [vmem:[#allocation153_spill] sm:$0xff]  ;;  %v8901_v55 = vld [vmem:[#allocation154_spill] sm:$0xff] }
 0x2e9   :  { %8890 = vst [vmem:[#allocation54_spill] sm:$0xff] %v6076_v35  ;;  %2676 = vrot.lane.b32.xlu1 %v8816_v50, %s3863_s24  ;;  %v1422_v5 = vadd.f32 %v1418_v36, %v1398_v39  ;;  %v1419_v6 = vmul.f32 %v1410_v28, %v8897_v4  ;;  %v8898_v35 = vld [vmem:[#allocation160_spill] sm:$0xff]  ;;  %v1412_v11 = vsel %vm66_vm2, %v8895_v38, %v8899_v16  ;;  %v8902_v61 = vld [vmem:[#allocation22_spill] sm:$0xff]  ;;  %3758 = vrsqrt.f32 %v1324_v42  ;;  %v8912_v42 = vld [vmem:[#allocation21_spill] sm:$0xff] }
 0x2ea   :  { %2678 = vrot.lane.b32.xlu0 %v8896_v17, %s3863_s24  ;;  %v1489_v52 = vsel %vm66_vm2, 0.0, %v8898_v35  ;;  %v1434_v40 = vsel %vm66_vm2, %v8885_v10, %v8900_v13  ;;  %v1435_v57 = vsel %vm66_vm2, %v8900_v13, %v8901_v55  ;;  %v1466_v12 = vmul.f32 %v1465_v41, %v8902_v61  ;;  %v8906_v16 = vld [vmem:[#allocation164_spill] sm:$0xff]  ;;  %v8907_v13 = vld [vmem:[#allocation157_spill] sm:$0xff] }
 0x2eb   :  { %v6104_v36 = vpop.permute.xlu1 %2252  ;;  %v6108_v48 = vpop.eup %3746  ;;  %v1400_v39 = vadd.f32 %v1396_v56, %v1376_v31  ;;  %v1401_v4 = vadd.f32 %v1397_v63, %v1377_v21  ;;  %v1420_v38 = vmul.f32 %v1411_v27, %v8905_v0  ;;  %v1513_v34 = vsel %vm66_vm2, 0.0, %v8906_v16  ;;  %v8910_v21 = vld [vmem:[#allocation19_spill] sm:$0xff]  ;;  %v8911_v31 = vld [vmem:[#allocation20_spill] sm:$0xff]  ;;  %v8915_v0 = vld [vmem:[#allocation161_spill] sm:$0xff] }
 0x2ec   :  { %8903 = vst [vmem:[#allocation47_spill] sm:$0xff] %v6104_v36  ;;  %v6106_v28 = vpop.permute.xlu0 %2254  ;;  %v6113_v10 = vpop.eup %3748  ;;  %v1446_v51 = vadd.f32 %v1442_v49, %v1422_v5  ;;  %v1458_v41 = vsel %vm66_vm2, %v8893_v43, %v8907_v13  ;;  %v1490_v36 = vmul.f32 %v1489_v52, %v8795_v3  ;;  %v1421_v27 = vmul.f32 %v1412_v11, %v8910_v21  ;;  %v8913_v5 = vld [vmem:[#allocation168_spill] sm:$0xff] }
 0x2ed   :  { %8904 = vst [vmem:[#allocation57_spill] sm:$0xff] %v6106_v28  ;;  %v8908_v28 = vld [vmem:[#allocation42_spill] sm:$0xff]  ;;  %v6123_v63 = vpop.eup %3750  ;;  %v1443_v56 = vmul.f32 %v1434_v40, %v8911_v31  ;;  %v1444_v49 = vmul.f32 %v1435_v57, %v8912_v42  ;;  %v1537_v61 = vsel %vm66_vm2, 0.0, %v8913_v5  ;;  %v1423_v52 = vadd.f32 %v1419_v6, %v1399_v33  ;;  %v8918_v31 = vld [vmem:[#allocation24_spill] sm:$0xff] }
 0x2ee   :  { %2680 = vrot.lane.b32.xlu1 %v8908_v28, %s3863_s24  ;;  %2726 = vrot.lane.b32.xlu0 %v8855_v47, %s3863_s24  ;;  %8909 = vst [vmem:[#allocation83_spill] sm:$0xff] %v6123_v63  ;;  %v6130_v43 = vpop.eup %3752  ;;  %v1470_v3 = vadd.f32 %v1466_v12, %v1446_v51  ;;  %v1482_v44 = vsel %vm66_vm2, %v8898_v35, %v8915_v0  ;;  %v8919_v42 = vld [vmem:[#allocation158_spill] sm:$0xff]  ;;  %v1325_v35 = vmax.f32 %v6067_v24, 1e-16 }
 0x2ef   :  { %8914 = vst [vmem:[#allocation43_spill] sm:$0xff] %v6130_v43  ;;  %v1514_v47 = vmul.f32 %v1513_v34, %v4495_v58  ;;  %v6136_v63 = vpop.permute.xlu1 %2256  ;;  %v1424_v40 = vadd.f32 %v1420_v38, %v1400_v39  ;;  %v1467_v57 = vmul.f32 %v1458_v41, %v8918_v31  ;;  %v1459_v21 = vsel %vm66_vm2, %v8907_v13, %v8919_v42  ;;  %v8920_v43 = vld [vmem:[#allocation172_spill] sm:$0xff]  ;;  %v6146_v51 = vpop.eup %3754  ;;  %v8921_v34 = vld [vmem:[#allocation165_spill] sm:$0xff]  ;;  %v8923_v24 = vld [vmem:[#allocation162_spill] sm:$0xff] }
 0x2f0   :  { %8916 = vst [vmem:[#allocation53_spill] sm:$0xff] %v6136_v63  ;;  %v6138_v11 = vpop.permute.xlu0 %2274  ;;  %v1561_v6 = vsel %vm66_vm2, 0.0, %v8920_v43  ;;  %v1494_v33 = vadd.f32 %v1490_v36, %v1470_v3  ;;  %v1506_v12 = vsel %vm66_vm2, %v8906_v16, %v8921_v34  ;;  %v1538_v39 = vmul.f32 %v1537_v61, %v4542_v53 }
 0x2f1   :  { %8917 = vst [vmem:[#allocation78_spill] sm:$0xff] %v6138_v11  ;;  %v1425_v38 = vadd.f32 %v1421_v27, %v1401_v4  ;;  %v1447_v13 = vadd.f32 %v1443_v56, %v1423_v52  ;;  %v1448_v41 = vadd.f32 %v1444_v49, %v1424_v40  ;;  %v1491_v63 = vmul.f32 %v1482_v44, %v4476_v1  ;;  %v8922_v11 = vld [vmem:[#allocation155_spill] sm:$0xff]  ;;  %v8926_v27 = vld [vmem:[#allocation25_spill] sm:$0xff] }
 0x2f2   :  { %2728 = vrot.lane.b32.xlu1 %v4675_v25, %s3863_s24  ;;  %2730 = vrot.lane.b32.xlu0 %v4677_v29, %s3863_s24  ;;  %v1436_v3 = vsel %vm66_vm2, %v8901_v55, %v8922_v11  ;;  %v1483_v36 = vsel %vm66_vm2, %v8915_v0, %v8923_v24  ;;  %v1518_v61 = vadd.f32 %v1514_v47, %v1494_v33  ;;  %v8927_v49 = vld [vmem:[#allocation169_spill] sm:$0xff]  ;;  %3760 = vrsqrt.f32 %v1325_v35  ;;  %v8928_v52 = vld [vmem:[#allocation159_spill] sm:$0xff]  ;;  %v8929_v0 = vld [vmem:[#allocation166_spill] sm:$0xff] }
 0x2f3   :  { %v1562_v16 = vmul.f32 %v1561_v6, %v4577_v9  ;;  %v6165_v53 = vpop.permute.xlu1 %2276  ;;  %v1471_v4 = vadd.f32 %v1467_v57, %v1447_v13  ;;  %v1468_v56 = vmul.f32 %v1459_v21, %v8926_v27  ;;  %v1515_v44 = vmul.f32 %v1506_v12, %v4525_v46  ;;  %v8930_v57 = vld [vmem:[#allocation23_spill] sm:$0xff]  ;;  %v8931_v33 = vld [vmem:[#allocation173_spill] sm:$0xff]  ;;  %v8933_v13 = vld [vmem:[#allocation170_spill] sm:$0xff] }
 0x2f4   :  { %8924 = vst [vmem:[#allocation128_spill] sm:$0xff] %v6165_v53  ;;  %v6167_v31 = vpop.permute.xlu0 %2278  ;;  %v1530_v55 = vsel %vm66_vm2, %v8913_v5, %v8927_v49  ;;  %v1460_v47 = vsel %vm66_vm2, %v8919_v42, %v8928_v52  ;;  %v1507_v11 = vsel %vm66_vm2, %v8921_v34, %v8929_v0  ;;  %v1542_v40 = vadd.f32 %v1538_v39, %v1518_v61  ;;  %v6184_v21 = vpop.eup %3756  ;;  %v8932_v12 = vld [vmem:[#allocation163_spill] sm:$0xff] }
 0x2f5   :  { %8925 = vst [vmem:[#allocation71_spill] sm:$0xff] %v6167_v31  ;;  %v1445_v5 = vmul.f32 %v1436_v3, %v8930_v57  ;;  %v1495_v6 = vadd.f32 %v1491_v63, %v1471_v4  ;;  %v1492_v35 = vmul.f32 %v1483_v36, %v4478_v20  ;;  %v1554_v42 = vsel %vm66_vm2, %v8920_v43, %v8931_v33  ;;  %v8936_v36 = vld [vmem:[#allocation27_spill] sm:$0xff] }
 0x2f6   :  { %2732 = vrot.lane.b32.xlu1 %v8862_v8, %s3863_s24  ;;  %2806 = vrot.lane.b32.xlu0 %v4683_v18, %s3863_s24  ;;  %v1484_v34 = vsel %vm66_vm2, %v8923_v24, %v8932_v12  ;;  %v1539_v39 = vmul.f32 %v1530_v55, %v4559_v22  ;;  %v1531_v61 = vsel %vm66_vm2, %v8927_v49, %v8933_v13  ;;  %v1220_v46 = vrot.slane %v6023_v32, 1  ;;  %v8937_v24 = vld [vmem:[#allocation167_spill] sm:$0xff]  ;;  %v8938_v49 = vld [vmem:[#allocation174_spill] sm:$0xff] }
 0x2f7   :  { %v1566_v52 = vadd.f32 %v1562_v16, %v1542_v40  ;;  %v6198_v31 = vpop.permute.xlu1 %2280  ;;  %v1472_v3 = vadd.f32 %v1468_v56, %v1448_v41  ;;  %v1469_v4 = vmul.f32 %v1460_v47, %v8936_v36  ;;  %v1519_v53 = vadd.f32 %v1515_v44, %v1495_v6  ;;  %v3759_v41 = vpop.eup %3758  ;;  %v8939_v6 = vld [vmem:[#allocation171_spill] sm:$0xff] }
 0x2f8   :  { %8934 = vst [vmem:[#allocation81_spill] sm:$0xff] %v6198_v31  ;;  %v6200_v63 = vpop.permute.xlu0 %2298  ;;  %v1516_v43 = vmul.f32 %v1507_v11, %v4527_v7  ;;  %v1508_v55 = vsel %vm66_vm2, %v8929_v0, %v8937_v24  ;;  %v1563_v12 = vmul.f32 %v1554_v42, %v8816_v50  ;;  %v1555_v16 = vsel %vm66_vm2, %v8931_v33, %v8938_v49 }
 0x2f9   :  { %8935 = vst [vmem:[#allocation129_spill] sm:$0xff] %v6200_v63  ;;  %v1449_v56 = vadd.f32 %v1445_v5, %v1425_v38  ;;  %v1496_v44 = vadd.f32 %v1492_v35, %v1472_v3  ;;  %v1493_v47 = vmul.f32 %v1484_v34, %v8818_v62  ;;  %v1540_v11 = vmul.f32 %v1531_v61, %v4562_v26  ;;  %v8942_v35 = vld [vmem:[#allocation48_spill] sm:$0xff] }
 0x2fa   :  { %2808 = vrot.lane.b32.xlu1 %v4695_v59, %s3863_s24  ;;  %2810 = vrot.lane.b32.xlu0 %v8718_v45, %s3863_s24  ;;  %v1300_v0 = vrot.slane %v6025_v37, 1  ;;  %v1543_v40 = vadd.f32 %v1539_v39, %v1519_v53  ;;  %v1532_v33 = vsel %vm66_vm2, %v8933_v13, %v8939_v6  ;;  %v1642_v42 = vrot.slane %v1566_v52, 4  ;;  %v8944_v13 = vld [vmem:[#allocation175_spill] sm:$0xff] }
 0x2fb   :  { %v6222_v24 = vpop.permute.xlu1 %2300  ;;  %v1473_v63 = vadd.f32 %v1469_v4, %v1449_v56  ;;  %v1520_v50 = vadd.f32 %v1516_v43, %v1496_v44  ;;  %v1517_v38 = vmul.f32 %v1508_v55, %v8822_v2  ;;  %v1564_v5 = vmul.f32 %v1555_v16, %v8896_v17  ;;  %v8945_v4 = vld [vmem:[#allocation3_spill] sm:$0xff] }
 0x2fc   :  { %8940 = vst [vmem:[#allocation130_spill] sm:$0xff] %v6222_v24  ;;  %v6224_v31 = vpop.permute.xlu0 %2302  ;;  %v981_v34 = vsel %vm49_vm0, 0.0, %v8942_v35  ;;  %v8943_v53 = vrot.slane %v5979_v54, 1  ;;  %v1567_v61 = vadd.f32 %v1563_v12, %v1543_v40  ;;  %v1556_v3 = vsel %vm66_vm2, %v8938_v49, %v8944_v13  ;;  %v8954_v13 = vld [vmem:[#allocation137_spill] sm:$0xff] }
 0x2fd   :  { %8941 = vst [vmem:[#allocation131_spill] sm:$0xff] %v6224_v31  ;;  %v1497_v43 = vadd.f32 %v1493_v47, %v1473_v63  ;;  %v1544_v55 = vadd.f32 %v1540_v11, %v1520_v50  ;;  %v1541_v16 = vmul.f32 %v1532_v33, %v8827_v15  ;;  %v1570_v56 = vsel %vm460_vm8, %v1566_v52, 0.0  ;;  %v8949_v11 = vld [vmem:[#allocation136_spill] sm:$0xff]  ;;  %v8951_v33 = vld [vmem:[#allocation5_spill] sm:$0xff] }
 0x2fe   :  { %v1287_v39 = vadd.f32 %v8943_v53, %v5979_v54  ;;  %2812 = vrot.lane.b32.xlu1 %v8724_v23, %s3863_s24  ;;  %2846 = vrot.lane.b32.xlu0 %v8945_v4, %s3864_s25  ;;  %v8946_v54 = vrot.slane %v5991_v30, 1  ;;  %v1221_v44 = vadd.f32 %v1220_v46, %v6023_v32  ;;  %v1250_v49 = vmul.f32 %v6108_v48, %v5989_v19  ;;  %v8950_v48 = vld [vmem:[#allocation4_spill] sm:$0xff]  ;;  %v8961_v4 = vld [vmem:[#allocation6_spill] sm:$0xff] }
 0x2ff   :  { %v1650_v40 = vsel %vm460_vm8, %v1642_v42, 0.0  ;;  %v6249_v6 = vpop.permute.xlu1 %2304  ;;  %v1301_v50 = vadd.f32 %v1300_v0, %v6025_v37  ;;  %v1521_v63 = vadd.f32 %v1517_v38, %v1497_v43  ;;  %v1568_v47 = vadd.f32 %v1564_v5, %v1544_v55  ;;  %v3761_v37 = vpop.eup %3760  ;;  %v8952_v0 = vld [vmem:[#allocation83_spill] sm:$0xff]  ;;  %v8956_v43 = vld [vmem:[#allocation138_spill] sm:$0xff] }
 0x300   :  { %v1294_v12 = vadd.f32 %v8946_v54, %v5991_v30  ;;  %8947 = vst [vmem:[#allocation132_spill] sm:$0xff] %v6249_v6  ;;  %v6251_v35 = vpop.permute.xlu0 %2350  ;;  %v1565_v52 = vmul.f32 %v1556_v3, %v8908_v28  ;;  %v1251_v30 = vmul.f32 %v6113_v10, %v6005_v14  ;;  %v6259_v46 = vsel %vm66_vm2, 0.0, %v8949_v11  ;;  %v8953_v10 = vld [vmem:[#allocation115_spill] sm:$0xff] }
 0x301   :  { %8948 = vst [vmem:[#allocation133_spill] sm:$0xff] %v6251_v35  ;;  %v1571_v19 = vrot.slane %v1570_v56, 4  ;;  %v1577_v32 = vsel %vm460_vm8, %v1567_v61, 0.0  ;;  %v1252_v42 = vmul.f32 %v8952_v0, %v6013_v60  ;;  %v1545_v38 = vadd.f32 %v1541_v16, %v1521_v63  ;;  %v8960_v0 = vld [vmem:[#allocation43_spill] sm:$0xff] }
 0x302   :  { %2848 = vrot.lane.b32.xlu1 %v8950_v48, %s3864_s25  ;;  %2850 = vrot.lane.b32.xlu0 %v8951_v33, %s3864_s25  ;;  %v1651_v5 = vrot.slane %v1650_v40, 4  ;;  %v1643_v14 = vrot.slane %v1567_v61, 4  ;;  %v1330_v53 = vmul.f32 %v6146_v51, %v8953_v10  ;;  %v6273_v3 = vsel %vm66_vm2, %v8949_v11, %v8954_v13 }
 0x303   :  { %8955 = vst [vmem:[#allocation134_spill] sm:$0xff] %v6273_v3  ;;  %v6278_v55 = vsel %vm66_vm2, %v8954_v13, %v8956_v43  ;;  %v6280_v54 = vpop.permute.xlu1 %2352  ;;  %v1254_v60 = vmul.f32 %v1250_v49, %v981_v34  ;;  %v1331_v61 = vmul.f32 %v6184_v21, %v1287_v39  ;;  %v1578_v16 = vrot.slane %v1577_v32, 4  ;;  %v8962_v13 = vld [vmem:[#allocation82_spill] sm:$0xff]  ;;  %v8963_v49 = vld [vmem:[#allocation7_spill] sm:$0xff]  ;;  %v8964_v21 = vld [vmem:[#allocation44_spill] sm:$0xff] }
 0x304   :  { %8957 = vst [vmem:[#allocation144_spill] sm:$0xff] %v6278_v55  ;;  %8958 = vst [vmem:[#allocation140_spill] sm:$0xff] %v6280_v54  ;;  %v6282_v33 = vpop.permute.xlu0 %2354  ;;  %v1584_v51 = vsel %vm460_vm8, %v1568_v47, 0.0  ;;  %v1569_v63 = vadd.f32 %v1565_v52, %v1545_v38  ;;  %v1253_v10 = vmul.f32 %v8960_v0, %v1221_v44  ;;  %v1572_v11 = vadd.f32 %v1571_v19, %v1570_v56  ;;  %v8965_v52 = vld [vmem:[#allocation139_spill] sm:$0xff] }
 0x305   :  { %8959 = vst [vmem:[#allocation135_spill] sm:$0xff] %v6282_v33  ;;  %v1644_v48 = vrot.slane %v1568_v47, 4  ;;  %v1255_v35 = vmul.f32 %v1251_v30, %v8962_v13  ;;  %v1332_v6 = vmul.f32 %v3759_v41, %v1294_v12  ;;  %v1652_v54 = vadd.f32 %v1651_v5, %v1650_v40  ;;  %v8969_v30 = vld [vmem:[#allocation109_spill] sm:$0xff] }
 0x306   :  { %2852 = vrot.lane.b32.xlu1 %v8961_v4, %s3864_s25  ;;  %v1657_v33 = vsel %vm460_vm8, %v1643_v14, 0.0  ;;  %2862 = vrot.lane.b32.xlu0 %v8963_v49, %s3864_s25  ;;  %v1256_v39 = vmul.f32 %v1252_v42, %v8964_v21  ;;  %v1333_v31 = vmul.f32 %v3761_v37, %v1301_v50  ;;  %v6297_v56 = vsel %vm66_vm2, %v8956_v43, %v8965_v52  ;;  %v8971_v14 = vld [vmem:[#allocation8_spill] sm:$0xff]  ;;  %v8972_v43 = vld [vmem:[#allocation45_spill] sm:$0xff] }
 0x307   :  { %8966 = vst [vmem:[#allocation145_spill] sm:$0xff] %v6297_v56  ;;  %v1585_v44 = vrot.slane %v1584_v51, 4  ;;  %v6299_v47 = vpop.permute.xlu1 %2356  ;;  %v1334_v41 = vmul.f32 %v1330_v53, %v981_v34  ;;  %v1579_v12 = vadd.f32 %v1578_v16, %v1577_v32  ;;  %v1645_v40 = vrot.slane %v1569_v63, 4  ;;  %v8973_v4 = vld [vmem:[#allocation9_spill] sm:$0xff]  ;;  %v8974_v34 = vld [vmem:[#allocation116_spill] sm:$0xff]  ;;  %v8976_v53 = vld [vmem:[#allocation110_spill] sm:$0xff] }
 0x308   :  { %8967 = vst [vmem:[#allocation148_spill] sm:$0xff] %v6299_v47  ;;  %v6301_v19 = vpop.permute.xlu0 %2430  ;;  %v6304_v38 = vadd.f32 %v1254_v60, %v8969_v30  ;;  %v1335_v5 = vmul.f32 %v1331_v61, %v8962_v13  ;;  %v1573_v42 = vrot.slane %v1572_v11, 2  ;;  %v1658_v50 = vrot.slane %v1657_v33, 4 }
 0x309   :  { %8968 = vst [vmem:[#allocation141_spill] sm:$0xff] %v6301_v19  ;;  %v1664_v37 = vsel %vm460_vm8, %v1644_v48, 0.0  ;;  %v1257_v0 = vmul.f32 %v1253_v10, %v8972_v43  ;;  %v1653_v52 = vrot.slane %v1652_v54, 2  ;;  %v6314_v32 = vadd.f32 %v1255_v35, %v8974_v34  ;;  %v8980_v10 = vld [vmem:[#allocation114_spill] sm:$0xff] }
 0x30a   :  { %8970 = vst [vmem:[#allocation142_spill] sm:$0xff] %v6304_v38  ;;  %2864 = vrot.lane.b32.xlu1 %v8971_v14, %s3864_s25  ;;  %2866 = vrot.lane.b32.xlu0 %v8973_v4, %s3864_s25  ;;  %v6317_v60 = vadd.f32 %v1256_v39, %v8976_v53  ;;  %v1336_v61 = vmul.f32 %v1332_v6, %v8964_v21  ;;  %v1591_v48 = vsel %vm460_vm8, %v1569_v63, 0.0  ;;  %v1580_v24 = vrot.slane %v1579_v12, 2  ;;  %v8982_v39 = vld [vmem:[#allocation118_spill] sm:$0xff]  ;;  %v8984_v21 = vld [vmem:[#allocation176_spill] sm:$0xff] }
 0x30b   :  { %8975 = vst [vmem:[#allocation146_spill] sm:$0xff] %v6314_v32  ;;  %v1586_v16 = vadd.f32 %v1585_v44, %v1584_v51  ;;  %v6321_v13 = vpop.permute.xlu1 %2432  ;;  %v6326_v19 = vadd.f32 %v1334_v41, %v8980_v10  ;;  %v1337_v47 = vmul.f32 %v1333_v31, %v8972_v43  ;;  %v1665_v35 = vrot.slane %v1664_v37, 4  ;;  %v8985_v44 = vld [vmem:[#allocation11_spill] sm:$0xff]  ;;  %v8988_v43 = vld [vmem:[#allocation177_spill] sm:$0xff]  ;;  %v9051_v38 = vld [vmem:[#allocation62_spill] sm:$0xff] }
 0x30c   :  { %8977 = vst [vmem:[#allocation147_spill] sm:$0xff] %v6317_v60  ;;  %8978 = vst [vmem:[#allocation143_spill] sm:$0xff] %v6321_v13  ;;  %v6323_v30 = vpop.permute.xlu0 %2434  ;;  %v1671_v34 = vsel %vm460_vm8, %v1645_v40, 0.0  ;;  %v6331_v53 = vadd.f32 %v1335_v5, %v8982_v39  ;;  %v1574_v6 = vadd.f32 %v1573_v42, %v1572_v11  ;;  %v1659_v51 = vadd.f32 %v1658_v50, %v1657_v33  ;;  %v8989_v5 = vld [vmem:[#allocation10_spill] sm:$0xff]  ;;  %v8990_v11 = vld [vmem:[#allocation121_spill] sm:$0xff] }
 0x30d   :  { %8979 = vst [vmem:[#allocation152_spill] sm:$0xff] %v6323_v30  ;;  %8981 = vst [vmem:[#allocation149_spill] sm:$0xff] %v6326_v19  ;;  %v1613_v63 = vsel %vm66_vm2, 0.0, %v8984_v21  ;;  %v8986_v30 = vld [vmem:[#allocation120_spill] sm:$0xff]  ;;  %v1654_v10 = vadd.f32 %v1653_v52, %v1652_v54  ;;  %v1592_v31 = vrot.slane %v1591_v48, 4  ;;  %v1606_v40 = vsel %vm66_vm2, %v8984_v21, %v8988_v43  ;;  %v8992_v39 = vld [vmem:[#allocation178_spill] sm:$0xff] }
 0x30e   :  { %8983 = vst [vmem:[#allocation156_spill] sm:$0xff] %v6331_v53  ;;  %2868 = vrot.lane.b32.xlu1 %v8985_v44, %s3864_s25  ;;  %v6338_v41 = vadd.f32 %v1257_v0, %v8986_v30  ;;  %2882 = vrot.lane.b32.xlu0 %v8989_v5, %s3864_s25  ;;  %v6346_v33 = vadd.f32 %v1336_v61, %v8990_v11  ;;  %v1587_v42 = vrot.slane %v1586_v16, 2  ;;  %v1672_v50 = vrot.slane %v1671_v34, 4  ;;  %v8995_v52 = vld [vmem:[#allocation125_spill] sm:$0xff]  ;;  %v8997_v53 = vld [vmem:[#allocation46_spill] sm:$0xff]  ;;  %v8998_v19 = vld [vmem:[#allocation179_spill] sm:$0xff] }
 0x30f   :  { %v1607_v13 = vsel %vm66_vm2, %v8988_v43, %v8992_v39  ;;  %v6351_v0 = vpop.permute.xlu1 %2436  ;;  %v6356_v30 = vadd.f32 %v1337_v47, %v8995_v52  ;;  %v1581_v21 = vadd.f32 %v1580_v24, %v1579_v12  ;;  %v1614_v60 = vmul.f32 %v1613_v63, %v8997_v53  ;;  %v8999_v43 = vld [vmem:[#allocation180_spill] sm:$0xff]  ;;  %v9001_v12 = vld [vmem:[#allocation181_spill] sm:$0xff] }
 0x310   :  { %8987 = vst [vmem:[#allocation150_spill] sm:$0xff] %v6338_v41  ;;  %8991 = vst [vmem:[#allocation160_spill] sm:$0xff] %v6346_v33  ;;  %v6353_v54 = vpop.permute.xlu0 %2470  ;;  %v1666_v41 = vadd.f32 %v1665_v35, %v1664_v37  ;;  %v1608_v61 = vsel %vm66_vm2, %v8992_v39, %v8998_v19  ;;  %v1575_v11 = vrot.slane %v1574_v6, 1  ;;  %v1660_v33 = vrot.slane %v1659_v51, 2  ;;  %v9002_v19 = vld [vmem:[#allocation13_spill] sm:$0xff]  ;;  %v9003_v39 = vld [vmem:[#allocation182_spill] sm:$0xff] }
 0x311   :  { %8993 = vst [vmem:[#allocation151_spill] sm:$0xff] %v6351_v0  ;;  %8994 = vst [vmem:[#allocation153_spill] sm:$0xff] %v6353_v54  ;;  %v1615_v32 = vmul.f32 %v1606_v40, %v4675_v25  ;;  %v1693_v0 = vsel %vm66_vm2, 0.0, %v8999_v43  ;;  %v9000_v54 = vld [vmem:[#allocation12_spill] sm:$0xff]  ;;  %v1655_v47 = vrot.slane %v1654_v10, 1  ;;  %v1593_v52 = vadd.f32 %v1592_v31, %v1591_v48 }
 0x312   :  { %8996 = vst [vmem:[#allocation154_spill] sm:$0xff] %v6356_v30  ;;  %2884 = vrot.lane.b32.xlu1 %v9000_v54, %s3864_s25  ;;  %v1616_v24 = vmul.f32 %v1607_v13, %v4677_v29  ;;  %v1686_v37 = vsel %vm66_vm2, %v8999_v43, %v9001_v12  ;;  %2886 = vrot.lane.b32.xlu0 %v9002_v19, %s3864_s25  ;;  %v1582_v13 = vrot.slane %v1581_v21, 1  ;;  %v1667_v31 = vrot.slane %v1666_v41, 2 }
 0x313   :  { %v1588_v35 = vadd.f32 %v1587_v42, %v1586_v16  ;;  %v1673_v63 = vadd.f32 %v1672_v50, %v1671_v34  ;;  %v1617_v40 = vmul.f32 %v1608_v61, %v8862_v8  ;;  %v1687_v30 = vsel %vm66_vm2, %v9001_v12, %v9003_v39  ;;  %v6377_v25 = vpop.permute.xlu1 %2472  ;;  %v9006_v34 = vld [vmem:[#allocation183_spill] sm:$0xff]  ;;  %v9050_v8 = vld [vmem:[#allocation24_spill] sm:$0xff] }
 0x314   :  { %9004 = vst [vmem:[#allocation164_spill] sm:$0xff] %v6377_v25  ;;  %v6379_v48 = vpop.permute.xlu0 %2474  ;;  %v1618_v29 = vmax.f32 %v1614_v60, 1e-16  ;;  %v1694_v43 = vmul.f32 %v1693_v0, %v4683_v18  ;;  %v6382_v53 = vadd.f32 %v1660_v33, %v1659_v51  ;;  %v1619_v56 = vmax.f32 %v1615_v32, 1e-16  ;;  %v9007_v50 = vld [vmem:[#allocation15_spill] sm:$0xff] }
 0x315   :  { %9005 = vst [vmem:[#allocation157_spill] sm:$0xff] %v6379_v48  ;;  %v1695_v16 = vmul.f32 %v1686_v37, %v4695_v59  ;;  %v1688_v42 = vsel %vm66_vm2, %v9003_v39, %v9006_v34  ;;  %v6390_v61 = vadd.f32 %v1575_v11, %v1574_v6  ;;  %v1594_v12 = vrot.slane %v1593_v52, 2  ;;  %v9008_v0 = vld [vmem:[#allocation14_spill] sm:$0xff] }
 0x316   :  { %2888 = vrot.lane.b32.xlu1 %v9007_v50, %s3864_s25  ;;  %v1620_v48 = vmax.f32 %v1616_v24, 1e-16  ;;  %v1696_v60 = vmul.f32 %v1687_v30, %v8718_v45  ;;  %2906 = vrot.lane.b32.xlu0 %v9008_v0, %s3864_s25  ;;  %v6395_v51 = vadd.f32 %v1655_v47, %v1654_v10  ;;  %v1589_v32 = vrot.slane %v1588_v35, 1  ;;  %v9011_v47 = vld [vmem:[#allocation16_spill] sm:$0xff] }
 0x317   :  { %v1674_v33 = vrot.slane %v1673_v63, 2  ;;  %v1621_v37 = vmax.f32 %v1617_v40, 1e-16  ;;  %v6397_v25 = vpop.permute.xlu1 %2476  ;;  %v6401_v34 = vadd.f32 %v1667_v31, %v1666_v41  ;;  %3762 = vrsqrt.f32 %v1618_v29  ;;  %v9013_v29 = vld [vmem:[#allocation17_spill] sm:$0xff]  ;;  %v9029_v45 = vld [vmem:[#allocation204_spill] sm:$0xff] }
 0x318   :  { %9009 = vst [vmem:[#allocation168_spill] sm:$0xff] %v6397_v25  ;;  %v6399_v39 = vpop.permute.xlu0 %2486  ;;  %v1698_v6 = vmax.f32 %v1694_v43, 1e-16  ;;  %v1697_v11 = vmul.f32 %v1688_v42, %v8724_v23  ;;  %v6404_v24 = vadd.f32 %v1582_v13, %v1581_v21  ;;  %3764 = vrsqrt.f32 %v1619_v56  ;;  %v9014_v56 = vld [vmem:[#allocation188_spill] sm:$0xff]  ;;  %v9027_v23 = vld [vmem:[#allocation190_spill] sm:$0xff] }
 0x319   :  { %9010 = vst [vmem:[#allocation161_spill] sm:$0xff] %v6399_v39  ;;  %v1699_v10 = vmax.f32 %v1695_v16, 1e-16  ;;  %v6409_v40 = vadd.f32 %v1594_v12, %v1593_v52  ;;  %3766 = vrsqrt.f32 %v1620_v48  ;;  %v1700_v25 = vmax.f32 %v1696_v60, 1e-16  ;;  %v9012_v39 = vld [vmem:[#allocation192_spill] sm:$0xff] }
 0x31a   :  { %2908 = vrot.lane.b32.xlu1 %v9011_v47, %s3864_s25  ;;  %v1769_v41 = vsel %vm83_vm3, 0.0, %v9012_v39  ;;  %2910 = vrot.lane.b32.xlu0 %v9013_v29, %s3864_s25  ;;  %v6415_v31 = vadd.f32 %v1589_v32, %v1588_v35  ;;  %v6417_v21 = vadd.f32 %v1674_v33, %v1673_v63  ;;  %3768 = vrsqrt.f32 %v1621_v37  ;;  %v9017_v16 = vld [vmem:[#allocation193_spill] sm:$0xff]  ;;  %v9018_v12 = vld [vmem:[#allocation196_spill] sm:$0xff]  ;;  %v9020_v37 = vld [vmem:[#allocation19_spill] sm:$0xff] }
 0x31b   :  { %v1749_v13 = vsel %vm83_vm3, 0.0, %v9014_v56  ;;  %v6421_v43 = vpop.permute.xlu1 %2488  ;;  %3770 = vrsqrt.f32 %v1698_v6  ;;  %v1701_v48 = vmax.f32 %v1697_v11, 1e-16  ;;  %v1762_v42 = vsel %vm83_vm3, %v9012_v39, %v9017_v16  ;;  %v9019_v60 = vld [vmem:[#allocation189_spill] sm:$0xff]  ;;  %v9021_v11 = vld [vmem:[#allocation194_spill] sm:$0xff] }
 0x31c   :  { %9015 = vst [vmem:[#allocation158_spill] sm:$0xff] %v6421_v43  ;;  %v6423_v52 = vpop.permute.xlu0 %2490  ;;  %v1793_v35 = vsel %vm83_vm3, 0.0, %v9018_v12  ;;  %3772 = vrsqrt.f32 %v1699_v10  ;;  %v1742_v32 = vsel %vm83_vm3, %v9014_v56, %v9019_v60  ;;  %v1770_v33 = vmul.f32 %v1769_v41, %v8989_v5  ;;  %v9022_v10 = vld [vmem:[#allocation18_spill] sm:$0xff]  ;;  %v9023_v41 = vld [vmem:[#allocation197_spill] sm:$0xff]  ;;  %v9024_v43 = vld [vmem:[#allocation200_spill] sm:$0xff] }
 0x31d   :  { %9016 = vst [vmem:[#allocation172_spill] sm:$0xff] %v6423_v52  ;;  %3774 = vrsqrt.f32 %v1700_v25  ;;  %v1750_v39 = vmul.f32 %v1749_v13, %v8963_v49  ;;  %v1763_v30 = vsel %vm83_vm3, %v9017_v16, %v9021_v11  ;;  %v1771_v63 = vmul.f32 %v1762_v42, %v9000_v54  ;;  %v9032_v16 = vld [vmem:[#allocation195_spill] sm:$0xff]  ;;  %v9034_v49 = vld [vmem:[#allocation61_spill] sm:$0xff] }
 0x31e   :  { %2912 = vrot.lane.b32.xlu1 %v9020_v37, %s3864_s25  ;;  %2930 = vrot.lane.b32.xlu0 %v9022_v10, %s3864_s25  ;;  %v1794_v56 = vmul.f32 %v1793_v35, %v9008_v0  ;;  %v1786_v52 = vsel %vm83_vm3, %v9018_v12, %v9023_v41  ;;  %v1817_v25 = vsel %vm83_vm3, 0.0, %v9024_v43  ;;  %3776 = vrsqrt.f32 %v1701_v48  ;;  %v9028_v12 = vld [vmem:[#allocation198_spill] sm:$0xff]  ;;  %v9031_v48 = vld [vmem:[#allocation191_spill] sm:$0xff] }
 0x31f   :  { %v6451_v6 = vpop.permute.xlu1 %2492  ;;  %v1751_v5 = vmul.f32 %v1742_v32, %v8971_v14  ;;  %v1743_v42 = vsel %vm83_vm3, %v9019_v60, %v9027_v23  ;;  %v1774_v35 = vadd.f32 %v1770_v33, %v1750_v39  ;;  %v1772_v0 = vmul.f32 %v1763_v30, %v9002_v19  ;;  %v9033_v39 = vld [vmem:[#allocation21_spill] sm:$0xff] }
 0x320   :  { %9025 = vst [vmem:[#allocation165_spill] sm:$0xff] %v6451_v6  ;;  %v6453_v13 = vpop.permute.xlu0 %2506  ;;  %v1787_v54 = vsel %vm83_vm3, %v9023_v41, %v9028_v12  ;;  %v1841_v6 = vsel %vm83_vm3, 0.0, %v9029_v45  ;;  %v1744_v32 = vsel %vm83_vm3, %v9027_v23, %v9031_v48  ;;  %v1764_v60 = vsel %vm83_vm3, %v9021_v11, %v9032_v16  ;;  %v9037_v16 = vld [vmem:[#allocation201_spill] sm:$0xff] }
 0x321   :  { %9026 = vst [vmem:[#allocation155_spill] sm:$0xff] %v6453_v13  ;;  %v9030_v13 = vld [vmem:[#allocation20_spill] sm:$0xff]  ;;  %v1795_v30 = vmul.f32 %v1786_v52, %v9011_v47  ;;  %v1818_v33 = vmul.f32 %v1817_v25, %v9022_v10  ;;  %v1752_v41 = vmul.f32 %v1743_v42, %v8973_v4  ;;  %v1775_v19 = vadd.f32 %v1771_v63, %v1751_v5  ;;  %v9038_v25 = vld [vmem:[#allocation202_spill] sm:$0xff] }
 0x322   :  { %2932 = vrot.lane.b32.xlu1 %v9030_v13, %s3864_s25  ;;  %2934 = vrot.lane.b32.xlu0 %v9033_v39, %s3864_s25  ;;  %v1798_v14 = vadd.f32 %v1794_v56, %v1774_v35  ;;  %v1865_v59 = vsel %vm83_vm3, 0.0, %v9034_v49  ;;  %v1796_v11 = vmul.f32 %v1787_v54, %v9013_v29  ;;  %v1810_v52 = vsel %vm83_vm3, %v9024_v43, %v9037_v16  ;;  %v9039_v42 = vld [vmem:[#allocation22_spill] sm:$0xff]  ;;  %v9040_v54 = vld [vmem:[#allocation76_spill] sm:$0xff] }
 0x323   :  { %v6481_v18 = vpop.permute.xlu1 %2508  ;;  %v1811_v48 = vsel %vm83_vm3, %v9037_v16, %v9038_v25  ;;  %v1842_v5 = vmul.f32 %v1841_v6, %v9039_v42  ;;  %v6496_v56 = vmul.f32 %v1744_v32, %v8985_v44  ;;  %v1776_v35 = vadd.f32 %v1772_v0, %v1752_v41  ;;  %v9041_v6 = vld [vmem:[#allocation59_spill] sm:$0xff]  ;;  %v9042_v32 = vld [vmem:[#allocation26_spill] sm:$0xff]  ;;  %v9048_v4 = vld [vmem:[#allocation72_spill] sm:$0xff] }
 0x324   :  { %9035 = vst [vmem:[#allocation162_spill] sm:$0xff] %v6481_v18  ;;  %v6483_v23 = vpop.permute.xlu0 %2510  ;;  %v6493_v63 = vpop.eup %3762  ;;  %v1889_v18 = vsel %vm83_vm3, 0.0, %v9040_v54  ;;  %v1799_v16 = vadd.f32 %v1795_v30, %v1775_v19  ;;  %v1822_v29 = vadd.f32 %v1818_v33, %v1798_v14  ;;  %v1834_v47 = vsel %vm83_vm3, %v9029_v45, %v9041_v6  ;;  %v9044_v14 = vld [vmem:[#allocation69_spill] sm:$0xff] }
 0x325   :  { %9036 = vst [vmem:[#allocation169_spill] sm:$0xff] %v6483_v23  ;;  %v6499_v23 = vmul.f32 %v1764_v60, %v9007_v50  ;;  %v6505_v43 = vpop.eup %3764  ;;  %v1866_v10 = vmul.f32 %v1865_v59, %v9042_v32  ;;  %v1819_v60 = vmul.f32 %v1810_v52, %v9030_v13  ;;  %v1820_v41 = vmul.f32 %v1811_v48, %v9033_v39  ;;  %v9043_v50 = vld [vmem:[#allocation68_spill] sm:$0xff] }
 0x326   :  { %2936 = vrot.lane.b32.xlu1 %v8930_v57, %s3864_s25  ;;  %2954 = vrot.lane.b32.xlu0 %v9039_v42, %s3864_s25  ;;  %v6513_v0 = vpop.eup %3766  ;;  %v1835_v19 = vsel %vm83_vm3, %v9041_v6, %v9043_v50  ;;  %v1913_v30 = vsel %vm83_vm3, 0.0, %v9044_v14  ;;  %v1800_v42 = vadd.f32 %v1796_v11, %v1776_v35  ;;  %v1846_v44 = vadd.f32 %v1842_v5, %v1822_v29  ;;  %v9049_v6 = vld [vmem:[#allocation199_spill] sm:$0xff]  ;;  %v9052_v11 = vld [vmem:[#allocation74_spill] sm:$0xff]  ;;  %v9053_v35 = vld [vmem:[#allocation65_spill] sm:$0xff] }
 0x327   :  { %v6522_v33 = vpop.permute.xlu1 %2512  ;;  %v6526_v59 = vpop.eup %3768  ;;  %v1858_v52 = vsel %vm83_vm3, %v9034_v49, %v9048_v4  ;;  %v1890_v48 = vmul.f32 %v1889_v18, %v4495_v58  ;;  %v1788_v13 = vsel %vm83_vm3, %v9028_v12, %v9049_v6  ;;  %v1937_v29 = vsel %vm83_vm3, 0.0, %v9052_v11 }
 0x328   :  { %9045 = vst [vmem:[#allocation159_spill] sm:$0xff] %v6522_v33  ;;  %v6524_v45 = vpop.permute.xlu0 %2530  ;;  %9047 = vst [vmem:[#allocation173_spill] sm:$0xff] %v6526_v59  ;;  %v6532_v39 = vpop.eup %3770  ;;  %v1843_v33 = vmul.f32 %v1834_v47, %v9050_v8  ;;  %v1844_v18 = vmul.f32 %v1835_v19, %v8926_v27  ;;  %v1870_v5 = vadd.f32 %v1866_v10, %v1846_v44  ;;  %v9054_v47 = vld [vmem:[#allocation34_spill] sm:$0xff]  ;;  %v9056_v59 = vld [vmem:[#allocation80_spill] sm:$0xff] }
 0x329   :  { %9046 = vst [vmem:[#allocation166_spill] sm:$0xff] %v6524_v45  ;;  %v1859_v45 = vsel %vm83_vm3, %v9048_v4, %v9051_v38  ;;  %v6545_v49 = vpop.eup %3772  ;;  %v1882_v12 = vsel %vm83_vm3, %v9040_v54, %v9053_v35  ;;  %v1914_v6 = vmul.f32 %v1913_v30, %v9054_v47  ;;  %v1823_v55 = vadd.f32 %v1819_v60, %v1799_v16  ;;  %v9059_v47 = vld [vmem:[#allocation64_spill] sm:$0xff]  ;;  %v9060_v60 = vld [vmem:[#allocation203_spill] sm:$0xff] }
 0x32a   :  { %2956 = vrot.lane.b32.xlu1 %v9050_v8, %s3864_s25  ;;  %2958 = vrot.lane.b32.xlu0 %v8926_v27, %s3864_s25  ;;  %v6554_v4 = vpop.eup %3774  ;;  %v1824_v3 = vadd.f32 %v1820_v41, %v1800_v42  ;;  %v1867_v8 = vmul.f32 %v1858_v52, %v4476_v1  ;;  %v1883_v19 = vsel %vm83_vm3, %v9053_v35, %v9056_v59  ;;  %v9061_v35 = vld [vmem:[#allocation32_spill] sm:$0xff] }
 0x32b   :  { %9055 = vst [vmem:[#allocation163_spill] sm:$0xff] %v6554_v4  ;;  %v6560_v44 = vpop.permute.xlu1 %2532  ;;  %v1868_v54 = vmul.f32 %v1859_v45, %v4478_v20  ;;  %v1894_v30 = vadd.f32 %v1890_v48, %v1870_v5  ;;  %v1906_v27 = vsel %vm83_vm3, %v9044_v14, %v9059_v47  ;;  %v1938_v16 = vmul.f32 %v1937_v29, %v4577_v9  ;;  %v6569_v42 = vpop.eup %3776  ;;  %v9062_v4 = vld [vmem:[#allocation70_spill] sm:$0xff]  ;;  %v9063_v5 = vld [vmem:[#allocation67_spill] sm:$0xff] }
 0x32c   :  { %9057 = vst [vmem:[#allocation170_spill] sm:$0xff] %v6560_v44  ;;  %v6562_v10 = vpop.permute.xlu0 %2534  ;;  %v1812_v41 = vsel %vm83_vm3, %v9038_v25, %v9060_v60  ;;  %v1847_v52 = vadd.f32 %v1843_v33, %v1823_v55  ;;  %v1891_v44 = vmul.f32 %v1882_v12, %v9061_v35  ;;  %v1907_v45 = vsel %vm83_vm3, %v9059_v47, %v9062_v4  ;;  %v9064_v12 = vld [vmem:[#allocation77_spill] sm:$0xff] }
 0x32d   :  { %9058 = vst [vmem:[#allocation167_spill] sm:$0xff] %v6562_v10  ;;  %v1848_v48 = vadd.f32 %v1844_v18, %v1824_v3  ;;  %v1892_v14 = vmul.f32 %v1883_v19, %v4527_v7  ;;  %v1918_v29 = vadd.f32 %v1914_v6, %v1894_v30  ;;  %v1930_v10 = vsel %vm83_vm3, %v9052_v11, %v9063_v5  ;;  %v9067_v6 = vld [vmem:[#allocation60_spill] sm:$0xff] }
 0x32e   :  { %2960 = vrot.lane.b32.xlu1 %v8936_v36, %s3864_s25  ;;  %2978 = vrot.lane.b32.xlu0 %v9042_v32, %s3864_s25  ;;  %v1797_v55 = vmul.f32 %v1788_v13, %v9020_v37  ;;  %v1871_v25 = vadd.f32 %v1867_v8, %v1847_v52  ;;  %v1915_v33 = vmul.f32 %v1906_v27, %v4559_v22  ;;  %v9068_v52 = vld [vmem:[#allocation40_spill] sm:$0xff] }
 0x32f   :  { %v1931_v47 = vsel %vm83_vm3, %v9063_v5, %v9064_v12  ;;  %v6591_v3 = vpop.permute.xlu1 %2536  ;;  %v1836_v11 = vsel %vm83_vm3, %v9043_v50, %v9067_v6  ;;  %v1872_v19 = vadd.f32 %v1868_v54, %v1848_v48  ;;  %v1916_v30 = vmul.f32 %v1907_v45, %v4562_v26  ;;  %v9070_v50 = vld [vmem:[#allocation63_spill] sm:$0xff]  ;;  %v9076_v6 = vld [vmem:[#allocation66_spill] sm:$0xff] }
 0x330   :  { %9065 = vst [vmem:[#allocation174_spill] sm:$0xff] %v6591_v3  ;;  %v6593_v18 = vpop.permute.xlu0 %2554  ;;  %v1942_v60 = vadd.f32 %v1938_v16, %v1918_v29  ;;  %v1777_v8 = vadd.f32 %v6499_v23, %v6496_v56  ;;  %v1821_v27 = vmul.f32 %v1812_v41, %v8930_v57  ;;  %v1895_v13 = vadd.f32 %v1891_v44, %v1871_v25 }
 0x331   :  { %9066 = vst [vmem:[#allocation171_spill] sm:$0xff] %v6593_v18  ;;  %v1939_v5 = vmul.f32 %v1930_v10, %v9068_v52  ;;  %v9069_v18 = vrot.slane %v6382_v53, 1  ;;  %v1860_v54 = vsel %vm83_vm3, %v9051_v38, %v9070_v50  ;;  %v1896_v16 = vadd.f32 %v1892_v14, %v1872_v19  ;;  %v9077_v19 = vld [vmem:[#allocation184_spill] sm:$0xff] }
 0x332   :  { %2980 = vrot.lane.b32.xlu1 %v4476_v1, %s3864_s25  ;;  %v1940_v45 = vmul.f32 %v1931_v47, %v8896_v17  ;;  %2982 = vrot.lane.b32.xlu0 %v4478_v20, %s3864_s25  ;;  %v9071_v23 = vrot.slane %v6401_v34, 1  ;;  %v1801_v44 = vadd.f32 %v1797_v55, %v1777_v8  ;;  %v1845_v10 = vmul.f32 %v1836_v11, %v8936_v36  ;;  %v9079_v8 = vld [vmem:[#allocation185_spill] sm:$0xff] }
 0x333   :  { %v1663_v3 = vadd.f32 %v9069_v18, %v6382_v53  ;;  %v1919_v41 = vadd.f32 %v1915_v33, %v1895_v13  ;;  %v6620_v53 = vpop.permute.xlu1 %2556  ;;  %v9074_v38 = vrot.slane %v6409_v40, 1  ;;  %v9075_v29 = vrot.slane %v6417_v21, 1 }
 0x334   :  { %v6617_v56 = vadd.f32 %v9071_v23, %v6401_v34  ;;  %9072 = vst [vmem:[#allocation48_spill] sm:$0xff] %v6620_v53  ;;  %v6622_v48 = vpop.permute.xlu0 %2558  ;;  %v1920_v47 = vadd.f32 %v1916_v30, %v1896_v16  ;;  %v2018_v34 = vrot.slane %v1942_v60, 4  ;;  %v1825_v18 = vadd.f32 %v1821_v27, %v1801_v44  ;;  %v9081_v30 = vld [vmem:[#allocation186_spill] sm:$0xff] }
 0x335   :  { %9073 = vst [vmem:[#allocation175_spill] sm:$0xff] %v6622_v48  ;;  %v1597_v14 = vadd.f32 %v9074_v38, %v6409_v40  ;;  %v6630_v25 = vadd.f32 %v9075_v29, %v6417_v21  ;;  %v1869_v55 = vmul.f32 %v1860_v54, %v8818_v62  ;;  %v1884_v33 = vsel %vm83_vm3, %v9056_v59, %v9076_v6  ;;  %v9086_v29 = vld [vmem:[#allocation75_spill] sm:$0xff] }
 0x336   :  { %v1943_v11 = vadd.f32 %v1939_v5, %v1919_v41  ;;  %2984 = vrot.lane.b32.xlu1 %v8818_v62, %s3864_s25  ;;  %v6640_v40 = vsel %vm83_vm3, 0.0, %v9077_v19  ;;  %v6645_v21 = vsel %vm83_vm3, %v9077_v19, %v9079_v8  ;;  %v6650_v27 = vsel %vm83_vm3, %v9079_v8, %v9081_v30  ;;  %3002 = vrot.lane.b32.xlu0 %v4495_v58, %s3864_s25  ;;  %v9083_v5 = vld [vmem:[#allocation73_spill] sm:$0xff]  ;;  %v9090_v8 = vld [vmem:[#allocation187_spill] sm:$0xff] }
 0x337   :  { %9078 = vst [vmem:[#allocation136_spill] sm:$0xff] %v6640_v40  ;;  %9080 = vst [vmem:[#allocation83_spill] sm:$0xff] %v6645_v21  ;;  %v1944_v13 = vadd.f32 %v1940_v45, %v1920_v47  ;;  %v1849_v59 = vadd.f32 %v1845_v10, %v1825_v18  ;;  %v1908_v50 = vsel %vm83_vm3, %v9062_v4, %v9083_v5  ;;  %v1946_v54 = vsel %vm460_vm8, %v1942_v60, 0.0  ;;  %v6658_v16 = vpop.permute.xlu1 %2560  ;;  %v9092_v5 = vld [vmem:[#allocation134_spill] sm:$0xff]  ;;  %v9187_v40 = vld [vmem:[#allocation128_spill] sm:$0xff] }
 0x338   :  { %9082 = vst [vmem:[#allocation115_spill] sm:$0xff] %v6650_v27  ;;  %9084 = vst [vmem:[#allocation137_spill] sm:$0xff] %v6658_v16  ;;  %v6660_v23 = vpop.permute.xlu0 %2578  ;;  %v1626_v44 = vmul.f32 %v6493_v63, %v6390_v61  ;;  %v1893_v41 = vmul.f32 %v1884_v33, %v8822_v2  ;;  %v2026_v45 = vsel %vm460_vm8, %v2018_v34, 0.0  ;;  %v1627_v10 = vmul.f32 %v6505_v43, %v6404_v24  ;;  %v9124_v16 = vld [vmem:[#allocation50_spill] sm:$0xff] }
 0x339   :  { %9085 = vst [vmem:[#allocation138_spill] sm:$0xff] %v6660_v23  ;;  %v1628_v38 = vmul.f32 %v6513_v0, %v6415_v31  ;;  %v1873_v4 = vadd.f32 %v1869_v55, %v1849_v59  ;;  %v1953_v60 = vsel %vm460_vm8, %v1943_v11, 0.0  ;;  %v1932_v47 = vsel %vm83_vm3, %v9064_v12, %v9086_v29 }
 0x33a   :  { %3004 = vrot.lane.b32.xlu1 %v9061_v35, %s3864_s25  ;;  %v1706_v61 = vmul.f32 %v6532_v39, %v6395_v51  ;;  %v1917_v63 = vmul.f32 %v1908_v50, %v8827_v15  ;;  %v1947_v34 = vrot.slane %v1946_v54, 4  ;;  %v2019_v24 = vrot.slane %v1943_v11, 4  ;;  %3006 = vrot.lane.b32.xlu0 %v4527_v7, %s3864_s25  ;;  %v9089_v11 = vld [vmem:[#allocation173_spill] sm:$0xff] }
 0x33b   :  { %v1960_v43 = vsel %vm460_vm8, %v1944_v13, 0.0  ;;  %v2027_v31 = vrot.slane %v2026_v45, 4  ;;  %v2020_v0 = vrot.slane %v1944_v13, 4  ;;  %v6682_v18 = vpop.permute.xlu1 %2580  ;;  %v1630_v55 = vmul.f32 %v1626_v44, %v6259_v46  ;;  %v9093_v44 = vld [vmem:[#allocation144_spill] sm:$0xff] }
 0x33c   :  { %9087 = vst [vmem:[#allocation43_spill] sm:$0xff] %v6682_v18  ;;  %v6684_v12 = vpop.permute.xlu0 %2582  ;;  %v1707_v6 = vmul.f32 %v6545_v49, %v1663_v3  ;;  %v1897_v51 = vadd.f32 %v1893_v41, %v1873_v4  ;;  %v1954_v39 = vrot.slane %v1953_v60, 4  ;;  %v1941_v33 = vmul.f32 %v1932_v47, %v8908_v28  ;;  %v9094_v4 = vld [vmem:[#allocation34_spill] sm:$0xff] }
 0x33d   :  { %9088 = vst [vmem:[#allocation82_spill] sm:$0xff] %v6684_v12  ;;  %v1629_v19 = vmul.f32 %v9089_v11, %v1597_v14  ;;  %v6693_v59 = vsel %vm83_vm3, %v9081_v30, %v9090_v8  ;;  %v1961_v13 = vrot.slane %v1960_v43, 4  ;;  %v1631_v50 = vmul.f32 %v1627_v10, %v9092_v5  ;;  %v9100_v12 = vld [vmem:[#allocation145_spill] sm:$0xff] }
 0x33e   :  { %9091 = vst [vmem:[#allocation44_spill] sm:$0xff] %v6693_v59  ;;  %3008 = vrot.lane.b32.xlu1 %v8822_v2, %s3864_s25  ;;  %v1632_v29 = vmul.f32 %v1628_v38, %v9093_v44  ;;  %v1921_v49 = vadd.f32 %v1917_v63, %v1897_v51  ;;  %v1948_v3 = vadd.f32 %v1947_v34, %v1946_v54  ;;  %v2033_v41 = vsel %vm460_vm8, %v2019_v24, 0.0  ;;  %v9097_v38 = vld [vmem:[#allocation163_spill] sm:$0xff]  ;;  %v9098_v24 = vld [vmem:[#allocation142_spill] sm:$0xff] }
 0x33f   :  { %3026 = vrot.lane.b32.xlu0 %v9094_v4, %s3864_s25  ;;  %v1710_v14 = vmul.f32 %v1706_v61, %v6259_v46  ;;  %v2028_v47 = vadd.f32 %v2027_v31, %v2026_v45  ;;  %v2040_v30 = vsel %vm460_vm8, %v2020_v0, 0.0  ;;  %v6704_v11 = vpop.permute.xlu1 %2584  ;;  %v1711_v10 = vmul.f32 %v1707_v6, %v9092_v5  ;;  %v9101_v61 = vld [vmem:[#allocation146_spill] sm:$0xff] }
 0x340   :  { %9095 = vst [vmem:[#allocation139_spill] sm:$0xff] %v6704_v11  ;;  %v6706_v8 = vpop.permute.xlu0 %2602  ;;  %v1708_v63 = vmul.f32 %v9097_v38, %v6617_v56  ;;  %v1955_v54 = vadd.f32 %v1954_v39, %v1953_v60  ;;  %v1945_v34 = vadd.f32 %v1941_v33, %v1921_v49  ;;  %v6712_v51 = vadd.f32 %v1630_v55, %v9098_v24  ;;  %v9103_v60 = vld [vmem:[#allocation149_spill] sm:$0xff]  ;;  %v9105_v39 = vld [vmem:[#allocation147_spill] sm:$0xff]  ;;  %v9116_v11 = vld [vmem:[#allocation88_spill] sm:$0xff] }
 0x341   :  { %9096 = vst [vmem:[#allocation109_spill] sm:$0xff] %v6706_v8  ;;  %v1633_v23 = vmul.f32 %v1629_v19, %v9100_v12  ;;  %v2034_v46 = vrot.slane %v2033_v41, 4  ;;  %v1962_v45 = vadd.f32 %v1961_v13, %v1960_v43  ;;  %v6718_v31 = vadd.f32 %v1631_v50, %v9101_v61  ;;  %v9107_v19 = vld [vmem:[#allocation79_spill] sm:$0xff]  ;;  %v9112_v61 = vld [vmem:[#allocation150_spill] sm:$0xff]  ;;  %v9114_v8 = vld [vmem:[#allocation84_spill] sm:$0xff] }
 0x342   :  { %9099 = vst [vmem:[#allocation45_spill] sm:$0xff] %v6712_v51  ;;  %3028 = vrot.lane.b32.xlu1 %v4559_v22, %s3864_s25  ;;  %v1709_v0 = vmul.f32 %v6569_v42, %v6630_v25  ;;  %v1949_v6 = vrot.slane %v1948_v3, 2  ;;  %v2041_v56 = vrot.slane %v2040_v30, 4  ;;  %v6725_v55 = vadd.f32 %v1710_v14, %v9103_v60  ;;  %v9110_v42 = vld [vmem:[#allocation156_spill] sm:$0xff] }
 0x343   :  { %9102 = vst [vmem:[#allocation116_spill] sm:$0xff] %v6718_v31  ;;  %3030 = vrot.lane.b32.xlu0 %v4562_v26, %s3864_s25  ;;  %v6728_v33 = vadd.f32 %v1632_v29, %v9105_v39  ;;  %v2029_v43 = vrot.slane %v2028_v47, 2  ;;  %v1989_v13 = vsel %vm83_vm3, 0.0, %v9107_v19  ;;  %v6732_v5 = vpop.permute.xlu1 %2604  ;;  %v6737_v25 = vadd.f32 %v1711_v10, %v9110_v42  ;;  %v9170_v31 = vld [vmem:[#allocation18_spill] sm:$0xff] }
 0x344   :  { %9104 = vst [vmem:[#allocation110_spill] sm:$0xff] %v6725_v55  ;;  %9108 = vst [vmem:[#allocation118_spill] sm:$0xff] %v6732_v5  ;;  %v6734_v50 = vpop.permute.xlu0 %2606  ;;  %v1712_v49 = vmul.f32 %v1708_v63, %v9093_v44  ;;  %v1956_v38 = vrot.slane %v1955_v54, 2  ;;  %v1967_v14 = vsel %vm460_vm8, %v1945_v34, 0.0  ;;  %v2021_v24 = vrot.slane %v1945_v34, 4  ;;  %v9115_v63 = vld [vmem:[#allocation46_spill] sm:$0xff] }
 0x345   :  { %9106 = vst [vmem:[#allocation114_spill] sm:$0xff] %v6728_v33  ;;  %9109 = vst [vmem:[#allocation176_spill] sm:$0xff] %v6734_v50  ;;  %v6742_v29 = vadd.f32 %v1633_v23, %v9112_v61  ;;  %v2035_v60 = vadd.f32 %v2034_v46, %v2033_v41  ;;  %v1963_v39 = vrot.slane %v1962_v45, 2  ;;  %v1982_v5 = vsel %vm83_vm3, %v9107_v19, %v9114_v8  ;;  %v9117_v46 = vld [vmem:[#allocation86_spill] sm:$0xff] }
 0x346   :  { %9111 = vst [vmem:[#allocation120_spill] sm:$0xff] %v6737_v25  ;;  %3032 = vrot.lane.b32.xlu1 %v8827_v15, %s3864_s25  ;;  %v1713_v10 = vmul.f32 %v1709_v0, %v9100_v12  ;;  %v1950_v42 = vadd.f32 %v1949_v6, %v1948_v3  ;;  %v2042_v44 = vadd.f32 %v2041_v56, %v2040_v30  ;;  %v1968_v34 = vrot.slane %v1967_v14, 4  ;;  %v9120_v3 = vld [vmem:[#allocation160_spill] sm:$0xff] }
 0x347   :  { %9113 = vst [vmem:[#allocation177_spill] sm:$0xff] %v6742_v29  ;;  %v1990_v50 = vmul.f32 %v1989_v13, %v9115_v63  ;;  %v1983_v23 = vsel %vm83_vm3, %v9114_v8, %v9116_v11  ;;  %3050 = vrot.lane.b32.xlu0 %v4577_v9, %s3864_s25  ;;  %v2030_v41 = vadd.f32 %v2029_v43, %v2028_v47  ;;  %v6759_v61 = vpop.permute.xlu1 %2608  ;;  %v2047_v6 = vsel %vm460_vm8, %v2021_v24, 0.0  ;;  %v9122_v8 = vld [vmem:[#allocation49_spill] sm:$0xff]  ;;  %v9123_v13 = vld [vmem:[#allocation87_spill] sm:$0xff]  ;;  %v9126_v24 = vld [vmem:[#allocation52_spill] sm:$0xff] }
 0x348   :  { %v1984_v19 = vsel %vm83_vm3, %v9116_v11, %v9117_v46  ;;  %9118 = vst [vmem:[#allocation121_spill] sm:$0xff] %v6759_v61  ;;  %v6761_v12 = vpop.permute.xlu0 %2626  ;;  %v6764_v30 = vadd.f32 %v1712_v49, %v9120_v3  ;;  %v1957_v0 = vadd.f32 %v1956_v38, %v1955_v54  ;;  %v1991_v56 = vmul.f32 %v1982_v5, %v9122_v8  ;;  %v9125_v11 = vld [vmem:[#allocation89_spill] sm:$0xff] }
 0x349   :  { %9119 = vst [vmem:[#allocation178_spill] sm:$0xff] %v6761_v12  ;;  %v2069_v47 = vsel %vm83_vm3, 0.0, %v9123_v13  ;;  %v2036_v43 = vrot.slane %v2035_v60, 2  ;;  %v1964_v18 = vadd.f32 %v1963_v39, %v1962_v45  ;;  %v1992_v48 = vmul.f32 %v1983_v23, %v9124_v16  ;;  %v9127_v45 = vld [vmem:[#allocation51_spill] sm:$0xff] }
 0x34a   :  { %9121 = vst [vmem:[#allocation125_spill] sm:$0xff] %v6764_v30  ;;  %v2062_v46 = vsel %vm83_vm3, %v9123_v13, %v9125_v11  ;;  %3052 = vrot.lane.b32.xlu1 %v9068_v52, %s3864_s25  ;;  %v1951_v49 = vrot.slane %v1950_v42, 1  ;;  %v2043_v54 = vrot.slane %v2042_v44, 2  ;;  %v1994_v38 = vmax.f32 %v1990_v50, 1e-16  ;;  %v9130_v13 = vld [vmem:[#allocation154_spill] sm:$0xff] }
 0x34b   :  { %v1993_v3 = vmul.f32 %v1984_v19, %v9126_v24  ;;  %3054 = vrot.lane.b32.xlu0 %v8896_v17, %s3864_s25  ;;  %v1969_v5 = vadd.f32 %v1968_v34, %v1967_v14  ;;  %v2048_v61 = vrot.slane %v2047_v6, 4  ;;  %v2070_v39 = vmul.f32 %v2069_v47, %v9127_v45  ;;  %v6780_v23 = vpop.permute.xlu1 %2628  ;;  %v9132_v50 = vld [vmem:[#allocation55_spill] sm:$0xff]  ;;  %v9133_v14 = vld [vmem:[#allocation90_spill] sm:$0xff] }
 0x34c   :  { %9128 = vst [vmem:[#allocation179_spill] sm:$0xff] %v6780_v23  ;;  %v6782_v12 = vpop.permute.xlu0 %2630  ;;  %v6785_v53 = vadd.f32 %v1713_v10, %v9130_v13  ;;  %v2031_v16 = vrot.slane %v2030_v41, 1  ;;  %v1958_v8 = vrot.slane %v1957_v0, 1  ;;  %v1995_v63 = vmax.f32 %v1991_v56, 1e-16  ;;  %v9134_v56 = vld [vmem:[#allocation7_spill] sm:$0xff] }
 0x34d   :  { %9129 = vst [vmem:[#allocation180_spill] sm:$0xff] %v6782_v12  ;;  %v2071_v30 = vmul.f32 %v2062_v46, %v9132_v50  ;;  %v6788_v19 = vadd.f32 %v2036_v43, %v2035_v60  ;;  %v1965_v24 = vrot.slane %v1964_v18, 1  ;;  %v1996_v29 = vmax.f32 %v1992_v48, 1e-16  ;;  %v9135_v46 = vld [vmem:[#allocation91_spill] sm:$0xff]  ;;  %v9161_v50 = vld [vmem:[#allocation105_spill] sm:$0xff] }
 0x34e   :  { %9131 = vst [vmem:[#allocation181_spill] sm:$0xff] %v6785_v53  ;;  %v2063_v34 = vsel %vm83_vm3, %v9125_v11, %v9133_v14  ;;  %3056 = vrot.lane.b32.xlu1 %v8908_v28, %s3864_s25  ;;  %v6795_v47 = vadd.f32 %v1951_v49, %v1950_v42  ;;  %v6797_v10 = vadd.f32 %v2043_v54, %v2042_v44  ;;  %3778 = vrsqrt.f32 %v1994_v38  ;;  %v9139_v49 = vld [vmem:[#allocation56_spill] sm:$0xff]  ;;  %v9162_v45 = vld [vmem:[#allocation14_spill] sm:$0xff] }
 0x34f   :  { %v1997_v13 = vmax.f32 %v1993_v3, 1e-16  ;;  %3238 = vrot.lane.b32.xlu0 %v9134_v56, %s3865_s26  ;;  %v1970_v60 = vrot.slane %v1969_v5, 2  ;;  %v6801_v43 = vadd.f32 %v2048_v61, %v2047_v6  ;;  %v2074_v48 = vmax.f32 %v2070_v39, 1e-16  ;;  %v6806_v12 = vpop.permute.xlu1 %2632  ;;  %v9142_v3 = vld [vmem:[#allocation8_spill] sm:$0xff] }
 0x350   :  { %v2064_v11 = vsel %vm83_vm3, %v9133_v14, %v9135_v46  ;;  %9136 = vst [vmem:[#allocation182_spill] sm:$0xff] %v6806_v12  ;;  %v6808_v23 = vpop.permute.xlu0 %2650  ;;  %v6810_v42 = vadd.f32 %v2031_v16, %v2030_v41  ;;  %3780 = vrsqrt.f32 %v1995_v63  ;;  %v2075_v44 = vmax.f32 %v2071_v30, 1e-16  ;;  %v9143_v16 = vld [vmem:[#allocation58_spill] sm:$0xff]  ;;  %v9144_v63 = vld [vmem:[#allocation101_spill] sm:$0xff] }
 0x351   :  { %9137 = vst [vmem:[#allocation183_spill] sm:$0xff] %v6808_v23  ;;  %v6813_v54 = vmul.f32 %v2063_v34, %v9139_v49  ;;  %v6815_v38 = vadd.f32 %v1958_v8, %v1957_v0  ;;  %v6818_v6 = vadd.f32 %v1965_v24, %v1964_v18  ;;  %3782 = vrsqrt.f32 %v1996_v29  ;;  %v9145_v30 = vld [vmem:[#allocation97_spill] sm:$0xff]  ;;  %v9147_v29 = vld [vmem:[#allocation102_spill] sm:$0xff]  ;;  %v9157_v23 = vld [vmem:[#allocation108_spill] sm:$0xff] }
 0x352   :  { %9138 = vst [vmem:[#allocation192_spill] sm:$0xff] %v6810_v42  ;;  %3240 = vrot.lane.b32.xlu1 %v9142_v3, %s3865_s26  ;;  %3784 = vrsqrt.f32 %v1997_v13  ;;  %v6824_v41 = vmul.f32 %v2064_v11, %v9143_v16  ;;  %v2138_v14 = vsel %vm100_vm4, %v9145_v30, %v9144_v63  ;;  %v9146_v0 = vld [vmem:[#allocation9_spill] sm:$0xff]  ;;  %v6831_v8 = vadd.f32 %v1970_v60, %v1969_v5  ;;  %v9150_v11 = vld [vmem:[#allocation95_spill] sm:$0xff]  ;;  %v9152_v5 = vld [vmem:[#allocation106_spill] sm:$0xff] }
 0x353   :  { %9140 = vst [vmem:[#allocation188_spill] sm:$0xff] %v6815_v38  ;;  %9141 = vst [vmem:[#allocation193_spill] sm:$0xff] %v6818_v6  ;;  %3242 = vrot.lane.b32.xlu0 %v9146_v0, %s3865_s26  ;;  %3786 = vrsqrt.f32 %v2074_v48  ;;  %v2139_v24 = vsel %vm100_vm4, %v9144_v63, %v9147_v29  ;;  %v6837_v34 = vpop.permute.xlu1 %2652  ;;  %v9151_v30 = vld [vmem:[#allocation99_spill] sm:$0xff]  ;;  %v9154_v48 = vld [vmem:[#allocation96_spill] sm:$0xff]  ;;  %v2140_v46 = vsel %vm100_vm4, %v9147_v29, %v9157_v23 }
 0x354   :  { %9148 = vst [vmem:[#allocation196_spill] sm:$0xff] %v6837_v34  ;;  %v6839_v13 = vpop.permute.xlu0 %2654  ;;  %3788 = vrsqrt.f32 %v2075_v44  ;;  %v2118_v39 = vsel %vm100_vm4, %v9151_v30, %v9150_v11  ;;  %v9153_v60 = vld [vmem:[#allocation103_spill] sm:$0xff]  ;;  %v2119_v61 = vsel %vm100_vm4, %v9150_v11, %v9154_v48  ;;  %v9155_v63 = vld [vmem:[#allocation100_spill] sm:$0xff]  ;;  %v2145_v11 = vsel %vm100_vm4, %v9157_v23, 0.0  ;;  %v9182_v6 = vld [vmem:[#allocation54_spill] sm:$0xff] }
 0x355   :  { %9149 = vst [vmem:[#allocation189_spill] sm:$0xff] %v6839_v13  ;;  %v2162_v18 = vsel %vm100_vm4, %v9153_v60, %v9152_v5  ;;  %v2120_v12 = vsel %vm100_vm4, %v9154_v48, %v9155_v63  ;;  %v9156_v13 = vld [vmem:[#allocation10_spill] sm:$0xff]  ;;  %v9158_v30 = vld [vmem:[#allocation11_spill] sm:$0xff]  ;;  %v9159_v60 = vld [vmem:[#allocation12_spill] sm:$0xff]  ;;  %v2125_v29 = vsel %vm100_vm4, %v9155_v63, 0.0 }
 0x356   :  { %v2146_v44 = vmul.f32 %v2138_v14, %v9156_v13  ;;  %3244 = vrot.lane.b32.xlu1 %v9158_v30, %s3865_s26  ;;  %v2147_v16 = vmul.f32 %v2139_v24, %v9159_v60  ;;  %v9160_v49 = vld [vmem:[#allocation107_spill] sm:$0xff]  ;;  %v2126_v14 = vmul.f32 %v2118_v39, %v9134_v56  ;;  %v2170_v53 = vmul.f32 %v2162_v18, %v9162_v45  ;;  %v9163_v34 = vld [vmem:[#allocation104_spill] sm:$0xff]  ;;  %v9168_v56 = vld [vmem:[#allocation117_spill] sm:$0xff] }
 0x357   :  { %v2186_v48 = vsel %vm100_vm4, %v9161_v50, %v9160_v49  ;;  %3258 = vrot.lane.b32.xlu0 %v9156_v13, %s3865_s26  ;;  %v2163_v24 = vsel %vm100_vm4, %v9152_v5, %v9163_v34  ;;  %v6876_v25 = vpop.permute.xlu1 %2656  ;;  %v2127_v50 = vmul.f32 %v2119_v61, %v9142_v3  ;;  %v2128_v55 = vmul.f32 %v2120_v12, %v9146_v0  ;;  %v9166_v13 = vld [vmem:[#allocation13_spill] sm:$0xff]  ;;  %v9167_v39 = vld [vmem:[#allocation111_spill] sm:$0xff] }
 0x358   :  { %9164 = vst [vmem:[#allocation194_spill] sm:$0xff] %v6876_v25  ;;  %v6878_v23 = vpop.permute.xlu0 %2674  ;;  %v2148_v33 = vmul.f32 %v2140_v46, %v9166_v13  ;;  %v2210_v63 = vsel %vm100_vm4, %v9168_v56, %v9167_v39  ;;  %v2150_v59 = vadd.f32 %v2146_v44, %v2126_v14  ;;  %v9169_v18 = vld [vmem:[#allocation15_spill] sm:$0xff]  ;;  %v2194_v42 = vmul.f32 %v2186_v48, %v9170_v31  ;;  %v9171_v5 = vld [vmem:[#allocation113_spill] sm:$0xff]  ;;  %v9172_v46 = vld [vmem:[#allocation16_spill] sm:$0xff] }
 0x359   :  { %9165 = vst [vmem:[#allocation197_spill] sm:$0xff] %v6878_v23  ;;  %v2149_v27 = vmul.f32 %v2145_v11, %v9169_v18  ;;  %v2187_v25 = vsel %vm100_vm4, %v9160_v49, %v9171_v5  ;;  %v2129_v12 = vmul.f32 %v2125_v29, %v9158_v30  ;;  %v2151_v61 = vadd.f32 %v2147_v16, %v2127_v50  ;;  %v9173_v0 = vld [vmem:[#allocation85_spill] sm:$0xff]  ;;  %v9174_v3 = vld [vmem:[#allocation119_spill] sm:$0xff]  ;;  %v9175_v48 = vld [vmem:[#allocation112_spill] sm:$0xff] }
 0x35a   :  { %3260 = vrot.lane.b32.xlu1 %v9159_v60, %s3865_s26  ;;  %v2171_v23 = vmul.f32 %v2163_v24, %v9172_v46  ;;  %v2234_v56 = vsel %vm100_vm4, %v9174_v3, %v9173_v0  ;;  %v2174_v11 = vadd.f32 %v2170_v53, %v2150_v59  ;;  %v2164_v49 = vsel %vm100_vm4, %v9163_v34, %v9175_v48  ;;  %v9176_v14 = vld [vmem:[#allocation22_spill] sm:$0xff]  ;;  %v9180_v30 = vld [vmem:[#allocation20_spill] sm:$0xff]  ;;  %v9181_v59 = vld [vmem:[#allocation47_spill] sm:$0xff] }
 0x35b   :  { %3262 = vrot.lane.b32.xlu0 %v9166_v13, %s3865_s26  ;;  %v6900_v44 = vpop.eup %3778  ;;  %v2218_v60 = vmul.f32 %v2210_v63, %v9176_v14  ;;  %v9177_v29 = vld [vmem:[#allocation122_spill] sm:$0xff]  ;;  %v6909_v24 = vpop.permute.xlu1 %2676  ;;  %v2152_v3 = vadd.f32 %v2148_v33, %v2128_v55  ;;  %v2169_v13 = vsel %vm100_vm4, %v9175_v48, 0.0  ;;  %v2195_v53 = vmul.f32 %v2187_v25, %v9180_v30  ;;  %v9184_v38 = vld [vmem:[#allocation123_spill] sm:$0xff]  ;;  %v9185_v25 = vld [vmem:[#allocation17_spill] sm:$0xff] }
 0x35c   :  { %v2211_v16 = vsel %vm100_vm4, %v9167_v39, %v9177_v29  ;;  %9178 = vst [vmem:[#allocation200_spill] sm:$0xff] %v6909_v24  ;;  %v6911_v50 = vpop.permute.xlu0 %2678  ;;  %v2258_v34 = vsel %vm100_vm4, %v9182_v6, %v9181_v59  ;;  %v2153_v63 = vadd.f32 %v2149_v27, %v2129_v12  ;;  %v2198_v51 = vadd.f32 %v2194_v42, %v2174_v11  ;;  %v9186_v24 = vld [vmem:[#allocation24_spill] sm:$0xff]  ;;  %v9190_v11 = vld [vmem:[#allocation57_spill] sm:$0xff] }
 0x35d   :  { %9179 = vst [vmem:[#allocation190_spill] sm:$0xff] %v6911_v50  ;;  %v6919_v21 = vpop.eup %3780  ;;  %v2242_v39 = vmul.f32 %v2234_v56, %v9042_v32  ;;  %v2235_v50 = vsel %vm100_vm4, %v9173_v0, %v9184_v38  ;;  %v2175_v33 = vadd.f32 %v2171_v23, %v2151_v61  ;;  %v2172_v48 = vmul.f32 %v2164_v49, %v9185_v25 }
 0x35e   :  { %9183 = vst [vmem:[#allocation198_spill] sm:$0xff] %v6919_v21  ;;  %3264 = vrot.lane.b32.xlu1 %v9169_v18, %s3865_s26  ;;  %v6927_v55 = vpop.eup %3782  ;;  %v2219_v6 = vmul.f32 %v2211_v16, %v9186_v24  ;;  %v9188_v21 = vld [vmem:[#allocation78_spill] sm:$0xff]  ;;  %v2173_v0 = vmul.f32 %v2169_v13, %v9020_v37  ;;  %v2222_v12 = vadd.f32 %v2218_v60, %v2198_v51  ;;  %v9193_v18 = vld [vmem:[#allocation124_spill] sm:$0xff]  ;;  %v9195_v60 = vld [vmem:[#allocation129_spill] sm:$0xff] }
 0x35f   :  { %v2282_v27 = vsel %vm100_vm4, %v9188_v21, %v9187_v40  ;;  %3282 = vrot.lane.b32.xlu0 %v9162_v45, %s3865_s26  ;;  %v6936_v42 = vpop.eup %3784  ;;  %v2266_v56 = vmul.f32 %v2258_v34, %v4495_v58  ;;  %v2259_v23 = vsel %vm100_vm4, %v9181_v59, %v9190_v11  ;;  %v2199_v21 = vadd.f32 %v2195_v53, %v2175_v33  ;;  %v9194_v51 = vld [vmem:[#allocation130_spill] sm:$0xff] }
 0x360   :  { %9189 = vst [vmem:[#allocation204_spill] sm:$0xff] %v6936_v42  ;;  %v6943_v61 = vpop.permute.xlu1 %2680  ;;  %v6945_v49 = vpop.permute.xlu0 %2726  ;;  %v2188_v45 = vsel %vm100_vm4, %v9171_v5, %v9193_v18  ;;  %v2243_v13 = vmul.f32 %v2235_v50, %v4476_v1  ;;  %v2306_v34 = vsel %vm100_vm4, %v9195_v60, %v9194_v51  ;;  %v2193_v59 = vsel %vm100_vm4, %v9193_v18, 0.0  ;;  %v9196_v42 = vld [vmem:[#allocation71_spill] sm:$0xff]  ;;  %v9197_v50 = vld [vmem:[#allocation126_spill] sm:$0xff] }
 0x361   :  { %9191 = vst [vmem:[#allocation191_spill] sm:$0xff] %v6943_v61  ;;  %9192 = vst [vmem:[#allocation195_spill] sm:$0xff] %v6945_v49  ;;  %v6947_v16 = vpop.eup %3786  ;;  %v2246_v61 = vadd.f32 %v2242_v39, %v2222_v12  ;;  %v2290_v49 = vmul.f32 %v2282_v27, %v9094_v4  ;;  %v2283_v53 = vsel %vm100_vm4, %v9187_v40, %v9196_v42  ;;  %v2217_v60 = vsel %vm100_vm4, %v9197_v50, 0.0  ;;  %v9198_v12 = vld [vmem:[#allocation131_spill] sm:$0xff] }
 0x362   :  { %v6956_v58 = vpop.eup %3788  ;;  %3284 = vrot.lane.b32.xlu1 %v9172_v46, %s3865_s26  ;;  %v2223_v5 = vadd.f32 %v2219_v6, %v2199_v21  ;;  %v2212_v33 = vsel %vm100_vm4, %v9177_v29, %v9197_v50  ;;  %v2267_v18 = vmul.f32 %v2259_v23, %v9061_v35  ;;  %v2176_v39 = vadd.f32 %v2172_v48, %v2152_v3  ;;  %v9201_v29 = vld [vmem:[#allocation21_spill] sm:$0xff] }
 0x363   :  { %3286 = vrot.lane.b32.xlu0 %v9185_v25, %s3865_s26  ;;  %v2270_v27 = vadd.f32 %v2266_v56, %v2246_v61  ;;  %v2314_v40 = vmul.f32 %v2306_v34, %v4577_v9  ;;  %v2307_v6 = vsel %vm100_vm4, %v9194_v51, %v9198_v12  ;;  %v2196_v4 = vmul.f32 %v2188_v45, %v9201_v29  ;;  %v9202_v3 = vld [vmem:[#allocation25_spill] sm:$0xff]  ;;  %v9203_v51 = vld [vmem:[#allocation127_spill] sm:$0xff] }
 0x364   :  { %v6978_v21 = vpop.permute.xlu1 %2728  ;;  %v6980_v46 = vpop.permute.xlu0 %2730  ;;  %v2197_v50 = vmul.f32 %v2193_v59, %v8930_v57  ;;  %v2247_v23 = vadd.f32 %v2243_v13, %v2223_v5  ;;  %v2291_v35 = vmul.f32 %v2283_v53, %v4559_v22  ;;  %v2177_v25 = vadd.f32 %v2173_v0, %v2153_v63 }
 0x365   :  { %9199 = vst [vmem:[#allocation61_spill] sm:$0xff] %v6978_v21  ;;  %9200 = vst [vmem:[#allocation201_spill] sm:$0xff] %v6980_v46  ;;  %v2220_v48 = vmul.f32 %v2212_v33, %v9202_v3  ;;  %v2221_v56 = vmul.f32 %v2217_v60, %v8936_v36  ;;  %v2294_v61 = vadd.f32 %v2290_v49, %v2270_v27  ;;  %v2241_v45 = vsel %vm100_vm4, %v9203_v51, 0.0 }
 0x366   :  { %3288 = vrot.lane.b32.xlu1 %v9020_v37, %s3865_s26  ;;  %v2236_v34 = vsel %vm100_vm4, %v9184_v38, %v9203_v51  ;;  %v2271_v59 = vadd.f32 %v2267_v18, %v2247_v23  ;;  %v2315_v13 = vmul.f32 %v2307_v6, %v9068_v52  ;;  %v9204_v63 = vrot.slane %v6788_v19, 1  ;;  %v9209_v6 = vld [vmem:[#allocation53_spill] sm:$0xff] }
 0x367   :  { %3306 = vrot.lane.b32.xlu0 %v9170_v31, %s3865_s26  ;;  %v9205_v49 = vrot.slane %v6801_v43, 2  ;;  %v9206_v38 = vmax.f32 %v6813_v54, 1e-16  ;;  %v2318_v5 = vadd.f32 %v2314_v40, %v2294_v61  ;;  %v2200_v18 = vadd.f32 %v2196_v4, %v2176_v39 }
 0x368   :  { %v7000_v0 = vadd.f32 %v9204_v63, %v6788_v19  ;;  %v7007_v33 = vpop.permute.xlu1 %2732  ;;  %v7009_v60 = vpop.permute.xlu0 %2806  ;;  %v2201_v27 = vadd.f32 %v2197_v50, %v2177_v25  ;;  %v2260_v23 = vsel %vm100_vm4, %v9190_v11, %v9209_v6  ;;  %v2295_v19 = vadd.f32 %v2291_v35, %v2271_v59 }
 0x369   :  { %v2051_v53 = vadd.f32 %v9205_v49, %v6801_v43  ;;  %3790 = vrsqrt.f32 %v9206_v38  ;;  %9207 = vst [vmem:[#allocation202_spill] sm:$0xff] %v7007_v33  ;;  %9208 = vst [vmem:[#allocation76_spill] sm:$0xff] %v7009_v60  ;;  %v9210_v51 = vmax.f32 %v6824_v41, 1e-16  ;;  %v2244_v43 = vmul.f32 %v2236_v34, %v4478_v20  ;;  %v9211_v41 = vld [vmem:[#allocation81_spill] sm:$0xff]  ;;  %v9231_v60 = vld [vmem:[#allocation83_spill] sm:$0xff] }
 0x36a   :  { %v2245_v54 = vmul.f32 %v2241_v45, %v8818_v62  ;;  %v2265_v40 = vsel %vm100_vm4, %v9209_v6, 0.0  ;;  %3308 = vrot.lane.b32.xlu1 %v9180_v30, %s3865_s26  ;;  %v1972_v4 = vrot.slane %v6831_v8, 1  ;;  %v2224_v25 = vadd.f32 %v2220_v48, %v2200_v18  ;;  %v9214_v18 = vld [vmem:[#allocation132_spill] sm:$0xff]  ;;  %v9232_v33 = vld [vmem:[#allocation193_spill] sm:$0xff] }
 0x36b   :  { %3792 = vrsqrt.f32 %v9210_v51  ;;  %v2225_v39 = vadd.f32 %v2221_v56, %v2201_v27  ;;  %v2319_v50 = vadd.f32 %v2315_v13, %v2295_v19  ;;  %3310 = vrot.lane.b32.xlu0 %v9201_v29, %s3865_s26  ;;  %v2268_v35 = vmul.f32 %v2260_v23, %v4527_v7 }
 0x36c   :  { %v2284_v11 = vsel %vm100_vm4, %v9196_v42, %v9211_v41  ;;  %v2289_v61 = vsel %vm100_vm4, %v9211_v41, 0.0  ;;  %v2322_v34 = vsel %vm460_vm8, %v2318_v5, 0.0  ;;  %v7032_v45 = vpop.permute.xlu1 %2808  ;;  %v7034_v59 = vpop.permute.xlu0 %2810  ;;  %v2052_v48 = vrot.slane %v2051_v53, 1 }
 0x36d   :  { %9212 = vst [vmem:[#allocation59_spill] sm:$0xff] %v7032_v45  ;;  %9213 = vst [vmem:[#allocation68_spill] sm:$0xff] %v7034_v59  ;;  %v2269_v56 = vmul.f32 %v2265_v40, %v8822_v2  ;;  %v2394_v13 = vrot.slane %v2318_v5, 4  ;;  %v2002_v63 = vmul.f32 %v6900_v44, %v6795_v47  ;;  %v2248_v49 = vadd.f32 %v2244_v43, %v2224_v25 }
 0x36e   :  { %v2249_v38 = vadd.f32 %v2245_v54, %v2225_v39  ;;  %v2308_v42 = vsel %vm100_vm4, %v9198_v12, %v9214_v18  ;;  %v2313_v27 = vsel %vm100_vm4, %v9214_v18, 0.0  ;;  %3312 = vrot.lane.b32.xlu1 %v8930_v57, %s3865_s26  ;;  %v2292_v6 = vmul.f32 %v2284_v11, %v4562_v26 }
 0x36f   :  { %v2293_v23 = vmul.f32 %v2289_v61, %v8827_v15  ;;  %v2323_v5 = vrot.slane %v2322_v34, 4  ;;  %v2329_v19 = vsel %vm460_vm8, %v2319_v50, 0.0  ;;  %3330 = vrot.lane.b32.xlu0 %v9176_v14, %s3865_s26  ;;  %v9215_v47 = vrot.slane %v6797_v10, 1 }
 0x370   :  { %v1973_v12 = vadd.f32 %v1972_v4, %v6831_v8  ;;  %v2272_v51 = vadd.f32 %v2268_v35, %v2248_v49  ;;  %v2395_v43 = vrot.slane %v2319_v50, 4  ;;  %v7055_v54 = vpop.permute.xlu1 %2812  ;;  %v2847_v40 = vpop.permute.xlu0 %2846  ;;  %v2273_v25 = vadd.f32 %v2269_v56, %v2249_v38  ;;  %v9218_v8 = vld [vmem:[#allocation188_spill] sm:$0xff]  ;;  %v9219_v4 = vld [vmem:[#allocation198_spill] sm:$0xff] }
 0x371   :  { %v2046_v44 = vadd.f32 %v9215_v47, %v6797_v10  ;;  %9216 = vst [vmem:[#allocation69_spill] sm:$0xff] %v7055_v54  ;;  %v2402_v39 = vsel %vm460_vm8, %v2394_v13, 0.0  ;;  %v2316_v41 = vmul.f32 %v2308_v42, %v8896_v17  ;;  %v2317_v11 = vmul.f32 %v2313_v27, %v8908_v28  ;;  %v9217_v10 = vld [vmem:[#allocation136_spill] sm:$0xff]  ;;  %v9220_v35 = vld [vmem:[#allocation98_spill] sm:$0xff] }
 0x372   :  { %v2053_v61 = vadd.f32 %v2052_v48, %v2051_v53  ;;  %v2330_v18 = vrot.slane %v2329_v19, 4  ;;  %3332 = vrot.lane.b32.xlu1 %v9186_v24, %s3865_s26  ;;  %v2006_v47 = vmul.f32 %v2002_v63, %v9217_v10  ;;  %v2003_v50 = vmul.f32 %v9219_v4, %v9218_v8  ;;  %v9221_v49 = vld [vmem:[#allocation92_spill] sm:$0xff]  ;;  %v9223_v53 = vld [vmem:[#allocation93_spill] sm:$0xff]  ;;  %v9225_v63 = vld [vmem:[#allocation94_spill] sm:$0xff] }
 0x373   :  { %v7068_v56 = vsel %vm100_vm4, %v9221_v49, %v9220_v35  ;;  %v2296_v13 = vadd.f32 %v2292_v6, %v2272_v51  ;;  %v2297_v38 = vadd.f32 %v2293_v23, %v2273_v25  ;;  %v2324_v42 = vadd.f32 %v2323_v5, %v2322_v34  ;;  %3334 = vrot.lane.b32.xlu0 %v9202_v3, %s3865_s26 }
 0x374   :  { %9222 = vst [vmem:[#allocation72_spill] sm:$0xff] %v7068_v56  ;;  %v7075_v48 = vsel %vm100_vm4, %v9220_v35, %v9223_v53  ;;  %v7080_v27 = vsel %vm100_vm4, %v9223_v53, %v9225_v63  ;;  %v2403_v8 = vrot.slane %v2402_v39, 4  ;;  %v2409_v4 = vsel %vm460_vm8, %v2395_v43, 0.0  ;;  %v2849_v49 = vpop.permute.xlu1 %2848  ;;  %v2851_v6 = vpop.permute.xlu0 %2850  ;;  %v9229_v53 = vld [vmem:[#allocation45_spill] sm:$0xff] }
 0x375   :  { %9224 = vst [vmem:[#allocation199_spill] sm:$0xff] %v7075_v48  ;;  %9226 = vst [vmem:[#allocation62_spill] sm:$0xff] %v7080_v27  ;;  %v7085_v34 = vsel %vm100_vm4, %v9225_v63, 0.0  ;;  %v2320_v5 = vadd.f32 %v2316_v41, %v2296_v13  ;;  %v2321_v51 = vadd.f32 %v2317_v11, %v2297_v38  ;;  %v7090_v25 = vsel %vm117_vm5, %v7034_v59, %v7055_v54  ;;  %v9241_v54 = vld [vmem:[#allocation115_spill] sm:$0xff]  ;;  %v9270_v27 = vld [vmem:[#allocation141_spill] sm:$0xff] }
 0x376   :  { %v3791_v23 = vpop.eup %3790  ;;  %9227 = vst [vmem:[#allocation74_spill] sm:$0xff] %v7085_v34  ;;  %9228 = vst [vmem:[#allocation65_spill] sm:$0xff] %v7090_v25  ;;  %v2331_v35 = vadd.f32 %v2330_v18, %v2329_v19  ;;  %3336 = vrot.lane.b32.xlu1 %v8936_v36, %s3865_s26  ;;  %v7095_v43 = vadd.f32 %v2006_v47, %v9229_v53  ;;  %v2007_v45 = vmul.f32 %v2003_v50, %v9231_v60  ;;  %v9236_v47 = vld [vmem:[#allocation192_spill] sm:$0xff] }
 0x377   :  { %v2004_v63 = vmul.f32 %v6927_v55, %v9232_v33  ;;  %v2325_v41 = vrot.slane %v2324_v42, 2  ;;  %v2410_v11 = vrot.slane %v2409_v4, 4  ;;  %v7101_v13 = vsel %vm134_vm6, %v2847_v40, %v2849_v49  ;;  %3354 = vrot.lane.b32.xlu0 %v9042_v32, %s3865_s26  ;;  %v9237_v33 = vld [vmem:[#allocation204_spill] sm:$0xff]  ;;  %v9283_v32 = vld [vmem:[#allocation17_spill] sm:$0xff] }
 0x378   :  { %9230 = vst [vmem:[#allocation80_spill] sm:$0xff] %v7095_v43  ;;  %v3793_v46 = vpop.eup %3792  ;;  %9233 = vst [vmem:[#allocation64_spill] sm:$0xff] %v7101_v13  ;;  %v7104_v38 = vsel %vm134_vm6, %v2849_v49, %v2851_v6  ;;  %v2404_v19 = vadd.f32 %v2403_v8, %v2402_v39  ;;  %v7108_v18 = vpop.permute.xlu1 %2852  ;;  %v2082_v50 = vmul.f32 %v6947_v16, %v9236_v47  ;;  %v2336_v40 = vsel %vm460_vm8, %v2320_v5, 0.0  ;;  %v9239_v16 = vld [vmem:[#allocation116_spill] sm:$0xff] }
 0x379   :  { %9234 = vst [vmem:[#allocation203_spill] sm:$0xff] %v7104_v38  ;;  %9235 = vst [vmem:[#allocation70_spill] sm:$0xff] %v7108_v18  ;;  %v2083_v55 = vmul.f32 %v6956_v58, %v7000_v0  ;;  %v2005_v53 = vmul.f32 %v9237_v33, %v1973_v12  ;;  %v2343_v13 = vsel %vm460_vm8, %v2321_v51, 0.0  ;;  %v7119_v49 = vsel %vm134_vm6, %v2851_v6, %v7108_v18  ;;  %v2863_v38 = vpop.permute.xlu0 %2862 }
 0x37a   :  { %9238 = vst [vmem:[#allocation67_spill] sm:$0xff] %v7119_v49  ;;  %v2084_v39 = vmul.f32 %v3791_v23, %v2046_v44  ;;  %v2396_v8 = vrot.slane %v2320_v5, 4  ;;  %v2397_v25 = vrot.slane %v2321_v51, 4  ;;  %3356 = vrot.lane.b32.xlu1 %v4476_v1, %s3865_s26  ;;  %v7124_v47 = vadd.f32 %v2007_v45, %v9239_v16  ;;  %v9246_v16 = vld [vmem:[#allocation110_spill] sm:$0xff] }
 0x37b   :  { %v2085_v58 = vmul.f32 %v3793_v46, %v2053_v61  ;;  %v2326_v0 = vadd.f32 %v2325_v41, %v2324_v42  ;;  %v2332_v12 = vrot.slane %v2331_v35, 2  ;;  %v2411_v33 = vadd.f32 %v2410_v11, %v2409_v4  ;;  %3358 = vrot.lane.b32.xlu0 %v4478_v20, %s3865_s26  ;;  %v9242_v46 = vld [vmem:[#allocation44_spill] sm:$0xff]  ;;  %v9275_v20 = vld [vmem:[#allocation15_spill] sm:$0xff] }
 0x37c   :  { %9240 = vst [vmem:[#allocation77_spill] sm:$0xff] %v7124_v47  ;;  %v2008_v6 = vmul.f32 %v2004_v63, %v9241_v54  ;;  %v2405_v49 = vrot.slane %v2404_v19, 2  ;;  %v2337_v18 = vrot.slane %v2336_v40, 4  ;;  %v2344_v44 = vrot.slane %v2343_v13, 4  ;;  %v2865_v23 = vpop.permute.xlu1 %2864 }
 0x37d   :  { %v2086_v5 = vmul.f32 %v2082_v50, %v9217_v10  ;;  %v2870_v51 = vsel %vm134_vm6, %v2863_v38, %v2865_v23  ;;  %v2867_v59 = vpop.permute.xlu0 %2866  ;;  %v2087_v45 = vmul.f32 %v2083_v55, %v9231_v60  ;;  %v2009_v61 = vmul.f32 %v2005_v53, %v9242_v46  ;;  %v9243_v60 = vld [vmem:[#allocation30_spill] sm:$0xff] }
 0x37e   :  { %v2088_v42 = vmul.f32 %v2084_v39, %v9241_v54  ;;  %v2416_v4 = vsel %vm460_vm8, %v2396_v8, 0.0  ;;  %v2423_v41 = vsel %vm460_vm8, %v2397_v25, 0.0  ;;  %v2871_v63 = vsel %vm134_vm6, %v2865_v23, %v2867_v59  ;;  %3360 = vrot.lane.b32.xlu1 %v8818_v62, %s3865_s26  ;;  %v9244_v55 = vld [vmem:[#allocation114_spill] sm:$0xff]  ;;  %v9274_v62 = vld [vmem:[#allocation13_spill] sm:$0xff] }
 0x37f   :  { %v2089_v10 = vmul.f32 %v2085_v58, %v9242_v46  ;;  %v2327_v11 = vrot.slane %v2326_v0, 1  ;;  %v7140_v38 = vadd.f32 %v2332_v12, %v2331_v35  ;;  %v2412_v50 = vrot.slane %v2411_v33, 2  ;;  %3378 = vrot.lane.b32.xlu0 %v9243_v60, %s3865_s26  ;;  %v9248_v35 = vld [vmem:[#allocation140_spill] sm:$0xff]  ;;  %v9249_v12 = vld [vmem:[#allocation133_spill] sm:$0xff] }
 0x380   :  { %v7145_v54 = vadd.f32 %v2008_v6, %v9244_v55  ;;  %v7147_v53 = vadd.f32 %v2405_v49, %v2404_v19  ;;  %v2338_v25 = vadd.f32 %v2337_v18, %v2336_v40  ;;  %v7149_v39 = vadd.f32 %v2344_v44, %v2343_v13  ;;  %v2869_v8 = vpop.permute.xlu1 %2868  ;;  %v9250_v6 = vld [vmem:[#allocation32_spill] sm:$0xff]  ;;  %v9253_v13 = vld [vmem:[#allocation177_spill] sm:$0xff] }
 0x381   :  { %v7152_v23 = vadd.f32 %v2086_v5, %v9246_v16  ;;  %v2417_v58 = vrot.slane %v2416_v4, 4  ;;  %v2424_v46 = vrot.slane %v2423_v41, 4  ;;  %v2358_v21 = vsel %vm100_vm4, %v9249_v12, %v9248_v35  ;;  %v2883_v43 = vpop.permute.xlu0 %2882  ;;  %v9251_v19 = vld [vmem:[#allocation120_spill] sm:$0xff]  ;;  %v9255_v49 = vld [vmem:[#allocation125_spill] sm:$0xff] }
 0x382   :  { %9245 = vst [vmem:[#allocation60_spill] sm:$0xff] %v7145_v54  ;;  %v2872_v47 = vsel %vm134_vm6, %v2867_v59, %v2869_v8  ;;  %3380 = vrot.lane.b32.xlu1 %v9250_v6, %s3865_s26  ;;  %v7161_v18 = vadd.f32 %v2087_v45, %v9251_v19  ;;  %v7164_v40 = vadd.f32 %v2009_v61, %v9253_v13  ;;  %v9257_v5 = vld [vmem:[#allocation181_spill] sm:$0xff]  ;;  %v2346_v19 = vrot.slane %v7149_v39, 2  ;;  %v9262_v61 = vld [vmem:[#allocation7_spill] sm:$0xff]  ;;  %v9267_v54 = vld [vmem:[#allocation34_spill] sm:$0xff] }
 0x383   :  { %9247 = vst [vmem:[#allocation63_spill] sm:$0xff] %v7152_v23  ;;  %v7167_v44 = vadd.f32 %v2088_v42, %v9255_v49  ;;  %v7170_v55 = vadd.f32 %v2089_v10, %v9257_v5  ;;  %v7172_v16 = vadd.f32 %v2327_v11, %v2326_v0  ;;  %v7175_v12 = vadd.f32 %v2412_v50, %v2411_v33  ;;  %v9259_v23 = vld [vmem:[#allocation135_spill] sm:$0xff]  ;;  %v9260_v10 = vld [vmem:[#allocation46_spill] sm:$0xff]  ;;  %v9261_v33 = vld [vmem:[#allocation148_spill] sm:$0xff] }
 0x384   :  { %9252 = vst [vmem:[#allocation66_spill] sm:$0xff] %v7161_v18  ;;  %9254 = vst [vmem:[#allocation184_spill] sm:$0xff] %v7164_v40  ;;  %v2359_v45 = vsel %vm100_vm4, %v9248_v35, %v9259_v23  ;;  %3382 = vrot.lane.b32.xlu0 %v4527_v7, %s3865_s26  ;;  %v2339_v42 = vrot.slane %v2338_v25, 2  ;;  %v2366_v13 = vmul.f32 %v2358_v21, %v9260_v10  ;;  %v2885_v0 = vpop.permute.xlu1 %2884  ;;  %v2365_v59 = vsel %vm100_vm4, %v9261_v33, 0.0  ;;  %v9272_v6 = vld [vmem:[#allocation9_spill] sm:$0xff] }
 0x385   :  { %9256 = vst [vmem:[#allocation185_spill] sm:$0xff] %v7167_v44  ;;  %9258 = vst [vmem:[#allocation186_spill] sm:$0xff] %v7170_v55  ;;  %v2418_v11 = vadd.f32 %v2417_v58, %v2416_v4  ;;  %v7185_v49 = vadd.f32 %v2424_v46, %v2423_v41  ;;  %v2360_v50 = vsel %vm100_vm4, %v9259_v23, %v9261_v33  ;;  %v2887_v5 = vpop.permute.xlu0 %2886  ;;  %v9263_v55 = vld [vmem:[#allocation10_spill] sm:$0xff]  ;;  %v9264_v4 = vld [vmem:[#allocation49_spill] sm:$0xff]  ;;  %v2877_v23 = vsel %vm134_vm6, %v2869_v8, 0.0 }
 0x386   :  { %v2890_v35 = vsel %vm134_vm6, %v2883_v43, %v2885_v0  ;;  %v2878_v44 = vmul.f32 %v2870_v51, %v9262_v61  ;;  %v2891_v21 = vsel %vm134_vm6, %v2885_v0, %v2887_v5  ;;  %3384 = vrot.lane.b32.xlu1 %v8822_v2, %s3865_s26  ;;  %v2367_v41 = vmul.f32 %v2359_v45, %v9264_v4  ;;  %v9265_v58 = vld [vmem:[#allocation8_spill] sm:$0xff]  ;;  %v9268_v51 = vld [vmem:[#allocation50_spill] sm:$0xff] }
 0x387   :  { %v2898_v18 = vmul.f32 %v2890_v35, %v9263_v55  ;;  %v2879_v46 = vmul.f32 %v2871_v63, %v9265_v58  ;;  %v9266_v43 = vld [vmem:[#allocation12_spill] sm:$0xff]  ;;  %v2370_v33 = vmax.f32 %v2366_v13, 1e-16  ;;  %v2368_v34 = vmul.f32 %v2360_v50, %v9268_v51  ;;  %v9269_v35 = vld [vmem:[#allocation143_spill] sm:$0xff] }
 0x388   :  { %v2899_v40 = vmul.f32 %v2891_v21, %v9266_v43  ;;  %3402 = vrot.lane.b32.xlu0 %v9267_v54, %s3865_s26  ;;  %v2438_v0 = vsel %vm100_vm4, %v9270_v27, %v9269_v35  ;;  %v2889_v56 = vpop.permute.xlu1 %2888  ;;  %v9271_v2 = vld [vmem:[#allocation52_spill] sm:$0xff]  ;;  %v2880_v60 = vmul.f32 %v2872_v47, %v9272_v6  ;;  %v9273_v54 = vld [vmem:[#allocation11_spill] sm:$0xff]  ;;  %v2414_v27 = vrot.slane %v7175_v12, 1 }
 0x389   :  { %v2902_v48 = vadd.f32 %v2898_v18, %v2878_v44  ;;  %v2369_v45 = vmul.f32 %v2365_v59, %v9271_v2  ;;  %v2892_v63 = vsel %vm134_vm6, %v2887_v5, %v2889_v56  ;;  %v2897_v8 = vsel %vm134_vm6, %v2889_v56, 0.0  ;;  %v2907_v21 = vpop.permute.xlu0 %2906  ;;  %v9276_v44 = vld [vmem:[#allocation51_spill] sm:$0xff] }
 0x38a   :  { %v2903_v7 = vadd.f32 %v2899_v40, %v2879_v46  ;;  %v2881_v13 = vmul.f32 %v2877_v23, %v9273_v54  ;;  %v2900_v50 = vmul.f32 %v2892_v63, %v9274_v62  ;;  %v2901_v1 = vmul.f32 %v2897_v8, %v9275_v20  ;;  %3404 = vrot.lane.b32.xlu1 %v4559_v22, %s3865_s26 }
 0x38b   :  { %v2340_v18 = vadd.f32 %v2339_v42, %v2338_v25  ;;  %v2371_v40 = vmax.f32 %v2367_v41, 1e-16  ;;  %v2446_v59 = vmul.f32 %v2438_v0, %v9276_v44  ;;  %v2419_v56 = vrot.slane %v2418_v11, 2  ;;  %v9277_v42 = vld [vmem:[#allocation152_spill] sm:$0xff]  ;;  %v9278_v0 = vld [vmem:[#allocation14_spill] sm:$0xff] }
 0x38c   :  { %3406 = vrot.lane.b32.xlu0 %v4562_v26, %s3865_s26  ;;  %v2372_v47 = vmax.f32 %v2368_v34, 1e-16  ;;  %v2904_v5 = vadd.f32 %v2900_v50, %v2880_v60  ;;  %v2905_v46 = vadd.f32 %v2901_v1, %v2881_v13  ;;  %v2909_v23 = vpop.permute.xlu1 %2908  ;;  %v2347_v63 = vadd.f32 %v2346_v19, %v7149_v39  ;;  %v9279_v60 = vld [vmem:[#allocation151_spill] sm:$0xff]  ;;  %v9280_v19 = vld [vmem:[#allocation16_spill] sm:$0xff] }
 0x38d   :  { %v2426_v8 = vrot.slane %v7185_v49, 2  ;;  %3794 = vrsqrt.f32 %v2370_v33  ;;  %v2914_v22 = vsel %vm134_vm6, %v2907_v21, %v2909_v23  ;;  %v2911_v28 = vpop.permute.xlu0 %2910  ;;  %v2373_v25 = vmax.f32 %v2369_v45, 1e-16  ;;  %v9281_v13 = vld [vmem:[#allocation55_spill] sm:$0xff] }
 0x38e   :  { %v2439_v41 = vsel %vm100_vm4, %v9269_v35, %v9277_v42  ;;  %v2922_v26 = vmul.f32 %v2914_v22, %v9278_v0  ;;  %v2915_v34 = vsel %vm134_vm6, %v2909_v23, %v2911_v28  ;;  %3408 = vrot.lane.b32.xlu1 %v8827_v15, %s3865_s26  ;;  %3796 = vrsqrt.f32 %v2371_v40 }
 0x38f   :  { %v2450_v1 = vmax.f32 %v2446_v59, 1e-16  ;;  %v2440_v39 = vsel %vm100_vm4, %v9277_v42, %v9279_v60  ;;  %v2923_v33 = vmul.f32 %v2915_v34, %v9280_v19  ;;  %v2420_v45 = vadd.f32 %v2419_v56, %v2418_v11  ;;  %v9282_v34 = vld [vmem:[#allocation56_spill] sm:$0xff]  ;;  %v9284_v56 = vld [vmem:[#allocation58_spill] sm:$0xff] }
 0x390   :  { %3102 = vrot.lane.b32.xlu0 %v9260_v10, %s3864_s25  ;;  %3798 = vrsqrt.f32 %v2372_v47  ;;  %v2445_v22 = vsel %vm100_vm4, %v9279_v60, 0.0  ;;  %v2926_v35 = vadd.f32 %v2922_v26, %v2902_v48  ;;  %v2913_v21 = vpop.permute.xlu1 %2912  ;;  %v2447_v50 = vmul.f32 %v2439_v41, %v9281_v13 }
 0x391   :  { %v2927_v40 = vadd.f32 %v2923_v33, %v2903_v7  ;;  %v2916_v59 = vsel %vm134_vm6, %v2911_v28, %v2913_v21  ;;  %v2921_v23 = vsel %vm134_vm6, %v2913_v21, 0.0  ;;  %v2931_v42 = vpop.permute.xlu0 %2930  ;;  %3800 = vrsqrt.f32 %v2373_v25 }
 0x392   :  { %v2448_v15 = vmul.f32 %v2440_v39, %v9282_v34  ;;  %v2924_v10 = vmul.f32 %v2916_v59, %v9283_v32  ;;  %v2925_v11 = vmul.f32 %v2921_v23, %v9020_v37  ;;  %3104 = vrot.lane.b32.xlu1 %v9264_v4, %s3864_s25  ;;  %v2341_v26 = vrot.slane %v2340_v18, 1 }
 0x393   :  { %v2348_v48 = vrot.slane %v2347_v63, 1  ;;  %3802 = vrsqrt.f32 %v2450_v1  ;;  %v2449_v7 = vmul.f32 %v2445_v22, %v9284_v56  ;;  %v2421_v28 = vrot.slane %v2420_v45, 1 }
 0x394   :  { %3106 = vrot.lane.b32.xlu0 %v9268_v51, %s3864_s25  ;;  %v7251_v47 = vadd.f32 %v2426_v8, %v7185_v49  ;;  %v2928_v25 = vadd.f32 %v2924_v10, %v2904_v5  ;;  %v2929_v41 = vadd.f32 %v2925_v11, %v2905_v46  ;;  %v2933_v60 = vpop.permute.xlu1 %2932  ;;  %v9285_v39 = vrot.slane %v7147_v53, 1 }
 0x395   :  { %v9286_v1 = vrot.slane %v7140_v38, 1  ;;  %v2451_v22 = vmax.f32 %v2447_v50, 1e-16  ;;  %v2938_v59 = vsel %vm134_vm6, %v2931_v42, %v2933_v60  ;;  %v2935_v23 = vpop.permute.xlu0 %2934  ;;  %v7263_v51 = vadd.f32 %v2414_v27, %v7175_v12  ;;  %v9288_v12 = vld [vmem:[#allocation158_spill] sm:$0xff]  ;;  %v9289_v27 = vld [vmem:[#allocation161_spill] sm:$0xff] }
 0x396   :  { %v7256_v33 = vadd.f32 %v9285_v39, %v7147_v53  ;;  %v2452_v49 = vmax.f32 %v2448_v15, 1e-16  ;;  %v2946_v10 = vmul.f32 %v2938_v59, %v9170_v31  ;;  %v2939_v5 = vsel %vm134_vm6, %v2933_v60, %v2935_v23  ;;  %3108 = vrot.lane.b32.xlu1 %v9271_v2, %s3864_s25  ;;  %v9290_v39 = vld [vmem:[#allocation172_spill] sm:$0xff] }
 0x397   :  { %v2335_v21 = vadd.f32 %v9286_v1, %v7140_v38  ;;  %v7269_v53 = vadd.f32 %v2341_v26, %v2340_v18  ;;  %v2349_v46 = vadd.f32 %v2348_v48, %v2347_v63  ;;  %v2453_v8 = vmax.f32 %v2449_v7, 1e-16 }
 0x398   :  { %v2947_v38 = vmul.f32 %v2939_v5, %v9180_v30  ;;  %3182 = vrot.lane.b32.xlu0 %v9276_v44, %s3864_s25  ;;  %v7274_v50 = vadd.f32 %v2421_v28, %v2420_v45  ;;  %v2494_v42 = vsel %vm117_vm5, %v9289_v27, %v9288_v12  ;;  %v2950_v11 = vadd.f32 %v2946_v10, %v2926_v35  ;;  %v2937_v60 = vpop.permute.xlu1 %2936  ;;  %v9291_v35 = vld [vmem:[#allocation164_spill] sm:$0xff] }
 0x399   :  { %3804 = vrsqrt.f32 %v2451_v22  ;;  %v2940_v63 = vsel %vm134_vm6, %v2935_v23, %v2937_v60  ;;  %v2945_v26 = vsel %vm134_vm6, %v2937_v60, 0.0  ;;  %v2955_v48 = vpop.permute.xlu0 %2954  ;;  %v2495_v45 = vsel %vm117_vm5, %v9288_v12, %v9290_v39  ;;  %v9294_v23 = vld [vmem:[#allocation165_spill] sm:$0xff] }
 0x39a   :  { %9287 = vst [vmem:[#allocation73_spill] sm:$0xff] %v7274_v50  ;;  %v2951_v18 = vadd.f32 %v2947_v38, %v2927_v40  ;;  %v3795_v7 = vpop.eup %3794  ;;  %3806 = vrsqrt.f32 %v2452_v49  ;;  %v2948_v28 = vmul.f32 %v2940_v63, %v9201_v29  ;;  %v2949_v1 = vmul.f32 %v2945_v26, %v8930_v57  ;;  %3184 = vrot.lane.b32.xlu1 %v9281_v13, %s3864_s25  ;;  %v9292_v40 = vld [vmem:[#allocation153_spill] sm:$0xff]  ;;  %v9295_v38 = vld [vmem:[#allocation162_spill] sm:$0xff]  ;;  %v9298_v50 = vld [vmem:[#allocation159_spill] sm:$0xff] }
 0x39b   :  { %3808 = vrsqrt.f32 %v2453_v8  ;;  %v7292_v22 = vsel %vm117_vm5, %v9292_v40, %v9291_v35  ;;  %v2502_v59 = vmul.f32 %v2494_v42, %v9262_v61  ;;  %v2496_v49 = vsel %vm117_vm5, %v9290_v39, %v9294_v23  ;;  %v3797_v10 = vpop.eup %3796  ;;  %v9296_v8 = vld [vmem:[#allocation155_spill] sm:$0xff]  ;;  %v9297_v40 = vld [vmem:[#allocation169_spill] sm:$0xff] }
 0x39c   :  { %9293 = vst [vmem:[#allocation75_spill] sm:$0xff] %v7292_v22  ;;  %3186 = vrot.lane.b32.xlu0 %v9282_v34, %s3864_s25  ;;  %v2501_v5 = vsel %vm117_vm5, %v9294_v23, 0.0  ;;  %v2514_v12 = vsel %vm117_vm5, %v9296_v8, %v9295_v38  ;;  %v2952_v27 = vadd.f32 %v2948_v28, %v2928_v25  ;;  %v2953_v60 = vadd.f32 %v2949_v1, %v2929_v41  ;;  %v2957_v63 = vpop.permute.xlu1 %2956  ;;  %v9299_v8 = vld [vmem:[#allocation170_spill] sm:$0xff] }
 0x39d   :  { %v3799_v26 = vpop.eup %3798  ;;  %v2503_v42 = vmul.f32 %v2495_v45, %v9265_v58  ;;  %v2515_v39 = vsel %vm117_vm5, %v9295_v38, %v9297_v40  ;;  %v2962_v15 = vsel %vm134_vm6, %v2955_v48, %v2957_v63  ;;  %v2959_v22 = vpop.permute.xlu0 %2958  ;;  %v7311_v61 = vmul.f32 %v3795_v7, %v7172_v16 }
 0x39e   :  { %v2504_v23 = vmul.f32 %v2496_v49, %v9272_v6  ;;  %v2516_v25 = vsel %vm117_vm5, %v9297_v40, %v9298_v50  ;;  %v2970_v41 = vmul.f32 %v2962_v15, %v9176_v14  ;;  %v2963_v45 = vsel %vm134_vm6, %v2957_v63, %v2959_v22  ;;  %3188 = vrot.lane.b32.xlu1 %v9284_v56, %s3864_s25  ;;  %v3801_v28 = vpop.eup %3800  ;;  %v9300_v63 = vld [vmem:[#allocation166_spill] sm:$0xff] }
 0x39f   :  { %v2505_v48 = vmul.f32 %v2501_v5, %v9273_v54  ;;  %v2522_v1 = vmul.f32 %v2514_v12, %v9263_v55  ;;  %v2971_v16 = vmul.f32 %v2963_v45, %v9186_v24  ;;  %v7326_v7 = vmul.f32 %v3797_v10, %v2335_v21 }
 0x3a0   :  { %3426 = vrot.lane.b32.xlu0 %v4577_v9, %s3865_s26  ;;  %v3803_v49 = vpop.eup %3802  ;;  %v2523_v15 = vmul.f32 %v2515_v39, %v9266_v43  ;;  %v2521_v38 = vsel %vm117_vm5, %v9298_v50, 0.0  ;;  %v2538_v40 = vsel %vm117_vm5, %v9300_v63, %v9299_v8  ;;  %v2974_v5 = vadd.f32 %v2970_v41, %v2950_v11  ;;  %v2961_v54 = vpop.permute.xlu1 %2960  ;;  %v9312_v43 = vld [vmem:[#allocation31_spill] sm:$0xff] }
 0x3a1   :  { %v2524_v12 = vmul.f32 %v2516_v25, %v9274_v62  ;;  %v2975_v45 = vadd.f32 %v2971_v16, %v2951_v18  ;;  %v2964_v6 = vsel %vm134_vm6, %v2959_v22, %v2961_v54  ;;  %v2969_v21 = vsel %vm134_vm6, %v2961_v54, 0.0  ;;  %v2979_v10 = vpop.permute.xlu0 %2978  ;;  %v9301_v22 = vld [vmem:[#allocation167_spill] sm:$0xff] }
 0x3a2   :  { %v2972_v58 = vmul.f32 %v2964_v6, %v9202_v3  ;;  %v2973_v39 = vmul.f32 %v2969_v21, %v8936_v36  ;;  %3428 = vrot.lane.b32.xlu1 %v9068_v52, %s3865_s26  ;;  %v7341_v50 = vmul.f32 %v3801_v28, %v2349_v46  ;;  %v7344_v11 = vmul.f32 %v3799_v26, %v7269_v53  ;;  %v9302_v46 = vld [vmem:[#allocation174_spill] sm:$0xff] }
 0x3a3   :  { %v2525_v25 = vmul.f32 %v2521_v38, %v9275_v20  ;;  %v2546_v18 = vmul.f32 %v2538_v40, %v9278_v0  ;;  %v2539_v54 = vsel %vm117_vm5, %v9299_v8, %v9301_v22  ;;  %v7354_v6 = vmul.f32 %v3803_v49, %v7256_v33 }
 0x3a4   :  { %3430 = vrot.lane.b32.xlu0 %v8896_v17, %s3865_s26  ;;  %v2526_v41 = vadd.f32 %v2522_v1, %v2502_v59  ;;  %v2540_v53 = vsel %vm117_vm5, %v9301_v22, %v9302_v46  ;;  %v2976_v26 = vadd.f32 %v2972_v58, %v2952_v27  ;;  %v2977_v28 = vadd.f32 %v2973_v39, %v2953_v60  ;;  %v2981_v16 = vpop.permute.xlu1 %2980  ;;  %v9303_v59 = vld [vmem:[#allocation48_spill] sm:$0xff]  ;;  %v9304_v1 = vld [vmem:[#allocation171_spill] sm:$0xff]  ;;  %v9305_v22 = vld [vmem:[#allocation26_spill] sm:$0xff] }
 0x3a5   :  { %v2527_v38 = vadd.f32 %v2523_v15, %v2503_v42  ;;  %v2528_v63 = vadd.f32 %v2524_v12, %v2504_v23  ;;  %v2545_v40 = vsel %vm117_vm5, %v9302_v46, 0.0  ;;  %v2986_v8 = vsel %vm134_vm6, %v2979_v10, %v2981_v16  ;;  %v2983_v21 = vpop.permute.xlu0 %2982  ;;  %v9306_v60 = vld [vmem:[#allocation42_spill] sm:$0xff]  ;;  %v9307_v10 = vld [vmem:[#allocation28_spill] sm:$0xff] }
 0x3a6   :  { %v7362_v0 = vpop.eup %3804  ;;  %v2547_v33 = vmul.f32 %v2539_v54, %v9280_v19  ;;  %v2562_v49 = vsel %vm117_vm5, %v9304_v1, %v9303_v59  ;;  %v2994_v58 = vmul.f32 %v2986_v8, %v9305_v22  ;;  %v2987_v27 = vsel %vm134_vm6, %v2981_v16, %v2983_v21  ;;  %3432 = vrot.lane.b32.xlu1 %v9306_v60, %s3865_s26  ;;  %v9308_v54 = vld [vmem:[#allocation46_spill] sm:$0xff]  ;;  %v9309_v1 = vld [vmem:[#allocation175_spill] sm:$0xff]  ;;  %v9310_v19 = vld [vmem:[#allocation137_spill] sm:$0xff] }
 0x3a7   :  { %v7372_v42 = vpop.eup %3806  ;;  %v2529_v23 = vadd.f32 %v2525_v25, %v2505_v48  ;;  %v2550_v15 = vadd.f32 %v2546_v18, %v2526_v41  ;;  %v2548_v12 = vmul.f32 %v2540_v53, %v9283_v32  ;;  %v2995_v39 = vmul.f32 %v2987_v27, %v9307_v10 }
 0x3a8   :  { %3478 = vrot.lane.b32.xlu0 %v9308_v54, %s3865_s26  ;;  %v7378_v46 = vpop.eup %3808  ;;  %v2549_v8 = vmul.f32 %v2545_v40, %v9020_v37  ;;  %v2563_v16 = vsel %vm117_vm5, %v9303_v59, %v9309_v1  ;;  %v2564_v48 = vsel %vm117_vm5, %v9309_v1, %v9310_v19  ;;  %v2998_v25 = vadd.f32 %v2994_v58, %v2974_v5  ;;  %v2985_v18 = vpop.permute.xlu1 %2984  ;;  %v9311_v37 = vld [vmem:[#allocation29_spill] sm:$0xff]  ;;  %v9314_v58 = vld [vmem:[#allocation138_spill] sm:$0xff] }
 0x3a9   :  { %v2570_v41 = vmul.f32 %v2562_v49, %v9170_v31  ;;  %v2999_v53 = vadd.f32 %v2995_v39, %v2975_v45  ;;  %v2988_v27 = vsel %vm134_vm6, %v2983_v21, %v2985_v18  ;;  %v2993_v32 = vsel %vm134_vm6, %v2985_v18, 0.0  ;;  %v3003_v20 = vpop.permute.xlu0 %3002  ;;  %v9313_v21 = vld [vmem:[#allocation43_spill] sm:$0xff]  ;;  %v9318_v31 = vld [vmem:[#allocation118_spill] sm:$0xff] }
 0x3aa   :  { %v2551_v62 = vadd.f32 %v2547_v33, %v2527_v38  ;;  %v2569_v40 = vsel %vm117_vm5, %v9310_v19, 0.0  ;;  %v2996_v59 = vmul.f32 %v2988_v27, %v9311_v37  ;;  %v2997_v55 = vmul.f32 %v2993_v32, %v9312_v43  ;;  %3480 = vrot.lane.b32.xlu1 %v9264_v4, %s3865_s26  ;;  %v9315_v38 = vld [vmem:[#allocation50_spill] sm:$0xff]  ;;  %v9317_v32 = vld [vmem:[#allocation139_spill] sm:$0xff] }
 0x3ab   :  { %v2552_v5 = vadd.f32 %v2548_v12, %v2528_v63  ;;  %v2571_v49 = vmul.f32 %v2563_v16, %v9180_v30  ;;  %v2572_v45 = vmul.f32 %v2564_v48, %v9201_v29  ;;  %v2586_v39 = vsel %vm117_vm5, %v9314_v58, %v9313_v21  ;;  %v9316_v19 = vld [vmem:[#allocation82_spill] sm:$0xff] }
 0x3ac   :  { %3482 = vrot.lane.b32.xlu0 %v9315_v38, %s3865_s26  ;;  %v2587_v33 = vsel %vm117_vm5, %v9313_v21, %v9316_v19  ;;  %v2588_v1 = vsel %vm117_vm5, %v9316_v19, %v9317_v32  ;;  %v3000_v63 = vadd.f32 %v2996_v59, %v2976_v26  ;;  %v3001_v12 = vadd.f32 %v2997_v55, %v2977_v28  ;;  %v3005_v16 = vpop.permute.xlu1 %3004  ;;  %v9319_v38 = vld [vmem:[#allocation109_spill] sm:$0xff]  ;;  %v9320_v4 = vld [vmem:[#allocation30_spill] sm:$0xff]  ;;  %v9321_v28 = vld [vmem:[#allocation176_spill] sm:$0xff] }
 0x3ad   :  { %v2553_v18 = vadd.f32 %v2549_v8, %v2529_v23  ;;  %v2574_v48 = vadd.f32 %v2570_v41, %v2550_v15  ;;  %v2573_v27 = vmul.f32 %v2569_v40, %v8930_v57  ;;  %v3010_v58 = vsel %vm134_vm6, %v3003_v20, %v3005_v16  ;;  %v3007_v29 = vpop.permute.xlu0 %3006  ;;  %v9322_v23 = vld [vmem:[#allocation32_spill] sm:$0xff] }
 0x3ae   :  { %v2594_v30 = vmul.f32 %v2586_v39, %v9176_v14  ;;  %v2610_v21 = vsel %vm117_vm5, %v9319_v38, %v9318_v31  ;;  %v3018_v54 = vmul.f32 %v3010_v58, %v9320_v4  ;;  %v3011_v19 = vsel %vm134_vm6, %v3005_v16, %v3007_v29  ;;  %3484 = vrot.lane.b32.xlu1 %v9271_v2, %s3865_s26 }
 0x3af   :  { %v2595_v55 = vmul.f32 %v2587_v33, %v9186_v24  ;;  %v2596_v26 = vmul.f32 %v2588_v1, %v9202_v3  ;;  %v2611_v20 = vsel %vm117_vm5, %v9318_v31, %v9321_v28  ;;  %v3019_v15 = vmul.f32 %v3011_v19, %v9322_v23  ;;  %v9323_v3 = vld [vmem:[#allocation33_spill] sm:$0xff] }
 0x3b0   :  { %3558 = vrot.lane.b32.xlu0 %v9276_v44, %s3865_s26  ;;  %v2575_v8 = vadd.f32 %v2571_v49, %v2551_v62  ;;  %v2576_v41 = vadd.f32 %v2572_v45, %v2552_v5  ;;  %v2593_v40 = vsel %vm117_vm5, %v9317_v32, 0.0  ;;  %v3022_v59 = vadd.f32 %v3018_v54, %v2998_v25  ;;  %v3009_v39 = vpop.permute.xlu1 %3008  ;;  %v9324_v62 = vld [vmem:[#allocation35_spill] sm:$0xff]  ;;  %v9326_v45 = vld [vmem:[#allocation178_spill] sm:$0xff] }
 0x3b1   :  { %v2618_v38 = vmul.f32 %v2610_v21, %v9305_v22  ;;  %v3023_v33 = vadd.f32 %v3019_v15, %v2999_v53  ;;  %v3012_v1 = vsel %vm134_vm6, %v3007_v29, %v3009_v39  ;;  %v3017_v16 = vsel %vm134_vm6, %v3009_v39, 0.0  ;;  %v3027_v31 = vpop.permute.xlu0 %3026  ;;  %v9325_v29 = vld [vmem:[#allocation179_spill] sm:$0xff] }
 0x3b2   :  { %v2577_v58 = vadd.f32 %v2573_v27, %v2553_v18  ;;  %v2619_v19 = vmul.f32 %v2611_v20, %v9307_v10  ;;  %v3020_v24 = vmul.f32 %v3012_v1, %v9323_v3  ;;  %v3021_v5 = vmul.f32 %v3017_v16, %v9324_v62  ;;  %3560 = vrot.lane.b32.xlu1 %v9281_v13, %s3865_s26  ;;  %v9327_v18 = vld [vmem:[#allocation180_spill] sm:$0xff]  ;;  %v9338_v10 = vld [vmem:[#allocation182_spill] sm:$0xff] }
 0x3b3   :  { %v2598_v54 = vadd.f32 %v2594_v30, %v2574_v48  ;;  %v2599_v25 = vadd.f32 %v2595_v55, %v2575_v8  ;;  %v2597_v49 = vmul.f32 %v2593_v40, %v8936_v36  ;;  %v2600_v53 = vadd.f32 %v2596_v26, %v2576_v41  ;;  %v9328_v30 = vld [vmem:[#allocation121_spill] sm:$0xff]  ;;  %v9329_v55 = vld [vmem:[#allocation196_spill] sm:$0xff]  ;;  %v9330_v26 = vld [vmem:[#allocation183_spill] sm:$0xff] }
 0x3b4   :  { %3562 = vrot.lane.b32.xlu0 %v9282_v34, %s3865_s26  ;;  %v2634_v32 = vsel %vm117_vm5, %v9326_v45, %v9325_v29  ;;  %v2635_v27 = vsel %vm117_vm5, %v9325_v29, %v9327_v18  ;;  %v3024_v21 = vadd.f32 %v3020_v24, %v3000_v63  ;;  %v3025_v20 = vadd.f32 %v3021_v5, %v3001_v12  ;;  %v3029_v15 = vpop.permute.xlu1 %3028  ;;  %v9331_v29 = vld [vmem:[#allocation34_spill] sm:$0xff]  ;;  %v9333_v5 = vld [vmem:[#allocation36_spill] sm:$0xff] }
 0x3b5   :  { %v2622_v39 = vadd.f32 %v2618_v38, %v2598_v54  ;;  %v2612_v48 = vsel %vm117_vm5, %v9321_v28, %v9328_v30  ;;  %v2658_v8 = vsel %vm117_vm5, %v9330_v26, %v9329_v55  ;;  %v3034_v41 = vsel %vm134_vm6, %v3027_v31, %v3029_v15  ;;  %v3031_v40 = vpop.permute.xlu0 %3030  ;;  %v9332_v38 = vld [vmem:[#allocation189_spill] sm:$0xff]  ;;  %v9334_v54 = vld [vmem:[#allocation3_spill] sm:$0xff] }
 0x3b6   :  { %v2623_v1 = vadd.f32 %v2619_v19, %v2599_v25  ;;  %v2617_v16 = vsel %vm117_vm5, %v9328_v30, 0.0  ;;  %v3042_v24 = vmul.f32 %v3034_v41, %v9331_v29  ;;  %v3035_v63 = vsel %vm134_vm6, %v3029_v15, %v3031_v40  ;;  %3564 = vrot.lane.b32.xlu1 %v9284_v56, %s3865_s26  ;;  %v9335_v15 = vld [vmem:[#allocation200_spill] sm:$0xff]  ;;  %v9336_v30 = vld [vmem:[#allocation197_spill] sm:$0xff] }
 0x3b7   :  { %v2642_v12 = vmul.f32 %v2634_v32, %v9320_v4  ;;  %v2643_v28 = vmul.f32 %v2635_v27, %v9322_v23  ;;  %v2659_v31 = vsel %vm117_vm5, %v9329_v55, %v9332_v38  ;;  %v3043_v19 = vmul.f32 %v3035_v63, %v9333_v5  ;;  %v9337_v27 = vld [vmem:[#allocation190_spill] sm:$0xff] }
 0x3b8   :  { %3222 = vrot.lane.b32.xlu0 %v9334_v54, %s3865_s26  ;;  %v2620_v25 = vmul.f32 %v2612_v48, %v9311_v37  ;;  %v2666_v45 = vmul.f32 %v2658_v8, %v9331_v29  ;;  %v2682_v26 = vsel %vm117_vm5, %v9336_v30, %v9335_v15  ;;  %v3046_v32 = vadd.f32 %v3042_v24, %v3022_v59  ;;  %v3033_v41 = vpop.permute.xlu1 %3032  ;;  %v9339_v29 = vld [vmem:[#allocation37_spill] sm:$0xff]  ;;  %v9340_v59 = vld [vmem:[#allocation39_spill] sm:$0xff]  ;;  %v9341_v37 = vld [vmem:[#allocation4_spill] sm:$0xff] }
 0x3b9   :  { %v2683_v23 = vsel %vm117_vm5, %v9335_v15, %v9337_v27  ;;  %v3047_v55 = vadd.f32 %v3043_v19, %v3023_v33  ;;  %v3036_v63 = vsel %vm134_vm6, %v3031_v40, %v3033_v41  ;;  %v3041_v4 = vsel %vm134_vm6, %v3033_v41, 0.0  ;;  %v3051_v54 = vpop.permute.xlu0 %3050  ;;  %v9342_v41 = vld [vmem:[#allocation5_spill] sm:$0xff] }
 0x3ba   :  { %v2636_v48 = vsel %vm117_vm5, %v9327_v18, %v9338_v10  ;;  %v2667_v8 = vmul.f32 %v2659_v31, %v9333_v5  ;;  %v3044_v30 = vmul.f32 %v3036_v63, %v9339_v29  ;;  %v3045_v24 = vmul.f32 %v3041_v4, %v9340_v59  ;;  %3224 = vrot.lane.b32.xlu1 %v9341_v37, %s3865_s26 }
 0x3bb   :  { %v2621_v33 = vmul.f32 %v2617_v16, %v9312_v43  ;;  %v2646_v19 = vadd.f32 %v2642_v12, %v2622_v39  ;;  %v2647_v40 = vadd.f32 %v2643_v28, %v2623_v1  ;;  %v2690_v15 = vmul.f32 %v2682_v26, %v4577_v9 }
 0x3bc   :  { %3226 = vrot.lane.b32.xlu0 %v9342_v41, %s3865_s26  ;;  %v2641_v18 = vsel %vm117_vm5, %v9338_v10, 0.0  ;;  %v2691_v31 = vmul.f32 %v2683_v23, %v9068_v52  ;;  %v3048_v63 = vadd.f32 %v3044_v30, %v3024_v21  ;;  %v3049_v5 = vadd.f32 %v3045_v24, %v3025_v20  ;;  %v3053_v4 = vpop.permute.xlu1 %3052  ;;  %v9343_v10 = vld [vmem:[#allocation6_spill] sm:$0xff] }
 0x3bd   :  { %v2601_v22 = vadd.f32 %v2597_v49, %v2577_v58  ;;  %v2644_v37 = vmul.f32 %v2636_v48, %v9323_v3  ;;  %v2670_v36 = vadd.f32 %v2666_v45, %v2646_v19  ;;  %v3058_v39 = vsel %vm134_vm6, %v3051_v54, %v3053_v4  ;;  %v3055_v1 = vpop.permute.xlu0 %3054  ;;  %v9344_v49 = vld [vmem:[#allocation194_spill] sm:$0xff] }
 0x3be   :  { %v2624_v16 = vadd.f32 %v2620_v25, %v2600_v53  ;;  %v2671_v12 = vadd.f32 %v2667_v8, %v2647_v40  ;;  %v3066_v28 = vmul.f32 %v3058_v39, %v4577_v9  ;;  %v3059_v26 = vsel %vm134_vm6, %v3053_v4, %v3055_v1  ;;  %3228 = vrot.lane.b32.xlu1 %v9343_v10, %s3865_s26  ;;  %v9346_v10 = vld [vmem:[#allocation157_spill] sm:$0xff] }
 0x3bf   :  { %v2625_v23 = vadd.f32 %v2621_v33, %v2601_v22  ;;  %v2645_v21 = vmul.f32 %v2641_v18, %v9324_v62  ;;  %v2694_v20 = vadd.f32 %v2690_v15, %v2670_v36  ;;  %v3067_v58 = vmul.f32 %v3059_v26, %v9068_v52  ;;  %v9345_v33 = vld [vmem:[#allocation191_spill] sm:$0xff]  ;;  %v9368_v62 = vld [vmem:[#allocation12_spill] sm:$0xff] }
 0x3c0   :  { %v2660_v45 = vsel %vm117_vm5, %v9332_v38, %v9344_v49  ;;  %v2665_v53 = vsel %vm117_vm5, %v9344_v49, 0.0  ;;  %v2695_v25 = vadd.f32 %v2691_v31, %v2671_v12  ;;  %v7505_v54 = vadd.f32 %v3066_v28, %v3046_v32  ;;  %v3057_v48 = vpop.permute.xlu1 %3056 }
 0x3c1   :  { %v2648_v8 = vadd.f32 %v2644_v37, %v2624_v16  ;;  %v7507_v30 = vadd.f32 %v3067_v58, %v3047_v55  ;;  %v3060_v22 = vsel %vm134_vm6, %v3055_v1, %v3057_v48  ;;  %v3065_v36 = vsel %vm134_vm6, %v3057_v48, 0.0  ;;  %v3239_v24 = vpop.permute.xlu0 %3238  ;;  %v9349_v58 = vld [vmem:[#allocation62_spill] sm:$0xff] }
 0x3c2   :  { %v2684_v19 = vsel %vm117_vm5, %v9337_v27, %v9345_v33  ;;  %v2689_v38 = vsel %vm117_vm5, %v9345_v33, 0.0  ;;  %v3068_v40 = vmul.f32 %v3060_v22, %v8896_v17  ;;  %v3069_v32 = vmul.f32 %v3065_v36, %v9306_v60 }
 0x3c3   :  { %v2649_v15 = vadd.f32 %v2645_v21, %v2625_v23  ;;  %v2668_v55 = vmul.f32 %v2660_v45, %v9339_v29  ;;  %v2669_v41 = vmul.f32 %v2665_v53, %v9340_v59  ;;  %v2698_v18 = vsel %vm460_vm8, %v2694_v20, 0.0  ;;  %v9347_v21 = vld [vmem:[#allocation72_spill] sm:$0xff] }
 0x3c4   :  { %v2770_v31 = vrot.slane %v2694_v20, 4  ;;  %v2705_v4 = vsel %vm460_vm8, %v2695_v25, 0.0  ;;  %v7522_v37 = vadd.f32 %v3068_v40, %v3048_v63  ;;  %v7524_v27 = vadd.f32 %v3069_v32, %v3049_v5  ;;  %v3241_v39 = vpop.permute.xlu1 %3240  ;;  %v9348_v20 = vld [vmem:[#allocation199_spill] sm:$0xff] }
 0x3c5   :  { %v2771_v1 = vrot.slane %v2695_v25, 4  ;;  %v2692_v16 = vmul.f32 %v2684_v19, %v8896_v17  ;;  %v2693_v12 = vmul.f32 %v2689_v38, %v9306_v60  ;;  %v3246_v28 = vsel %vm151_vm7, %v3239_v24, %v3241_v39  ;;  %v3243_v26 = vpop.permute.xlu0 %3242  ;;  %v9365_v60 = vld [vmem:[#allocation10_spill] sm:$0xff] }
 0x3c6   :  { %v7532_v23 = vsel %vm117_vm5, %v9291_v35, %v9346_v10  ;;  %v2382_v63 = vmul.f32 %v7311_v61, %v9347_v21  ;;  %v2383_v5 = vmul.f32 %v7326_v7, %v9348_v20  ;;  %v2384_v49 = vmul.f32 %v7344_v11, %v9349_v58  ;;  %v9350_v61 = vld [vmem:[#allocation74_spill] sm:$0xff]  ;;  %v9351_v7 = vld [vmem:[#allocation168_spill] sm:$0xff] }
 0x3c7   :  { %v2672_v45 = vadd.f32 %v2668_v55, %v2648_v8  ;;  %v2673_v53 = vadd.f32 %v2669_v41, %v2649_v15  ;;  %v2699_v25 = vrot.slane %v2698_v18, 4  ;;  %v2706_v48 = vrot.slane %v2705_v4, 4 }
 0x3c8   :  { %v2778_v22 = vsel %vm460_vm8, %v2770_v31, 0.0  ;;  %v3245_v36 = vpop.permute.xlu1 %3244  ;;  %v2462_v35 = vmul.f32 %v7354_v6, %v9347_v21  ;;  %v2459_v24 = vmul.f32 %v7362_v0, %v7263_v51  ;;  %v2385_v33 = vmul.f32 %v7341_v50, %v9350_v61  ;;  %v9352_v6 = vld [vmem:[#allocation80_spill] sm:$0xff]  ;;  %v9353_v51 = vld [vmem:[#allocation77_spill] sm:$0xff] }
 0x3c9   :  { %v7550_v11 = vsel %vm117_vm5, %v9346_v10, %v9351_v7  ;;  %v2785_v8 = vsel %vm460_vm8, %v2771_v1, 0.0  ;;  %v2696_v19 = vadd.f32 %v2692_v16, %v2672_v45  ;;  %v2697_v38 = vadd.f32 %v2693_v12, %v2673_v53  ;;  %v3259_v40 = vpop.permute.xlu0 %3258  ;;  %v9355_v16 = vld [vmem:[#allocation60_spill] sm:$0xff]  ;;  %v9356_v45 = vld [vmem:[#allocation63_spill] sm:$0xff] }
 0x3ca   :  { %v7555_v32 = vsel %vm117_vm5, %v9351_v7, 0.0  ;;  %v7558_v15 = vadd.f32 %v2382_v63, %v9352_v6  ;;  %v7561_v0 = vadd.f32 %v2383_v5, %v9353_v51  ;;  %v9354_v50 = vrot.slane %v7251_v47, 1  ;;  %v9357_v53 = vld [vmem:[#allocation184_spill] sm:$0xff]  ;;  %v9359_v6 = vld [vmem:[#allocation195_spill] sm:$0xff]  ;;  %v9360_v51 = vld [vmem:[#allocation201_spill] sm:$0xff] }
 0x3cb   :  { %v7566_v41 = vadd.f32 %v2699_v25, %v2698_v18  ;;  %v2779_v31 = vrot.slane %v2778_v22, 4  ;;  %v7568_v1 = vadd.f32 %v2706_v48, %v2705_v4  ;;  %v7571_v12 = vadd.f32 %v2384_v49, %v9355_v16  ;;  %v9358_v48 = vld [vmem:[#allocation61_spill] sm:$0xff]  ;;  %v9364_v16 = vld [vmem:[#allocation7_spill] sm:$0xff] }
 0x3cc   :  { %v2429_v55 = vadd.f32 %v9354_v50, %v7251_v47  ;;  %v2786_v10 = vrot.slane %v2785_v8, 4  ;;  %v3261_v21 = vpop.permute.xlu1 %3260  ;;  %v7574_v63 = vadd.f32 %v2462_v35, %v9356_v45  ;;  %v7577_v5 = vmul.f32 %v2459_v24, %v9348_v20 }
 0x3cd   :  { %v7580_v7 = vadd.f32 %v2385_v33, %v9357_v53  ;;  %v7583_v47 = vsel %vm460_vm8, %v2696_v19, 0.0  ;;  %v7586_v18 = vsel %vm460_vm8, %v2697_v38, 0.0  ;;  %v2772_v4 = vrot.slane %v2696_v19, 4  ;;  %v3263_v25 = vpop.permute.xlu0 %3262  ;;  %v9361_v33 = vld [vmem:[#allocation73_spill] sm:$0xff] }
 0x3ce   :  { %v2773_v49 = vrot.slane %v2697_v38, 4  ;;  %v2734_v35 = vsel %vm117_vm5, %v9359_v6, %v9358_v48  ;;  %v2735_v20 = vsel %vm117_vm5, %v9358_v48, %v9360_v51  ;;  %v7595_v24 = vmul.f32 %v7378_v46, %v2429_v55 }
 0x3cf   :  { %v7599_v50 = vmul.f32 %v7372_v42, %v9361_v33  ;;  %v7602_v19 = vadd.f32 %v2779_v31, %v2778_v22  ;;  %v3247_v45 = vsel %vm151_vm7, %v3241_v39, %v3243_v26  ;;  %v7606_v53 = vadd.f32 %v2786_v10, %v2785_v8  ;;  %v9362_v22 = vld [vmem:[#allocation46_spill] sm:$0xff] }
 0x3d0   :  { %v2713_v6 = vrot.slane %v7583_v47, 4  ;;  %v3248_v46 = vsel %vm151_vm7, %v3243_v26, %v3245_v36  ;;  %v3265_v55 = vpop.permute.xlu1 %3264  ;;  %v7612_v42 = vsel %vm460_vm8, %v2772_v4, 0.0  ;;  %v7615_v33 = vsel %vm460_vm8, %v2773_v49, 0.0  ;;  %v9363_v8 = vld [vmem:[#allocation202_spill] sm:$0xff]  ;;  %v9366_v4 = vld [vmem:[#allocation8_spill] sm:$0xff] }
 0x3d1   :  { %v2742_v31 = vmul.f32 %v2734_v35, %v9362_v22  ;;  %v3266_v38 = vsel %vm151_vm7, %v3259_v40, %v3261_v21  ;;  %v3283_v39 = vpop.permute.xlu0 %3282  ;;  %v2736_v10 = vsel %vm117_vm5, %v9360_v51, %v9363_v8  ;;  %v3254_v48 = vmul.f32 %v3246_v28, %v9364_v16  ;;  %v9367_v40 = vld [vmem:[#allocation9_spill] sm:$0xff]  ;;  %v9372_v22 = vld [vmem:[#allocation14_spill] sm:$0xff] }
 0x3d2   :  { %v3253_v26 = vsel %vm151_vm7, %v3245_v36, 0.0  ;;  %v3274_v17 = vmul.f32 %v3266_v38, %v9365_v60  ;;  %v3255_v52 = vmul.f32 %v3247_v45, %v9366_v4  ;;  %v3267_v49 = vsel %vm151_vm7, %v3261_v21, %v3263_v25  ;;  %v9369_v51 = vld [vmem:[#allocation13_spill] sm:$0xff]  ;;  %v9370_v60 = vld [vmem:[#allocation11_spill] sm:$0xff] }
 0x3d3   :  { %v3268_v9 = vsel %vm151_vm7, %v3263_v25, %v3265_v55  ;;  %v3273_v35 = vsel %vm151_vm7, %v3265_v55, 0.0  ;;  %v3256_v59 = vmul.f32 %v3248_v46, %v9367_v40  ;;  %v3275_v3 = vmul.f32 %v3267_v49, %v9368_v62  ;;  %v9371_v38 = vld [vmem:[#allocation15_spill] sm:$0xff]  ;;  %v9373_v62 = vld [vmem:[#allocation49_spill] sm:$0xff]  ;;  %v9375_v49 = vld [vmem:[#allocation76_spill] sm:$0xff] }
 0x3d4   :  { %v3278_v29 = vadd.f32 %v3274_v17, %v3254_v48  ;;  %v3276_v43 = vmul.f32 %v3268_v9, %v9369_v51  ;;  %v3285_v28 = vpop.permute.xlu1 %3284  ;;  %v2741_v36 = vsel %vm117_vm5, %v9363_v8, 0.0  ;;  %v3257_v16 = vmul.f32 %v3253_v26, %v9370_v60  ;;  %v9374_v9 = vld [vmem:[#allocation59_spill] sm:$0xff]  ;;  %v9376_v51 = vld [vmem:[#allocation16_spill] sm:$0xff] }
 0x3d5   :  { %v3277_v45 = vmul.f32 %v3273_v35, %v9371_v38  ;;  %v3290_v21 = vsel %vm151_vm7, %v3283_v39, %v3285_v28  ;;  %v3287_v25 = vpop.permute.xlu0 %3286  ;;  %v3279_v4 = vadd.f32 %v3275_v3, %v3255_v52  ;;  %v2743_v48 = vmul.f32 %v2735_v20, %v9373_v62  ;;  %v9377_v35 = vld [vmem:[#allocation50_spill] sm:$0xff]  ;;  %v9378_v39 = vld [vmem:[#allocation68_spill] sm:$0xff] }
 0x3d6   :  { %v3280_v55 = vadd.f32 %v3276_v43, %v3256_v59  ;;  %v3298_v46 = vmul.f32 %v3290_v21, %v9372_v22  ;;  %v3291_v17 = vsel %vm151_vm7, %v3285_v28, %v3287_v25  ;;  %v2814_v40 = vsel %vm117_vm5, %v9375_v49, %v9374_v9  ;;  %v9381_v49 = vld [vmem:[#allocation19_spill] sm:$0xff] }
 0x3d7   :  { %v3281_v8 = vadd.f32 %v3277_v45, %v3257_v16  ;;  %v3299_v26 = vmul.f32 %v3291_v17, %v9376_v51  ;;  %v2746_v60 = vmax.f32 %v2742_v31, 1e-16  ;;  %v2744_v38 = vmul.f32 %v2736_v10, %v9377_v35  ;;  %v9379_v45 = vld [vmem:[#allocation69_spill] sm:$0xff] }
 0x3d8   :  { %v2815_v52 = vsel %vm117_vm5, %v9374_v9, %v9378_v39  ;;  %v3302_v3 = vadd.f32 %v3298_v46, %v3278_v29  ;;  %v3289_v43 = vpop.permute.xlu1 %3288  ;;  %v2745_v59 = vmul.f32 %v2741_v36, %v9271_v2  ;;  %v2822_v16 = vmul.f32 %v2814_v40, %v9276_v44  ;;  %v9380_v10 = vld [vmem:[#allocation17_spill] sm:$0xff] }
 0x3d9   :  { %v3303_v22 = vadd.f32 %v3299_v26, %v3279_v4  ;;  %v3292_v20 = vsel %vm151_vm7, %v3287_v25, %v3289_v43  ;;  %v3297_v28 = vsel %vm151_vm7, %v3289_v43, 0.0  ;;  %v3307_v21 = vpop.permute.xlu0 %3306  ;;  %v2821_v31 = vsel %vm117_vm5, %v9379_v45, 0.0  ;;  %v9382_v9 = vld [vmem:[#allocation65_spill] sm:$0xff] }
 0x3da   :  { %v3300_v17 = vmul.f32 %v3292_v20, %v9380_v10  ;;  %v3301_v51 = vmul.f32 %v3297_v28, %v9381_v49  ;;  %v2714_v29 = vadd.f32 %v2713_v6, %v7583_v47  ;;  %v2793_v46 = vrot.slane %v7612_v42, 4 }
 0x3db   :  { %v2747_v36 = vmax.f32 %v2743_v48, 1e-16  ;;  %v2823_v4 = vmul.f32 %v2815_v52, %v9281_v13  ;;  %v2748_v25 = vmax.f32 %v2744_v38, 1e-16  ;;  %v2824_v26 = vmul.f32 %v9382_v9, %v9282_v34  ;;  %v9385_v38 = vld [vmem:[#allocation18_spill] sm:$0xff] }
 0x3dc   :  { %v7661_v39 = vadd.f32 %v3300_v17, %v3280_v55  ;;  %v7663_v40 = vadd.f32 %v3301_v51, %v3281_v8  ;;  %v3309_v43 = vpop.permute.xlu1 %3308  ;;  %v2800_v20 = vrot.slane %v7615_v33, 4  ;;  %v2749_v45 = vmax.f32 %v2745_v59, 1e-16  ;;  %v9387_v59 = vld [vmem:[#allocation20_spill] sm:$0xff] }
 0x3dd   :  { %v2825_v28 = vmul.f32 %v2821_v31, %v9284_v56  ;;  %v3314_v47 = vsel %vm151_vm7, %v3307_v21, %v3309_v43  ;;  %v7668_v6 = vpop.permute.xlu0 %3310  ;;  %3810 = vrsqrt.f32 %v2746_v60  ;;  %v2826_v48 = vmax.f32 %v2822_v16, 1e-16 }
 0x3de   :  { %9383 = vst [vmem:[#allocation173_spill] sm:$0xff] %v7661_v39  ;;  %9384 = vst [vmem:[#allocation187_spill] sm:$0xff] %v7663_v40  ;;  %v3322_v52 = vmul.f32 %v3314_v47, %v9385_v38  ;;  %v3315_v55 = vsel %vm151_vm7, %v3309_v43, %v7668_v6  ;;  %v9386_v8 = vrot.slane %v7586_v18, 4  ;;  %3812 = vrsqrt.f32 %v2747_v36  ;;  %v9393_v38 = vld [vmem:[#allocation186_spill] sm:$0xff] }
 0x3df   :  { %v2827_v17 = vmax.f32 %v2823_v4, 1e-16  ;;  %v3323_v49 = vmul.f32 %v3315_v55, %v9387_v59  ;;  %v2794_v31 = vadd.f32 %v2793_v46, %v7612_v42  ;;  %3814 = vrsqrt.f32 %v2748_v25 }
 0x3e0   :  { %v2721_v10 = vadd.f32 %v9386_v8, %v7586_v18  ;;  %v2828_v21 = vmax.f32 %v2824_v26, 1e-16  ;;  %v7678_v51 = vadd.f32 %v3322_v52, %v3302_v3  ;;  %v7680_v60 = vpop.permute.xlu1 %3312  ;;  %v2801_v16 = vadd.f32 %v2800_v20, %v7615_v33 }
 0x3e1   :  { %3816 = vrsqrt.f32 %v2749_v45  ;;  %v2829_v9 = vmax.f32 %v2825_v28, 1e-16  ;;  %v7683_v43 = vadd.f32 %v3323_v49, %v3303_v22  ;;  %v7685_v47 = vpop.permute.xlu0 %3330  ;;  %v2781_v18 = vrot.slane %v7602_v19, 2  ;;  %v9392_v45 = vld [vmem:[#allocation66_spill] sm:$0xff] }
 0x3e2   :  { %9388 = vst [vmem:[#allocation134_spill] sm:$0xff] %v7678_v51  ;;  %v2715_v36 = vrot.slane %v2714_v29, 2  ;;  %3818 = vrsqrt.f32 %v2826_v48  ;;  %v2465_v42 = vmul.f32 %v7595_v24, %v9350_v61  ;;  %v9390_v3 = vrot.slane %v7566_v41, 2 }
 0x3e3   :  { %9389 = vst [vmem:[#allocation144_spill] sm:$0xff] %v7683_v43  ;;  %v9391_v33 = vrot.slane %v7568_v1, 2  ;;  %3820 = vrsqrt.f32 %v2827_v17  ;;  %v2464_v22 = vmul.f32 %v7599_v50, %v9349_v58  ;;  %v2788_v25 = vrot.slane %v7606_v53, 2  ;;  %v9394_v17 = vld [vmem:[#allocation185_spill] sm:$0xff] }
 0x3e4   :  { %v2702_v46 = vadd.f32 %v9390_v3, %v7566_v41  ;;  %v2722_v26 = vrot.slane %v2721_v10, 2  ;;  %3822 = vrsqrt.f32 %v2828_v21  ;;  %v7699_v20 = vpop.permute.xlu1 %3332  ;;  %v7703_v61 = vadd.f32 %v7577_v5, %v9392_v45 }
 0x3e5   :  { %v2709_v4 = vadd.f32 %v9391_v33, %v7568_v1  ;;  %v2795_v24 = vrot.slane %v2794_v31, 2  ;;  %v2802_v41 = vrot.slane %v2801_v16, 2  ;;  %3824 = vrsqrt.f32 %v2829_v9  ;;  %v7706_v1 = vpop.permute.xlu0 %3334 }
 0x3e6   :  { %v3146_v28 = vrot.slane %v7505_v54, 4  ;;  %v2782_v48 = vadd.f32 %v2781_v18, %v7602_v19  ;;  %v2716_v58 = vadd.f32 %v2715_v36, %v2714_v29  ;;  %v3147_v50 = vrot.slane %v7507_v30, 4 }
 0x3e7   :  { %v7711_v52 = vadd.f32 %v2465_v42, %v9393_v38  ;;  %v2703_v55 = vrot.slane %v2702_v46, 1  ;;  %v2710_v8 = vrot.slane %v2709_v4, 1  ;;  %v3074_v5 = vsel %vm460_vm8, %v7505_v54, 0.0 }
 0x3e8   :  { %v7716_v59 = vadd.f32 %v2464_v22, %v9394_v17  ;;  %v2789_v49 = vadd.f32 %v2788_v25, %v7606_v53  ;;  %v2723_v21 = vadd.f32 %v2722_v26, %v2721_v10  ;;  %v3081_v19 = vsel %vm460_vm8, %v7507_v30, 0.0  ;;  %v7723_v9 = vpop.permute.xlu1 %3336 }
 0x3e9   :  { %v3088_v29 = vsel %vm460_vm8, %v7522_v37, 0.0  ;;  %9395 = vst [vmem:[#allocation163_spill] sm:$0xff] %v7723_v9  ;;  %v2796_v18 = vadd.f32 %v2795_v24, %v2794_v31  ;;  %v2803_v36 = vadd.f32 %v2802_v41, %v2801_v16  ;;  %v3154_v42 = vsel %vm460_vm8, %v3146_v28, 0.0  ;;  %v7727_v3 = vpop.permute.xlu0 %3354 }
 0x3ea   :  { %v3148_v54 = vrot.slane %v7522_v37, 4  ;;  %9396 = vst [vmem:[#allocation142_spill] sm:$0xff] %v7727_v3  ;;  %v2783_v33 = vrot.slane %v2782_v48, 1  ;;  %v2717_v22 = vrot.slane %v2716_v58, 1  ;;  %v3075_v53 = vrot.slane %v3074_v5, 4  ;;  %v3811_v25 = vpop.eup %3810 }
 0x3eb   :  { %v3161_v10 = vsel %vm460_vm8, %v3147_v50, 0.0  ;;  %v3082_v30 = vrot.slane %v3081_v19, 4  ;;  %v3089_v26 = vrot.slane %v3088_v29, 4  ;;  %v3095_v45 = vsel %vm460_vm8, %v7524_v27, 0.0  ;;  %v3813_v16 = vpop.eup %3812 }
 0x3ec   :  { %v3149_v31 = vrot.slane %v7524_v27, 4  ;;  %v2704_v24 = vadd.f32 %v2703_v55, %v2702_v46  ;;  %v2790_v41 = vrot.slane %v2789_v49, 1  ;;  %v2724_v28 = vrot.slane %v2723_v21, 1  ;;  %v7733_v38 = vpop.permute.xlu1 %3356  ;;  %v3815_v17 = vpop.eup %3814 }
 0x3ed   :  { %v3155_v37 = vrot.slane %v3154_v42, 4  ;;  %9397 = vst [vmem:[#allocation145_spill] sm:$0xff] %v7733_v38  ;;  %v2797_v56 = vrot.slane %v2796_v18, 1  ;;  %v3162_v34 = vrot.slane %v3161_v10, 4  ;;  %v3168_v50 = vsel %vm460_vm8, %v3148_v54, 0.0  ;;  %v7736_v13 = vpop.permute.xlu0 %3358  ;;  %v9399_v38 = vld [vmem:[#allocation70_spill] sm:$0xff] }
 0x3ee   :  { %9398 = vst [vmem:[#allocation146_spill] sm:$0xff] %v7736_v13  ;;  %v2804_v44 = vrot.slane %v2803_v36, 1  ;;  %v3817_v2 = vpop.eup %3816  ;;  %v2711_v35 = vadd.f32 %v2710_v8, %v2709_v4  ;;  %v2718_v43 = vadd.f32 %v2717_v22, %v2716_v58  ;;  %v3096_v51 = vrot.slane %v3095_v45, 4 }
 0x3ef   :  { %v2784_v27 = vadd.f32 %v2783_v33, %v2782_v48  ;;  %v3819_v62 = vpop.eup %3818  ;;  %v3076_v46 = vadd.f32 %v3075_v53, %v3074_v5  ;;  %v3083_v55 = vadd.f32 %v3082_v30, %v3081_v19  ;;  %v3090_v40 = vadd.f32 %v3089_v26, %v3088_v29 }
 0x3f0   :  { %v3175_v39 = vsel %vm460_vm8, %v3149_v31, 0.0  ;;  %v3821_v3 = vpop.eup %3820  ;;  %v7741_v14 = vsel %vm134_vm6, %v9399_v38, 0.0  ;;  %v3156_v54 = vadd.f32 %v3155_v37, %v3154_v42  ;;  %v3169_v57 = vrot.slane %v3168_v50, 4  ;;  %v7743_v13 = vpop.permute.xlu1 %3360 }
 0x3f1   :  { %9400 = vst [vmem:[#allocation149_spill] sm:$0xff] %v7741_v14  ;;  %9401 = vst [vmem:[#allocation147_spill] sm:$0xff] %v7743_v13  ;;  %v2791_v9 = vadd.f32 %v2790_v41, %v2789_v49  ;;  %v3823_v4 = vpop.eup %3822  ;;  %v3163_v58 = vadd.f32 %v3162_v34, %v3161_v10  ;;  %v7745_v8 = vpop.permute.xlu0 %3378  ;;  %v2725_v48 = vadd.f32 %v2724_v28, %v2723_v21  ;;  %v3176_v22 = vrot.slane %v3175_v39, 4 }
 0x3f2   :  { %v2805_v5 = vadd.f32 %v2804_v44, %v2803_v36  ;;  %v2798_v19 = vadd.f32 %v2797_v56, %v2796_v18  ;;  %v3825_v29 = vpop.eup %3824  ;;  %v3097_v33 = vadd.f32 %v3096_v51, %v3095_v45  ;;  %v2754_v53 = vmul.f32 %v3811_v25, %v2704_v24  ;;  %v9402_v36 = vld [vmem:[#allocation75_spill] sm:$0xff] }
 0x3f3   :  { %v2755_v30 = vmul.f32 %v3813_v16, %v2711_v35  ;;  %v3077_v26 = vrot.slane %v3076_v46, 2  ;;  %v3084_v31 = vrot.slane %v3083_v55, 2  ;;  %v3091_v38 = vrot.slane %v3090_v40, 2 }
 0x3f4   :  { %v2756_v42 = vmul.f32 %v3815_v17, %v2718_v43  ;;  %v3157_v37 = vrot.slane %v3156_v54, 2  ;;  %v3170_v14 = vadd.f32 %v3169_v57, %v3168_v50  ;;  %v7747_v13 = vpop.permute.xlu1 %3380  ;;  %v2834_v49 = vmul.f32 %v3819_v62, %v2784_v27 }
 0x3f5   :  { %v2757_v34 = vmul.f32 %v3817_v2, %v2725_v48  ;;  %v3164_v10 = vrot.slane %v3163_v58, 2  ;;  %v2835_v44 = vmul.f32 %v3821_v3, %v2791_v9  ;;  %v2837_v56 = vmul.f32 %v3825_v29, %v2805_v5 }
 0x3f6   :  { %v7749_v41 = vpop.permute.xlu0 %3382  ;;  %v2836_v21 = vmul.f32 %v3823_v4, %v2798_v19  ;;  %v3098_v51 = vrot.slane %v3097_v33, 2  ;;  %v3177_v18 = vadd.f32 %v3176_v22, %v3175_v39  ;;  %v2758_v35 = vmul.f32 %v2754_v53, %v9402_v36 }
 0x3f7   :  { %v2759_v25 = vmul.f32 %v2755_v30, %v7532_v23  ;;  %v3078_v45 = vadd.f32 %v3077_v26, %v3076_v46  ;;  %v3085_v43 = vadd.f32 %v3084_v31, %v3083_v55  ;;  %v3092_v16 = vadd.f32 %v3091_v38, %v3090_v40  ;;  %v9403_v26 = vld [vmem:[#allocation2_spill] sm:$0xff] }
 0x3f8   :  { %v2760_v57 = vmul.f32 %v2756_v42, %v7550_v11  ;;  %v3158_v24 = vadd.f32 %v3157_v37, %v3156_v54  ;;  %v3171_v62 = vrot.slane %v3170_v14, 2  ;;  %v7754_v2 = vpop.permute.xlu1 %3384  ;;  %v2838_v28 = vmul.f32 %v2834_v49, %v9402_v36 }
 0x3f9   :  { %v2761_v9 = vmul.f32 %v2757_v34, %v7555_v32  ;;  %v3165_v3 = vadd.f32 %v3164_v10, %v3163_v58  ;;  %v2839_v39 = vmul.f32 %v2835_v44, %v7532_v23  ;;  %v2841_v50 = vmul.f32 %v2837_v56, %v7555_v32  ;;  %v19_v58 = vld [vmem:[%s8032_s2] sm:$0xf] }
 0x3fa   :  { %v7758_v17 = vpop.permute.xlu0 %3402  ;;  %v2840_v27 = vmul.f32 %v2836_v21, %v7550_v11  ;;  %v3099_v40 = vadd.f32 %v3098_v51, %v3097_v33  ;;  %v3178_v46 = vrot.slane %v3177_v18, 2  ;;  %v7764_v55 = vadd.f32 %v2758_v35, %v7558_v15  ;;  %v9406_v21 = vld [vmem:[#allocation163_spill] sm:$0xff] }
 0x3fb   :  { %v7767_v54 = vadd.f32 %v2759_v25, %v7561_v0  ;;  %v3079_v4 = vrot.slane %v3078_v45, 1  ;;  %v3086_v48 = vrot.slane %v3085_v43, 1  ;;  %v3093_v5 = vrot.slane %v3092_v16, 1 }
 0x3fc   :  { %v7773_v23 = vadd.f32 %v2760_v57, %v7571_v12  ;;  %v3159_v32 = vrot.slane %v3158_v24, 1  ;;  %v3172_v11 = vadd.f32 %v3171_v62, %v3170_v14  ;;  %v7775_v19 = vpop.permute.xlu1 %3404  ;;  %v7778_v15 = vadd.f32 %v2838_v28, %v7574_v63  ;;  %v9412_v28 = vld [vmem:[#allocation22_spill] sm:$0xff] }
 0x3fd   :  { %v7781_v0 = vadd.f32 %v2761_v9, %v7580_v7  ;;  %v3166_v29 = vrot.slane %v3165_v3, 1  ;;  %v7786_v22 = vadd.f32 %v2839_v39, %v7703_v61  ;;  %v7789_v53 = vadd.f32 %v2840_v27, %v7716_v59 }
 0x3fe   :  { %v7783_v33 = vpop.permute.xlu0 %3406  ;;  %v7792_v12 = vadd.f32 %v2841_v50, %v7711_v52  ;;  %v3100_v14 = vrot.slane %v3099_v40, 1  ;;  %v3179_v30 = vadd.f32 %v3178_v46, %v3177_v18  ;;  %v9404_v63 = vsub.s32 0, %v9403_v26  ;;  %v9414_v50 = vld [vmem:[#allocation25_spill] sm:$0xff]  ;;  %v9416_v46 = vld [vmem:[#allocation142_spill] sm:$0xff] }
 0x3ff   :  { %v9405_v7 = vsub.s32 1, %v9403_v26  ;;  %v7802_v42 = vadd.f32 %v3079_v4, %v3078_v45  ;;  %v7804_v61 = vadd.f32 %v3086_v48, %v3085_v43  ;;  %v7806_v37 = vadd.f32 %v3093_v5, %v3092_v16  ;;  %v9409_v43 = vld [vmem:[#allocation21_spill] sm:$0xff]  ;;  %v9417_v5 = vld [vmem:[#allocation146_spill] sm:$0xff] }
 0x400   :  { %v7796_v31 = vrot.slane %v19_v58, %v9404_v63  ;;  %v3173_v59 = vrot.slane %v3172_v11, 1  ;;  %v3316_v52 = vsel %vm151_vm7, %v7668_v6, %v7680_v60  ;;  %v3321_v49 = vsel %vm151_vm7, %v7680_v60, 0.0  ;;  %v7813_v34 = vpop.permute.xlu1 %3408 }
 0x401   :  { %v7800_v38 = vrot.slane %v19_v58, %v9405_v7  ;;  %v7815_v10 = vadd.f32 %v3159_v32, %v3158_v24  ;;  %v3338_v44 = vsel %vm151_vm7, %v7685_v47, %v7699_v20  ;;  %v3339_v56 = vsel %vm151_vm7, %v7699_v20, %v7706_v1  ;;  %v9410_v20 = vld [vmem:[#allocation23_spill] sm:$0xff] }
 0x402   :  { %v3340_v51 = vsel %vm151_vm7, %v7706_v1, %v9406_v21  ;;  %v3103_v6 = vpop.permute.xlu0 %3102  ;;  %v7826_v18 = vadd.f32 %v3166_v29, %v3165_v3  ;;  %v3866_v60 = vmov 1966171168   ;;  %v7830_v35 = vadd.f32 %v3100_v14, %v3099_v40  ;;  %v9413_v3 = vld [vmem:[#allocation24_spill] sm:$0xff]  ;;  %v9415_v40 = vld [vmem:[#allocation145_spill] sm:$0xff]  ;;  %v9418_v29 = vld [vmem:[#allocation147_spill] sm:$0xff] }
 0x403   :  { %v7828_v36 = vunpack.c.l.s4 %v3866_v60  ;;  %v3180_v25 = vrot.slane %v3179_v30, 1  ;;  %v9407_v45 = vsub.s32 2, %v9403_v26  ;;  %v3324_v16 = vmul.f32 %v3316_v52, %v9409_v43  ;;  %v9419_v52 = vld [vmem:[#allocation27_spill] sm:$0xff]  ;;  %v9421_v60 = vld [vmem:[#allocation173_spill] sm:$0xff] }
 0x404   :  { %v3325_v57 = vmul.f32 %v3321_v49, %v9410_v20  ;;  %v3345_v1 = vsel %vm151_vm7, %v9406_v21, 0.0  ;;  %v9411_v24 = vsub.s32 3, %v9403_v26  ;;  %v3346_v9 = vmul.f32 %v3338_v44, %v9412_v28  ;;  %v3105_v48 = vpop.permute.xlu1 %3104  ;;  %v9420_v44 = vld [vmem:[#allocation46_spill] sm:$0xff]  ;;  %v9422_v43 = vld [vmem:[#allocation187_spill] sm:$0xff] }
 0x405   :  { %v7834_v47 = vrot.slane %v19_v58, %v9407_v45  ;;  %v3347_v39 = vmul.f32 %v3339_v56, %v9413_v3  ;;  %v3348_v27 = vmul.f32 %v3340_v51, %v9414_v50  ;;  %v3362_v4 = vsel %vm151_vm7, %v9416_v46, %v9415_v40  ;;  %v9424_v3 = vld [vmem:[#allocation49_spill] sm:$0xff]  ;;  %v9428_v26 = vld [vmem:[#allocation134_spill] sm:$0xff] }
 0x406   :  { %v7842_v62 = vrot.slane %v19_v58, %v9411_v24  ;;  %v3363_v32 = vsel %vm151_vm7, %v9415_v40, %v9417_v5  ;;  %v3364_v58 = vsel %vm151_vm7, %v9417_v5, %v9418_v29  ;;  %v3369_v14 = vsel %vm151_vm7, %v9418_v29, 0.0  ;;  %v3107_v7 = vpop.permute.xlu0 %3106  ;;  %v9423_v24 = vld [vmem:[#allocation26_spill] sm:$0xff]  ;;  %v9425_v40 = vld [vmem:[#allocation28_spill] sm:$0xff]  ;;  %v9427_v29 = vld [vmem:[#allocation31_spill] sm:$0xff] }
 0x407   :  { %9408 = vst [vmem:[#allocation79_spill] sm:$0xff] %v7834_v47  ;;  %v3110_v63 = vsel %vm134_vm6, %v3103_v6, %v3105_v48  ;;  %v3349_v49 = vmul.f32 %v3345_v1, %v9419_v52  ;;  %v3111_v21 = vsel %vm134_vm6, %v3105_v48, %v3107_v7  ;;  %v7862_v51 = vadd.f32 %v3180_v25, %v3179_v30  ;;  %v9426_v6 = vld [vmem:[#allocation29_spill] sm:$0xff]  ;;  %v9429_v30 = vld [vmem:[#allocation144_spill] sm:$0xff] }
 0x408   :  { %v3118_v56 = vmul.f32 %v3110_v63, %v9420_v44  ;;  %v3328_v45 = vadd.f32 %v3324_v16, %v9421_v60  ;;  %v3329_v20 = vadd.f32 %v3325_v57, %v9422_v43  ;;  %v3370_v28 = vmul.f32 %v3362_v4, %v9423_v24  ;;  %v3109_v63 = vpop.permute.xlu1 %3108 }
 0x409   :  { %v3119_v50 = vmul.f32 %v3111_v21, %v9424_v3  ;;  %v3371_v46 = vmul.f32 %v3363_v32, %v9425_v40  ;;  %v3372_v5 = vmul.f32 %v3364_v58, %v9426_v6  ;;  %v3373_v1 = vmul.f32 %v3369_v14, %v9427_v29  ;;  %v9431_v21 = vld [vmem:[#allocation50_spill] sm:$0xff]  ;;  %v9434_v40 = vld [vmem:[#allocation33_spill] sm:$0xff]  ;;  %v9435_v6 = vld [vmem:[#allocation51_spill] sm:$0xff] }
 0x40a   :  { %v3122_v52 = vmax.f32 %v3118_v56, 1e-16  ;;  %v3350_v48 = vadd.f32 %v3346_v9, %v9428_v26  ;;  %v3351_v25 = vadd.f32 %v3347_v39, %v9429_v30  ;;  %v3352_v47 = vadd.f32 %v3348_v27, %v3328_v45  ;;  %v3183_v16 = vpop.permute.xlu0 %3182  ;;  %v9436_v29 = vld [vmem:[#allocation35_spill] sm:$0xff] }
 0x40b   :  { %v7873_v60 = vadd.f32 %v3173_v59, %v3172_v11  ;;  %v3353_v57 = vadd.f32 %v3349_v49, %v3329_v20  ;;  %v3386_v4 = vsel %vm151_vm7, %v7745_v8, %v7747_v13  ;;  %v3112_v32 = vsel %vm134_vm6, %v3107_v7, %v3109_v63  ;;  %v9430_v8 = vld [vmem:[#allocation30_spill] sm:$0xff]  ;;  %v9432_v20 = vld [vmem:[#allocation32_spill] sm:$0xff] }
 0x40c   :  { %3826 = vrsqrt.f32 %v3122_v52  ;;  %v3374_v58 = vadd.f32 %v3370_v28, %v3350_v48  ;;  %v3387_v14 = vsel %vm151_vm7, %v7747_v13, %v7749_v41  ;;  %v3123_v26 = vmax.f32 %v3119_v50, 1e-16  ;;  %v3185_v49 = vpop.permute.xlu1 %3184  ;;  %v9433_v28 = vld [vmem:[#allocation52_spill] sm:$0xff] }
 0x40d   :  { %v3117_v9 = vsel %vm134_vm6, %v3109_v63, 0.0  ;;  %v3375_v39 = vadd.f32 %v3371_v46, %v3351_v25  ;;  %v3376_v27 = vadd.f32 %v3372_v5, %v3352_v47  ;;  %v3377_v11 = vadd.f32 %v3373_v1, %v3353_v57  ;;  %v9437_v63 = vld [vmem:[#allocation55_spill] sm:$0xff]  ;;  %v9438_v25 = vld [vmem:[#allocation34_spill] sm:$0xff] }
 0x40e   :  { %v3388_v59 = vsel %vm151_vm7, %v7749_v41, %v7754_v2  ;;  %v3394_v56 = vmul.f32 %v3386_v4, %v9430_v8  ;;  %v3393_v7 = vsel %vm151_vm7, %v7754_v2, 0.0  ;;  %v3120_v45 = vmul.f32 %v3112_v32, %v9431_v21  ;;  %v3187_v43 = vpop.permute.xlu0 %3186 }
 0x40f   :  { %v3190_v13 = vsel %vm134_vm6, %v3183_v16, %v3185_v49  ;;  %v3395_v24 = vmul.f32 %v3387_v14, %v9432_v20  ;;  %v3410_v47 = vsel %vm151_vm7, %v7758_v17, %v7775_v19  ;;  %v3121_v50 = vmul.f32 %v3117_v9, %v9433_v28 }
 0x410   :  { %v3191_v41 = vsel %vm134_vm6, %v3185_v49, %v3187_v43  ;;  %v3396_v46 = vmul.f32 %v3388_v59, %v9434_v40  ;;  %v3411_v2 = vsel %vm151_vm7, %v7775_v19, %v7783_v33  ;;  %3828 = vrsqrt.f32 %v3123_v26  ;;  %v3189_v30 = vpop.permute.xlu1 %3188  ;;  %v9439_v26 = vld [vmem:[#allocation36_spill] sm:$0xff] }
 0x411   :  { %v3198_v5 = vmul.f32 %v3190_v13, %v9435_v6  ;;  %v3397_v1 = vmul.f32 %v3393_v7, %v9436_v29  ;;  %v3412_v52 = vsel %vm151_vm7, %v7783_v33, %v7813_v34  ;;  %v3417_v17 = vsel %vm151_vm7, %v7813_v34, 0.0  ;;  %v9440_v49 = vld [vmem:[#allocation56_spill] sm:$0xff]  ;;  %v9441_v7 = vld [vmem:[#allocation37_spill] sm:$0xff]  ;;  %v9442_v13 = vld [vmem:[#allocation39_spill] sm:$0xff] }
 0x412   :  { %v3199_v48 = vmul.f32 %v3191_v41, %v9437_v63  ;;  %v3418_v16 = vmul.f32 %v3410_v47, %v9438_v25  ;;  %v3124_v57 = vmax.f32 %v3120_v45, 1e-16  ;;  %v3192_v19 = vsel %vm134_vm6, %v3187_v43, %v3189_v30  ;;  %v3427_v32 = vpop.permute.xlu0 %3426  ;;  %v9443_v29 = vld [vmem:[#allocation58_spill] sm:$0xff] }
 0x413   :  { %v3197_v4 = vsel %vm134_vm6, %v3189_v30, 0.0  ;;  %v3398_v14 = vadd.f32 %v3394_v56, %v3374_v58  ;;  %v3419_v9 = vmul.f32 %v3411_v2, %v9439_v26  ;;  %v3125_v59 = vmax.f32 %v3121_v50, 1e-16 }
 0x414   :  { %v3200_v33 = vmul.f32 %v3192_v19, %v9440_v49  ;;  %v3399_v8 = vadd.f32 %v3395_v24, %v3375_v39  ;;  %v3420_v34 = vmul.f32 %v3412_v52, %v9441_v7  ;;  %v3421_v20 = vmul.f32 %v3417_v17, %v9442_v13  ;;  %v3429_v25 = vpop.permute.xlu1 %3428  ;;  %v9444_v39 = vld [vmem:[#allocation38_spill] sm:$0xff] }
 0x415   :  { %v3202_v41 = vmax.f32 %v3198_v5, 1e-16  ;;  %v3400_v40 = vadd.f32 %v3396_v46, %v3376_v27  ;;  %v3401_v47 = vadd.f32 %v3397_v1, %v3377_v11  ;;  %v3203_v45 = vmax.f32 %v3199_v48, 1e-16  ;;  %v9445_v11 = vld [vmem:[#allocation40_spill] sm:$0xff] }
 0x416   :  { %v3201_v43 = vmul.f32 %v3197_v4, %v9443_v29  ;;  %v3422_v30 = vadd.f32 %v3418_v16, %v3398_v14  ;;  %3830 = vrsqrt.f32 %v3124_v57  ;;  %v3204_v58 = vmax.f32 %v3200_v33, 1e-16  ;;  %v3431_v50 = vpop.permute.xlu0 %3430 }
 0x417   :  { %v3434_v56 = vsel %vm151_vm7, %v3427_v32, %v3429_v25  ;;  %v3423_v2 = vadd.f32 %v3419_v9, %v3399_v8  ;;  %3832 = vrsqrt.f32 %v3125_v59  ;;  %v3435_v52 = vsel %vm151_vm7, %v3429_v25, %v3431_v50  ;;  %v9446_v59 = vld [vmem:[#allocation41_spill] sm:$0xff]  ;;  %v9447_v8 = vld [vmem:[#allocation42_spill] sm:$0xff] }
 0x418   :  { %v3442_v24 = vmul.f32 %v3434_v56, %v9444_v39  ;;  %v3424_v5 = vadd.f32 %v3420_v34, %v3400_v40  ;;  %v3425_v27 = vadd.f32 %v3421_v20, %v3401_v47  ;;  %3834 = vrsqrt.f32 %v3202_v41  ;;  %v3433_v16 = vpop.permute.xlu1 %3432  ;;  %v9448_v41 = vld [vmem:[#allocation64_spill] sm:$0xff] }
 0x419   :  { %v3827_v17 = vpop.eup %3826  ;;  %v3443_v46 = vmul.f32 %v3435_v52, %v9445_v11  ;;  %3836 = vrsqrt.f32 %v3203_v45  ;;  %v3205_v1 = vmax.f32 %v3201_v43, 1e-16  ;;  %v3436_v4 = vsel %vm151_vm7, %v3431_v50, %v3433_v16 }
 0x41a   :  { %v3446_v48 = vadd.f32 %v3442_v24, %v3422_v30  ;;  %v3130_v57 = vmul.f32 %v3827_v17, %v7802_v42  ;;  %3838 = vrsqrt.f32 %v3204_v58  ;;  %v3441_v32 = vsel %vm151_vm7, %v3433_v16, 0.0  ;;  %v3479_v14 = vpop.permute.xlu0 %3478 }
 0x41b   :  { %v3447_v19 = vadd.f32 %v3443_v46, %v3423_v2  ;;  %v3444_v33 = vmul.f32 %v3436_v4, %v9446_v59  ;;  %v3445_v7 = vmul.f32 %v3441_v32, %v9447_v8  ;;  %3840 = vrsqrt.f32 %v3205_v1 }
 0x41c   :  { %v3450_v26 = vsel %vm460_vm8, %v3446_v48, 0.0  ;;  %v3522_v9 = vrot.slane %v3446_v48, 4  ;;  %v3134_v42 = vmul.f32 %v3130_v57, %v9448_v41  ;;  %v3481_v30 = vpop.permute.xlu1 %3480 }
 0x41d   :  { %v3451_v34 = vrot.slane %v3450_v26, 4  ;;  %v3457_v13 = vsel %vm460_vm8, %v3447_v19, 0.0  ;;  %v3523_v20 = vrot.slane %v3447_v19, 4  ;;  %v3829_v40 = vpop.eup %3828  ;;  %v3448_v43 = vadd.f32 %v3444_v33, %v3424_v5 }
 0x41e   :  { %v3530_v47 = vsel %vm460_vm8, %v3522_v9, 0.0  ;;  %v3458_v45 = vrot.slane %v3457_v13, 4  ;;  %v3449_v25 = vadd.f32 %v3445_v7, %v3425_v27  ;;  %v3483_v2 = vpop.permute.xlu0 %3482  ;;  %v3486_v17 = vsel %vm151_vm7, %v3479_v14, %v3481_v30 }
 0x41f   :  { %v3452_v58 = vadd.f32 %v3451_v34, %v3450_v26  ;;  %v3531_v56 = vrot.slane %v3530_v47, 4  ;;  %v3537_v50 = vsel %vm460_vm8, %v3523_v20, 0.0  ;;  %v3464_v24 = vsel %vm460_vm8, %v3448_v43, 0.0 }
 0x420   :  { %v7931_v39 = vadd.f32 %v3458_v45, %v3457_v13  ;;  %v3471_v52 = vsel %vm460_vm8, %v3449_v25, 0.0  ;;  %v3538_v11 = vrot.slane %v3537_v50, 4  ;;  %v3465_v46 = vrot.slane %v3464_v24, 4  ;;  %v3485_v19 = vpop.permute.xlu1 %3484 }
 0x421   :  { %v3472_v48 = vrot.slane %v3471_v52, 4  ;;  %v3131_v5 = vmul.f32 %v3829_v40, %v7804_v61  ;;  %v3453_v27 = vrot.slane %v3452_v58, 2  ;;  %v3532_v1 = vadd.f32 %v3531_v56, %v3530_v47 }
 0x422   :  { %v3524_v16 = vrot.slane %v3448_v43, 4  ;;  %v3525_v57 = vrot.slane %v3449_v25, 4  ;;  %v3460_v4 = vrot.slane %v7931_v39, 2  ;;  %v7938_v32 = vadd.f32 %v3465_v46, %v3464_v24  ;;  %v3559_v59 = vpop.permute.xlu0 %3558 }
 0x423   :  { %v3494_v26 = vmul.f32 %v3486_v17, %v9420_v44  ;;  %v3487_v9 = vsel %vm151_vm7, %v3481_v30, %v3483_v2  ;;  %v7942_v14 = vpop.eup %3830  ;;  %v3488_v7 = vsel %vm151_vm7, %v3483_v2, %v3485_v19  ;;  %v3539_v13 = vadd.f32 %v3538_v11, %v3537_v50 }
 0x424   :  { %v3544_v33 = vsel %vm460_vm8, %v3524_v16, 0.0  ;;  %v7946_v61 = vsel %vm460_vm8, %v3525_v57, 0.0  ;;  %v3495_v8 = vmul.f32 %v3487_v9, %v9424_v3  ;;  %v3833_v34 = vpop.eup %3832  ;;  %v3467_v20 = vrot.slane %v7938_v32, 2  ;;  %v3561_v56 = vpop.permute.xlu1 %3560 }
 0x425   :  { %v7951_v40 = vadd.f32 %v3472_v48, %v3471_v52  ;;  %v3498_v44 = vmax.f32 %v3494_v26, 1e-16  ;;  %v3835_v47 = vpop.eup %3834  ;;  %v3545_v45 = vrot.slane %v3544_v33, 4  ;;  %v3493_v25 = vsel %vm151_vm7, %v3485_v19, 0.0 }
 0x426   :  { %v3499_v43 = vmax.f32 %v3495_v8, 1e-16  ;;  %v3496_v30 = vmul.f32 %v3488_v7, %v9431_v21  ;;  %v3837_v24 = vpop.eup %3836  ;;  %v3552_v3 = vrot.slane %v7946_v61, 4  ;;  %v3497_v2 = vmul.f32 %v3493_v25, %v9433_v28  ;;  %v3563_v17 = vpop.permute.xlu0 %3562  ;;  %v9449_v8 = vld [vmem:[#allocation203_spill] sm:$0xff] }
 0x427   :  { %3842 = vrsqrt.f32 %v3498_v44  ;;  %v3566_v50 = vsel %vm151_vm7, %v3559_v59, %v3561_v56  ;;  %v3839_v52 = vpop.eup %3838  ;;  %v3567_v46 = vsel %vm151_vm7, %v3561_v56, %v3563_v17  ;;  %v7961_v48 = vadd.f32 %v3134_v42, %v7764_v55 }
 0x428   :  { %3844 = vrsqrt.f32 %v3499_v43  ;;  %v3574_v11 = vmul.f32 %v3566_v50, %v9435_v6  ;;  %v3501_v21 = vmax.f32 %v3497_v2, 1e-16  ;;  %v3575_v16 = vmul.f32 %v3567_v46, %v9437_v63  ;;  %v3565_v9 = vpop.permute.xlu1 %3564  ;;  %v3841_v55 = vpop.eup %3840 }
 0x429   :  { %v3210_v57 = vmul.f32 %v3835_v47, %v7815_v10  ;;  %v3454_v19 = vadd.f32 %v3453_v27, %v3452_v58  ;;  %v3500_v26 = vmax.f32 %v3496_v30, 1e-16  ;;  %v3533_v59 = vrot.slane %v3532_v1, 2 }
 0x42a   :  { %v3578_v28 = vmax.f32 %v3574_v11, 1e-16  ;;  %v3135_v7 = vmul.f32 %v3131_v5, %v9449_v8  ;;  %3846 = vrsqrt.f32 %v3501_v21  ;;  %v3579_v44 = vmax.f32 %v3575_v16, 1e-16  ;;  %v3223_v10 = vpop.permute.xlu0 %3222 }
 0x42b   :  { %v3568_v6 = vsel %vm151_vm7, %v3563_v17, %v3565_v9  ;;  %v3573_v43 = vsel %vm151_vm7, %v3565_v9, 0.0  ;;  %v3214_v58 = vmul.f32 %v3210_v57, %v9448_v41  ;;  %v7971_v27 = vadd.f32 %v3545_v45, %v3544_v33 }
 0x42c   :  { %3848 = vrsqrt.f32 %v3578_v28  ;;  %v3576_v42 = vmul.f32 %v3568_v6, %v9440_v49  ;;  %v3577_v63 = vmul.f32 %v3573_v43, %v9443_v29  ;;  %v3455_v47 = vrot.slane %v3454_v19, 1  ;;  %v3225_v56 = vpop.permute.xlu1 %3224 }
 0x42d   :  { %3850 = vrsqrt.f32 %v3579_v44  ;;  %v3534_v5 = vadd.f32 %v3533_v59, %v3532_v1  ;;  %v3211_v2 = vmul.f32 %v3837_v24, %v7826_v18  ;;  %v7975_v50 = vadd.f32 %v3214_v58, %v7778_v15 }
 0x42e   :  { %3852 = vrsqrt.f32 %v3500_v26  ;;  %v3580_v25 = vmax.f32 %v3576_v42, 1e-16  ;;  %v3581_v30 = vmax.f32 %v3577_v63, 1e-16  ;;  %v3230_v49 = vsel %vm151_vm7, %v3223_v10, %v3225_v56  ;;  %v3227_v46 = vpop.permute.xlu0 %3226 }
 0x42f   :  { %v3139_v29 = vadd.f32 %v3135_v7, %v7767_v54  ;;  %v3461_v41 = vadd.f32 %v3460_v4, %v7931_v39  ;;  %v3456_v33 = vadd.f32 %v3455_v47, %v3454_v19  ;;  %v3215_v1 = vmul.f32 %v3211_v2, %v9449_v8  ;;  %v9450_v4 = vld [vmem:[#allocation149_spill] sm:$0xff]  ;;  %v9451_v8 = vld [vmem:[#allocation67_spill] sm:$0xff] }
 0x430   :  { %3854 = vrsqrt.f32 %v3580_v25  ;;  %v3540_v45 = vrot.slane %v3539_v13, 2  ;;  %v3535_v17 = vrot.slane %v3534_v5, 1  ;;  %v3133_v18 = vmul.f32 %v3833_v34, %v7830_v35  ;;  %v3229_v6 = vpop.permute.xlu1 %3228 }
 0x431   :  { %3856 = vrsqrt.f32 %v3581_v30  ;;  %v3462_v11 = vrot.slane %v3461_v41, 1  ;;  %v7985_v15 = vadd.f32 %v3215_v1, %v7786_v22  ;;  %v3213_v54 = vmul.f32 %v3841_v55, %v7862_v51 }
 0x432   :  { %v3541_v24 = vadd.f32 %v3540_v45, %v3539_v13  ;;  %v3474_v21 = vrot.slane %v7951_v40, 2  ;;  %v3137_v16 = vmul.f32 %v3133_v18, %v9450_v4  ;;  %v3553_v57 = vadd.f32 %v3552_v3, %v7946_v61 }
 0x433   :  { %v3463_v39 = vadd.f32 %v3462_v11, %v3461_v41  ;;  %v3132_v19 = vmul.f32 %v7942_v14, %v7806_v37  ;;  %v3217_v35 = vmul.f32 %v3213_v54, %v9450_v4  ;;  %v3212_v34 = vmul.f32 %v3839_v52, %v7873_v60 }
 0x434   :  { %v3843_v26 = vpop.eup %3842  ;;  %v3542_v28 = vrot.slane %v3541_v24, 1  ;;  %v3475_v22 = vadd.f32 %v3474_v21, %v7951_v40  ;;  %v3231_v9 = vsel %vm151_vm7, %v3225_v56, %v3227_v46  ;;  %v3554_v59 = vrot.slane %v3553_v57, 2 }
 0x435   :  { %v3845_v13 = vpop.eup %3844  ;;  %v3506_v51 = vmul.f32 %v3843_v26, %v3456_v33  ;;  %v3136_v7 = vmul.f32 %v3132_v19, %v9451_v8  ;;  %v3536_v44 = vadd.f32 %v3535_v17, %v3534_v5  ;;  %v3216_v37 = vmul.f32 %v3212_v34, %v9451_v8 }
 0x436   :  { %v3507_v61 = vmul.f32 %v3845_v13, %v3463_v39  ;;  %v3476_v3 = vrot.slane %v3475_v22, 1  ;;  %v3555_v43 = vadd.f32 %v3554_v59, %v3553_v57  ;;  %v3141_v55 = vadd.f32 %v3137_v16, %v7781_v0 }
 0x437   :  { %v3510_v14 = vmul.f32 %v3506_v51, %v3230_v49  ;;  %v3221_v40 = vadd.f32 %v3217_v35, %v7792_v12  ;;  %v3847_v60 = vpop.eup %3846  ;;  %v3543_v52 = vadd.f32 %v3542_v28, %v3541_v24  ;;  %v3220_v10 = vadd.f32 %v3216_v37, %v7789_v53 }
 0x438   :  { %v3511_v42 = vmul.f32 %v3507_v61, %v3231_v9  ;;  %v3477_v63 = vadd.f32 %v3476_v3, %v3475_v22  ;;  %v3556_v5 = vrot.slane %v3555_v43, 1  ;;  %v3237_v25 = vsel %vm151_vm7, %v3229_v6, 0.0 }
 0x439   :  { %v3849_v58 = vpop.eup %3848  ;;  %v3514_v47 = vadd.f32 %v3510_v14, %v7961_v48  ;;  %v3468_v30 = vadd.f32 %v3467_v20, %v7938_v32  ;;  %v3547_v41 = vrot.slane %v7971_v27, 2  ;;  %v3232_v45 = vsel %vm151_vm7, %v3227_v46, %v3229_v6 }
 0x43a   :  { %v3851_v56 = vpop.eup %3850  ;;  %v3586_v0 = vmul.f32 %v3849_v58, %v3536_v44  ;;  %v3515_v2 = vadd.f32 %v3511_v42, %v3139_v29  ;;  %v3509_v12 = vmul.f32 %v3847_v60, %v3477_v63  ;;  %v3557_v29 = vadd.f32 %v3556_v5, %v3555_v43 }
 0x43b   :  { %v3853_v33 = vpop.eup %3852  ;;  %v3619_v1 = vmul.f32 %v7796_v31, %v3514_v47  ;;  %v3587_v53 = vmul.f32 %v3851_v56, %v3543_v52  ;;  %v3469_v48 = vrot.slane %v3468_v30, 1  ;;  %v3548_v24 = vadd.f32 %v3547_v41, %v7971_v27  ;;  %v9453_v47 = vld [vmem:[#allocation2_spill] sm:$0xff] }
 0x43c   :  { %v3590_v17 = vmul.f32 %v3586_v0, %v3230_v49  ;;  %v3620_v11 = vmul.f32 %v7800_v38, %v3515_v2  ;;  %v3513_v18 = vmul.f32 %v3509_v12, %v3237_v25  ;;  %v3140_v51 = vadd.f32 %v3136_v7, %v7773_v23 }
 0x43d   :  { %v3855_v32 = vpop.eup %3854  ;;  %v3623_v20 = vmul.f32 0.5, %v3619_v1  ;;  %v3591_v54 = vmul.f32 %v3587_v53, %v3231_v9  ;;  %v3470_v21 = vadd.f32 %v3469_v48, %v3468_v30  ;;  %v3549_v19 = vrot.slane %v3548_v24, 1 }
 0x43e   :  { %v3857_v39 = vpop.eup %3856  ;;  %v3594_v4 = vadd.f32 %v3590_v17, %v7975_v50  ;;  %v3624_v16 = vmul.f32 0.5, %v3620_v11  ;;  %v3517_v57 = vadd.f32 %v3513_v18, %v3141_v55  ;;  %v9452_v55 = vld [vmem:[#allocation79_spill] sm:$0xff] }
 0x43f   :  { %v3627_v26 = vsub.f32 0.5, %v3623_v20  ;;  %v3595_v46 = vadd.f32 %v3591_v54, %v7985_v15  ;;  %v3589_v49 = vmul.f32 %v3857_v39, %v3557_v29  ;;  %v3508_v28 = vmul.f32 %v3853_v33, %v3470_v21 }
 0x440   :  { %v3665_v35 = vmul.f32 %v7796_v31, %v3594_v4  ;;  %v3628_v22 = vsub.f32 0.5, %v3624_v16  ;;  %v3550_v27 = vadd.f32 %v3549_v19, %v3548_v24  ;;  %v3622_v34 = vmul.f32 %v7842_v62, %v3517_v57 }
 0x441   :  { %v3666_v13 = vmul.f32 %v7800_v38, %v3595_v46  ;;  %v3512_v9 = vmul.f32 %v3508_v28, %v3232_v45  ;;  %v3593_v50 = vmul.f32 %v3589_v49, %v3237_v25  ;;  %v3639_v31 = vunpack.c.0.s8 %v7828_v36 }
 0x442   :  { %v3669_v59 = vmul.f32 0.5, %v3665_v35  ;;  %v3635_v8 = vcombine.low %v3627_v26, %v3628_v22  ;;  %v3588_v44 = vmul.f32 %v3855_v32, %v3550_v27  ;;  %v3626_v6 = vmul.f32 0.5, %v3622_v34 }
 0x443   :  { %v3670_v61 = vmul.f32 0.5, %v3666_v13  ;;  %v3516_v3 = vadd.f32 %v3512_v9, %v3140_v51  ;;  %v3597_v15 = vadd.f32 %v3593_v50, %v3221_v40  ;;  %v3642_v5 = vsub.s32 %v3639_v31, %v9453_v47 }
 0x444   :  { %v3673_v37 = vsub.f32 0.5, %v3669_v59  ;;  %v3592_v14 = vmul.f32 %v3588_v44, %v3232_v45  ;;  %v3630_v42 = vsub.f32 0.5, %v3626_v6 }
 0x445   :  { %v3674_v43 = vsub.f32 0.5, %v3670_v61  ;;  %v3621_v60 = vmul.f32 %v9452_v55, %v3516_v3  ;;  %v3668_v38 = vmul.f32 %v7842_v62, %v3597_v15  ;;  %v3643_v36 = vrot.slane %v3635_v8, %v3642_v5 }
 0x446   :  { %v3596_v52 = vadd.f32 %v3592_v14, %v3220_v10  ;;  %v9454_v62 = vlaneseq }
 0x447   :  { %v3681_v23 = vcombine.low %v3673_v37, %v3674_v43  ;;  %v3625_v7 = vmul.f32 0.5, %v3621_v60  ;;  %v3672_v63 = vmul.f32 0.5, %v3668_v38 }
 0x448   :  { %v3667_v58 = vmul.f32 %v9452_v55, %v3596_v52  ;;  %vm3662_vm9 = vcmp.lt.s32.totalorder %v9454_v62, 512 }
 0x449   :  { %v3629_v40 = vsub.f32 0.5, %v3625_v7  ;;  %v3676_v30 = vsub.f32 0.5, %v3672_v63  ;;  %v3689_v33 = vrot.slane %v3681_v23, %v3642_v5 }
 0x44a   :  { %v3671_v25 = vmul.f32 0.5, %v3667_v58 }
 0x44b   :  { %v3636_v56 = vcombine.low %v3629_v40, %v3630_v42 }
 0x44c   :  { %v3675_v0 = vsub.f32 0.5, %v3671_v25 }
 0x44d   :  { %v3650_v2 = vrot.slane %v3636_v56, %v3642_v5 }
 0x44e   :  { %v3682_v12 = vcombine.low %v3675_v0, %v3676_v30 }
 0x44f   :  { %v3651_v41 = vcombine.low %v3643_v36, %v3650_v2 }
 0x450   :  { %v3696_v10 = vrot.slane %v3682_v12, %v3642_v5 }
 0x451   :  { %v3658_v1 = vrot.slane %v3651_v41, %v3642_v5 }
 0x452   :  { %v3697_v53 = vcombine.low %v3689_v33, %v3696_v10 }
 0x453   :  { %3664 = vst.msk [vmem:[%s8033_s3] ss:$2 sm:$0xf] %vm3662_vm9, %v3658_v1 }
 0x454   :  { %v3704_v45 = vrot.slane %v3697_v53, %v3642_v5 }
 0x456   :  { %3712 = vst.msk [vmem:[%s8033_s3 + $0x1] ss:$2 sm:$0xf] %vm3662_vm9, %v3704_v45 }

</bundles_post_ra>
